<compile_context>
chip_gen: v7x
topology: tpu7x:2x2x1
jax: 0.10.0
libtpu: 0.0.40
codegen_flags: <defaults>
</compile_context>

<pallas_src>
import numpy as np
import jax
import jax.numpy as jnp
from jax import lax
from jax.experimental import pallas as pl
from jax.experimental.pallas import tpu as pltpu

# ---------------- configuration (mirrors the nn.Module __init__) ------------
IN_CHANNELS = 16
OUT_CHANNELS = 16
KERNEL_SIZE = 3
NUM_EXPERTS = 3
STRIDE = 1
PADDING = 1
GROUPS = 1          # Pallas GEMM path assumes groups == 1
REDUCTION = 16
MODE = 'A'
SQUEEZE = max(IN_CHANNELS // REDUCTION, REDUCTION)
BN_EPS = 1e-5

# bf16 streaming of x / fused weights (f32 MXU accumulation).  Set False to
# verify the kernel at f32 precision against a 5e-3 tolerance.
BF16_STREAM = True
STREAM_DTYPE = jnp.bfloat16 if BF16_STREAM else jnp.float32
VMEM_LIMIT_BYTES = 32 * 1024 * 1024     # within v5e/v6e/v7x budgets

# TODO(synk): modes 'B'/'S', deploy=True (weight fusion), stride>1 and groups>1
# are not implemented (same kernel structure applies).


# ---------------------------- small JAX helpers ------------------------------
def conv2d_nchw(x, w, stride=1, padding=0, groups=1):
    return lax.conv_general_dilated(
        x, w, window_strides=(stride, stride),
        padding=[(padding, padding), (padding, padding)],
        dimension_numbers=('NCHW', 'OIHW', 'NCHW'),
        feature_group_count=groups)


def adaptive_avg_pool2d_nchw(x, out_size):
    """PyTorch AdaptiveAvgPool2d semantics: bin i covers [floor(i*H/o), ceil((i+1)*H/o))."""
    B, C, H, W = x.shape
    rows = []
    for i in range(out_size):
        h0 = (i * H) // out_size
        h1 = -((-(i + 1) * H) // out_size)
        cols = []
        for j in range(out_size):
            w0 = (j * W) // out_size
            w1 = -((-(j + 1) * W) // out_size)
            cols.append(jnp.mean(x[:, :, h0:h1, w0:w1], axis=(2, 3)))
        rows.append(jnp.stack(cols, axis=-1))
    return jnp.stack(rows, axis=-2)


def bicubic_interp_matrix(in_size, out_size, A=-0.75):
    """PyTorch F.interpolate(mode='bicubic', align_corners=False) as a separable matrix."""
    def c1(t):
        return ((A + 2) * t - (A + 3)) * t * t + 1
    def c2(t):
        return ((A * t - 5 * A) * t + 8 * A) * t - 4 * A
    scale = in_size / out_size
    M = np.zeros((out_size, in_size), dtype=np.float32)
    for i in range(out_size):
        real = scale * (i + 0.5) - 0.5
        i0 = int(np.floor(real))
        t = real - i0
        w = [c2(t + 1.0), c1(t), c1(1.0 - t), c2(2.0 - t)]
        for k in range(4):
            idx = min(max(i0 - 1 + k, 0), in_size - 1)
            M[i, idx] += w[k]
    return M


def route_func_forward(x, params):
    """route_func, mode='A'.  Returns sigmoid attention (B, E*C, 1, 1)."""
    a1 = adaptive_avg_pool2d_nchw(x, 1)                   # (B, C, 1, 1)
    a3 = adaptive_avg_pool2d_nchw(x, 3)                   # (B, C, 3, 3)
    a5 = adaptive_avg_pool2d_nchw(x, 5)                   # (B, C, 5, 5)
    M = params['bicubic_5x3']
    a3u = jnp.einsum('oi,bcij,pj->bcop', M, a3, M)        # bicubic 3 -> 5
    a1e = jnp.broadcast_to(a1, a5.shape)
    att = jnp.concatenate([a1e, a3u, a5], axis=1)         # (B, 3C, 5, 5)
    h = jax.nn.relu(conv2d_nchw(att, params['rw1']))                      # 1x1
    h = jax.nn.relu(conv2d_nchw(h, params['rw2'], groups=SQUEEZE))        # dw 3x3 -> 3x3
    h = jax.nn.relu(conv2d_nchw(h, params['rw3'], groups=SQUEEZE))        # dw 3x3 -> 1x1
    h = conv2d_nchw(h, params['rw4'])                                     # 1x1
    return jax.nn.sigmoid(h)                              # (B, E*C, 1, 1)


# --------------------------- Pallas forward path ------------------------------
def dyres_conv_forward(x, params):
    B, C, H, W = x.shape
    assert C == IN_CHANNELS and GROUPS == 1 and MODE == 'A' and STRIDE == 1
    E, OC, K, P = NUM_EXPERTS, OUT_CHANNELS, KERNEL_SIZE, PADDING
    OH = (H + 2 * P - K) // STRIDE + 1
    OW = (W + 2 * P - K) // STRIDE + 1
    R = OH * OW                     # output rows per batch image
    EOC = E * OC                    # expert-fused GEMM width (48)
    KK = K * K * C
    HP, WP = H + 2 * P, W + 2 * P
    inv_n = 1.0 / float(B * R)      # BN stats are over the whole batch

    # ---- routing branch (tiny, plain JAX) -> per (batch, expert, channel) gate
    rw = route_func_forward(x, params)                    # (B, E*C, 1, 1)
    route = rw.reshape(B, E, C)

    # ---- padded NHWC input, streamed directly (no HBM im2col) ---------------
    xh = jnp.transpose(x, (0, 2, 3, 1))
    xpad = jnp.pad(xh, ((0, 0), (P, P), (P, P), (0, 0))).astype(STREAM_DTYPE)

    # ---- routing gate folded into per-batch expert-concatenated weights -----
    # wfused[b, (kh*K + kw)*C + c, e*OC + oc] = route[b, e, c] * W[e, oc, c, kh, kw]
    w_taps = jnp.transpose(params['conv_w'], (0, 3, 4, 2, 1))      # (E,K,K,C,OC)
    w_fold = route[:, :, None, None, :, None] * w_taps[None]       # (B,E,K,K,C,OC)
    wfused = jnp.transpose(w_fold, (0, 2, 3, 4, 1, 5)).reshape(B, KK, EOC)
    wfused = wfused.astype(STREAM_DTYPE)
    # NOTE: the expert conv bias is dropped — training-mode BatchNorm subtracts
    # the batch mean, which absorbs the per-channel bias exactly (dead work).

    gamma_cat = params['bn_gamma'].reshape(EOC)
    beta_cat = params['bn_beta'].reshape(EOC)

    # ---- shared kernel body: KxK conv as K*K shifted MXU matmuls ------------
    def conv_rows(x_ref, w_ref):
        acc = jnp.zeros((R, EOC), jnp.float32)
        for kh in range(K):
            for kw in range(K):
                xs = x_ref[kh:kh + OH, kw:kw + OW, :].reshape(R, C)
                wk = w_ref[(kh * K + kw) * C:(kh * K + kw + 1) * C, :]
                acc = acc + jnp.dot(xs, wk, preferred_element_type=jnp.float32)
        return acc                                        # (R, E*OC) f32

    # ---- kernel 1: one-pass BN statistics (sum, sum of squares) -------------
    def stats_kernel(x_ref, w_ref, stat_ref):
        acc = conv_rows(x_ref, w_ref)
        s0 = jnp.sum(acc, axis=0, keepdims=True)
        s1 = jnp.sum(acc * acc, axis=0, keepdims=True)
        stat_ref[...] = jnp.concatenate([s0, s1], axis=0)

    # ---- kernel 2: conv -> folded-BN affine -> expert sum -> output ---------
    def apply_kernel(x_ref, w_ref, st_ref, out_ref):
        acc = conv_rows(x_ref, w_ref)
        y = acc * st_ref[0:1, :] + st_ref[1:2, :]         # BN as one scale/shift
        ysum = y[:, 0:OC]
        for e in range(1, E):
            ysum = ysum + y[:, e * OC:(e + 1) * OC]       # sum over experts
        out_ref[...] = ysum
        # TODO(synk): lane-dense (R//8, 128) output packing (unmasked stores)
        # needs an in-kernel sublane->lane repack; left as a follow-up.

    cparams = pltpu.CompilerParams(
        dimension_semantics=("parallel",),                # batch axis -> megacore
        vmem_limit_bytes=VMEM_LIMIT_BYTES)

    # TODO(synk): for very large H*W, add halo row-tiling of the padded image
    # (manual DMA) so the per-batch block stays small; per-batch blocks are fine
    # for typical feature-map sizes at these channel counts.
    psum = pl.pallas_call(
        stats_kernel,
        out_shape=jax.ShapeDtypeStruct((B, 2, EOC), jnp.float32),
        grid_spec=pltpu.PrefetchScalarGridSpec(
            num_scalar_prefetch=0,
            grid=(B,),
            in_specs=[
                pl.BlockSpec((None, HP, WP, C), lambda b: (b, 0, 0, 0)),
                pl.BlockSpec((None, KK, EOC), lambda b: (b, 0, 0)),
            ],
            out_specs=pl.BlockSpec((None, 2, EOC), lambda b: (b, 0, 0)),
        ),
        compiler_params=cparams,
    )(xpad, wfused)

    # global BN stats + folded scale/shift (tiny, per-channel, plain JAX)
    tot = jnp.sum(psum, axis=0)                           # (2, EOC)
    mean = tot[0] * inv_n
    var = jnp.maximum(tot[1] * inv_n - mean * mean, 0.0)  # one-pass var, clamped
    scale = gamma_cat * lax.rsqrt(var + BN_EPS)
    shift = beta_cat - scale * mean
    st = jnp.stack([scale, shift], axis=0)                # (2, EOC) f32

    out = pl.pallas_call(
        apply_kernel,
        out_shape=jax.ShapeDtypeStruct((B, R, OC), jnp.float32),
        grid_spec=pltpu.PrefetchScalarGridSpec(
            num_scalar_prefetch=0,
            grid=(B,),
            in_specs=[
                pl.BlockSpec((None, HP, WP, C), lambda b: (b, 0, 0, 0)),
                pl.BlockSpec((None, KK, EOC), lambda b: (b, 0, 0)),
                pl.BlockSpec((2, EOC), lambda b: (0, 0)),
            ],
            out_specs=pl.BlockSpec((None, R, OC), lambda b: (b, 0, 0)),
        ),
        compiler_params=cparams,
    )(xpad, wfused, st)

    return jnp.transpose(out.reshape(B, OH, OW, OC), (0, 3, 1, 2))   # NCHW


# ----------------------------- reference (pure JAX) --------------------------
def reference_forward(x, params):
    B, C, H, W = x.shape
    rw = route_func_forward(x, params).reshape(B, NUM_EXPERTS, C)
    total = None
    for e in range(NUM_EXPERTS):
        att = x * rw[:, e, :][:, :, None, None]
        y = conv2d_nchw(att, params['conv_w'][e], stride=STRIDE, padding=PADDING)
        y = y + params['conv_b'][e][None, :, None, None]
        mean = jnp.mean(y, axis=(0, 2, 3), keepdims=True)
        var = jnp.mean((y - mean) ** 2, axis=(0, 2, 3), keepdims=True)
        y = (params['bn_gamma'][e][None, :, None, None] * (y - mean)
             / jnp.sqrt(var + BN_EPS)
             + params['bn_beta'][e][None, :, None, None])
        total = y if total is None else total + y
    return total


# --------------------------- deterministic parameters ------------------------
def init_params(key):
    ks = jax.random.split(key, 6)

    def nrm(k, shape, fan_in):
        return (jax.random.normal(k, shape, jnp.float32) / np.sqrt(fan_in))

    p = {}
    # route_func.dwise_separable (mode 'A'), all bias=False
    p['rw1'] = nrm(ks[0], (SQUEEZE, 3 * IN_CHANNELS, 1, 1), 3 * IN_CHANNELS)
    p['rw2'] = nrm(ks[1], (SQUEEZE, 1, 3, 3), 9)
    p['rw3'] = nrm(ks[2], (SQUEEZE, 1, 3, 3), 9)
    p['rw4'] = nrm(ks[3], (NUM_EXPERTS * IN_CHANNELS, SQUEEZE, 1, 1), SQUEEZE)
    p['bicubic_5x3'] = jnp.asarray(bicubic_interp_matrix(3, 5))
    # expert convs (bias=True) + BatchNorm params (PyTorch init: gamma=1, beta=0)
    p['conv_w'] = nrm(ks[4],
                      (NUM_EXPERTS, OUT_CHANNELS, IN_CHANNELS, KERNEL_SIZE, KERNEL_SIZE),
                      IN_CHANNELS * KERNEL_SIZE * KERNEL_SIZE)
    p['conv_b'] = 0.1 * jax.random.normal(ks[5], (NUM_EXPERTS, OUT_CHANNELS), jnp.float32)
    p['bn_gamma'] = jnp.ones((NUM_EXPERTS, OUT_CHANNELS), jnp.float32)
    p['bn_beta'] = jnp.zeros((NUM_EXPERTS, OUT_CHANNELS), jnp.float32)
    return p


if __name__ == "__main__":
    key = jax.random.PRNGKey(0)
    pkey, xkey = jax.random.split(key)
    params = init_params(pkey)
    x = jax.random.normal(xkey, (2, IN_CHANNELS, 16, 16), jnp.float32)

    fwd = jax.jit(dyres_conv_forward)
    out = jax.block_until_ready(fwd(x, params))
    ref = jax.block_until_ready(reference_forward(x, params))

    # Tolerance sized for bf16 streaming of x / fused weights (f32 accumulation);
    # set BF16_STREAM=False above to check the f32 path at 5e-3.
    tol = 2e-2 if BF16_STREAM else 5e-3
    np.testing.assert_allclose(np.asarray(out), np.asarray(ref), rtol=tol, atol=tol)

    print("KERNEL_OK")
</pallas_src>

<mosaic_0001>
module attributes {stable_mosaic.version = 11 : i64} {
  func.func @stats_kernel(%arg0: i32, %arg1: memref<1x18x18x16xbf16, #tpu.memory_space<vmem>>, %arg2: memref<1x144x48xbf16, #tpu.memory_space<vmem>>, %arg3: memref<1x2x48xf32, #tpu.memory_space<vmem>>) attributes {dimension_semantics = [#tpu.dimension_semantics<parallel>], iteration_bounds = array<i64: 2>, scalar_prefetch = 0 : i64, scratch_operands = 0 : i64, tpu.core_type = #tpu.core_type<tc>, window_params = [{transform_indices = @transform_0, window_bounds = array<i64: 1, 18, 18, 16>}, {transform_indices = @transform_1, window_bounds = array<i64: 1, 144, 48>}, {transform_indices = @transform_2, window_bounds = array<i64: 1, 2, 48>}]} {
    %cst = arith.constant 0.000000e+00 : f32
    %0 = vector.broadcast %cst : f32 to vector<256x48xf32>
    %c0 = arith.constant 0 : index
    %c0_0 = arith.constant 0 : index
    %c0_1 = arith.constant 0 : index
    %c0_2 = arith.constant 0 : index
    %1 = vector.load %arg1[%c0, %c0_0, %c0_1, %c0_2] : memref<1x18x18x16xbf16, #tpu.memory_space<vmem>>, vector<1x16x16x16xbf16>
    %2 = vector.shape_cast %1 : vector<1x16x16x16xbf16> to vector<16x16x16xbf16>
    %3 = vector.shape_cast %2 : vector<16x16x16xbf16> to vector<256x16xbf16>
    %c0_3 = arith.constant 0 : index
    %c0_4 = arith.constant 0 : index
    %c0_5 = arith.constant 0 : index
    %4 = vector.load %arg2[%c0_3, %c0_4, %c0_5] : memref<1x144x48xbf16, #tpu.memory_space<vmem>>, vector<1x16x48xbf16>
    %5 = vector.shape_cast %4 : vector<1x16x48xbf16> to vector<16x48xbf16>
    %cst_6 = arith.constant dense<0.000000e+00> : vector<256x48xf32>
    %6 = tpu.matmul %3, %5, %cst_6 {dimension_numbers = #tpu.dot_dimension_numbers<[1], [0], [0], [1], [0, 0, 1, 1], [], []>} : vector<256x16xbf16>, vector<16x48xbf16>, vector<256x48xf32> -> vector<256x48xf32>
    %7 = arith.addf %0, %6 : vector<256x48xf32>
    %c0_7 = arith.constant 0 : index
    %c0_8 = arith.constant 0 : index
    %c1 = arith.constant 1 : index
    %c0_9 = arith.constant 0 : index
    %8 = vector.load %arg1[%c0_7, %c0_8, %c1, %c0_9] : memref<1x18x18x16xbf16, #tpu.memory_space<vmem>>, vector<1x16x16x16xbf16>
    %9 = vector.shape_cast %8 : vector<1x16x16x16xbf16> to vector<16x16x16xbf16>
    %10 = vector.shape_cast %9 : vector<16x16x16xbf16> to vector<256x16xbf16>
    %c0_10 = arith.constant 0 : index
    %c16 = arith.constant 16 : index
    %c0_11 = arith.constant 0 : index
    %11 = vector.load %arg2[%c0_10, %c16, %c0_11] : memref<1x144x48xbf16, #tpu.memory_space<vmem>>, vector<1x16x48xbf16>
    %12 = vector.shape_cast %11 : vector<1x16x48xbf16> to vector<16x48xbf16>
    %cst_12 = arith.constant dense<0.000000e+00> : vector<256x48xf32>
    %13 = tpu.matmul %10, %12, %cst_12 {dimension_numbers = #tpu.dot_dimension_numbers<[1], [0], [0], [1], [0, 0, 1, 1], [], []>} : vector<256x16xbf16>, vector<16x48xbf16>, vector<256x48xf32> -> vector<256x48xf32>
    %14 = arith.addf %7, %13 : vector<256x48xf32>
    %c0_13 = arith.constant 0 : index
    %c0_14 = arith.constant 0 : index
    %c2 = arith.constant 2 : index
    %c0_15 = arith.constant 0 : index
    %15 = vector.load %arg1[%c0_13, %c0_14, %c2, %c0_15] : memref<1x18x18x16xbf16, #tpu.memory_space<vmem>>, vector<1x16x16x16xbf16>
    %16 = vector.shape_cast %15 : vector<1x16x16x16xbf16> to vector<16x16x16xbf16>
    %17 = vector.shape_cast %16 : vector<16x16x16xbf16> to vector<256x16xbf16>
    %c0_16 = arith.constant 0 : index
    %c32 = arith.constant 32 : index
    %c0_17 = arith.constant 0 : index
    %18 = vector.load %arg2[%c0_16, %c32, %c0_17] : memref<1x144x48xbf16, #tpu.memory_space<vmem>>, vector<1x16x48xbf16>
    %19 = vector.shape_cast %18 : vector<1x16x48xbf16> to vector<16x48xbf16>
    %cst_18 = arith.constant dense<0.000000e+00> : vector<256x48xf32>
    %20 = tpu.matmul %17, %19, %cst_18 {dimension_numbers = #tpu.dot_dimension_numbers<[1], [0], [0], [1], [0, 0, 1, 1], [], []>} : vector<256x16xbf16>, vector<16x48xbf16>, vector<256x48xf32> -> vector<256x48xf32>
    %21 = arith.addf %14, %20 : vector<256x48xf32>
    %c0_19 = arith.constant 0 : index
    %c1_20 = arith.constant 1 : index
    %c0_21 = arith.constant 0 : index
    %c0_22 = arith.constant 0 : index
    %22 = vector.load %arg1[%c0_19, %c1_20, %c0_21, %c0_22] : memref<1x18x18x16xbf16, #tpu.memory_space<vmem>>, vector<1x16x16x16xbf16>
    %23 = vector.shape_cast %22 : vector<1x16x16x16xbf16> to vector<16x16x16xbf16>
    %24 = vector.shape_cast %23 : vector<16x16x16xbf16> to vector<256x16xbf16>
    %c0_23 = arith.constant 0 : index
    %c48 = arith.constant 48 : index
    %c0_24 = arith.constant 0 : index
    %25 = vector.load %arg2[%c0_23, %c48, %c0_24] : memref<1x144x48xbf16, #tpu.memory_space<vmem>>, vector<1x16x48xbf16>
    %26 = vector.shape_cast %25 : vector<1x16x48xbf16> to vector<16x48xbf16>
    %cst_25 = arith.constant dense<0.000000e+00> : vector<256x48xf32>
    %27 = tpu.matmul %24, %26, %cst_25 {dimension_numbers = #tpu.dot_dimension_numbers<[1], [0], [0], [1], [0, 0, 1, 1], [], []>} : vector<256x16xbf16>, vector<16x48xbf16>, vector<256x48xf32> -> vector<256x48xf32>
    %28 = arith.addf %21, %27 : vector<256x48xf32>
    %c0_26 = arith.constant 0 : index
    %c1_27 = arith.constant 1 : index
    %c1_28 = arith.constant 1 : index
    %c0_29 = arith.constant 0 : index
    %29 = vector.load %arg1[%c0_26, %c1_27, %c1_28, %c0_29] : memref<1x18x18x16xbf16, #tpu.memory_space<vmem>>, vector<1x16x16x16xbf16>
    %30 = vector.shape_cast %29 : vector<1x16x16x16xbf16> to vector<16x16x16xbf16>
    %31 = vector.shape_cast %30 : vector<16x16x16xbf16> to vector<256x16xbf16>
    %c0_30 = arith.constant 0 : index
    %c64 = arith.constant 64 : index
    %c0_31 = arith.constant 0 : index
    %32 = vector.load %arg2[%c0_30, %c64, %c0_31] : memref<1x144x48xbf16, #tpu.memory_space<vmem>>, vector<1x16x48xbf16>
    %33 = vector.shape_cast %32 : vector<1x16x48xbf16> to vector<16x48xbf16>
    %cst_32 = arith.constant dense<0.000000e+00> : vector<256x48xf32>
    %34 = tpu.matmul %31, %33, %cst_32 {dimension_numbers = #tpu.dot_dimension_numbers<[1], [0], [0], [1], [0, 0, 1, 1], [], []>} : vector<256x16xbf16>, vector<16x48xbf16>, vector<256x48xf32> -> vector<256x48xf32>
    %35 = arith.addf %28, %34 : vector<256x48xf32>
    %c0_33 = arith.constant 0 : index
    %c1_34 = arith.constant 1 : index
    %c2_35 = arith.constant 2 : index
    %c0_36 = arith.constant 0 : index
    %36 = vector.load %arg1[%c0_33, %c1_34, %c2_35, %c0_36] : memref<1x18x18x16xbf16, #tpu.memory_space<vmem>>, vector<1x16x16x16xbf16>
    %37 = vector.shape_cast %36 : vector<1x16x16x16xbf16> to vector<16x16x16xbf16>
    %38 = vector.shape_cast %37 : vector<16x16x16xbf16> to vector<256x16xbf16>
    %c0_37 = arith.constant 0 : index
    %c80 = arith.constant 80 : index
    %c0_38 = arith.constant 0 : index
    %39 = vector.load %arg2[%c0_37, %c80, %c0_38] : memref<1x144x48xbf16, #tpu.memory_space<vmem>>, vector<1x16x48xbf16>
    %40 = vector.shape_cast %39 : vector<1x16x48xbf16> to vector<16x48xbf16>
    %cst_39 = arith.constant dense<0.000000e+00> : vector<256x48xf32>
    %41 = tpu.matmul %38, %40, %cst_39 {dimension_numbers = #tpu.dot_dimension_numbers<[1], [0], [0], [1], [0, 0, 1, 1], [], []>} : vector<256x16xbf16>, vector<16x48xbf16>, vector<256x48xf32> -> vector<256x48xf32>
    %42 = arith.addf %35, %41 : vector<256x48xf32>
    %c0_40 = arith.constant 0 : index
    %c2_41 = arith.constant 2 : index
    %c0_42 = arith.constant 0 : index
    %c0_43 = arith.constant 0 : index
    %43 = vector.load %arg1[%c0_40, %c2_41, %c0_42, %c0_43] : memref<1x18x18x16xbf16, #tpu.memory_space<vmem>>, vector<1x16x16x16xbf16>
    %44 = vector.shape_cast %43 : vector<1x16x16x16xbf16> to vector<16x16x16xbf16>
    %45 = vector.shape_cast %44 : vector<16x16x16xbf16> to vector<256x16xbf16>
    %c0_44 = arith.constant 0 : index
    %c96 = arith.constant 96 : index
    %c0_45 = arith.constant 0 : index
    %46 = vector.load %arg2[%c0_44, %c96, %c0_45] : memref<1x144x48xbf16, #tpu.memory_space<vmem>>, vector<1x16x48xbf16>
    %47 = vector.shape_cast %46 : vector<1x16x48xbf16> to vector<16x48xbf16>
    %cst_46 = arith.constant dense<0.000000e+00> : vector<256x48xf32>
    %48 = tpu.matmul %45, %47, %cst_46 {dimension_numbers = #tpu.dot_dimension_numbers<[1], [0], [0], [1], [0, 0, 1, 1], [], []>} : vector<256x16xbf16>, vector<16x48xbf16>, vector<256x48xf32> -> vector<256x48xf32>
    %49 = arith.addf %42, %48 : vector<256x48xf32>
    %c0_47 = arith.constant 0 : index
    %c2_48 = arith.constant 2 : index
    %c1_49 = arith.constant 1 : index
    %c0_50 = arith.constant 0 : index
    %50 = vector.load %arg1[%c0_47, %c2_48, %c1_49, %c0_50] : memref<1x18x18x16xbf16, #tpu.memory_space<vmem>>, vector<1x16x16x16xbf16>
    %51 = vector.shape_cast %50 : vector<1x16x16x16xbf16> to vector<16x16x16xbf16>
    %52 = vector.shape_cast %51 : vector<16x16x16xbf16> to vector<256x16xbf16>
    %c0_51 = arith.constant 0 : index
    %c112 = arith.constant 112 : index
    %c0_52 = arith.constant 0 : index
    %53 = vector.load %arg2[%c0_51, %c112, %c0_52] : memref<1x144x48xbf16, #tpu.memory_space<vmem>>, vector<1x16x48xbf16>
    %54 = vector.shape_cast %53 : vector<1x16x48xbf16> to vector<16x48xbf16>
    %cst_53 = arith.constant dense<0.000000e+00> : vector<256x48xf32>
    %55 = tpu.matmul %52, %54, %cst_53 {dimension_numbers = #tpu.dot_dimension_numbers<[1], [0], [0], [1], [0, 0, 1, 1], [], []>} : vector<256x16xbf16>, vector<16x48xbf16>, vector<256x48xf32> -> vector<256x48xf32>
    %56 = arith.addf %49, %55 : vector<256x48xf32>
    %c0_54 = arith.constant 0 : index
    %c2_55 = arith.constant 2 : index
    %c2_56 = arith.constant 2 : index
    %c0_57 = arith.constant 0 : index
    %57 = vector.load %arg1[%c0_54, %c2_55, %c2_56, %c0_57] : memref<1x18x18x16xbf16, #tpu.memory_space<vmem>>, vector<1x16x16x16xbf16>
    %58 = vector.shape_cast %57 : vector<1x16x16x16xbf16> to vector<16x16x16xbf16>
    %59 = vector.shape_cast %58 : vector<16x16x16xbf16> to vector<256x16xbf16>
    %c0_58 = arith.constant 0 : index
    %c128 = arith.constant 128 : index
    %c0_59 = arith.constant 0 : index
    %60 = vector.load %arg2[%c0_58, %c128, %c0_59] : memref<1x144x48xbf16, #tpu.memory_space<vmem>>, vector<1x16x48xbf16>
    %61 = vector.shape_cast %60 : vector<1x16x48xbf16> to vector<16x48xbf16>
    %cst_60 = arith.constant dense<0.000000e+00> : vector<256x48xf32>
    %62 = tpu.matmul %59, %61, %cst_60 {dimension_numbers = #tpu.dot_dimension_numbers<[1], [0], [0], [1], [0, 0, 1, 1], [], []>} : vector<256x16xbf16>, vector<16x48xbf16>, vector<256x48xf32> -> vector<256x48xf32>
    %63 = arith.addf %56, %62 : vector<256x48xf32>
    %cst_61 = arith.constant dense<0.000000e+00> : vector<48xf32>
    %64 = vector.multi_reduction <add>, %63, %cst_61 [0] : vector<256x48xf32> to vector<48xf32>
    %65 = vector.shape_cast %64 : vector<48xf32> to vector<1x48xf32>
    %66 = arith.mulf %63, %63 : vector<256x48xf32>
    %cst_62 = arith.constant dense<0.000000e+00> : vector<48xf32>
    %67 = vector.multi_reduction <add>, %66, %cst_62 [0] : vector<256x48xf32> to vector<48xf32>
    %68 = vector.shape_cast %67 : vector<48xf32> to vector<1x48xf32>
    %69 = tpu.concatenate %65, %68 in 0 : vector<1x48xf32>, vector<1x48xf32> -> vector<2x48xf32>
    %c0_63 = arith.constant 0 : index
    %c0_64 = arith.constant 0 : index
    %c0_65 = arith.constant 0 : index
    %70 = vector.load %arg3[%c0_63, %c0_64, %c0_65] : memref<1x2x48xf32, #tpu.memory_space<vmem>>, vector<1x2x48xf32>
    %71 = vector.shape_cast %70 : vector<1x2x48xf32> to vector<2x48xf32>
    %72 = vector.shape_cast %69 : vector<2x48xf32> to vector<1x2x48xf32>
    tpu.vector_store %arg3[%c0_63, %c0_64, %c0_65], %72 {strides = array<i32>} : memref<1x2x48xf32, #tpu.memory_space<vmem>>, vector<1x2x48xf32>,
    return
  }
  func.func @transform_0(%arg0: i32) -> (i32, i32, i32, i32) {
    %c0_i32 = arith.constant 0 : i32
    %c0_i32_0 = arith.constant 0 : i32
    %c0_i32_1 = arith.constant 0 : i32
    %c0_i32_2 = arith.constant 0 : i32
    return %arg0, %c0_i32, %c0_i32_0, %c0_i32_1 : i32, i32, i32, i32
  }
  func.func @transform_1(%arg0: i32) -> (i32, i32, i32) {
    %c0_i32 = arith.constant 0 : i32
    %c0_i32_0 = arith.constant 0 : i32
    %c0_i32_1 = arith.constant 0 : i32
    return %arg0, %c0_i32, %c0_i32_0 : i32, i32, i32
  }
  func.func @transform_2(%arg0: i32) -> (i32, i32, i32) {
    %c0_i32 = arith.constant 0 : i32
    %c0_i32_0 = arith.constant 0 : i32
    %c0_i32_1 = arith.constant 0 : i32
    return %arg0, %c0_i32, %c0_i32_0 : i32, i32, i32
  }
}

module attributes {stable_mosaic.version = 11 : i64} {
  func.func @apply_kernel(%arg0: i32, %arg1: memref<1x18x18x16xbf16, #tpu.memory_space<vmem>>, %arg2: memref<1x144x48xbf16, #tpu.memory_space<vmem>>, %arg3: memref<2x48xf32, #tpu.memory_space<vmem>>, %arg4: memref<1x256x16xf32, #tpu.memory_space<vmem>>) attributes {dimension_semantics = [#tpu.dimension_semantics<parallel>], iteration_bounds = array<i64: 2>, scalar_prefetch = 0 : i64, scratch_operands = 0 : i64, tpu.core_type = #tpu.core_type<tc>, window_params = [{transform_indices = @transform_0, window_bounds = array<i64: 1, 18, 18, 16>}, {transform_indices = @transform_1, window_bounds = array<i64: 1, 144, 48>}, {pipeline_mode = #tpu.pipeline_mode<synchronous>, transform_indices = @transform_2, window_bounds = array<i64: 2, 48>}, {transform_indices = @transform_3, window_bounds = array<i64: 1, 256, 16>}]} {
    %cst = arith.constant 0.000000e+00 : f32
    %0 = vector.broadcast %cst : f32 to vector<256x48xf32>
    %c0 = arith.constant 0 : index
    %c0_0 = arith.constant 0 : index
    %c0_1 = arith.constant 0 : index
    %c0_2 = arith.constant 0 : index
    %1 = vector.load %arg1[%c0, %c0_0, %c0_1, %c0_2] : memref<1x18x18x16xbf16, #tpu.memory_space<vmem>>, vector<1x16x16x16xbf16>
    %2 = vector.shape_cast %1 : vector<1x16x16x16xbf16> to vector<16x16x16xbf16>
    %3 = vector.shape_cast %2 : vector<16x16x16xbf16> to vector<256x16xbf16>
    %c0_3 = arith.constant 0 : index
    %c0_4 = arith.constant 0 : index
    %c0_5 = arith.constant 0 : index
    %4 = vector.load %arg2[%c0_3, %c0_4, %c0_5] : memref<1x144x48xbf16, #tpu.memory_space<vmem>>, vector<1x16x48xbf16>
    %5 = vector.shape_cast %4 : vector<1x16x48xbf16> to vector<16x48xbf16>
    %cst_6 = arith.constant dense<0.000000e+00> : vector<256x48xf32>
    %6 = tpu.matmul %3, %5, %cst_6 {dimension_numbers = #tpu.dot_dimension_numbers<[1], [0], [0], [1], [0, 0, 1, 1], [], []>} : vector<256x16xbf16>, vector<16x48xbf16>, vector<256x48xf32> -> vector<256x48xf32>
    %7 = arith.addf %0, %6 : vector<256x48xf32>
    %c0_7 = arith.constant 0 : index
    %c0_8 = arith.constant 0 : index
    %c1 = arith.constant 1 : index
    %c0_9 = arith.constant 0 : index
    %8 = vector.load %arg1[%c0_7, %c0_8, %c1, %c0_9] : memref<1x18x18x16xbf16, #tpu.memory_space<vmem>>, vector<1x16x16x16xbf16>
    %9 = vector.shape_cast %8 : vector<1x16x16x16xbf16> to vector<16x16x16xbf16>
    %10 = vector.shape_cast %9 : vector<16x16x16xbf16> to vector<256x16xbf16>
    %c0_10 = arith.constant 0 : index
    %c16 = arith.constant 16 : index
    %c0_11 = arith.constant 0 : index
    %11 = vector.load %arg2[%c0_10, %c16, %c0_11] : memref<1x144x48xbf16, #tpu.memory_space<vmem>>, vector<1x16x48xbf16>
    %12 = vector.shape_cast %11 : vector<1x16x48xbf16> to vector<16x48xbf16>
    %cst_12 = arith.constant dense<0.000000e+00> : vector<256x48xf32>
    %13 = tpu.matmul %10, %12, %cst_12 {dimension_numbers = #tpu.dot_dimension_numbers<[1], [0], [0], [1], [0, 0, 1, 1], [], []>} : vector<256x16xbf16>, vector<16x48xbf16>, vector<256x48xf32> -> vector<256x48xf32>
    %14 = arith.addf %7, %13 : vector<256x48xf32>
    %c0_13 = arith.constant 0 : index
    %c0_14 = arith.constant 0 : index
    %c2 = arith.constant 2 : index
    %c0_15 = arith.constant 0 : index
    %15 = vector.load %arg1[%c0_13, %c0_14, %c2, %c0_15] : memref<1x18x18x16xbf16, #tpu.memory_space<vmem>>, vector<1x16x16x16xbf16>
    %16 = vector.shape_cast %15 : vector<1x16x16x16xbf16> to vector<16x16x16xbf16>
    %17 = vector.shape_cast %16 : vector<16x16x16xbf16> to vector<256x16xbf16>
    %c0_16 = arith.constant 0 : index
    %c32 = arith.constant 32 : index
    %c0_17 = arith.constant 0 : index
    %18 = vector.load %arg2[%c0_16, %c32, %c0_17] : memref<1x144x48xbf16, #tpu.memory_space<vmem>>, vector<1x16x48xbf16>
    %19 = vector.shape_cast %18 : vector<1x16x48xbf16> to vector<16x48xbf16>
    %cst_18 = arith.constant dense<0.000000e+00> : vector<256x48xf32>
    %20 = tpu.matmul %17, %19, %cst_18 {dimension_numbers = #tpu.dot_dimension_numbers<[1], [0], [0], [1], [0, 0, 1, 1], [], []>} : vector<256x16xbf16>, vector<16x48xbf16>, vector<256x48xf32> -> vector<256x48xf32>
    %21 = arith.addf %14, %20 : vector<256x48xf32>
    %c0_19 = arith.constant 0 : index
    %c1_20 = arith.constant 1 : index
    %c0_21 = arith.constant 0 : index
    %c0_22 = arith.constant 0 : index
    %22 = vector.load %arg1[%c0_19, %c1_20, %c0_21, %c0_22] : memref<1x18x18x16xbf16, #tpu.memory_space<vmem>>, vector<1x16x16x16xbf16>
    %23 = vector.shape_cast %22 : vector<1x16x16x16xbf16> to vector<16x16x16xbf16>
    %24 = vector.shape_cast %23 : vector<16x16x16xbf16> to vector<256x16xbf16>
    %c0_23 = arith.constant 0 : index
    %c48 = arith.constant 48 : index
    %c0_24 = arith.constant 0 : index
    %25 = vector.load %arg2[%c0_23, %c48, %c0_24] : memref<1x144x48xbf16, #tpu.memory_space<vmem>>, vector<1x16x48xbf16>
    %26 = vector.shape_cast %25 : vector<1x16x48xbf16> to vector<16x48xbf16>
    %cst_25 = arith.constant dense<0.000000e+00> : vector<256x48xf32>
    %27 = tpu.matmul %24, %26, %cst_25 {dimension_numbers = #tpu.dot_dimension_numbers<[1], [0], [0], [1], [0, 0, 1, 1], [], []>} : vector<256x16xbf16>, vector<16x48xbf16>, vector<256x48xf32> -> vector<256x48xf32>
    %28 = arith.addf %21, %27 : vector<256x48xf32>
    %c0_26 = arith.constant 0 : index
    %c1_27 = arith.constant 1 : index
    %c1_28 = arith.constant 1 : index
    %c0_29 = arith.constant 0 : index
    %29 = vector.load %arg1[%c0_26, %c1_27, %c1_28, %c0_29] : memref<1x18x18x16xbf16, #tpu.memory_space<vmem>>, vector<1x16x16x16xbf16>
    %30 = vector.shape_cast %29 : vector<1x16x16x16xbf16> to vector<16x16x16xbf16>
    %31 = vector.shape_cast %30 : vector<16x16x16xbf16> to vector<256x16xbf16>
    %c0_30 = arith.constant 0 : index
    %c64 = arith.constant 64 : index
    %c0_31 = arith.constant 0 : index
    %32 = vector.load %arg2[%c0_30, %c64, %c0_31] : memref<1x144x48xbf16, #tpu.memory_space<vmem>>, vector<1x16x48xbf16>
    %33 = vector.shape_cast %32 : vector<1x16x48xbf16> to vector<16x48xbf16>
    %cst_32 = arith.constant dense<0.000000e+00> : vector<256x48xf32>
    %34 = tpu.matmul %31, %33, %cst_32 {dimension_numbers = #tpu.dot_dimension_numbers<[1], [0], [0], [1], [0, 0, 1, 1], [], []>} : vector<256x16xbf16>, vector<16x48xbf16>, vector<256x48xf32> -> vector<256x48xf32>
    %35 = arith.addf %28, %34 : vector<256x48xf32>
    %c0_33 = arith.constant 0 : index
    %c1_34 = arith.constant 1 : index
    %c2_35 = arith.constant 2 : index
    %c0_36 = arith.constant 0 : index
    %36 = vector.load %arg1[%c0_33, %c1_34, %c2_35, %c0_36] : memref<1x18x18x16xbf16, #tpu.memory_space<vmem>>, vector<1x16x16x16xbf16>
    %37 = vector.shape_cast %36 : vector<1x16x16x16xbf16> to vector<16x16x16xbf16>
    %38 = vector.shape_cast %37 : vector<16x16x16xbf16> to vector<256x16xbf16>
    %c0_37 = arith.constant 0 : index
    %c80 = arith.constant 80 : index
    %c0_38 = arith.constant 0 : index
    %39 = vector.load %arg2[%c0_37, %c80, %c0_38] : memref<1x144x48xbf16, #tpu.memory_space<vmem>>, vector<1x16x48xbf16>
    %40 = vector.shape_cast %39 : vector<1x16x48xbf16> to vector<16x48xbf16>
    %cst_39 = arith.constant dense<0.000000e+00> : vector<256x48xf32>
    %41 = tpu.matmul %38, %40, %cst_39 {dimension_numbers = #tpu.dot_dimension_numbers<[1], [0], [0], [1], [0, 0, 1, 1], [], []>} : vector<256x16xbf16>, vector<16x48xbf16>, vector<256x48xf32> -> vector<256x48xf32>
    %42 = arith.addf %35, %41 : vector<256x48xf32>
    %c0_40 = arith.constant 0 : index
    %c2_41 = arith.constant 2 : index
    %c0_42 = arith.constant 0 : index
    %c0_43 = arith.constant 0 : index
    %43 = vector.load %arg1[%c0_40, %c2_41, %c0_42, %c0_43] : memref<1x18x18x16xbf16, #tpu.memory_space<vmem>>, vector<1x16x16x16xbf16>
    %44 = vector.shape_cast %43 : vector<1x16x16x16xbf16> to vector<16x16x16xbf16>
    %45 = vector.shape_cast %44 : vector<16x16x16xbf16> to vector<256x16xbf16>
    %c0_44 = arith.constant 0 : index
    %c96 = arith.constant 96 : index
    %c0_45 = arith.constant 0 : index
    %46 = vector.load %arg2[%c0_44, %c96, %c0_45] : memref<1x144x48xbf16, #tpu.memory_space<vmem>>, vector<1x16x48xbf16>
    %47 = vector.shape_cast %46 : vector<1x16x48xbf16> to vector<16x48xbf16>
    %cst_46 = arith.constant dense<0.000000e+00> : vector<256x48xf32>
    %48 = tpu.matmul %45, %47, %cst_46 {dimension_numbers = #tpu.dot_dimension_numbers<[1], [0], [0], [1], [0, 0, 1, 1], [], []>} : vector<256x16xbf16>, vector<16x48xbf16>, vector<256x48xf32> -> vector<256x48xf32>
    %49 = arith.addf %42, %48 : vector<256x48xf32>
    %c0_47 = arith.constant 0 : index
    %c2_48 = arith.constant 2 : index
    %c1_49 = arith.constant 1 : index
    %c0_50 = arith.constant 0 : index
    %50 = vector.load %arg1[%c0_47, %c2_48, %c1_49, %c0_50] : memref<1x18x18x16xbf16, #tpu.memory_space<vmem>>, vector<1x16x16x16xbf16>
    %51 = vector.shape_cast %50 : vector<1x16x16x16xbf16> to vector<16x16x16xbf16>
    %52 = vector.shape_cast %51 : vector<16x16x16xbf16> to vector<256x16xbf16>
    %c0_51 = arith.constant 0 : index
    %c112 = arith.constant 112 : index
    %c0_52 = arith.constant 0 : index
    %53 = vector.load %arg2[%c0_51, %c112, %c0_52] : memref<1x144x48xbf16, #tpu.memory_space<vmem>>, vector<1x16x48xbf16>
    %54 = vector.shape_cast %53 : vector<1x16x48xbf16> to vector<16x48xbf16>
    %cst_53 = arith.constant dense<0.000000e+00> : vector<256x48xf32>
    %55 = tpu.matmul %52, %54, %cst_53 {dimension_numbers = #tpu.dot_dimension_numbers<[1], [0], [0], [1], [0, 0, 1, 1], [], []>} : vector<256x16xbf16>, vector<16x48xbf16>, vector<256x48xf32> -> vector<256x48xf32>
    %56 = arith.addf %49, %55 : vector<256x48xf32>
    %c0_54 = arith.constant 0 : index
    %c2_55 = arith.constant 2 : index
    %c2_56 = arith.constant 2 : index
    %c0_57 = arith.constant 0 : index
    %57 = vector.load %arg1[%c0_54, %c2_55, %c2_56, %c0_57] : memref<1x18x18x16xbf16, #tpu.memory_space<vmem>>, vector<1x16x16x16xbf16>
    %58 = vector.shape_cast %57 : vector<1x16x16x16xbf16> to vector<16x16x16xbf16>
    %59 = vector.shape_cast %58 : vector<16x16x16xbf16> to vector<256x16xbf16>
    %c0_58 = arith.constant 0 : index
    %c128 = arith.constant 128 : index
    %c0_59 = arith.constant 0 : index
    %60 = vector.load %arg2[%c0_58, %c128, %c0_59] : memref<1x144x48xbf16, #tpu.memory_space<vmem>>, vector<1x16x48xbf16>
    %61 = vector.shape_cast %60 : vector<1x16x48xbf16> to vector<16x48xbf16>
    %cst_60 = arith.constant dense<0.000000e+00> : vector<256x48xf32>
    %62 = tpu.matmul %59, %61, %cst_60 {dimension_numbers = #tpu.dot_dimension_numbers<[1], [0], [0], [1], [0, 0, 1, 1], [], []>} : vector<256x16xbf16>, vector<16x48xbf16>, vector<256x48xf32> -> vector<256x48xf32>
    %63 = arith.addf %56, %62 : vector<256x48xf32>
    %c0_61 = arith.constant 0 : index
    %c0_62 = arith.constant 0 : index
    %64 = vector.load %arg3[%c0_61, %c0_62] : memref<2x48xf32, #tpu.memory_space<vmem>>, vector<1x48xf32>
    %65 = vector.broadcast %64 : vector<1x48xf32> to vector<256x48xf32>
    %66 = arith.mulf %63, %65 : vector<256x48xf32>
    %c1_63 = arith.constant 1 : index
    %c0_64 = arith.constant 0 : index
    %67 = vector.load %arg3[%c1_63, %c0_64] : memref<2x48xf32, #tpu.memory_space<vmem>>, vector<1x48xf32>
    %68 = vector.broadcast %67 : vector<1x48xf32> to vector<256x48xf32>
    %69 = arith.addf %66, %68 : vector<256x48xf32>
    %70 = vector.extract_strided_slice %69 {offsets = [0, 0], sizes = [256, 16], strides = [1, 1]} : vector<256x48xf32> to vector<256x16xf32>
    %71 = vector.extract_strided_slice %69 {offsets = [0, 16], sizes = [256, 16], strides = [1, 1]} : vector<256x48xf32> to vector<256x16xf32>
    %72 = arith.addf %70, %71 : vector<256x16xf32>
    %73 = vector.extract_strided_slice %69 {offsets = [0, 32], sizes = [256, 16], strides = [1, 1]} : vector<256x48xf32> to vector<256x16xf32>
    %74 = arith.addf %72, %73 : vector<256x16xf32>
    %c0_65 = arith.constant 0 : index
    %c0_66 = arith.constant 0 : index
    %c0_67 = arith.constant 0 : index
    %75 = vector.load %arg4[%c0_65, %c0_66, %c0_67] : memref<1x256x16xf32, #tpu.memory_space<vmem>>, vector<1x256x16xf32>
    %76 = vector.shape_cast %75 : vector<1x256x16xf32> to vector<256x16xf32>
    %77 = vector.shape_cast %74 : vector<256x16xf32> to vector<1x256x16xf32>
    tpu.vector_store %arg4[%c0_65, %c0_66, %c0_67], %77 {strides = array<i32>} : memref<1x256x16xf32, #tpu.memory_space<vmem>>, vector<1x256x16xf32>,
    return
  }
  func.func @transform_0(%arg0: i32) -> (i32, i32, i32, i32) {
    %c0_i32 = arith.constant 0 : i32
    %c0_i32_0 = arith.constant 0 : i32
    %c0_i32_1 = arith.constant 0 : i32
    %c0_i32_2 = arith.constant 0 : i32
    return %arg0, %c0_i32, %c0_i32_0, %c0_i32_1 : i32, i32, i32, i32
  }
  func.func @transform_1(%arg0: i32) -> (i32, i32, i32) {
    %c0_i32 = arith.constant 0 : i32
    %c0_i32_0 = arith.constant 0 : i32
    %c0_i32_1 = arith.constant 0 : i32
    return %arg0, %c0_i32, %c0_i32_0 : i32, i32, i32
  }
  func.func @transform_2(%arg0: i32) -> (i32, i32) {
    %c0_i32 = arith.constant 0 : i32
    %c0_i32_0 = arith.constant 0 : i32
    %c0_i32_1 = arith.constant 0 : i32
    return %c0_i32, %c0_i32_0 : i32, i32
  }
  func.func @transform_3(%arg0: i32) -> (i32, i32, i32) {
    %c0_i32 = arith.constant 0 : i32
    %c0_i32_0 = arith.constant 0 : i32
    %c0_i32_1 = arith.constant 0 : i32
    return %arg0, %c0_i32, %c0_i32_0 : i32, i32, i32
  }
}

</mosaic_0001>

<bundles_post_ra>
// kernel: mul.13
= control target key start
LH: loop header
LB: loop body
LE: loop exit
PB: predicated region body
PF: predicated region fallthrough
CT: control target
= control target key end

     0   :  { %vm7_vm0 = vcmask 130048   ;;  %s36_s8 = smov 96   ;;  %s56_s0 = inlined_call_operand.vmem [shape: f32[2,48,1,1], index: 0, kind: input, shape index: {}]   ;;  %s57_s1 = inlined_call_operand.vmem [shape: f32[2,3,16], index: 1, kind: output, shape index: {}]  }
   0x1   :  { %v4_v0 = vld [vmem:[%s56_s0] sm:$0x3]  ;;  %s35_s0 = smov 112  }
   0x2   :  { %5 = vst [vmem:[#allocation1] sm:$0x3] %v4_v0 }
   0x9   :  { %v9_v1 = vld [vmem:[#allocation1] sm:$0x3]  }
   0xa   :  { %v6_v2 = vld [vmem:[#allocation1] sm:$0x3]   ;;  %10 = vrot.lane.b32.xlu0 %v9_v1, %s35_s0 }
   0xb   :  { %8 = vst.msk [vmem:[#allocation0] ss:$8 sm:$0x3] %vm7_vm0, %v6_v2   ;;  %v15_v3 = vld [vmem:[#allocation1] sm:$0x3]  }
   0xe   :  { %16 = vrot.lane.b32.xlu0 %v15_v3, %s36_s8 }
  0x7c   :  { %v11_v4 = vpop.permute.xlu0 %10  }
  0x7d   :  { %14 = vst.msk [vmem:[#allocation0 + $0x1] ss:$8 sm:$0x3] %vm7_vm0, %v11_v4  }
  0x80   :  { %v17_v5 = vpop.permute.xlu0 %16  }
  0x81   :  { %20 = vst.msk [vmem:[#allocation0 + $0x2] ss:$8 sm:$0x3] %vm7_vm0, %v17_v5  }
  0x88   :  { %v24_v6 = vld [vmem:[#allocation0] sm:$0xf]  ;;  %v28_v7 = vld [vmem:[#allocation0 + $0x8] sm:$0xf] }
  0x89   :  { %26 = vst [vmem:[%s57_s1] sm:$0xf] %v24_v6  ;;  %32 = vst [vmem:[%s57_s1 + $0x4] sm:$0xf] %v28_v7 }

// kernel: dyres_conv_forward.2
= control target key start
LH: loop header
LB: loop body
LE: loop exit
PB: predicated region body
PF: predicated region fallthrough
CT: control target
= control target key end

     0   :  { %s6401_s9 = smov 0   ;;  %s8165_s0 = inlined_call_operand.vmem [shape: bf16[2,18,18,16], index: 0, kind: input, shape index: {}]   ;;  %s8166_s1 = inlined_call_operand.vmem [shape: bf16[2,144,48], index: 1, kind: input, shape index: {}]   ;;  %s8167_s2 = inlined_call_operand.vmem [shape: f32[2,2,48], index: 2, kind: output, shape index: {}]  }
   0x1 LB: > { %s4989_s10 = sadd.s32 4294967295, %s6384_s9   ;;  %p4993_p0 = scmp.ge.s32.totalorder %s6384_s9, 1  ;;  %s6384_s9 = sphi %s6401_s9, %s12_s9  }
   0x2   : > { %p122_p1 = scmp.lt.s32.totalorder %s6384_s9, 3 }
   0x4   : > { %p123_p2 = pnand %p4993_p0, %p122_p1 }
   0x6   : > { %126 = sbr.rel (%p123_p2) target bundleno = 605 (0x25d), region = 28 }
   0xd   : > { %p148_p3 = scmp.lt.s32.totalorder %s4989_s10, 1  ;;  %vm213_vm0 = vsmask.f32 3328  ;;  %vm214_vm1 = vsmask.f32 7440  ;;  %vm656_vm3 = vcmask 130048  }
   0xe   : > { %vm6445_vm2 = vmor %vm213_vm0, %vm214_vm1  ;;  %vm1209_vm4 = vcmask 1042432   ;;  %vm1210_vm5 = vcmask 1046532   ;;  %vm4749_vm7 = vcmask 392192   ;;  %vm4920_vm8 = vcmask 1040384  }
   0xf   : > { %s8231_s10 = smov (!%p148_p3, %s4989_s10), 1  ;;  %vm6662_vm6 = vmor %vm1209_vm4, %vm1210_vm5  ;;  %vm4922_vm9 = vcmask 386048  }
  0x10   : > { %s6253_s11 = smul.u32 216, %s8231_s10  ;;  %s4996_s19 = sshll.u32 %s8231_s10, 1 }
  0x11   : > { %s6254_s12 = smul.u32 72, %s8231_s10  ;;  %s161_s22 = scalar_lea.vmem %s8167_s2, %s4996_s19 }
  0x12   : > { %s6416_s15 = scalar_lea.vmem %s8165_s0, %s6253_s11 }
  0x13   : > { %s6421_s18 = scalar_lea.vmem %s8166_s1, %s6254_s12  ;;  %v163_v0 = vld [vmem:[%s6416_s15] sm:$0xf]  ;;  %v164_v1 = vld [vmem:[%s6416_s15 + $0x4] sm:$0xf]  ;;  %v197_v2 = vld [vmem:[%s6416_s15 + $0x8] sm:$0x1] }
  0x14   : > { %v6263_v3 = vld [vmem:[%s6421_s18 + $0x8] sm:$0xff]   ;;  %v217_v4 = vshrl.u32 %v163_v0, 16  ;;  %v6264_v5 = vld [vmem:[%s6421_s18 + $0x20] sm:$0xff]   ;;  %v220_v6 = vshll.u32 %v163_v0, 16  ;;  %v226_v8 = vshll.u32 %v164_v1, 16  ;;  %v230_v9 = vshrl.u32 %v164_v1, 16 }
  0x15   : > { %5689 = vmatprep.subr.bf16.mxu1 %v6263_v3  ;;  %v236_v10 = vshll.u32 %v197_v2, 16  ;;  %5825 = vmatprep.subr.bf16.mxu0 %v6264_v5  ;;  %v6429_v12 = vld [vmem:[%s6421_s18] sm:$0xff]   ;;  %v6432_v13 = vld [vmem:[%s6421_s18 + $0x28] sm:$0xff]   ;;  %v6437_v19 = vld [vmem:[%s6416_s15 + $0x10] sm:$0xf] }
  0x16   : > { %v219_v7 = vrot.slane %v217_v4, 4  ;;  %5690 = vmatpush3.bf16.msra.mxu1 %v6263_v3  ;;  %v222_v11 = vrot.slane %v220_v6, 5  ;;  %5826 = vmatpush3.bf16.msra.mxu0 %v6264_v5  ;;  %v228_v14 = vrot.slane %v226_v8, 5  ;;  %v232_v15 = vrot.slane %v230_v9, 4  ;;  %v5177_v17 = vld [vmem:[%s6416_s15 + $0xc] sm:$0xf] }
  0x17   : > { %v238_v16 = vrot.slane %v236_v10, 5  ;;  %5723 = vmatprep.subr.bf16.mxu1 %v6429_v12  ;;  %v6440_v20 = vld [vmem:[%s6416_s15 + $0x14] sm:$0x1]  ;;  %v2032_v21 = vshrl.u32 %v5177_v17, 16  ;;  %v2035_v22 = vshll.u32 %v5177_v17, 16  ;;  %5859 = vmatprep.subr.bf16.mxu0 %v6432_v13  ;;  %v2041_v25 = vshll.u32 %v6437_v19, 16 }
  0x18   : > { %v223_v18 = vor.u32 %v222_v11, %v219_v7  ;;  %v233_v24 = vor.u32 %v232_v15, %v228_v14  ;;  %v2045_v26 = vshrl.u32 %v6437_v19, 16  ;;  %v2051_v27 = vshll.u32 %v6440_v20, 16  ;;  %v165_v34 = vld [vmem:[%s6416_s15 + $0xc] sm:$0xf]  ;;  %v166_v38 = vld [vmem:[%s6416_s15 + $0x10] sm:$0xf] }
  0x19   : > { %v2034_v29 = vrot.slane %v2032_v21, 4  ;;  %v2037_v30 = vrot.slane %v2035_v22, 5  ;;  %v2043_v32 = vrot.slane %v2041_v25, 5  ;;  %v198_v39 = vld [vmem:[%s6416_s15 + $0x14] sm:$0x1]  ;;  %v241_v40 = vshrl.u32 %v165_v34, 16 }
  0x1a   : > { %v224_v28 = vrot.slane %v223_v18, 4  ;;  %v234_v31 = vrot.slane %v233_v24, 4  ;;  %v2047_v33 = vrot.slane %v2045_v26, 4  ;;  %v2053_v37 = vrot.slane %v2051_v27, 5  ;;  %v5180_v49 = vld [vmem:[%s6416_s15 + $0x18] sm:$0xf] }
  0x1b   : > { %v2038_v36 = vor.u32 %v2037_v30, %v2034_v29  ;;  %v244_v43 = vshll.u32 %v165_v34, 16  ;;  %v250_v44 = vshll.u32 %v166_v38, 16  ;;  %v243_v47 = vrot.slane %v241_v40, 4  ;;  %v6461_v54 = vld [vmem:[%s6416_s15 + $0x1c] sm:$0xf] }
  0x1c   : > { %v229_v35 = vsel %vm6445_vm2, %v224_v28, %v228_v14  ;;  %v239_v41 = vsel %vm6445_vm2, %v234_v31, %v238_v16  ;;  %v2048_v42 = vor.u32 %v2047_v33, %v2043_v32  ;;  %v254_v48 = vshrl.u32 %v166_v38, 16  ;;  %v6469_v59 = vld [vmem:[%s6416_s15 + $0x20] sm:$0x1]  ;;  %v167_v8 = vld [vmem:[%s6416_s15 + $0x18] sm:$0xf]  ;;  %v6269_v33 = vld [vmem:[%s6421_s18 + $0x10] sm:$0xff]  }
  0x1d   : > { %v4997_v45 = vcombine.low %v229_v35, %v239_v41  ;;  %v2039_v46 = vrot.slane %v2038_v36, 4  ;;  %v246_v51 = vrot.slane %v244_v43, 5  ;;  %v252_v52 = vrot.slane %v250_v44, 5  ;;  %v168_v15 = vld [vmem:[%s6416_s15 + $0x1c] sm:$0xf] }
  0x1e   : > { %v2049_v50 = vrot.slane %v2048_v42, 4  ;;  %v260_v53 = vshll.u32 %v198_v39, 16  ;;  %v2778_v56 = vrot.slane %v6437_v19, 5  ;;  %v2781_v57 = vrot.slane %v6440_v20, 5  ;;  %v199_v22 = vld [vmem:[%s6416_s15 + $0x20] sm:$0x1] }
  0x1f   : > { %5691 = vmatprep.mubr.msk.bf16.mxu1 %vm656_vm3, %v4997_v45  ;;  %v2044_v55 = vsel %vm6445_vm2, %v2039_v46, %v2043_v32  ;;  %v256_v58 = vrot.slane %v254_v48, 4  ;;  %v247_v61 = vor.u32 %v246_v51, %v243_v47  ;;  %v2056_v63 = vshrl.u32 %v5180_v49, 16  ;;  %v5183_v28 = vld [vmem:[%s6416_s15 + $0x24] sm:$0xf]  ;;  %v6493_v38 = vld [vmem:[%s6416_s15 + $0x28] sm:$0xf] }
  0x20   : > { %v2054_v60 = vsel %vm6445_vm2, %v2049_v50, %v2053_v37  ;;  %v262_v62 = vrot.slane %v260_v53, 5  ;;  %v2059_v2 = vshll.u32 %v5180_v49, 16  ;;  %v2065_v3 = vshll.u32 %v6461_v54, 16  ;;  %v6497_v42 = vld [vmem:[%s6416_s15 + $0x2c] sm:$0x1] }
  0x21   : > { %v5225_v0 = vcombine.low %v2044_v55, %v2054_v60  ;;  %v257_v1 = vor.u32 %v256_v58, %v252_v52  ;;  %v248_v4 = vrot.slane %v247_v61, 4  ;;  %v2058_v5 = vrot.slane %v2056_v63, 4  ;;  %v169_v48 = vld [vmem:[%s6416_s15 + $0x24] sm:$0xf]  ;;  %v170_v60 = vld [vmem:[%s6416_s15 + $0x28] sm:$0xf] }
  0x22   : > { %v2069_v6 = vshrl.u32 %v6461_v54, 16  ;;  %v2075_v7 = vshll.u32 %v6469_v59, 16  ;;  %v2061_v10 = vrot.slane %v2059_v2, 5  ;;  %v2067_v11 = vrot.slane %v2065_v3, 5  ;;  %v6509_v61 = vld [vmem:[%s6421_s18 + $0x30] sm:$0xff]  }
  0x23   : > { %5827 = vmatprep.mubr.msk.bf16.mxu0 %vm656_vm3, %v5225_v0  ;;  %v258_v9 = vrot.slane %v257_v1, 4  ;;  %v2785_v14 = vrot.slane %v6461_v54, 5  ;;  %v253_v16 = vsel %vm6445_vm2, %v248_v4, %v252_v52  ;;  %v2788_v21 = vrot.slane %v6469_v59, 5 }
  0x24   : > { %v2071_v17 = vrot.slane %v2069_v6, 4  ;;  %v2077_v18 = vrot.slane %v2075_v7, 5  ;;  %v2062_v25 = vor.u32 %v2061_v10, %v2058_v5  ;;  %v265_v27 = vshrl.u32 %v167_v8, 16  ;;  %v200_v5 = vld [vmem:[%s6416_s15 + $0x2c] sm:$0x1] }
  0x25   : > { %v263_v24 = vsel %vm6445_vm2, %v258_v9, %v262_v62  ;;  %v6488_v26 = vrot.slane %v2785_v14, 4  ;;  %v268_v31 = vshll.u32 %v167_v8, 16  ;;  %v274_v32 = vshll.u32 %v168_v15, 16 }
  0x26   : > { %v4998_v29 = vcombine.low %v253_v16, %v263_v24  ;;  %v2072_v30 = vor.u32 %v2071_v17, %v2067_v11  ;;  %v2063_v34 = vrot.slane %v2062_v25, 4  ;;  %v267_v35 = vrot.slane %v265_v27, 4 }
  0x27   : > { %v278_v36 = vshrl.u32 %v168_v15, 16  ;;  %v284_v37 = vshll.u32 %v199_v22, 16  ;;  %v270_v40 = vrot.slane %v268_v31, 5  ;;  %v276_v41 = vrot.slane %v274_v32, 5  ;;  %v6521_v22 = vld [vmem:[%s6416_s15 + $0x34] sm:$0xf] }
  0x28   : > { %5692 = vmatmul.mubr.msk.bf16.vlgmr.msra.gmra.mrb[0].mxu1 %vm656_vm3, %v4998_v29  ;;  %v2073_v39 = vrot.slane %v2072_v30, 4  ;;  %v2080_v43 = vshrl.u32 %v5183_v28, 16  ;;  %v2068_v44 = vsel %vm6445_vm2, %v2063_v34, %v2067_v11  ;;  %v2083_v47 = vshll.u32 %v5183_v28, 16  ;;  %v5186_v11 = vld [vmem:[%s6416_s15 + $0x30] sm:$0xf] }
  0x29   : > { %5724 = vmatpush3.bf16.msra.mxu1 %v6429_v12  ;;  %v280_v45 = vrot.slane %v278_v36, 4  ;;  %v286_v46 = vrot.slane %v284_v37, 5  ;;  %v271_v50 = vor.u32 %v270_v40, %v267_v35  ;;  %v2089_v52 = vshll.u32 %v6493_v38, 16  ;;  %v6527_v31 = vld [vmem:[%s6416_s15 + $0x38] sm:$0x1] }
  0x2a   : > { %v2078_v49 = vsel %vm6445_vm2, %v2073_v39, %v2077_v18  ;;  %v2082_v51 = vrot.slane %v2080_v43, 4  ;;  %5757 = vmatprep.subr.bf16.mxu1 %v6269_v33  ;;  %v2085_v12 = vrot.slane %v2083_v47, 5  ;;  %v2093_v58 = vshrl.u32 %v6493_v38, 16  ;;  %v171_v37 = vld [vmem:[%s6416_s15 + $0x30] sm:$0xf] }
  0x2b   : > { %v5226_v53 = vcombine.low %v2068_v44, %v2078_v49  ;;  %v281_v55 = vor.u32 %v280_v45, %v276_v41  ;;  %v272_v62 = vrot.slane %v271_v50, 4  ;;  %v2091_v63 = vrot.slane %v2089_v52, 5  ;;  %v172_v44 = vld [vmem:[%s6416_s15 + $0x34] sm:$0xf] }
  0x2c   : > { %v2099_v0 = vshll.u32 %v6497_v42, 16  ;;  %v289_v1 = vshrl.u32 %v169_v48, 16  ;;  %v2086_v3 = vor.u32 %v2085_v12, %v2082_v51  ;;  %v2095_v4 = vrot.slane %v2093_v58, 4  ;;  %v201_v12 = vld [vmem:[%s6416_s15 + $0x38] sm:$0x1] }
  0x2d   : > { %5828 = vmatmul.mubr.msk.bf16.vlgmr.msra.gmra.mrb[0].mxu0 %vm656_vm3, %v5226_v53  ;;  %v282_v2 = vrot.slane %v281_v55, 4  ;;  %v292_v6 = vshll.u32 %v169_v48, 16  ;;  %v277_v7 = vsel %vm6445_vm2, %v272_v62, %v276_v41  ;;  %v298_v10 = vshll.u32 %v170_v60, 16 }
  0x2e   : > { %5860 = vmatpush3.bf16.msra.mxu0 %v6432_v13  ;;  %v2101_v8 = vrot.slane %v2099_v0, 5  ;;  %v291_v9 = vrot.slane %v289_v1, 4  ;;  %v2087_v16 = vrot.slane %v2086_v3, 4  ;;  %v2096_v17 = vor.u32 %v2095_v4, %v2091_v63 }
  0x2f   : > { %v287_v15 = vsel %vm6445_vm2, %v282_v2, %v286_v46  ;;  %v294_v18 = vrot.slane %v292_v6, 5  ;;  %5893 = vmatprep.subr.bf16.mxu0 %v6509_v61  ;;  %v300_v24 = vrot.slane %v298_v10, 5  ;;  %v302_v25 = vshrl.u32 %v170_v60, 16  ;;  %v5189_v2 = vld [vmem:[%s6416_s15 + $0x3c] sm:$0xf] }
  0x30   : > { %v4999_v13 = vcombine.low %v277_v7, %v287_v15  ;;  %v308_v27 = vshll.u32 %v200_v5, 16  ;;  %v2092_v28 = vsel %vm6445_vm2, %v2087_v16, %v2091_v63  ;;  %v2097_v29 = vrot.slane %v2096_v17, 4  ;;  %v6545_v7 = vld [vmem:[%s6416_s15 + $0x40] sm:$0xf]  ;;  %v6550_v17 = vld [vmem:[%s6416_s15 + $0x44] sm:$0x1] }
  0x31   : > { %v295_v30 = vor.u32 %v294_v18, %v291_v9  ;;  %v2104_v32 = vshrl.u32 %v5186_v11, 16  ;;  %v304_v33 = vrot.slane %v302_v25, 4  ;;  %v2107_v35 = vshll.u32 %v5186_v11, 16 }
  0x32   : > { %5695 = vmatprep.mubr.msk.bf16.mxu1 %vm656_vm3, %v4999_v13  ;;  %v310_v34 = vrot.slane %v308_v27, 5  ;;  %v2113_v36 = vshll.u32 %v6521_v22, 16  ;;  %v2102_v39 = vsel %vm6445_vm2, %v2097_v29, %v2101_v8  ;;  %v2117_v43 = vshrl.u32 %v6521_v22, 16 }
  0x33   : > { %v296_v40 = vrot.slane %v295_v30, 4  ;;  %v2106_v41 = vrot.slane %v2104_v32, 4  ;;  %v5227_v45 = vcombine.low %v2092_v28, %v2102_v39  ;;  %v305_v46 = vor.u32 %v304_v33, %v300_v24  ;;  %v174_v30 = vld [vmem:[%s6416_s15 + $0x40] sm:$0xf] }
  0x34   : > { %v2109_v47 = vrot.slane %v2107_v35, 5  ;;  %v2115_v48 = vrot.slane %v2113_v36, 5  ;;  %v2119_v50 = vrot.slane %v2117_v43, 4  ;;  %v2123_v51 = vshll.u32 %v6527_v31, 16 }
  0x35   : > { %v301_v49 = vsel %vm6445_vm2, %v296_v40, %v300_v24  ;;  %v313_v52 = vshrl.u32 %v171_v37, 16  ;;  %5831 = vmatprep.mubr.msk.bf16.mxu0 %vm656_vm3, %v5227_v45  ;;  %v306_v53 = vrot.slane %v305_v46, 4  ;;  %v316_v58 = vshll.u32 %v171_v37, 16  ;;  %v173_v24 = vld [vmem:[%s6416_s15 + $0x3c] sm:$0xf] }
  0x36   : > { %v2110_v55 = vor.u32 %v2109_v47, %v2106_v41  ;;  %v322_v60 = vshll.u32 %v172_v44, 16  ;;  %v2120_v62 = vor.u32 %v2119_v50, %v2115_v48  ;;  %v2125_v63 = vrot.slane %v2123_v51, 5  ;;  %v5192_v51 = vld [vmem:[%s6416_s15 + $0x48] sm:$0xf] }
  0x37   : > { %v315_v0 = vrot.slane %v313_v52, 4  ;;  %v326_v1 = vshrl.u32 %v172_v44, 16  ;;  %v311_v3 = vsel %vm6445_vm2, %v306_v53, %v310_v34  ;;  %v318_v5 = vrot.slane %v316_v58, 5  ;;  %v202_v44 = vld [vmem:[%s6416_s15 + $0x44] sm:$0x1] }
  0x38   : > { %v2111_v4 = vrot.slane %v2110_v55, 4  ;;  %v324_v6 = vrot.slane %v322_v60, 5  ;;  %v5000_v8 = vcombine.low %v301_v49, %v311_v3  ;;  %v2121_v9 = vrot.slane %v2120_v62, 4  ;;  %v6568_v58 = vld [vmem:[%s6416_s15 + $0x4c] sm:$0xf] }
  0x39   : > { %v328_v10 = vrot.slane %v326_v1, 4  ;;  %v332_v11 = vshll.u32 %v201_v12, 16  ;;  %v319_v16 = vor.u32 %v318_v5, %v315_v0  ;;  %v2128_v18 = vshrl.u32 %v5189_v2, 16  ;;  %v6574_v3 = vld [vmem:[%s6416_s15 + $0x50] sm:$0x1] }
  0x3a   : > { %v2116_v15 = vsel %vm6445_vm2, %v2111_v4, %v2115_v48  ;;  %v2131_v13 = vshll.u32 %v5189_v2, 16  ;;  %5696 = vmatmul.mubr.msk.bf16.gmra.mrb[4].mxu1 %vm656_vm3, %v5000_v8  ;;  %v2126_v25 = vsel %vm6445_vm2, %v2121_v9, %v2125_v63  ;;  %v2137_v29 = vshll.u32 %v6545_v7, 16 }
  0x3b   : > { %v329_v27 = vor.u32 %v328_v10, %v324_v6  ;;  %v334_v28 = vrot.slane %v332_v11, 5  ;;  %v5228_v32 = vcombine.low %v2116_v15, %v2126_v25  ;;  %v320_v33 = vrot.slane %v319_v16, 4 }
  0x3c   : > { %v2130_v34 = vrot.slane %v2128_v18, 4  ;;  %v2133_v35 = vrot.slane %v2131_v13, 5  ;;  %v2139_v37 = vrot.slane %v2137_v29, 5  ;;  %v2141_v39 = vshrl.u32 %v6545_v7, 16  ;;  %v6579_v13 = vld [vmem:[%s6416_s15 + $0x48] sm:$0xf] }
  0x3d   : > { %v330_v36 = vrot.slane %v329_v27, 4  ;;  %v2147_v40 = vshll.u32 %v6550_v17, 16  ;;  %5832 = vmatmul.mubr.msk.bf16.gmra.mrb[4].mxu0 %vm656_vm3, %v5228_v32  ;;  %v325_v41 = vsel %vm6445_vm2, %v320_v33, %v324_v6  ;;  %v337_v45 = vshrl.u32 %v173_v24, 16  ;;  %v6585_v29 = vld [vmem:[%s6416_s15 + $0x4c] sm:$0xf] }
  0x3e   : > { %v2134_v43 = vor.u32 %v2133_v35, %v2130_v34  ;;  %v340_v46 = vshll.u32 %v173_v24, 16  ;;  %v2143_v48 = vrot.slane %v2141_v39, 4  ;;  %v346_v50 = vshll.u32 %v174_v30, 16  ;;  %v203_v35 = vld [vmem:[%s6416_s15 + $0x50] sm:$0x1] }
  0x3f   : > { %v335_v47 = vsel %vm6445_vm2, %v330_v36, %v334_v28  ;;  %v2149_v49 = vrot.slane %v2147_v40, 5  ;;  %v339_v55 = vrot.slane %v337_v45, 4  ;;  %v350_v63 = vshrl.u32 %v174_v30, 16 }
  0x40   : > { %v5001_v52 = vcombine.low %v325_v41, %v335_v47  ;;  %v2135_v53 = vrot.slane %v2134_v43, 4  ;;  %v342_v12 = vrot.slane %v340_v46, 5  ;;  %v2144_v60 = vor.u32 %v2143_v48, %v2139_v37  ;;  %v5195_v46 = vld [vmem:[%s6416_s15 + $0x54] sm:$0xf] }
  0x41   : > { %v348_v62 = vrot.slane %v346_v50, 5  ;;  %v356_v0 = vshll.u32 %v202_v44, 16  ;;  %v2152_v4 = vshrl.u32 %v5192_v51, 16  ;;  %v2155_v5 = vshll.u32 %v5192_v51, 16  ;;  %v6599_v51 = vld [vmem:[%s6416_s15 + $0x58] sm:$0xf] }
  0x42   : > { %5699 = vmatprep.mubr.msk.bf16.mxu1 %vm656_vm3, %v5001_v52  ;;  %v2140_v1 = vsel %vm6445_vm2, %v2135_v53, %v2139_v37  ;;  %v343_v2 = vor.u32 %v342_v12, %v339_v55  ;;  %v2145_v6 = vrot.slane %v2144_v60, 4  ;;  %v352_v8 = vrot.slane %v350_v63, 4 }
  0x43   : > { %v358_v9 = vrot.slane %v356_v0, 5  ;;  %v2161_v10 = vshll.u32 %v6568_v58, 16  ;;  %v2154_v15 = vrot.slane %v2152_v4, 4  ;;  %v2157_v16 = vrot.slane %v2155_v5, 5  ;;  %v6604_v0 = vld [vmem:[%s6416_s15 + $0x5c] sm:$0x1] }
  0x44   : > { %v344_v11 = vrot.slane %v343_v2, 4  ;;  %v2165_v18 = vshrl.u32 %v6568_v58, 16  ;;  %v2150_v24 = vsel %vm6445_vm2, %v2145_v6, %v2149_v49  ;;  %v353_v25 = vor.u32 %v352_v8, %v348_v62  ;;  %v6612_v8 = vld [vmem:[%s6416_s15 + $0x54] sm:$0xf] }
  0x45   : > { %v2163_v27 = vrot.slane %v2161_v10, 5  ;;  %v2171_v28 = vshll.u32 %v6574_v3, 16  ;;  %v5229_v30 = vcombine.low %v2140_v1, %v2150_v24  ;;  %v2158_v33 = vor.u32 %v2157_v16, %v2154_v15  ;;  %v6615_v16 = vld [vmem:[%s6416_s15 + $0x58] sm:$0xf] }
  0x46   : > { %v349_v32 = vsel %vm6445_vm2, %v344_v11, %v348_v62  ;;  %v2167_v34 = vrot.slane %v2165_v18, 4  ;;  %v354_v36 = vrot.slane %v353_v25, 4  ;;  %v361_v39 = vshrl.u32 %v6579_v13, 16 }
  0x47   : > { %v2173_v37 = vrot.slane %v2171_v28, 5  ;;  %v364_v40 = vshll.u32 %v6579_v13, 16  ;;  %5835 = vmatprep.mubr.msk.bf16.mxu0 %vm656_vm3, %v5229_v30  ;;  %v2159_v41 = vrot.slane %v2158_v33, 4  ;;  %v370_v44 = vshll.u32 %v6585_v29, 16 }
  0x48   : > { %v2168_v43 = vor.u32 %v2167_v34, %v2163_v27  ;;  %v374_v45 = vshrl.u32 %v6585_v29, 16  ;;  %v359_v47 = vsel %vm6445_vm2, %v354_v36, %v358_v9  ;;  %v363_v48 = vrot.slane %v361_v39, 4 }
  0x49   : > { %v366_v49 = vrot.slane %v364_v40, 5  ;;  %v380_v50 = vshll.u32 %v203_v35, 16  ;;  %v5002_v52 = vcombine.low %v349_v32, %v359_v47  ;;  %v2164_v53 = vsel %vm6445_vm2, %v2159_v41, %v2163_v27  ;;  %v5198_v40 = vld [vmem:[%s6416_s15 + $0x60] sm:$0xf] }
  0x4a   : > { %v2169_v55 = vrot.slane %v2168_v43, 4  ;;  %v372_v12 = vrot.slane %v370_v44, 5  ;;  %v376_v62 = vrot.slane %v374_v45, 4  ;;  %v2176_v1 = vshrl.u32 %v5195_v46, 16 }
  0x4b   : > { %v367_v60 = vor.u32 %v366_v49, %v363_v48  ;;  %v382_v63 = vrot.slane %v380_v50, 5  ;;  %5700 = vmatmul.mubr.msk.bf16.gmra.mrb[8].mxu1 %vm656_vm3, %v5002_v52  ;;  %v2179_v4 = vshll.u32 %v5195_v46, 16  ;;  %v2185_v5 = vshll.u32 %v6599_v51, 16  ;;  %v6630_v46 = vld [vmem:[%s6416_s15 + $0x64] sm:$0xf] }
  0x4c   : > { %v2174_v2 = vsel %vm6445_vm2, %v2169_v55, %v2173_v37  ;;  %v2189_v6 = vshrl.u32 %v6599_v51, 16  ;;  %v377_v11 = vor.u32 %v376_v62, %v372_v12  ;;  %v2178_v15 = vrot.slane %v2176_v1, 4  ;;  %v204_v37 = vld [vmem:[%s6416_s15 + $0x5c] sm:$0x1] }
  0x4d   : > { %v5230_v9 = vcombine.low %v2164_v53, %v2174_v2  ;;  %v368_v10 = vrot.slane %v367_v60, 4  ;;  %v2181_v18 = vrot.slane %v2179_v4, 5  ;;  %v2187_v24 = vrot.slane %v2185_v5, 5  ;;  %v6642_v4 = vld [vmem:[%s6416_s15 + $0x60] sm:$0xf] }
  0x4e   : > { %v2191_v25 = vrot.slane %v2189_v6, 4  ;;  %v2195_v27 = vshll.u32 %v6604_v0, 16  ;;  %v378_v30 = vrot.slane %v377_v11, 4  ;;  %v385_v32 = vshrl.u32 %v6612_v8, 16  ;;  %v6645_v11 = vld [vmem:[%s6416_s15 + $0x64] sm:$0xf] }
  0x4f   : > { %5836 = vmatmul.mubr.msk.bf16.gmra.mrb[8].mxu0 %vm656_vm3, %v5230_v9  ;;  %v373_v28 = vsel %vm6445_vm2, %v368_v10, %v372_v12  ;;  %v388_v33 = vshll.u32 %v6612_v8, 16  ;;  %v2182_v34 = vor.u32 %v2181_v18, %v2178_v15  ;;  %v394_v39 = vshll.u32 %v6615_v16, 16 }
  0x50   : > { %v2192_v35 = vor.u32 %v2191_v25, %v2187_v24  ;;  %v2197_v36 = vrot.slane %v2195_v27, 5  ;;  %v383_v41 = vsel %vm6445_vm2, %v378_v30, %v382_v63  ;;  %v387_v43 = vrot.slane %v385_v32, 4  ;;  %v6638_v63 = vld [vmem:[%s6416_s15 + $0x68] sm:$0x1] }
  0x51   : > { %v390_v44 = vrot.slane %v388_v33, 5  ;;  %v398_v45 = vshrl.u32 %v6615_v16, 16  ;;  %v5003_v47 = vcombine.low %v373_v28, %v383_v41  ;;  %v2183_v48 = vrot.slane %v2182_v34, 4  ;;  %v205_v32 = vld [vmem:[%s6416_s15 + $0x68] sm:$0x1] }
  0x52   : > { %v2193_v49 = vrot.slane %v2192_v35, 4  ;;  %v396_v50 = vrot.slane %v394_v39, 5  ;;  %v404_v55 = vshll.u32 %v204_v37, 16  ;;  %v2200_v12 = vshrl.u32 %v5198_v40, 16  ;;  %v5258_v39 = vld [vmem:[%s6416_s15 + $0xc] sm:$0xe] }
  0x53   : > { %v391_v52 = vor.u32 %v390_v44, %v387_v43  ;;  %v400_v53 = vrot.slane %v398_v45, 4  ;;  %5703 = vmatprep.mubr.msk.bf16.mxu1 %vm656_vm3, %v5003_v47  ;;  %v2188_v60 = vsel %vm6445_vm2, %v2183_v48, %v2187_v24  ;;  %v2203_v1 = vshll.u32 %v5198_v40, 16 }
  0x54   : > { %v2198_v62 = vsel %vm6445_vm2, %v2193_v49, %v2197_v36  ;;  %v2209_v2 = vshll.u32 %v6630_v46, 16  ;;  %v406_v10 = vrot.slane %v404_v55, 5  ;;  %v2202_v15 = vrot.slane %v2200_v12, 4 }
  0x55   : > { %v5231_v5 = vcombine.low %v2188_v60, %v2198_v62  ;;  %v392_v6 = vrot.slane %v391_v52, 4  ;;  %v401_v9 = vor.u32 %v400_v53, %v396_v50  ;;  %v2205_v18 = vrot.slane %v2203_v1, 5  ;;  %v6667_v52 = vld [vmem:[%s6416_s15 + $0x6c] sm:$0xf] }
  0x56   : > { %v2211_v24 = vrot.slane %v2209_v2, 5  ;;  %v2213_v25 = vshrl.u32 %v6630_v46, 16  ;;  %v2219_v30 = vshll.u32 %v6638_v63, 16  ;;  %v409_v33 = vshrl.u32 %v6642_v4, 16 }
  0x57   : > { %5839 = vmatprep.mubr.msk.bf16.mxu0 %vm656_vm3, %v5231_v5  ;;  %v397_v27 = vsel %vm6445_vm2, %v392_v6, %v396_v50  ;;  %v402_v28 = vrot.slane %v401_v9, 4  ;;  %v2206_v34 = vor.u32 %v2205_v18, %v2202_v15  ;;  %v412_v36 = vshll.u32 %v6642_v4, 16  ;;  %v6679_v15 = vld [vmem:[%s6416_s15 + $0x70] sm:$0xf] }
  0x58   : > { %v2215_v35 = vrot.slane %v2213_v25, 4  ;;  %v418_v37 = vshll.u32 %v6645_v11, 16  ;;  %v2221_v41 = vrot.slane %v2219_v30, 5  ;;  %v411_v43 = vrot.slane %v409_v33, 4  ;;  %v5259_v30 = vld [vmem:[%s6416_s15 + $0x18] sm:$0xe] }
  0x59   : > { %v407_v40 = vsel %vm6445_vm2, %v402_v28, %v406_v10  ;;  %v422_v44 = vshrl.u32 %v6645_v11, 16  ;;  %v2207_v47 = vrot.slane %v2206_v34, 4  ;;  %v414_v49 = vrot.slane %v412_v36, 5  ;;  %v206_v28 = vld [vmem:[%s6416_s15 + $0x74] sm:$0x1] }
  0x5a   : > { %v5004_v45 = vcombine.low %v397_v27, %v407_v40  ;;  %v2216_v48 = vor.u32 %v2215_v35, %v2211_v24  ;;  %v420_v53 = vrot.slane %v418_v37, 5  ;;  %v428_v12 = vshll.u32 %v205_v32, 16 }
  0x5b   : > { %v424_v55 = vrot.slane %v422_v44, 4  ;;  %v5274_v60 = vrot.slane %v5258_v39, 9  ;;  %v2212_v62 = vsel %vm6445_vm2, %v2207_v47, %v2211_v24  ;;  %v415_v2 = vor.u32 %v414_v49, %v411_v43  ;;  %v6707_v44 = vld [vmem:[%s6416_s15 + $0x7c] sm:$0xf] }
  0x5c   : > { %5704 = vmatmul.mubr.msk.bf16.gmra.mrb[12].mxu1 %vm656_vm3, %v5004_v45  ;;  %v2217_v1 = vrot.slane %v2216_v48, 4  ;;  %v2780_v5 = vrot.slane %v2778_v56, 4  ;;  %v430_v9 = vrot.slane %v428_v12, 5  ;;  %v433_v18 = vshrl.u32 %v6667_v52, 16 }
  0x5d   : > { %v425_v6 = vor.u32 %v424_v55, %v420_v53  ;;  %v2779_v10 = vsel %vm6662_vm6, %v5274_v60, %v2778_v56  ;;  %v416_v25 = vrot.slane %v415_v2, 4  ;;  %v436_v19 = vshll.u32 %v6667_v52, 16  ;;  %v5260_v55 = vld [vmem:[%s6416_s15 + $0x24] sm:$0xe] }
  0x5e   : > { %v2222_v24 = vsel %vm6445_vm2, %v2217_v1, %v2221_v41  ;;  %v2782_v27 = vsel %vm6662_vm6, %v2780_v5, %v2781_v57  ;;  %v435_v34 = vrot.slane %v433_v18, 4  ;;  %v442_v20 = vshll.u32 %v6679_v15, 16  ;;  %v6696_v57 = vld [vmem:[%s6416_s15 + $0x78] sm:$0xf] }
  0x5f   : > { %v5232_v56 = vcombine.low %v2212_v62, %v2222_v24  ;;  %v426_v32 = vrot.slane %v425_v6, 4  ;;  %v5290_v33 = vcombine.low %v2779_v10, %v2782_v27  ;;  %v421_v35 = vsel %vm6445_vm2, %v416_v25, %v420_v53  ;;  %v207_v53 = vld [vmem:[%s6416_s15 + $0x80] sm:$0x1]  ;;  %v6725_v10 = vld [vmem:[%s6416_s15 + $0x88] sm:$0xf] }
  0x60   : > { %v438_v36 = vrot.slane %v436_v19, 5  ;;  %v446_v37 = vshrl.u32 %v6679_v15, 16  ;;  %v452_v40 = vshll.u32 %v206_v28, 16  ;;  %v5275_v41 = vrot.slane %v5259_v30, 9  ;;  %v208_v28 = vld [vmem:[%s6416_s15 + $0x8c] sm:$0x1] }
  0x61   : > { %5840 = vmatmul.mubr.msk.bf16.gmra.mrb[12].mxu0 %vm656_vm3, %v5232_v56  ;;  %v431_v39 = vsel %vm6445_vm2, %v426_v32, %v430_v9  ;;  %v2789_v43 = vsel %vm6662_vm6, %v6488_v26, %v2788_v21  ;;  %v444_v48 = vrot.slane %v442_v20, 5  ;;  %v457_v60 = vshrl.u32 %v6696_v57, 16  ;;  %v6719_v26 = vld [vmem:[%s6416_s15 + $0x84] sm:$0xf] }
  0x62   : > { %v5005_v45 = vcombine.low %v421_v35, %v431_v39  ;;  %5861 = vmatprep.mubr.msk.bf16.mxu0 %vm656_vm3, %v5290_v33  ;;  %v439_v47 = vor.u32 %v438_v36, %v435_v34  ;;  %v448_v49 = vrot.slane %v446_v37, 4  ;;  %v454_v12 = vrot.slane %v452_v40, 5  ;;  %v5261_v33 = vld [vmem:[%s6416_s15 + $0x30] sm:$0xe]  ;;  %v6733_v34 = vld [vmem:[%s6421_s18 + $0x38] sm:$0xff]  }
  0x63   : > { %v2786_v59 = vsel %vm6662_vm6, %v5275_v41, %v2785_v14  ;;  %v460_v21 = vshll.u32 %v6696_v57, 16  ;;  %v466_v5 = vshll.u32 %v6707_v44, 16  ;;  %v459_v54 = vrot.slane %v457_v60, 4 }
  0x64   : > { %5707 = vmatprep.mubr.msk.bf16.mxu1 %vm656_vm3, %v5005_v45  ;;  %v440_v62 = vrot.slane %v439_v47, 4  ;;  %v449_v1 = vor.u32 %v448_v49, %v444_v48  ;;  %v5291_v2 = vcombine.low %v2786_v59, %v2789_v43  ;;  %v470_v14 = vshrl.u32 %v6707_v44, 16  ;;  %v6749_v49 = vld [vmem:[%s6416_s15 + $0x94] sm:$0xf] }
  0x65   : > { %v462_v6 = vrot.slane %v460_v21, 5  ;;  %v476_v9 = vshll.u32 %v207_v53, 16  ;;  %v468_v25 = vrot.slane %v466_v5, 5  ;;  %v5276_v27 = vrot.slane %v5260_v55, 9 }
  0x66   : > { %v445_v18 = vsel %vm6445_vm2, %v440_v62, %v444_v48  ;;  %v450_v24 = vrot.slane %v449_v1, 4  ;;  %v472_v30 = vrot.slane %v470_v14, 4  ;;  %v2792_v32 = vrot.slane %v6493_v38, 5  ;;  %v5262_v14 = vld [vmem:[%s6416_s15 + $0x3c] sm:$0xe] }
  0x67   : > { %v463_v19 = vor.u32 %v462_v6, %v459_v54  ;;  %v478_v56 = vrot.slane %v476_v9, 5  ;;  %v2795_v36 = vrot.slane %v6497_v42, 5  ;;  %v481_v20 = vshrl.u32 %v6719_v26, 16  ;;  %v6746_v42 = vld [vmem:[%s6416_s15 + $0x90] sm:$0xf] }
  0x68   : > { %v455_v35 = vsel %vm6445_vm2, %v450_v24, %v454_v12  ;;  %v484_v37 = vshll.u32 %v6719_v26, 16  ;;  %v473_v41 = vor.u32 %v472_v30, %v468_v25  ;;  %v2793_v38 = vsel %vm6662_vm6, %v5276_v27, %v2792_v32  ;;  %v209_v6 = vld [vmem:[%s6416_s15 + $0x98] sm:$0x1] }
  0x69   : > { %v5006_v39 = vcombine.low %v445_v18, %v455_v35  ;;  %5862 = vmatmul.mubr.msk.bf16.vlgmr.msra.gmra.mrb[0].mxu0 %vm656_vm3, %v5291_v2  ;;  %v464_v40 = vrot.slane %v463_v19, 4  ;;  %v2794_v43 = vrot.slane %v2792_v32, 4  ;;  %v483_v45 = vrot.slane %v481_v20, 4 }
  0x6a   : > { %5894 = vmatpush3.bf16.msra.mxu0 %v6509_v61  ;;  %v486_v47 = vrot.slane %v484_v37, 5  ;;  %v490_v48 = vshll.u32 %v6725_v10, 16  ;;  %v474_v55 = vrot.slane %v473_v41, 4  ;;  %v494_v12 = vshrl.u32 %v6725_v10, 16 }
  0x6b   : > { %5708 = vmatmul.mubr.msk.bf16.gmra.mrb[16].mxu1 %vm656_vm3, %v5006_v39  ;;  %v469_v53 = vsel %vm6445_vm2, %v464_v40, %v468_v25  ;;  %v500_v61 = vshll.u32 %v208_v28, 16  ;;  %5927 = vmatprep.subr.bf16.mxu0 %v6733_v34  ;;  %v2796_v59 = vsel %vm6662_vm6, %v2794_v43, %v2795_v36  ;;  %v5277_v62 = vrot.slane %v5261_v33, 9  ;;  %v6775_v33 = vld [vmem:[%s6416_s15 + $0x9c] sm:$0xf]  ;;  %v6778_v39 = vld [vmem:[%s6416_s15 + $0xa0] sm:$0xf] }
  0x6c   : > { %v487_v60 = vor.u32 %v486_v47, %v483_v45  ;;  %v492_v21 = vrot.slane %v490_v48, 5  ;;  %v479_v1 = vsel %vm6445_vm2, %v474_v55, %v478_v56  ;;  %v5292_v2 = vcombine.low %v2793_v38, %v2796_v59  ;;  %v210_v45 = vld [vmem:[%s6416_s15 + $0xa4] sm:$0x1] }
  0x6d   : > { %v496_v5 = vrot.slane %v494_v12, 4  ;;  %v502_v54 = vrot.slane %v500_v61, 5  ;;  %v5007_v9 = vcombine.low %v469_v53, %v479_v1  ;;  %v2799_v24 = vrot.slane %v6521_v22, 5 }
  0x6e   : > { %v488_v18 = vrot.slane %v487_v60, 4  ;;  %v2802_v25 = vrot.slane %v6527_v31, 5  ;;  %5865 = vmatprep.mubr.msk.bf16.mxu0 %vm656_vm3, %v5292_v2  ;;  %v505_v28 = vshrl.u32 %v6746_v42, 16  ;;  %v508_v19 = vshll.u32 %v6746_v42, 16 }
  0x6f   : > { %v497_v27 = vor.u32 %v496_v5, %v492_v21  ;;  %v514_v30 = vshll.u32 %v6749_v49, 16  ;;  %5711 = vmatprep.mubr.msk.bf16.mxu1 %vm656_vm3, %v5007_v9  ;;  %v2800_v22 = vsel %vm6662_vm6, %v5277_v62, %v2799_v24  ;;  %v2801_v31 = vrot.slane %v2799_v24, 4 }
  0x70   : > { %v493_v56 = vsel %vm6445_vm2, %v488_v18, %v492_v21  ;;  %v518_v32 = vshrl.u32 %v6749_v49, 16  ;;  %v507_v36 = vrot.slane %v505_v28, 4  ;;  %v510_v20 = vrot.slane %v508_v19, 5  ;;  %v5263_v21 = vld [vmem:[%s6416_s15 + $0x48] sm:$0xe] }
  0x71   : > { %v498_v35 = vrot.slane %v497_v27, 4  ;;  %v516_v37 = vrot.slane %v514_v30, 5  ;;  %v2803_v40 = vsel %vm6662_vm6, %v2801_v31, %v2802_v25  ;;  %v524_v38 = vshll.u32 %v209_v6, 16 }
  0x72   : > { %v520_v41 = vrot.slane %v518_v32, 4  ;;  %v5278_v43 = vrot.slane %v5262_v14, 9  ;;  %v5293_v48 = vcombine.low %v2800_v22, %v2803_v40  ;;  %v511_v53 = vor.u32 %v510_v20, %v507_v36  ;;  %v6797_v14 = vld [vmem:[%s6416_s15 + $0xa8] sm:$0xf]  ;;  %v211_v36 = vld [vmem:[%s6416_s15 + $0xb0] sm:$0x1] }
  0x73   : > { %v503_v47 = vsel %vm6445_vm2, %v498_v35, %v502_v54  ;;  %v2806_v55 = vrot.slane %v6545_v7, 5  ;;  %v526_v59 = vrot.slane %v524_v38, 5  ;;  %v2809_v60 = vrot.slane %v6550_v17, 5  ;;  %v5264_v38 = vld [vmem:[%s6416_s15 + $0x54] sm:$0xe] }
  0x74   : > { %v5008_v12 = vcombine.low %v493_v56, %v503_v47  ;;  %v521_v61 = vor.u32 %v520_v41, %v516_v37  ;;  %5866 = vmatmul.mubr.msk.bf16.gmra.mrb[4].mxu0 %vm656_vm3, %v5293_v48  ;;  %v512_v62 = vrot.slane %v511_v53, 4  ;;  %v529_v5 = vshrl.u32 %v6775_v33, 16  ;;  %v6806_v56 = vld [vmem:[%s6416_s15 + $0xac] sm:$0xf] }
  0x75   : > { %v2807_v1 = vsel %vm6662_vm6, %v5278_v43, %v2806_v55  ;;  %v2808_v2 = vrot.slane %v2806_v55, 4  ;;  %v532_v54 = vshll.u32 %v6775_v33, 16  ;;  %v538_v6 = vshll.u32 %v6778_v39, 16 }
  0x76   : > { %5712 = vmatmul.mubr.msk.bf16.gmra.mrb[20].mxu1 %vm656_vm3, %v5008_v12  ;;  %v522_v7 = vrot.slane %v521_v61, 4  ;;  %v542_v17 = vshrl.u32 %v6778_v39, 16  ;;  %v517_v9 = vsel %vm6445_vm2, %v512_v62, %v516_v37  ;;  %v531_v24 = vrot.slane %v529_v5, 4 }
  0x77   : > { %v2810_v18 = vsel %vm6662_vm6, %v2808_v2, %v2809_v60  ;;  %v548_v25 = vshll.u32 %v210_v45, 16  ;;  %v534_v19 = vrot.slane %v532_v54, 5  ;;  %v540_v30 = vrot.slane %v538_v6, 5 }
  0x78   : > { %v527_v27 = vsel %vm6445_vm2, %v522_v7, %v526_v59  ;;  %v5294_v28 = vcombine.low %v2807_v1, %v2810_v18  ;;  %v544_v31 = vrot.slane %v542_v17, 4  ;;  %v5279_v35 = vrot.slane %v5263_v21, 9  ;;  %v6821_v21 = vld [vmem:[%s6416_s15 + $0xb4] sm:$0xf] }
  0x79   : > { %v5009_v22 = vcombine.low %v517_v9, %v527_v27  ;;  %v550_v32 = vrot.slane %v548_v25, 5  ;;  %v535_v20 = vor.u32 %v534_v19, %v531_v24  ;;  %v2813_v37 = vrot.slane %v6568_v58, 5  ;;  %v6830_v9 = vld [vmem:[%s6416_s15 + $0xb8] sm:$0xf]  ;;  %v5265_v19 = vld [vmem:[%s6416_s15 + $0x60] sm:$0xe] }
  0x7a   : > { %5869 = vmatprep.mubr.msk.bf16.mxu0 %vm656_vm3, %v5294_v28  ;;  %v2816_v40 = vrot.slane %v6574_v3, 5  ;;  %v553_v41 = vshrl.u32 %v6797_v14, 16  ;;  %v545_v43 = vor.u32 %v544_v31, %v540_v30  ;;  %v556_v45 = vshll.u32 %v6797_v14, 16  ;;  %v212_v28 = vld [vmem:[%s6416_s15 + $0xbc] sm:$0x1] }
  0x7b   : > { %5715 = vmatprep.mubr.msk.bf16.mxu1 %vm656_vm3, %v5009_v22  ;;  %v562_v47 = vshll.u32 %v6806_v56, 16  ;;  %v566_v48 = vshrl.u32 %v6806_v56, 16  ;;  %v536_v53 = vrot.slane %v535_v20, 4  ;;  %v2814_v55 = vsel %vm6662_vm6, %v5279_v35, %v2813_v37 }
  0x7c   : > { %v2815_v58 = vrot.slane %v2813_v37, 4  ;;  %v555_v3 = vrot.slane %v553_v41, 4  ;;  %v546_v12 = vrot.slane %v545_v43, 4  ;;  %v558_v61 = vrot.slane %v556_v45, 5 }
  0x7d   : > { %v564_v59 = vrot.slane %v562_v47, 5  ;;  %v568_v60 = vrot.slane %v566_v48, 4  ;;  %v541_v62 = vsel %vm6445_vm2, %v536_v53, %v540_v30  ;;  %v572_v2 = vshll.u32 %v211_v36, 16  ;;  %v5202_v53 = vld [vmem:[%s6416_s15 + $0x70] sm:$0xf] }
  0x7e   : > { %v2817_v1 = vsel %vm6662_vm6, %v2815_v58, %v2816_v40  ;;  %v5280_v5 = vrot.slane %v5264_v38, 9  ;;  %v551_v7 = vsel %vm6445_vm2, %v546_v12, %v550_v32  ;;  %v559_v6 = vor.u32 %v558_v61, %v555_v3  ;;  %v5266_v38 = vld [vmem:[%s6416_s15 + $0x6c] sm:$0xe] }
  0x7f   : > { %v5295_v54 = vcombine.low %v2814_v55, %v2817_v1  ;;  %v569_v17 = vor.u32 %v568_v60, %v564_v59  ;;  %v5010_v18 = vcombine.low %v541_v62, %v551_v7  ;;  %v574_v24 = vrot.slane %v572_v2, 5  ;;  %v5203_v55 = vld [vmem:[%s6416_s15 + $0x74] sm:$0x1] }
  0x80   : > { %v2820_v25 = vrot.slane %v6599_v51, 5  ;;  %v2823_v27 = vrot.slane %v6604_v0, 5  ;;  %v560_v30 = vrot.slane %v559_v6, 4  ;;  %v577_v31 = vshrl.u32 %v6821_v21, 16 }
  0x81   : > { %5870 = vmatmul.mubr.msk.bf16.gmra.mrb[8].mxu0 %vm656_vm3, %v5295_v54  ;;  %v570_v22 = vrot.slane %v569_v17, 4  ;;  %v580_v32 = vshll.u32 %v6821_v21, 16  ;;  %5716 = vmatmul.mubr.msk.bf16.gmra.mrb[24].mxu1 %vm656_vm3, %v5010_v18  ;;  %v586_v0 = vshll.u32 %v6830_v9, 16  ;;  %v590_v36 = vshrl.u32 %v6830_v9, 16 }
  0x82   : > { %v2821_v51 = vsel %vm6662_vm6, %v5280_v5, %v2820_v25  ;;  %v2822_v35 = vrot.slane %v2820_v25, 4  ;;  %v565_v20 = vsel %vm6445_vm2, %v560_v30, %v564_v59  ;;  %v579_v40 = vrot.slane %v577_v31, 4  ;;  %v5267_v25 = vld [vmem:[%s6416_s15 + $0x78] sm:$0xe]  ;;  %v6870_v30 = vld [vmem:[%s6416_s15 + $0x4] sm:$0xf] }
  0x83   : > { %v575_v37 = vsel %vm6445_vm2, %v570_v22, %v574_v24  ;;  %v582_v41 = vrot.slane %v580_v32, 5  ;;  %v588_v47 = vrot.slane %v586_v0, 5  ;;  %v592_v48 = vrot.slane %v590_v36, 4  ;;  %v6874_v31 = vld [vmem:[%s6416_s15 + $0x7c] sm:$0xf] }
  0x84   : > { %v5011_v43 = vcombine.low %v565_v20, %v575_v37  ;;  %v2824_v45 = vsel %vm6662_vm6, %v2822_v35, %v2823_v27  ;;  %v596_v12 = vshll.u32 %v212_v28, 16  ;;  %v5281_v61 = vrot.slane %v5265_v19, 9  ;;  %v6320_v19 = vld [vmem:[%s6416_s15] sm:$0xf]  ;;  %v5208_v20 = vld [vmem:[%s6416_s15 + $0x88] sm:$0xf] }
  0x85   : > { %v5296_v58 = vcombine.low %v2821_v51, %v2824_v45  ;;  %v583_v3 = vor.u32 %v582_v41, %v579_v40  ;;  %v593_v59 = vor.u32 %v592_v48, %v588_v47  ;;  %v2827_v60 = vrot.slane %v6630_v46, 5  ;;  %v6877_v32 = vld [vmem:[%s6416_s15 + $0x80] sm:$0x1]  ;;  %v5268_v51 = vld [vmem:[%s6416_s15 + $0x84] sm:$0xe] }
  0x86   : > { %5719 = vmatprep.mubr.msk.bf16.mxu1 %vm656_vm3, %v5011_v43  ;;  %v2830_v62 = vrot.slane %v6638_v63, 5  ;;  %v5282_v1 = vrot.slane %v5266_v38, 9  ;;  %v598_v5 = vrot.slane %v596_v12, 5  ;;  %v2834_v7 = vrot.slane %v5202_v53, 5  ;;  %v5209_v37 = vld [vmem:[%s6416_s15 + $0x8c] sm:$0x1] }
  0x87   : > { %5873 = vmatprep.mubr.msk.bf16.mxu0 %vm656_vm3, %v5296_v58  ;;  %v584_v2 = vrot.slane %v583_v3, 4  ;;  %v2837_v54 = vrot.slane %v5203_v55, 5  ;;  %v594_v6 = vrot.slane %v593_v59, 4  ;;  %v2828_v17 = vsel %vm6662_vm6, %v5281_v61, %v2827_v60  ;;  %v5211_v38 = vld [vmem:[%s6416_s15 + $0x94] sm:$0xf] }
  0x88   : > { %v2829_v18 = vrot.slane %v2827_v60, 4  ;;  %v2835_v63 = vsel %vm6662_vm6, %v5282_v1, %v2834_v7  ;;  %v2836_v24 = vrot.slane %v2834_v7, 4  ;;  %v5030_v22 = vcombine.low %v6320_v19, %v6870_v30  ;;  %v5212_v55 = vld [vmem:[%s6416_s15 + $0x98] sm:$0x1]  ;;  %v5269_v58 = vld [vmem:[%s6416_s15 + $0x90] sm:$0xe] }
  0x89   : > { %v589_v46 = vsel %vm6445_vm2, %v584_v2, %v588_v47  ;;  %v599_v27 = vsel %vm6445_vm2, %v594_v6, %v598_v5  ;;  %v5283_v41 = vrot.slane %v5267_v25, 9  ;;  %v2841_v43 = vrot.slane %v6874_v31, 5  ;;  %v5214_v59 = vld [vmem:[%s6416_s15 + $0xa0] sm:$0xf]  ;;  %v6322_v60 = vld [vmem:[%s6416_s15 + $0xc] sm:$0xf] }
  0x8a   : > { %v2831_v28 = vsel %vm6662_vm6, %v2829_v18, %v2830_v62  ;;  %v5012_v35 = vcombine.low %v589_v46, %v599_v27  ;;  %v2838_v36 = vsel %vm6662_vm6, %v2836_v24, %v2837_v54  ;;  %v2844_v45 = vrot.slane %v6877_v32, 5  ;;  %v6898_v62 = vld [vmem:[%s6416_s15 + $0x10] sm:$0xf]  ;;  %v5215_v7 = vld [vmem:[%s6416_s15 + $0xa4] sm:$0x1] }
  0x8b   : > { %v5297_v0 = vcombine.low %v2828_v17, %v2831_v28  ;;  %v5298_v40 = vcombine.low %v2835_v63, %v2838_v36  ;;  %v5284_v47 = vrot.slane %v5268_v51, 9  ;;  %v2848_v48 = vrot.slane %v5208_v20, 5  ;;  %v5270_v54 = vld [vmem:[%s6416_s15 + $0x9c] sm:$0xe]  ;;  %v6324_v17 = vld [vmem:[%s6416_s15 + $0x18] sm:$0xf] }
  0x8c   : > { %5720 = vmatmul.mubr.msk.bf16.gmra.mrb[28].mxu1 %vm656_vm3, %v5012_v35  ;;  %v2851_v53 = vrot.slane %v5209_v37, 5  ;;  %v2842_v3 = vsel %vm6662_vm6, %v5283_v41, %v2841_v43  ;;  %v2843_v12 = vrot.slane %v2841_v43, 4  ;;  %v2855_v61 = vrot.slane %v5211_v38, 5  ;;  %v6909_v18 = vld [vmem:[%s6416_s15 + $0x1c] sm:$0xf] }
  0x8d   : > { %5874 = vmatmul.mubr.msk.bf16.gmra.mrb[12].mxu0 %vm656_vm3, %v5297_v0  ;;  %5725 = vmatprep.mubr.msk.bf16.mxu1 %vm656_vm3, %v5030_v22  ;;  %v5031_v1 = vcombine.low %v6322_v60, %v6898_v62  ;;  %v2849_v2 = vsel %vm6662_vm6, %v5284_v47, %v2848_v48  ;;  %v2850_v5 = vrot.slane %v2848_v48, 4  ;;  %v5032_v46 = vcombine.low %v6324_v17, %v6909_v18  ;;  %v5217_v0 = vld [vmem:[%s6416_s15 + $0xac] sm:$0xf]  ;;  %v6916_v36 = vld [vmem:[%s6421_s18 + $0x18] sm:$0xff]   ;;  %v5271_v43 = vld [vmem:[%s6416_s15 + $0xa8] sm:$0xe] }
  0x8e   : > { %5877 = vmatprep.mubr.msk.bf16.mxu0 %vm656_vm3, %v5298_v40  ;;  %v2845_v6 = vsel %vm6662_vm6, %v2843_v12, %v2844_v45  ;;  %v5285_v63 = vrot.slane %v5269_v58, 9  ;;  %v2858_v24 = vrot.slane %v5212_v55, 5  ;;  %v2857_v28 = vrot.slane %v2855_v61, 4  ;;  %v5220_v37 = vld [vmem:[%s6416_s15 + $0xb8] sm:$0xf]  ;;  %v6326_v40 = vld [vmem:[%s6421_s18 + $0x10] sm:$0xff]  }
  0x8f   : > { %v5299_v25 = vcombine.low %v2842_v3, %v2845_v6  ;;  %v2852_v27 = vsel %vm6662_vm6, %v2850_v5, %v2851_v53  ;;  %v2862_v19 = vrot.slane %v5214_v59, 5  ;;  %v5286_v51 = vrot.slane %v5270_v54, 9  ;;  %v5218_v53 = vld [vmem:[%s6416_s15 + $0xb0] sm:$0x1]  ;;  %v5221_v58 = vld [vmem:[%s6416_s15 + $0xbc] sm:$0x1] }
  0x90   : > { %v5300_v22 = vcombine.low %v2849_v2, %v2852_v27  ;;  %v2865_v35 = vrot.slane %v5215_v7, 5  ;;  %v2856_v41 = vsel %vm6662_vm6, %v5285_v63, %v2855_v61  ;;  %v2859_v38 = vsel %vm6662_vm6, %v2857_v28, %v2858_v24  ;;  %v5272_v3 = vld [vmem:[%s6416_s15 + $0xb4] sm:$0xe]  ;;  %v6327_v12 = vld [vmem:[%s6416_s15 + $0x24] sm:$0xf] }
  0x91   : > { %v2864_v20 = vrot.slane %v2862_v19, 4  ;;  %v2869_v45 = vrot.slane %v5217_v0, 5  ;;  %v2863_v47 = vsel %vm6662_vm6, %v5286_v51, %v2862_v19  ;;  %v2876_v55 = vrot.slane %v5220_v37, 5  ;;  %v6939_v61 = vld [vmem:[%s6416_s15 + $0x28] sm:$0xf] }
  0x92   : > { %v5033_v59 = vcombine.low %v6327_v12, %v6939_v61  ;;  %v5301_v60 = vcombine.low %v2856_v41, %v2859_v38  ;;  %v6329_v2 = vld [vmem:[%s6416_s15 + $0x30] sm:$0xf]  ;;  %v6944_v5 = vld [vmem:[%s6416_s15 + $0x34] sm:$0xf]  ;;  %v2872_v17 = vrot.slane %v5218_v53, 5  ;;  %v2879_v24 = vrot.slane %v5221_v58, 5 }
  0x93   : > { %v2866_v48 = vsel %vm6662_vm6, %v2864_v20, %v2865_v35  ;;  %v5034_v7 = vcombine.low %v6329_v2, %v6944_v5  ;;  %v2871_v6 = vrot.slane %v2869_v45, 4  ;;  %v2878_v63 = vrot.slane %v2876_v55, 4  ;;  %v5224_v35 = vld [vmem:[%s6416_s15 + $0xc8] sm:$0x1]  ;;  %v5273_v0 = vld [vmem:[%s6416_s15 + $0xc0] sm:$0xe] }
  0x94   : > { %5726 = vmatmul.mubr.msk.bf16.vlgmr.msra.gmra.mrb[0].mxu1 %vm656_vm3, %v5031_v1  ;;  %v5287_v1 = vrot.slane %v5271_v43, 9  ;;  %v5302_v54 = vcombine.low %v2863_v47, %v2866_v48  ;;  %v6331_v20 = vld [vmem:[%s6416_s15 + $0x3c] sm:$0xf]  ;;  %v6964_v37 = vld [vmem:[%s6416_s15 + $0x40] sm:$0xf]  ;;  %v5036_v38 = vcombine.low %v6579_v13, %v6585_v29  ;;  %v2886_v48 = vrot.slane %v5224_v35, 5 }
  0x95   : > { %5878 = vmatmul.mubr.msk.bf16.gmra.mrb[16].mxu0 %vm656_vm3, %v5299_v25  ;;  %5758 = vmatpush3.bf16.msra.mxu1 %v6326_v40  ;;  %v5223_v25 = vld [vmem:[%s6416_s15 + $0xc4] sm:$0xf]  ;;  %v2873_v28 = vsel %vm6662_vm6, %v2871_v6, %v2872_v17  ;;  %v2880_v51 = vsel %vm6662_vm6, %v2878_v63, %v2879_v24  ;;  %v5035_v40 = vcombine.low %v6331_v20, %v6964_v37  ;;  %v2257_v29 = vshll.u32 %v6874_v31, 16  ;;  %v1162_v2 = vld [vmem:[%s6416_s15 + $0xc] sm:$0xe] }
  0x96   : > { %5729 = vmatprep.mubr.msk.bf16.mxu1 %vm656_vm3, %v5032_v46  ;;  %5881 = vmatprep.mubr.msk.bf16.mxu0 %vm656_vm3, %v5300_v22  ;;  %v5288_v46 = vrot.slane %v5272_v3, 9  ;;  %v2870_v27 = vsel %vm6662_vm6, %v5287_v1, %v2869_v45  ;;  %v2883_v19 = vrot.slane %v5223_v25, 5  ;;  %v5289_v45 = vrot.slane %v5273_v0, 9  ;;  %v1161_v1 = vld [vmem:[%s6416_s15] sm:$0xe]  ;;  %v6283_v0 = vld [vmem:[%s6416_s15 + $0x30] sm:$0xff]  }
  0x97   : > { %5791 = vmatprep.subr.bf16.mxu1 %v6916_v36  ;;  %v5303_v41 = vcombine.low %v2870_v27, %v2873_v28  ;;  %v5037_v58 = vcombine.low %v6612_v8, %v6615_v16  ;;  %v5038_v12 = vcombine.low %v6642_v4, %v6645_v11  ;;  %v6333_v8 = vld [vmem:[%s6416_s15 + $0x8] sm:$0x1]  ;;  %v6334_v4 = vld [vmem:[%s6416_s15 + $0x14] sm:$0x1]  ;;  %v5064_v17 = vrot.slane %v1162_v2, 9 }
  0x98   : > { %v2877_v22 = vsel %vm6662_vm6, %v5288_v46, %v2876_v55  ;;  %v2885_v47 = vrot.slane %v2883_v19, 4  ;;  %v2884_v53 = vsel %vm6662_vm6, %v5289_v45, %v2883_v19  ;;  %v2261_v55 = vshrl.u32 %v6874_v31, 16  ;;  %v1164_v63 = vld [vmem:[%s6416_s15 + $0x24] sm:$0xe] }
  0x99   : > { %v5304_v43 = vcombine.low %v2877_v22, %v2880_v51  ;;  %v1217_v16 = vrot.slane %v6333_v8, 5  ;;  %v1224_v11 = vrot.slane %v6334_v4, 5  ;;  %v2267_v31 = vshll.u32 %v6877_v32, 16  ;;  %v6281_v19 = vld [vmem:[%s6416_s15 + $0x24] sm:$0xff]   ;;  %v1165_v32 = vld [vmem:[%s6416_s15 + $0x30] sm:$0xe] }
  0x9a   : > { %v2887_v13 = vsel %vm6662_vm6, %v2885_v47, %v2886_v48  ;;  %v6990_v6 = vrot.slane %v2261_v55, 4  ;;  %v1228_v25 = vrot.slane %v6909_v18, 5  ;;  %v5039_v28 = vcombine.low %v6667_v52, %v6679_v15  ;;  %v6336_v48 = vld [vmem:[%s6416_s15 + $0x2c] sm:$0x1]  ;;  %v6337_v55 = vld [vmem:[%s6416_s15 + $0x38] sm:$0x1] }
  0x9b   : > { %v5305_v3 = vcombine.low %v2884_v53, %v2887_v13  ;;  %v1235_v22 = vrot.slane %v6939_v61, 5  ;;  %v1242_v51 = vrot.slane %v6944_v5, 5  ;;  %v5040_v35 = vcombine.low %v6696_v57, %v6707_v44  ;;  %v6335_v5 = vld [vmem:[%s6416_s15 + $0x20] sm:$0x1] }
  0x9c   : > { %5730 = vmatmul.mubr.msk.bf16.gmra.mrb[4].mxu1 %vm656_vm3, %v5033_v59  ;;  %v6278_v59 = vld [vmem:[%s6416_s15 + $0x18] sm:$0xff]   ;;  %v5041_v18 = vcombine.low %v6719_v26, %v6725_v10  ;;  %v5042_v20 = vcombine.low %v6746_v42, %v6749_v49  ;;  %v1249_v52 = vrot.slane %v6964_v37, 5  ;;  %v5066_v57 = vrot.slane %v1164_v63, 9  ;;  %v7025_v44 = vld [vmem:[%s6421_s18 + $0x40] sm:$0xff]   ;;  %v6287_v63 = vld [vmem:[%s6416_s15 + $0x48] sm:$0xff]  }
  0x9d   : > { %5882 = vmatmul.mubr.msk.bf16.gmra.mrb[20].mxu0 %vm656_vm3, %v5301_v60  ;;  %5733 = vmatprep.mubr.msk.bf16.mxu1 %vm656_vm3, %v5034_v7  ;;  %v1221_v60 = vrot.slane %v6898_v62, 5  ;;  %v1214_v7 = vrot.slane %v6870_v30, 5  ;;  %v1163_v30 = vld [vmem:[%s6416_s15 + $0x18] sm:$0xe]  ;;  %v5063_v62 = vrot.slane %v1161_v1, 9  ;;  %v1230_v45 = vrot.slane %v1228_v25, 4 }
  0x9e   : > { %5885 = vmatprep.mubr.msk.bf16.mxu0 %vm656_vm3, %v5302_v54  ;;  %v6988_v54 = vrot.slane %v2257_v29, 5  ;;  %v5065_v61 = vrot.slane %v1163_v30, 9  ;;  %v1237_v47 = vrot.slane %v1235_v22, 4  ;;  %v1238_v53 = vrot.slane %v6336_v48, 5  ;;  %v1167_v1 = vld [vmem:[%s6416_s15 + $0x48] sm:$0xe] }
  0x9f   : > { %v1223_v46 = vrot.slane %v1221_v60, 4  ;;  %v1216_v24 = vrot.slane %v1214_v7, 4  ;;  %v7021_v15 = vsel %vm6662_vm6, %v5063_v62, %v1214_v7  ;;  %v5067_v13 = vrot.slane %v1165_v32, 9  ;;  %v6285_v4 = vld [vmem:[%s6416_s15 + $0x3c] sm:$0xff]   ;;  %v6339_v62 = vld [vmem:[%s6416_s15 + $0x4c] sm:$0xf] }
  0xa0   : > { %8184 = vst [vmem:[#allocation2_spill] sm:$0xff] %v6988_v54  ;;  %v1244_v29 = vrot.slane %v1242_v51, 4  ;;  %v7047_v2 = vrot.slane %v2267_v31, 5  ;;  %v5044_v7 = vcombine.low %v6797_v14, %v6806_v56  ;;  %v5045_v8 = vcombine.low %v6821_v21, %v6830_v9  ;;  %v1168_v32 = vld [vmem:[%s6416_s15 + $0x54] sm:$0xe] }
  0xa1   : > { %v7037_v37 = vsel %vm6662_vm6, %v1223_v46, %v1224_v11  ;;  %v7065_v31 = vsel %vm6662_vm6, %v5065_v61, %v1228_v25  ;;  %v5389_v46 = vld [vmem:[%s6416_s15 + $0x1c] sm:$0xf]  ;;  %v5069_v25 = vrot.slane %v1167_v1, 9  ;;  %v5394_v1 = vld [vmem:[%s6416_s15 + $0x30] sm:$0xf] }
  0xa2   : > { %8185 = vst [vmem:[#allocation3_spill] sm:$0xff] %v7047_v2  ;;  %v6342_v10 = vld [vmem:[%s6416_s15 + $0x5c] sm:$0x1]  ;;  %v1170_v26 = vld [vmem:[%s6416_s15 + $0x6c] sm:$0xe] }
  0xa3   : > { %v7323_v14 = vld [vmem:[%s6416_s15 + $0x5c] sm:$0x1] }
  0xa4   : > { %5734 = vmatmul.mubr.msk.bf16.gmra.mrb[8].mxu1 %vm656_vm3, %v5035_v40  ;;  %v1166_v40 = vld [vmem:[%s6416_s15 + $0x3c] sm:$0xe]  ;;  %8193 = vst [vmem:[#allocation9_spill] sm:$0xff] %v7323_v14 }
  0xa5   : > { %5886 = vmatmul.mubr.msk.bf16.gmra.mrb[24].mxu0 %vm656_vm3, %v5303_v41  ;;  %5737 = vmatprep.mubr.msk.bf16.mxu1 %vm656_vm3, %v5036_v38  ;;  %v1231_v41 = vrot.slane %v6335_v5, 5  ;;  %v7029_v38 = vsel %vm6662_vm6, %v1216_v24, %v1217_v16  ;;  %v5388_v16 = vld [vmem:[%s6416_s15 + $0x18] sm:$0xf] }
  0xa6   : > { %5889 = vmatprep.mubr.msk.bf16.mxu0 %vm656_vm3, %v5304_v43  ;;  %v7033_v43 = vsel %vm6662_vm6, %v5064_v17, %v1221_v60  ;;  %v5079_v11 = vcombine.low %v7021_v15, %v7029_v38  ;;  %v1256_v17 = vrot.slane %v6339_v62, 5  ;;  %v3596_v61 = vshrl.u32 %v5388_v16, 16  ;;  %v6296_v15 = vld [vmem:[%s6416_s15 + $0x84] sm:$0xff]   ;;  %v6352_v38 = vld [vmem:[%s6416_s15 + $0x94] sm:$0xf] }
  0xa7   : > { %v7072_v24 = vsel %vm6662_vm6, %v1230_v45, %v1231_v41  ;;  %v3599_v5 = vshll.u32 %v5388_v16, 16  ;;  %v3605_v41 = vshll.u32 %v5389_v46, 16  ;;  %v5391_v45 = vld [vmem:[%s6416_s15 + $0x24] sm:$0xf] }
  0xa8   : > { %v1258_v48 = vrot.slane %v1256_v17, 4 }
  0xa9   : > { %v3601_v42 = vrot.slane %v3599_v5, 5  ;;  %v7134_v49 = vrot.slane %v3605_v41, 5 }
  0xac   : > { %5738 = vmatmul.mubr.msk.bf16.gmra.mrb[12].mxu1 %vm656_vm3, %v5037_v58  ;;  %v1245_v58 = vrot.slane %v6337_v55, 5  ;;  %v5390_v55 = vld [vmem:[%s6416_s15 + $0x20] sm:$0x1] }
  0xad   : > { %5890 = vmatmul.mubr.msk.bf16.gmra.mrb[28].mxu0 %vm656_vm3, %v5305_v3  ;;  %5741 = vmatprep.mubr.msk.bf16.mxu1 %vm656_vm3, %v5038_v12  ;;  %v5068_v3 = vrot.slane %v1166_v40, 9  ;;  %v1251_v12 = vrot.slane %v1249_v52, 4  ;;  %v7100_v40 = vld [vmem:[%s6416_s15 + $0x60] sm:$0xe] }
  0xae   : > { %5895 = vmatprep.mubr.msk.bf16.mxu0 %vm656_vm3, %v6278_v59  ;;  %v6338_v59 = vld [vmem:[%s6416_s15 + $0x44] sm:$0x1]  ;;  %v5071_v16 = vrot.slane %v7100_v40, 9 }
  0xaf   : > { %v1252_v60 = vrot.slane %v6338_v59, 5  ;;  %v7120_v59 = vsel %vm6662_vm6, %v5069_v25, %v1256_v17  ;;  %v5395_v17 = vld [vmem:[%s6416_s15 + $0x34] sm:$0xf] }
  0xb4   : > { %5742 = vmatmul.mubr.msk.bf16.gmra.mrb[16].mxu1 %vm656_vm3, %v5039_v28  ;;  %v7076_v28 = vsel %vm6662_vm6, %v5066_v57, %v1235_v22  ;;  %v7093_v22 = vsel %vm6662_vm6, %v5068_v3, %v1249_v52  ;;  %v3609_v57 = vshrl.u32 %v5389_v46, 16  ;;  %v3598_v46 = vrot.slane %v3596_v61, 4 }
  0xb5   : > { %5896 = vmatmul.mubr.msk.bf16.vlgmr.msra.gmra.mrb[0].mxu0 %vm656_vm3, %v6281_v19  ;;  %5745 = vmatprep.mubr.msk.bf16.mxu1 %vm656_vm3, %v5040_v35  ;;  %v7080_v19 = vsel %vm6662_vm6, %v5067_v13, %v1242_v51  ;;  %v7085_v35 = vsel %vm6662_vm6, %v1237_v47, %v1238_v53  ;;  %v7097_v51 = vsel %vm6662_vm6, %v1251_v12, %v1252_v60  ;;  %v6340_v53 = vld [vmem:[%s6416_s15 + $0x50] sm:$0x1]  ;;  %v6341_v13 = vld [vmem:[%s6416_s15 + $0x58] sm:$0xf]  ;;  %v5070_v60 = vrot.slane %v1168_v32, 9 }
  0xb6   : > { %5928 = vmatpush3.bf16.msra.mxu0 %v6733_v34  ;;  %5899 = vmatprep.mubr.msk.bf16.mxu0 %vm656_vm3, %v6283_v0  ;;  %v5043_v34 = vcombine.low %v6775_v33, %v6778_v39  ;;  %v7089_v0 = vsel %vm6662_vm6, %v1244_v29, %v1245_v58  ;;  %v1259_v52 = vrot.slane %v6340_v53, 5  ;;  %v1263_v29 = vrot.slane %v6341_v13, 5  ;;  %v5392_v58 = vld [vmem:[%s6416_s15 + $0x28] sm:$0xf]  ;;  %v6289_v13 = vld [vmem:[%s6416_s15 + $0x54] sm:$0xff]  }
  0xb7   : > { %5961 = vmatprep.subr.bf16.mxu0 %v7025_v44  ;;  %v3620_v32 = vshrl.u32 %v5391_v45, 16  ;;  %v3623_v53 = vshll.u32 %v5391_v45, 16  ;;  %v3615_v61 = vshll.u32 %v5390_v55, 16  ;;  %v3633_v5 = vshrl.u32 %v5392_v58, 16  ;;  %v6345_v55 = vld [vmem:[%s6416_s15 + $0x68] sm:$0x1] }
  0xb8   : > { %v1265_v25 = vrot.slane %v1263_v29, 4  ;;  %v7144_v40 = vsel %vm6662_vm6, %v5070_v60, %v1263_v29  ;;  %v3602_v12 = vor.u32 %v3601_v42, %v3598_v46  ;;  %v3653_v3 = vshll.u32 %v5395_v17, 16  ;;  %v5393_v46 = vld [vmem:[%s6416_s15 + $0x2c] sm:$0x1]  ;;  %v6346_v39 = vld [vmem:[%s6416_s15 + $0x74] sm:$0x1] }
  0xb9   : > { %v3657_v47 = vshrl.u32 %v5395_v17, 16  ;;  %v3622_v60 = vrot.slane %v3620_v32, 4  ;;  %v3625_v30 = vrot.slane %v3623_v53, 5  ;;  %v5072_v17 = vrot.slane %v1170_v26, 9 }
  0xba   : > { %v3603_v32 = vrot.slane %v3602_v12, 4 }
  0xbc   : > { %5746 = vmatmul.mubr.msk.bf16.gmra.mrb[20].mxu1 %vm656_vm3, %v5041_v18  ;;  %v1266_v18 = vrot.slane %v6342_v10, 5  ;;  %v6291_v10 = vld [vmem:[%s6416_s15 + $0x60] sm:$0xff]  }
  0xbd   : > { %5900 = vmatmul.mubr.msk.bf16.gmra.mrb[4].mxu0 %vm656_vm3, %v6285_v4  ;;  %5749 = vmatprep.mubr.msk.bf16.mxu1 %vm656_vm3, %v5042_v20  ;;  %v6343_v4 = vld [vmem:[%s6416_s15 + $0x64] sm:$0xf]  ;;  %v3611_v20 = vrot.slane %v3609_v57, 4  ;;  %v6344_v57 = vld [vmem:[%s6416_s15 + $0x70] sm:$0xf] }
  0xbe   : > { %5903 = vmatprep.mubr.msk.bf16.mxu0 %vm656_vm3, %v6287_v63  ;;  %v1270_v62 = vrot.slane %v6343_v4, 5  ;;  %v7138_v63 = vsel %vm6662_vm6, %v1258_v48, %v1259_v52  ;;  %v3629_v4 = vshll.u32 %v5392_v58, 16  ;;  %v1277_v27 = vrot.slane %v6344_v57, 5 }
  0xbf   : > { %v3644_v48 = vshrl.u32 %v5394_v1, 16  ;;  %v3647_v52 = vshll.u32 %v5394_v1, 16  ;;  %v3612_v45 = vor.u32 %v3611_v20, %v7134_v49  ;;  %v7151_v29 = vsel %vm6662_vm6, %v1265_v25, %v1266_v18  ;;  %v5396_v20 = vld [vmem:[%s6416_s15 + $0x38] sm:$0x1] }
  0xc0   : > { %v1272_v41 = vrot.slane %v1270_v62, 4  ;;  %v1273_v58 = vrot.slane %v6345_v55, 5  ;;  %v7159_v1 = vrot.slane %v3615_v61, 5  ;;  %v7162_v42 = vrot.slane %v3629_v4, 5 }
  0xc1   : > { %v3635_v18 = vrot.slane %v3633_v5, 4  ;;  %v1279_v33 = vrot.slane %v1277_v27, 4  ;;  %v3646_v25 = vrot.slane %v3644_v48, 4  ;;  %v3649_v26 = vrot.slane %v3647_v52, 5  ;;  %v6293_v5 = vld [vmem:[%s6416_s15 + $0x6c] sm:$0xff]  }
  0xc2   : > { %v3613_v53 = vrot.slane %v3612_v45, 4  ;;  %v3659_v61 = vrot.slane %v3657_v47, 4  ;;  %v3639_v4 = vshll.u32 %v5393_v46, 16  ;;  %v6347_v47 = vld [vmem:[%s6416_s15 + $0x7c] sm:$0xf]  ;;  %v3663_v52 = vshll.u32 %v5396_v20, 16 }
  0xc3   : > { %v3636_v12 = vor.u32 %v3635_v18, %v7162_v42  ;;  %v1284_v48 = vrot.slane %v6347_v47, 5  ;;  %v6295_v45 = vld [vmem:[%s6416_s15 + $0x78] sm:$0xff]   ;;  %v3650_v55 = vor.u32 %v3649_v26, %v3646_v25  ;;  %v3608_v46 = vsel %vm6445_vm2, %v3603_v32, %v7134_v49  ;;  %v6349_v25 = vld [vmem:[%s6416_s15 + $0x80] sm:$0x1] }
  0xc4   : > { %5750 = vmatmul.mubr.msk.bf16.gmra.mrb[24].mxu1 %vm656_vm3, %v5043_v34  ;;  %v1280_v34 = vrot.slane %v6346_v39, 5  ;;  %v3618_v18 = vsel %vm6445_vm2, %v3613_v53, %v7159_v1  ;;  %v1287_v26 = vrot.slane %v6349_v25, 5  ;;  %v3665_v32 = vrot.slane %v3663_v52, 5  ;;  %v7263_v25 = vld [vmem:[%s6416_s15 + $0x58] sm:$0xf] }
  0xc5   : > { %5904 = vmatmul.mubr.msk.bf16.gmra.mrb[8].mxu0 %vm656_vm3, %v6289_v13  ;;  %5753 = vmatprep.mubr.msk.bf16.mxu1 %vm656_vm3, %v5044_v7  ;;  %v7171_v13 = vrot.slane %v3653_v3, 5  ;;  %v7177_v7 = vsel %vm6662_vm6, %v5071_v16, %v1270_v62  ;;  %v1171_v3 = vld [vmem:[%s6416_s15 + $0x78] sm:$0xe]  ;;  %v7188_v16 = vsel %vm6662_vm6, %v1272_v41, %v1273_v58  ;;  %v6348_v58 = vld [vmem:[%s6416_s15 + $0x88] sm:$0xf]  ;;  %v3637_v49 = vrot.slane %v3636_v12, 4 }
  0xc6   : > { %5907 = vmatprep.mubr.msk.bf16.mxu0 %vm656_vm3, %v6291_v10  ;;  %v3626_v10 = vor.u32 %v3625_v30, %v3622_v60  ;;  %v7192_v30 = vsel %vm6662_vm6, %v5072_v17, %v1277_v27  ;;  %v7196_v62 = vsel %vm6662_vm6, %v1279_v33, %v1280_v34  ;;  %v1172_v60 = vld [vmem:[%s6416_s15 + $0x84] sm:$0xe]  ;;  %v1291_v39 = vrot.slane %v6348_v58, 5  ;;  %v5397_v27 = vld [vmem:[%s6416_s15 + $0x3c] sm:$0xf]  ;;  %8188 = vst [vmem:[#allocation6_spill] sm:$0xff] %v7263_v25 }
  0xc7   : > { %v3660_v41 = vor.u32 %v3659_v61, %v7171_v13  ;;  %v7209_v17 = vld [vmem:[%s6416_s15 + $0x40] sm:$0xf]  ;;  %v3641_v33 = vrot.slane %v3639_v4, 5  ;;  %v5073_v34 = vrot.slane %v1171_v3, 9  ;;  %v1286_v1 = vrot.slane %v1284_v48, 4 }
  0xc8   : > { %8186 = vst [vmem:[#allocation4_spill] sm:$0xff] %v7209_v17  ;;  %v3627_v20 = vrot.slane %v3626_v10, 4  ;;  %v5074_v53 = vrot.slane %v1172_v60, 9  ;;  %v3651_v61 = vrot.slane %v3650_v55, 4  ;;  %v3668_v10 = vshrl.u32 %v5397_v27, 16 }
  0xc9   : > { %v3671_v21 = vshll.u32 %v5397_v27, 16  ;;  %v3661_v4 = vrot.slane %v3660_v41, 4  ;;  %v6350_v12 = vld [vmem:[%s6416_s15 + $0x8c] sm:$0x1]  ;;  %v3681_v47 = vshrl.u32 %v7209_v17, 16  ;;  %v3642_v41 = vsel %vm6445_vm2, %v3637_v49, %v3641_v33 }
  0xca   : > { %v1294_v3 = vrot.slane %v6350_v12, 5  ;;  %v7237_v55 = vld [vmem:[%s6416_s15 + $0x44] sm:$0x1]  ;;  %v3632_v60 = vsel %vm6445_vm2, %v3627_v20, %v7162_v42  ;;  %v7254_v58 = vld [vmem:[%s6416_s15 + $0x4c] sm:$0xf]  ;;  %v3656_v42 = vsel %vm6445_vm2, %v3651_v61, %v7171_v13  ;;  %v3670_v20 = vrot.slane %v3668_v10, 4 }
  0xcb   : > { %8187 = vst [vmem:[#allocation5_spill] sm:$0xff] %v7237_v55  ;;  %v5403_v27 = vld [vmem:[%s6416_s15 + $0x54] sm:$0xf]  ;;  %v3666_v49 = vsel %vm6445_vm2, %v3661_v4, %v3665_v32  ;;  %v1173_v12 = vld [vmem:[%s6416_s15 + $0x90] sm:$0xe]  ;;  %v3701_v61 = vshll.u32 %v7254_v58, 16 }
  0xcc   : > { %5754 = vmatmul.mubr.msk.bf16.gmra.mrb[28].mxu1 %vm656_vm3, %v5045_v8  ;;  %v3677_v8 = vshll.u32 %v7209_v17, 16  ;;  %v3705_v10 = vshrl.u32 %v7254_v58, 16  ;;  %v3716_v32 = vshrl.u32 %v5403_v27, 16  ;;  %v3725_v4 = vshll.u32 %v7263_v25, 16 }
  0xcd   : > { %5908 = vmatmul.mubr.msk.bf16.gmra.mrb[12].mxu0 %vm656_vm3, %v6293_v5  ;;  %5759 = vmatprep.mubr.msk.bf16.mxu1 %vm656_vm3, %v5079_v11  ;;  %v1293_v5 = vrot.slane %v1291_v39, 4  ;;  %v7228_v11 = vcombine.low %v3608_v46, %v3618_v18  ;;  %v7246_v46 = vsel %vm6662_vm6, %v1286_v1, %v1287_v26  ;;  %v7250_v18 = vsel %vm6662_vm6, %v5074_v53, %v1291_v39  ;;  %v6297_v26 = vld [vmem:[%s6416_s15 + $0x90] sm:$0xff]  }
  0xce   : > { %5911 = vmatprep.mubr.msk.bf16.mxu0 %vm656_vm3, %v6295_v45  ;;  %v7234_v45 = vsel %vm6662_vm6, %v5073_v34, %v1284_v48  ;;  %v5400_v48 = vld [vmem:[%s6416_s15 + $0x48] sm:$0xf]  ;;  %v3673_v34 = vrot.slane %v3671_v21, 5  ;;  %v7260_v33 = vrot.slane %v3677_v8, 5  ;;  %v3683_v1 = vrot.slane %v3681_v47, 4 }
  0xcf   : > { %v7270_v39 = vsel %vm6662_vm6, %v1293_v5, %v1294_v3  ;;  %v3687_v53 = vshll.u32 %v7237_v55, 16  ;;  %v3692_v52 = vshrl.u32 %v5400_v48, 16  ;;  %v3695_v13 = vshll.u32 %v5400_v48, 16 }
  0xd0   : > { %v8189_v21 = vcombine.low %v7033_v43, %v7037_v37  ;;  %v3719_v8 = vshll.u32 %v5403_v27, 16  ;;  %v3729_v5 = vshrl.u32 %v7263_v25, 16  ;;  %v8190_v3 = vcombine.low %v7065_v31, %v7072_v24  ;;  %v7305_v27 = vld [vmem:[%s6421_s18 + $0x20] sm:$0xff]   ;;  %v5409_v25 = vld [vmem:[%s6416_s15 + $0x6c] sm:$0xf] }
  0xd1   : > { %v7288_v43 = vcombine.low %v3632_v60, %v3642_v41  ;;  %v3674_v47 = vor.u32 %v3673_v34, %v3670_v20  ;;  %v7293_v48 = vcombine.low %v3656_v42, %v3666_v49  ;;  %v3684_v31 = vor.u32 %v3683_v1, %v7260_v33  ;;  %v7301_v60 = vld [vmem:[%s6416_s15 + $0x50] sm:$0x1]  ;;  %v5406_v41 = vld [vmem:[%s6416_s15 + $0x60] sm:$0xf]  ;;  %8191 = vst [vmem:[#allocation7_spill] sm:$0xff] %v7305_v27 }
  0xd2   : > { %v7298_v24 = vrot.slane %v3687_v53, 5  ;;  %v3694_v20 = vrot.slane %v3692_v52, 4  ;;  %v3697_v34 = vrot.slane %v3695_v13, 5  ;;  %v7308_v42 = vrot.slane %v3701_v61, 5  ;;  %v7311_v49 = vld [vmem:[%s6416_s15 + $0x64] sm:$0xf] }
  0xd3   : > { %8192 = vst [vmem:[#allocation8_spill] sm:$0xff] %v7311_v49  ;;  %v6298_v1 = vld [vmem:[%s6416_s15 + $0x9c] sm:$0xff]   ;;  %v6299_v53 = vld [vmem:[%s6416_s15 + $0xa8] sm:$0xff]   ;;  %v7317_v37 = vrot.slane %v3674_v47, 4  ;;  %v1298_v52 = vrot.slane %v6352_v38, 5  ;;  %v3711_v61 = vshll.u32 %v7301_v60, 16 }
  0xd4   : > { %5760 = vmatmul.mubr.msk.bf16.vlgmr.msra.gmra.mrb[0].mxu1 %vm656_vm3, %v8189_v21  ;;  %v3721_v21 = vrot.slane %v3719_v8, 5  ;;  %v6353_v13 = vld [vmem:[%s6416_s15 + $0x98] sm:$0x1]  ;;  %v3740_v55 = vshrl.u32 %v5406_v41, 16  ;;  %v3743_v17 = vshll.u32 %v5406_v41, 16  ;;  %v3753_v8 = vshrl.u32 %v7311_v49, 16 }
  0xd5   : > { %5912 = vmatmul.mubr.msk.bf16.gmra.mrb[16].mxu0 %vm656_vm3, %v6296_v15  ;;  %5792 = vmatpush3.bf16.msra.mxu1 %v6916_v36  ;;  %v5075_v15 = vrot.slane %v1173_v12, 9  ;;  %v3718_v12 = vrot.slane %v3716_v32, 4  ;;  %v3731_v36 = vrot.slane %v3729_v5, 4  ;;  %v1301_v57 = vrot.slane %v6353_v13, 5  ;;  %v6354_v38 = vld [vmem:[%s6416_s15 + $0xa0] sm:$0xf] }
  0xd6   : > { %5763 = vmatprep.mubr.msk.bf16.mxu1 %vm656_vm3, %v8190_v3  ;;  %5915 = vmatprep.mubr.msk.bf16.mxu0 %vm656_vm3, %v6297_v26  ;;  %v3707_v26 = vrot.slane %v3705_v10, 4  ;;  %v7315_v3 = vrot.slane %v3725_v4, 5  ;;  %v1174_v10 = vld [vmem:[%s6416_s15 + $0x9c] sm:$0xe]  ;;  %v3749_v32 = vshll.u32 %v7311_v49, 16  ;;  %v7328_v4 = vrot.slane %v3684_v31, 4 }
  0xd7   : > { %5995 = vmatprep.subr.bf16.mxu1 %v7305_v27  ;;  %v3698_v5 = vor.u32 %v3697_v34, %v3694_v20  ;;  %v1305_v27 = vrot.slane %v6354_v38, 5  ;;  %v8194_v13 = vcombine.low %v7076_v28, %v7085_v35  ;;  %v7339_v41 = vsel %vm6662_vm6, %v5075_v15, %v1298_v52  ;;  %v1175_v15 = vld [vmem:[%s6416_s15 + $0xa8] sm:$0xe] }
  0xd8   : > { %v3708_v47 = vor.u32 %v3707_v26, %v7308_v42  ;;  %v3722_v2 = vor.u32 %v3721_v21, %v3718_v12  ;;  %v3732_v31 = vor.u32 %v3731_v36, %v7315_v3  ;;  %v3735_v20 = vshll.u32 %v7323_v14, 16 }
  0xd9   : > { %v8195_v34 = vcombine.low %v7080_v19, %v7089_v0  ;;  %v1300_v28 = vrot.slane %v1298_v52, 4  ;;  %v3713_v35 = vrot.slane %v3711_v61, 5  ;;  %v5076_v26 = vrot.slane %v1174_v10, 9  ;;  %v6300_v52 = vld [vmem:[%s6416_s15 + $0xb4] sm:$0xff]  }
  0xda   : > { %v3742_v36 = vrot.slane %v3740_v55, 4  ;;  %v3745_v12 = vrot.slane %v3743_v17, 5  ;;  %v7350_v21 = vrot.slane %v3749_v32, 5  ;;  %v3755_v38 = vrot.slane %v3753_v8, 4  ;;  %v6301_v55 = vld [vmem:[%s6416_s15 + $0xc0] sm:$0xff]  }
  0xdb   : > { %v3699_v19 = vrot.slane %v3698_v5, 4  ;;  %v3709_v0 = vrot.slane %v3708_v47, 4  ;;  %v3723_v61 = vrot.slane %v3722_v2, 4  ;;  %v3733_v10 = vrot.slane %v3732_v31, 4  ;;  %v6356_v5 = vld [vmem:[%s6416_s15 + $0xb0] sm:$0x1] }
  0xdc   : > { %5764 = vmatmul.mubr.msk.bf16.gmra.mrb[4].mxu1 %vm656_vm3, %v8194_v13  ;;  %v1307_v13 = vrot.slane %v1305_v27, 4  ;;  %v5077_v14 = vrot.slane %v1175_v15, 9  ;;  %v3680_v17 = vsel %vm6445_vm2, %v7317_v37, %v7260_v33  ;;  %v3690_v32 = vsel %vm6445_vm2, %v7328_v4, %v7298_v24 }
  0xdd   : > { %5916 = vmatmul.mubr.msk.bf16.gmra.mrb[20].mxu0 %vm656_vm3, %v6298_v1  ;;  %5767 = vmatprep.mubr.msk.bf16.mxu1 %vm656_vm3, %v8195_v34  ;;  %v1312_v1 = vrot.slane %v6806_v56, 5  ;;  %v6355_v34 = vld [vmem:[%s6416_s15 + $0xa4] sm:$0x1]  ;;  %v3737_v56 = vrot.slane %v3735_v20, 5  ;;  %v1315_v47 = vrot.slane %v6356_v5, 5  ;;  %v7369_v2 = vsel %vm6662_vm6, %v1300_v28, %v1301_v57 }
  0xde   : > { %5919 = vmatprep.mubr.msk.bf16.mxu0 %vm656_vm3, %v6299_v53  ;;  %v1308_v49 = vrot.slane %v6355_v34, 5  ;;  %v7354_v53 = vld [vmem:[%s6416_s15 + $0x68] sm:$0x1]  ;;  %v3746_v31 = vor.u32 %v3745_v12, %v3742_v36  ;;  %v3756_v20 = vor.u32 %v3755_v38, %v7350_v21  ;;  %v1176_v34 = vld [vmem:[%s6416_s15 + $0xb4] sm:$0xe]  ;;  %v3704_v33 = vsel %vm6445_vm2, %v3699_v19, %v7308_v42 }
  0xdf   : > { %v1314_v8 = vrot.slane %v1312_v1, 4  ;;  %v3759_v15 = vshll.u32 %v7354_v53, 16  ;;  %v3714_v37 = vsel %vm6445_vm2, %v3709_v0, %v3713_v35  ;;  %v7382_v24 = vsel %vm6662_vm6, %v5076_v26, %v1305_v27  ;;  %v5412_v0 = vld [vmem:[%s6416_s15 + $0x78] sm:$0xf] }
  0xe0   : > { %v7386_v57 = vsel %vm6662_vm6, %v1307_v13, %v1308_v49  ;;  %v8196_v4 = vor.u32 %v6990_v6, %v6988_v54  ;;  %v8198_v36 = vcombine.low %v7093_v22, %v7097_v51  ;;  %v3728_v27 = vsel %vm6445_vm2, %v3723_v61, %v7315_v3  ;;  %v7438_v13 = vld [vmem:[%s6416_s15 + $0x7c] sm:$0xf]  ;;  %v6302_v61 = vld [vmem:[%s6416_s15 + $0xcc] sm:$0xff]  }
  0xe1   : > { %v3738_v42 = vsel %vm6445_vm2, %v3733_v10, %v3737_v56  ;;  %v7405_v49 = vsel %vm6662_vm6, %v5077_v14, %v1312_v1  ;;  %v8199_v6 = vcombine.low %v7120_v59, %v7138_v63  ;;  %v7414_v22 = vsel %vm6662_vm6, %v1314_v8, %v1315_v47  ;;  %v7418_v14 = vld [vmem:[%s6416_s15 + $0x70] sm:$0xf]  ;;  %8201 = vst [vmem:[#allocation12_spill] sm:$0xff] %v7438_v13  ;;  %v7445_v56 = vld [vmem:[%s6416_s15 + $0xbc] sm:$0x1] }
  0xe2   : > { %v7391_v28 = vrot.slane %v8196_v4, 4  ;;  %v5078_v51 = vrot.slane %v1176_v34, 9  ;;  %v1319_v3 = vrot.slane %v6830_v9, 5  ;;  %8200 = vst [vmem:[#allocation11_spill] sm:$0xff] %v7418_v14  ;;  %v3764_v35 = vshrl.u32 %v5409_v25, 16 }
  0xe3   : > { %v7420_v59 = vcombine.low %v3680_v17, %v3690_v32  ;;  %v7422_v63 = vrot.slane %v3746_v31, 4  ;;  %v7424_v26 = vrot.slane %v3756_v20, 4  ;;  %v7426_v1 = vrot.slane %v3759_v15, 5  ;;  %v7450_v8 = vld [vmem:[%s6416_s15 + $0x88] sm:$0xf] }
  0xe4   : > { %8197 = vst [vmem:[#allocation10_spill] sm:$0xff] %v7391_v28  ;;  %5768 = vmatmul.mubr.msk.bf16.gmra.mrb[8].mxu1 %vm656_vm3, %v8198_v36  ;;  %v7430_v38 = vcombine.low %v3704_v33, %v3714_v37  ;;  %v7434_v19 = vcombine.low %v3728_v27, %v3738_v42  ;;  %v3767_v17 = vshll.u32 %v5409_v25, 16  ;;  %v3773_v32 = vshll.u32 %v7418_v14, 16  ;;  %8202 = vst [vmem:[#allocation13_spill] sm:$0xff] %v7450_v8  ;;  %v5418_v15 = vld [vmem:[%s6416_s15 + $0x90] sm:$0xf] }
  0xe5   : > { %5920 = vmatmul.mubr.msk.bf16.gmra.mrb[24].mxu0 %vm656_vm3, %v6300_v52  ;;  %5771 = vmatprep.mubr.msk.bf16.mxu1 %vm656_vm3, %v8199_v6  ;;  %v5415_v52 = vld [vmem:[%s6416_s15 + $0x84] sm:$0xf]  ;;  %v7454_v5 = vsel %vm6662_vm6, %v5078_v51, %v1319_v3  ;;  %v7456_v47 = vrot.slane %v1319_v3, 4  ;;  %v7458_v31 = vrot.slane %v3764_v35, 4  ;;  %v3777_v20 = vshrl.u32 %v7418_v14, 16 }
  0xe6   : > { %5923 = vmatprep.mubr.msk.bf16.mxu0 %vm656_vm3, %v6301_v55  ;;  %v3788_v33 = vshrl.u32 %v5412_v0, 16  ;;  %v3791_v37 = vshll.u32 %v5412_v0, 16  ;;  %v7471_v4 = vld [vmem:[%s6416_s15 + $0x94] sm:$0xf]  ;;  %v3797_v27 = vshll.u32 %v7438_v13, 16  ;;  %v3801_v42 = vshrl.u32 %v7438_v13, 16 }
  0xe7   : > { %8203 = vst [vmem:[#allocation14_spill] sm:$0xff] %v7471_v4  ;;  %v7474_v36 = vld [vmem:[%s6416_s15 + $0x74] sm:$0x1]  ;;  %v3812_v6 = vshrl.u32 %v5415_v52, 16  ;;  %v3815_v51 = vshll.u32 %v5415_v52, 16  ;;  %v8205_v3 = vcombine.low %v7144_v40, %v7151_v29  ;;  %v3821_v35 = vshll.u32 %v7450_v8, 16 }
  0xe8   : > { %8204 = vst [vmem:[#allocation15_spill] sm:$0xff] %v7474_v36  ;;  %v3825_v0 = vshrl.u32 %v7450_v8, 16  ;;  %v3836_v10 = vshrl.u32 %v5418_v15, 16  ;;  %v3839_v9 = vshll.u32 %v5418_v15, 16  ;;  %v8206_v25 = vcombine.low %v7177_v7, %v7188_v16  ;;  %v7494_v52 = vld [vmem:[%s6416_s15 + $0x80] sm:$0x1] }
  0xe9   : > { %v3769_v40 = vrot.slane %v3767_v17, 5  ;;  %v7491_v29 = vrot.slane %v3773_v32, 5  ;;  %v3779_v15 = vrot.slane %v3777_v20, 4  ;;  %v3783_v34 = vshll.u32 %v7474_v36, 16  ;;  %v7503_v17 = vld [vmem:[%s6416_s15 + $0x8c] sm:$0x1] }
  0xea   : > { %v3790_v7 = vrot.slane %v3788_v33, 4  ;;  %v3793_v16 = vrot.slane %v3791_v37, 5  ;;  %v7500_v12 = vrot.slane %v3797_v27, 5  ;;  %v3814_v32 = vrot.slane %v3812_v6, 4  ;;  %v7511_v20 = vld [vmem:[%s6416_s15 + $0x98] sm:$0x1] }
  0xeb   : > { %v3817_v55 = vrot.slane %v3815_v51, 5  ;;  %v7505_v54 = vrot.slane %v3821_v35, 5  ;;  %v3827_v8 = vrot.slane %v3825_v0, 4  ;;  %v3838_v28 = vrot.slane %v3836_v10, 4 }
  0xec   : > { %5772 = vmatmul.mubr.msk.bf16.gmra.mrb[12].mxu1 %vm656_vm3, %v8205_v3  ;;  %v3849_v3 = vshrl.u32 %v7471_v4, 16  ;;  %v3841_v13 = vrot.slane %v3839_v9, 5  ;;  %v3780_v14 = vor.u32 %v3779_v15, %v7491_v29  ;;  %v3794_v6 = vor.u32 %v3793_v16, %v3790_v7 }
  0xed   : > { %5924 = vmatmul.mubr.msk.bf16.gmra.mrb[28].mxu0 %vm656_vm3, %v6302_v61  ;;  %5775 = vmatprep.mubr.msk.bf16.mxu1 %vm656_vm3, %v8206_v25  ;;  %v3845_v61 = vshll.u32 %v7471_v4, 16  ;;  %v5421_v25 = vld [vmem:[%s6416_s15 + $0x9c] sm:$0xf]  ;;  %v7508_v4 = vld [vmem:[%s6416_s15 + $0xa0] sm:$0xf]  ;;  %v3807_v51 = vshll.u32 %v7494_v52, 16  ;;  %v3818_v10 = vor.u32 %v3817_v55, %v3814_v32  ;;  %v8208_v15 = vcombine.low %v7234_v45, %v7246_v46 }
  0xee   : > { %5929 = vmatprep.mubr.msk.bf16.mxu0 %vm656_vm3, %v7228_v11  ;;  %v3803_v11 = vrot.slane %v3801_v42, 4  ;;  %v3851_v33 = vrot.slane %v3849_v3, 4  ;;  %v3860_v37 = vshrl.u32 %v5421_v25, 16  ;;  %v3863_v27 = vshll.u32 %v5421_v25, 16 }
  0xef   : > { %v7513_v36 = vrot.slane %v3845_v61, 5  ;;  %v3770_v42 = vor.u32 %v3769_v40, %v7458_v31  ;;  %v3869_v9 = vshll.u32 %v7508_v4, 16  ;;  %v3873_v0 = vshrl.u32 %v7508_v4, 16 }
  0xf0   : > { %v3804_v35 = vor.u32 %v3803_v11, %v7500_v12  ;;  %v8207_v61 = vcombine.low %v7192_v30, %v7196_v62  ;;  %v3828_v31 = vor.u32 %v3827_v8, %v7505_v54  ;;  %v3831_v40 = vshll.u32 %v7503_v17, 16 }
  0xf1   : > { %v3842_v3 = vor.u32 %v3841_v13, %v3838_v28  ;;  %v3855_v55 = vshll.u32 %v7511_v20, 16  ;;  %v3785_v30 = vrot.slane %v3783_v34, 5  ;;  %v3852_v62 = vor.u32 %v3851_v33, %v7513_v36 }
  0xf2   : > { %v3862_v7 = vrot.slane %v3860_v37, 4  ;;  %v3771_v8 = vrot.slane %v3770_v42, 4  ;;  %v3781_v28 = vrot.slane %v3780_v14, 4  ;;  %v3795_v13 = vrot.slane %v3794_v6, 4 }
  0xf3   : > { %v3809_v16 = vrot.slane %v3807_v51, 5  ;;  %v3805_v25 = vrot.slane %v3804_v35, 4  ;;  %v3819_v11 = vrot.slane %v3818_v10, 4  ;;  %v7539_v45 = vrot.slane %v3869_v9, 5 }
  0xf4   : > { %5776 = vmatmul.mubr.msk.bf16.gmra.mrb[16].mxu1 %vm656_vm3, %v8207_v61  ;;  %v3875_v46 = vrot.slane %v3873_v0, 4  ;;  %v3829_v34 = vrot.slane %v3828_v31, 4  ;;  %v3833_v32 = vrot.slane %v3831_v40, 5  ;;  %v3843_v33 = vrot.slane %v3842_v3, 4  ;;  %v7542_v61 = vld [vmem:[%s6416_s15 + $0xa4] sm:$0x1] }
  0xf5   : > { %5930 = vmatmul.mubr.msk.bf16.vlgmr.msra.gmra.mrb[0].mxu0 %vm656_vm3, %v7288_v43  ;;  %5779 = vmatprep.mubr.msk.bf16.mxu1 %vm656_vm3, %v8208_v15  ;;  %v3865_v43 = vrot.slane %v3863_v27, 5  ;;  %v3857_v37 = vrot.slane %v3855_v55, 5  ;;  %v3853_v27 = vrot.slane %v3852_v62, 4  ;;  %v8209_v6 = vrot.slane %v7445_v56, 5  ;;  %v5473_v55 = vld [vmem:[%s6416_s15 + $0x48] sm:$0xe] }
  0xf6   : > { %5962 = vmatpush3.bf16.msra.mxu0 %v7025_v44  ;;  %5933 = vmatprep.mubr.msk.bf16.mxu0 %vm656_vm3, %v7293_v48  ;;  %v5424_v44 = vld [vmem:[%s6416_s15 + $0xa8] sm:$0xf]  ;;  %v7545_v48 = vld [vmem:[%s6416_s15 + $0xac] sm:$0xf]  ;;  %v3776_v35 = vsel %vm6445_vm2, %v3771_v8, %v7491_v29  ;;  %v3786_v10 = vsel %vm6445_vm2, %v3781_v28, %v3785_v30  ;;  %v3800_v9 = vsel %vm6445_vm2, %v3795_v13, %v7500_v12  ;;  %v3879_v31 = vshll.u32 %v7542_v61, 16 }
  0xf7   : > { %v3866_v15 = vor.u32 %v3865_v43, %v3862_v7  ;;  %v3884_v42 = vshrl.u32 %v5424_v44, 16  ;;  %v3887_v14 = vshll.u32 %v5424_v44, 16  ;;  %v7552_v51 = vsel %vm6662_vm6, %v7456_v47, %v8209_v6  ;;  %v7592_v30 = vld [vmem:[%s6416_s15 + $0xb0] sm:$0x1]  ;;  %v5427_v28 = vld [vmem:[%s6416_s15 + $0xb4] sm:$0xf] }
  0xf8   : > { %v3810_v56 = vsel %vm6445_vm2, %v3805_v25, %v3809_v16  ;;  %v3824_v47 = vsel %vm6445_vm2, %v3819_v11, %v7505_v54  ;;  %v3876_v0 = vor.u32 %v3875_v46, %v7539_v45  ;;  %v8210_v29 = vcombine.low %v7250_v18, %v7270_v39  ;;  %v8215_v6 = vld [vmem:[#allocation9_spill] sm:$0xff] }
  0xf9   : > { %v3834_v12 = vsel %vm6445_vm2, %v3829_v34, %v3833_v32  ;;  %v3848_v54 = vsel %vm6445_vm2, %v3843_v33, %v7513_v36  ;;  %v3893_v40 = vshll.u32 %v7545_v48, 16  ;;  %v3897_v3 = vshrl.u32 %v7545_v48, 16 }
  0xfa   : > { %v8211_v18 = vcombine.low %v7339_v41, %v7369_v2  ;;  %v3858_v39 = vsel %vm6445_vm2, %v3853_v27, %v3857_v37  ;;  %v3886_v36 = vrot.slane %v3884_v42, 4  ;;  %v3889_v62 = vrot.slane %v3887_v14, 5  ;;  %v5475_v37 = vld [vmem:[%s6416_s15 + $0x60] sm:$0xe] }
  0xfb   : > { %v8212_v7 = vsel %vm6445_vm2, %v7424_v26, %v7426_v1  ;;  %v8213_v41 = vsel %vm6445_vm2, %v7422_v63, %v7350_v21  ;;  %v7606_v43 = vcombine.low %v3776_v35, %v3786_v10  ;;  %v7608_v8 = vcombine.low %v3800_v9, %v3810_v56  ;;  %v5474_v1 = vld [vmem:[%s6416_s15 + $0x54] sm:$0xe]  ;;  %v8214_v42 = vld [vmem:[#allocation6_spill] sm:$0xff]  ;;  %v5476_v10 = vld [vmem:[%s6416_s15 + $0x6c] sm:$0xe] }
  0xfc   : > { %5780 = vmatmul.mubr.msk.bf16.gmra.mrb[20].mxu1 %vm656_vm3, %v8210_v29  ;;  %v5442_v2 = vcombine.low %v8213_v41, %v8212_v7  ;;  %v7611_v13 = vcombine.low %v3824_v47, %v3834_v12  ;;  %v3877_v16 = vrot.slane %v3876_v0, 4  ;;  %v3881_v44 = vrot.slane %v3879_v31, 5  ;;  %v7642_v0 = vld [vmem:[%s6416_s15 + $0xb8] sm:$0xf] }
  0xfd   : > { %5934 = vmatmul.mubr.msk.bf16.gmra.mrb[4].mxu0 %vm656_vm3, %v7420_v59  ;;  %5783 = vmatprep.mubr.msk.bf16.mxu1 %vm656_vm3, %v8211_v18  ;;  %v3867_v59 = vrot.slane %v3866_v15, 4  ;;  %v5489_v26 = vrot.slane %v5473_v55, 9  ;;  %v7614_v25 = vcombine.low %v3848_v54, %v3858_v39  ;;  %v7616_v21 = vrot.slane %v3893_v40, 5  ;;  %v8220_v39 = vld [vmem:[#allocation15_spill] sm:$0xff] }
  0xfe   : > { %5937 = vmatprep.mubr.msk.bf16.mxu0 %vm656_vm3, %v7430_v38  ;;  %v5094_v38 = vcombine.low %v7454_v5, %v7552_v51  ;;  %v3899_v63 = vrot.slane %v3897_v3, 4  ;;  %v3903_v11 = vshll.u32 %v7592_v30, 16  ;;  %v3890_v34 = vor.u32 %v3889_v62, %v3886_v36  ;;  %v5430_v62 = vld [vmem:[%s6416_s15 + $0xc0] sm:$0xf] }
  0xff   : > { %v3872_v46 = vsel %vm6445_vm2, %v3867_v59, %v7539_v45  ;;  %v4370_v32 = vrot.slane %v7254_v58, 5  ;;  %v4373_v33 = vrot.slane %v7301_v60, 5  ;;  %v3908_v27 = vshrl.u32 %v5427_v28, 16 }
 0x100   : > { %v5490_v15 = vrot.slane %v5474_v1, 9  ;;  %v4377_v14 = vrot.slane %v8214_v42, 5  ;;  %v4380_v35 = vrot.slane %v8215_v6, 5  ;;  %v3882_v9 = vsel %vm6445_vm2, %v3877_v16, %v3881_v44  ;;  %v6304_v1 = vld [vmem:[%s6416_s15 + $0xc] sm:$0xff]  }
 0x101   : > { %v3911_v56 = vshll.u32 %v5427_v28, 16  ;;  %v7632_v45 = vsel %vm6662_vm6, %v5489_v26, %v4370_v32  ;;  %v4372_v47 = vrot.slane %v4370_v32, 4  ;;  %v8216_v58 = vcombine.low %v7382_v24, %v7386_v57  ;;  %v8218_v57 = vld [vmem:[#allocation8_spill] sm:$0xff]  ;;  %v5477_v26 = vld [vmem:[%s6416_s15 + $0x78] sm:$0xe] }
 0x102   : > { %v3900_v60 = vor.u32 %v3899_v63, %v7616_v21  ;;  %v7646_v31 = vsel %vm6662_vm6, %v5490_v15, %v4377_v14  ;;  %v4379_v29 = vrot.slane %v4377_v14, 4  ;;  %v5491_v12 = vrot.slane %v5475_v37, 9  ;;  %v5204_v37 = vld [vmem:[%s6416_s15 + $0x78] sm:$0xf]  ;;  %v7700_v14 = vld [vmem:[%s6416_s15 + $0xc4] sm:$0xf] }
 0x103   : > { %v8217_v54 = vcombine.low %v7405_v49, %v7414_v22  ;;  %v7655_v24 = vsel %vm6662_vm6, %v4372_v47, %v4373_v33  ;;  %v4387_v40 = vrot.slane %v7354_v53, 5  ;;  %v5492_v3 = vrot.slane %v5476_v10, 9  ;;  %v8219_v22 = vld [vmem:[#allocation11_spill] sm:$0xff] }
 0x104   : > { %5784 = vmatmul.mubr.msk.bf16.gmra.mrb[24].mxu1 %vm656_vm3, %v8216_v58  ;;  %v5505_v55 = vcombine.low %v7632_v45, %v7655_v24  ;;  %v7663_v49 = vsel %vm6662_vm6, %v4379_v29, %v4380_v35  ;;  %v4391_v18 = vrot.slane %v8219_v22, 5  ;;  %v4394_v59 = vrot.slane %v8220_v39, 5  ;;  %v8221_v58 = vld [vmem:[#allocation12_spill] sm:$0xff]  ;;  %v8224_v39 = vld [vmem:[#allocation13_spill] sm:$0xff] }
 0x105   : > { %5938 = vmatmul.mubr.msk.bf16.gmra.mrb[8].mxu0 %vm656_vm3, %v7434_v19  ;;  %5787 = vmatprep.mubr.msk.bf16.mxu1 %vm656_vm3, %v8217_v54  ;;  %v4384_v19 = vrot.slane %v8218_v57, 5  ;;  %v3917_v36 = vshll.u32 %v7642_v0, 16  ;;  %v5506_v53 = vcombine.low %v7646_v31, %v7663_v49  ;;  %v3921_v28 = vshrl.u32 %v7642_v0, 16  ;;  %v8223_v54 = vld [vmem:[#allocation10_spill] sm:$0xff]  ;;  %v6369_v49 = vld [vmem:[%s6416_s15 + $0x8c] sm:$0x1] }
 0x106   : > { %5941 = vmatprep.mubr.msk.bf16.mxu0 %vm656_vm3, %v5442_v2  ;;  %v7675_v2 = vrot.slane %v3903_v11, 5  ;;  %v7680_v16 = vsel %vm6662_vm6, %v5492_v3, %v4391_v18  ;;  %v4393_v44 = vrot.slane %v4391_v18, 4  ;;  %v7684_v63 = vcombine.low %v3872_v46, %v3882_v9  ;;  %v5478_v9 = vld [vmem:[%s6416_s15 + $0x84] sm:$0xe] }
 0x107   : > { %v7673_v7 = vsel %vm6662_vm6, %v5491_v12, %v4384_v19  ;;  %v4386_v41 = vrot.slane %v4384_v19, 4  ;;  %v7686_v32 = vrot.slane %v3890_v34, 4  ;;  %v7688_v33 = vrot.slane %v3908_v27, 4 }
 0x108   : > { %v7695_v15 = vrot.slane %v3900_v60, 4  ;;  %v7697_v42 = vrot.slane %v3911_v56, 5  ;;  %v7706_v34 = vsel %vm6662_vm6, %v4393_v44, %v4394_v59  ;;  %v7708_v27 = vrot.slane %v3917_v36, 5  ;;  %v7720_v56 = vld [vmem:[%s6416_s15 + $0xbc] sm:$0x1] }
 0x109   : > { %v7692_v11 = vsel %vm6662_vm6, %v4386_v41, %v4387_v40  ;;  %v3932_v6 = vshrl.u32 %v5430_v62, 16  ;;  %v5508_v35 = vcombine.low %v7680_v16, %v7706_v34  ;;  %v5493_v10 = vrot.slane %v5477_v26, 9  ;;  %v6305_v36 = vld [vmem:[%s6416_s15 + $0x18] sm:$0xff]   ;;  %v5433_v44 = vld [vmem:[%s6416_s15 + $0xcc] sm:$0xf] }
 0x10a   : > { %v5507_v46 = vcombine.low %v7673_v7, %v7692_v11  ;;  %v3935_v47 = vshll.u32 %v5430_v62, 16  ;;  %v4398_v60 = vrot.slane %v8221_v58, 5  ;;  %v4401_v29 = vrot.slane %v7494_v52, 5 }
 0x10b   : > { %v2248_v12 = vshrl.u32 %v5204_v37, 16  ;;  %v3941_v5 = vshll.u32 %v7700_v14, 16  ;;  %v3945_v51 = vshrl.u32 %v7700_v14, 16  ;;  %v5494_v3 = vrot.slane %v5478_v9, 9 }
 0x10c   : > { %5788 = vmatmul.mubr.msk.bf16.gmra.mrb[28].mxu1 %vm656_vm3, %v5094_v38  ;;  %v2251_v38 = vshll.u32 %v5204_v37, 16  ;;  %v7735_v52 = vsel %vm6662_vm6, %v5493_v10, %v4398_v60  ;;  %v4400_v19 = vrot.slane %v4398_v60, 4  ;;  %v3927_v22 = vshll.u32 %v7720_v56, 16  ;;  %v5479_v60 = vld [vmem:[%s6416_s15 + $0x90] sm:$0xe] }
 0x10d   : > { %5942 = vmatmul.mubr.msk.bf16.gmra.mrb[12].mxu0 %vm656_vm3, %v7606_v43  ;;  %5793 = vmatprep.mubr.msk.bf16.mxu1 %vm656_vm3, %v6304_v1  ;;  %v8222_v43 = vld [vmem:[#allocation3_spill] sm:$0xff]  ;;  %v2250_v40 = vrot.slane %v2248_v12, 4  ;;  %v4405_v59 = vrot.slane %v8224_v39, 5  ;;  %v3896_v62 = vsel %vm6445_vm2, %v7686_v32, %v7616_v21  ;;  %v3914_v41 = vor.u32 %v7697_v42, %v7688_v33  ;;  %v7759_v33 = vld [vmem:[%s6416_s15 + $0xd0] sm:$0xf] }
 0x10e   : > { %5945 = vmatprep.mubr.msk.bf16.mxu0 %vm656_vm3, %v7608_v8  ;;  %v2270_v57 = vsel %vm6445_vm2, %v8223_v54, %v8222_v43  ;;  %v3923_v8 = vrot.slane %v3921_v28, 4  ;;  %v2253_v18 = vrot.slane %v2251_v38, 5  ;;  %v7749_v28 = vsel %vm6662_vm6, %v4400_v19, %v4401_v29  ;;  %v6306_v1 = vld [vmem:[%s6416_s15 + $0x24] sm:$0xff]  }
 0x10f   : > { %v4408_v26 = vrot.slane %v7503_v17, 5  ;;  %v3934_v37 = vrot.slane %v3932_v6, 4  ;;  %v3937_v10 = vrot.slane %v3935_v47, 5  ;;  %v5509_v9 = vcombine.low %v7735_v52, %v7749_v28  ;;  %v7771_v47 = vld [vmem:[%s6416_s15 + $0xc8] sm:$0x1]  ;;  %v8225_v54 = vld [vmem:[#allocation14_spill] sm:$0xff] }
 0x110   : > { %v2254_v58 = vor.u32 %v2253_v18, %v2250_v40  ;;  %v7756_v21 = vrot.slane %v3941_v5, 5  ;;  %v3947_v32 = vrot.slane %v3945_v51, 4  ;;  %v7763_v42 = vsel %vm6662_vm6, %v5494_v3, %v4405_v59  ;;  %v8227_v3 = vld [vmem:[#allocation2_spill] sm:$0xff] }
 0x111   : > { %v4407_v29 = vrot.slane %v4405_v59, 4  ;;  %v3906_v17 = vsel %vm6445_vm2, %v7695_v15, %v7675_v2  ;;  %v3924_v6 = vor.u32 %v3923_v8, %v7708_v27  ;;  %v3956_v12 = vshrl.u32 %v5433_v44, 16  ;;  %v8226_v2 = vld [vmem:[#allocation7_spill] sm:$0xff] }
 0x112   : > { %v2255_v5 = vrot.slane %v2254_v58, 4  ;;  %v3959_v51 = vshll.u32 %v5433_v44, 16  ;;  %v5495_v43 = vrot.slane %v5479_v60, 9  ;;  %v4412_v19 = vrot.slane %v8225_v54, 5  ;;  %v6307_v60 = vld [vmem:[%s6416_s15 + $0x30] sm:$0xff]  }
 0x113   : > { %v7778_v38 = vsel %vm6662_vm6, %v4407_v29, %v4408_v26  ;;  %v3965_v15 = vshll.u32 %v7759_v33, 16  ;;  %v3969_v40 = vshrl.u32 %v7759_v33, 16  ;;  %v3938_v18 = vor.u32 %v3937_v10, %v3934_v37  ;;  %v5480_v37 = vld [vmem:[%s6416_s15 + $0x9c] sm:$0xe] }
 0x114   : > { %5794 = vmatmul.mubr.msk.bf16.vlgmr.msra.gmra.mrb[0].mxu1 %vm656_vm3, %v6305_v36  ;;  %v5510_v8 = vcombine.low %v7763_v42, %v7778_v38  ;;  %v3948_v39 = vor.u32 %v3947_v32, %v7756_v21  ;;  %v3951_v59 = vshll.u32 %v7771_v47, 16  ;;  %v3929_v44 = vrot.slane %v3927_v22, 5  ;;  %v6308_v10 = vld [vmem:[%s6416_s15 + $0x3c] sm:$0xff]   ;;  %v7805_v32 = vld [vmem:[%s6416_s15 + $0xd4] sm:$0x1] }
 0x115   : > { %5946 = vmatmul.mubr.msk.bf16.gmra.mrb[16].mxu0 %vm656_vm3, %v7611_v13  ;;  %5996 = vmatpush3.bf16.msra.mxu1 %v8226_v2  ;;  %v2260_v13 = vsel %vm6445_vm2, %v2255_v5, %v8227_v3  ;;  %v7798_v26 = vsel %vm6662_vm6, %v5495_v43, %v4412_v19  ;;  %v4415_v58 = vrot.slane %v7511_v20, 5  ;;  %v5448_v29 = vcombine.low %v3896_v62, %v3906_v17  ;;  %v6375_v42 = vld [vmem:[%s6416_s15 + $0xc4] sm:$0xf] }
 0x116   : > { %5797 = vmatprep.mubr.msk.bf16.mxu1 %vm656_vm3, %v6306_v1  ;;  %5949 = vmatprep.mubr.msk.bf16.mxu0 %vm656_vm3, %v7614_v25  ;;  %v7794_v36 = vcombine.low %v2260_v13, %v2270_v57  ;;  %v4414_v1 = vrot.slane %v4412_v19, 4  ;;  %v3915_v5 = vrot.slane %v3914_v41, 4  ;;  %v3925_v25 = vrot.slane %v3924_v6, 4 }
 0x117   : > { %v3958_v54 = vrot.slane %v3956_v12, 4  ;;  %v3961_v2 = vrot.slane %v3959_v51, 5  ;;  %v7807_v57 = vrot.slane %v3965_v15, 5  ;;  %v3971_v22 = vrot.slane %v3969_v40, 4  ;;  %v5469_v40 = vld [vmem:[%s6416_s15 + $0x18] sm:$0xe] }
 0x118   : > { %v7811_v43 = vsel %vm6662_vm6, %v4414_v1, %v4415_v58  ;;  %v3939_v19 = vrot.slane %v3938_v18, 4  ;;  %v3949_v20 = vrot.slane %v3948_v39, 4  ;;  %v3953_v3 = vrot.slane %v3951_v59, 5  ;;  %v6358_v39 = vld [vmem:[%s6416_s15 + $0x1c] sm:$0xf]  ;;  %v6309_v58 = vld [vmem:[%s6416_s15 + $0x48] sm:$0xff]  }
 0x119   : > { %v5511_v62 = vcombine.low %v7798_v26, %v7811_v43  ;;  %v5496_v41 = vrot.slane %v5480_v37, 9  ;;  %v4419_v17 = vrot.slane %v7508_v4, 5  ;;  %v3920_v6 = vsel %vm6445_vm2, %v3915_v5, %v7708_v27  ;;  %v5481_v1 = vld [vmem:[%s6416_s15 + $0xa8] sm:$0xe] }
 0x11a   : > { %v3930_v12 = vsel %vm6445_vm2, %v3925_v25, %v3929_v44  ;;  %v3975_v51 = vshll.u32 %v7805_v32, 16  ;;  %v4422_v15 = vrot.slane %v7542_v61, 5  ;;  %v3962_v4 = vor.u32 %v3961_v2, %v3958_v54  ;;  %v6310_v54 = vld [vmem:[%s6416_s15 + $0x54] sm:$0xff]   ;;  %v6359_v2 = vld [vmem:[%s6416_s15 + $0x20] sm:$0x1] }
 0x11b   : > { %v7832_v27 = vsel %vm6662_vm6, %v5496_v41, %v4419_v17  ;;  %v4421_v13 = vrot.slane %v4419_v17, 4  ;;  %v3944_v18 = vsel %vm6445_vm2, %v3939_v19, %v7756_v21  ;;  %v3954_v61 = vsel %vm6445_vm2, %v3949_v20, %v3953_v3  ;;  %v5482_v17 = vld [vmem:[%s6416_s15 + $0xb4] sm:$0xe] }
 0x11c   : > { %5798 = vmatmul.mubr.msk.bf16.gmra.mrb[4].mxu1 %vm656_vm3, %v6307_v60  ;;  %v4342_v59 = vrot.slane %v6358_v39, 5  ;;  %v5449_v60 = vcombine.low %v3920_v6, %v3930_v12  ;;  %v5485_v5 = vrot.slane %v5469_v40, 9  ;;  %v5450_v21 = vcombine.low %v3944_v18, %v3954_v61  ;;  %v5471_v39 = vld [vmem:[%s6416_s15 + $0x30] sm:$0xe] }
 0x11d   : > { %5950 = vmatmul.mubr.msk.bf16.gmra.mrb[20].mxu0 %vm656_vm3, %v7684_v63  ;;  %5801 = vmatprep.mubr.msk.bf16.mxu1 %vm656_vm3, %v6308_v10  ;;  %v3972_v63 = vor.u32 %v3971_v22, %v7807_v57  ;;  %v7842_v44 = vsel %vm6662_vm6, %v4421_v13, %v4422_v15  ;;  %v3963_v37 = vrot.slane %v3962_v4, 4  ;;  %v4345_v22 = vrot.slane %v6359_v2, 5  ;;  %v5470_v15 = vld [vmem:[%s6416_s15 + $0x24] sm:$0xe]  ;;  %v6360_v4 = vld [vmem:[%s6416_s15 + $0x28] sm:$0xf] }
 0x11e   : > { %5953 = vmatprep.mubr.msk.bf16.mxu0 %vm656_vm3, %v5448_v29  ;;  %v3977_v29 = vrot.slane %v3975_v51, 5  ;;  %v5512_v25 = vcombine.low %v7832_v27, %v7842_v44  ;;  %v4344_v19 = vrot.slane %v4342_v59, 4  ;;  %v5497_v20 = vrot.slane %v5481_v1, 9  ;;  %v6361_v13 = vld [vmem:[%s6416_s15 + $0x34] sm:$0xf] }
 0x11f   : > { %v3973_v10 = vrot.slane %v3972_v63, 4  ;;  %v4426_v3 = vrot.slane %v7545_v48, 5  ;;  %v4429_v41 = vrot.slane %v7592_v30, 5  ;;  %v3968_v48 = vsel %vm6445_vm2, %v3963_v37, %v7807_v57  ;;  %v6312_v37 = vld [vmem:[%s6416_s15 + $0x6c] sm:$0xff]  }
 0x120   : > { %v4343_v51 = vsel %vm6662_vm6, %v5485_v5, %v4342_v59  ;;  %v4349_v63 = vrot.slane %v6360_v4, 5  ;;  %v4346_v40 = vsel %vm6662_vm6, %v4344_v19, %v4345_v22  ;;  %v4356_v18 = vrot.slane %v6361_v13, 5  ;;  %v6362_v5 = vld [vmem:[%s6416_s15 + $0x2c] sm:$0x1] }
 0x121   : > { %v7857_v6 = vsel %vm6662_vm6, %v5497_v20, %v4426_v3  ;;  %v4428_v12 = vrot.slane %v4426_v3, 4  ;;  %v3978_v30 = vsel %vm6445_vm2, %v3973_v10, %v3977_v29  ;;  %v5498_v57 = vrot.slane %v5482_v17, 9  ;;  %v5483_v17 = vld [vmem:[%s6416_s15 + $0xc0] sm:$0xe] }
 0x122   : > { %v4433_v59 = vrot.slane %v7642_v0, 5  ;;  %v5486_v29 = vrot.slane %v5470_v15, 9  ;;  %v5501_v10 = vcombine.low %v4343_v51, %v4346_v40  ;;  %v4351_v2 = vrot.slane %v4349_v63, 4  ;;  %v6363_v0 = vld [vmem:[%s6416_s15 + $0x38] sm:$0x1]  ;;  %v8228_v51 = vld [vmem:[#allocation4_spill] sm:$0xff] }
 0x123   : > { %v7875_v61 = vsel %vm6662_vm6, %v4428_v12, %v4429_v41  ;;  %v5487_v20 = vrot.slane %v5471_v39, 9  ;;  %v4358_v3 = vrot.slane %v4356_v18, 4  ;;  %v4359_v41 = vrot.slane %v6363_v0, 5 }
 0x124   : > { %5802 = vmatmul.mubr.msk.bf16.gmra.mrb[8].mxu1 %vm656_vm3, %v6309_v58  ;;  %v5513_v1 = vcombine.low %v7857_v6, %v7875_v61  ;;  %v6311_v58 = vld [vmem:[%s6416_s15 + $0x60] sm:$0xff]   ;;  %v7887_v22 = vsel %vm6662_vm6, %v5498_v57, %v4433_v59  ;;  %v4435_v19 = vrot.slane %v4433_v59, 4  ;;  %v4363_v15 = vrot.slane %v8228_v51, 5  ;;  %v5472_v57 = vld [vmem:[%s6416_s15 + $0x3c] sm:$0xe] }
 0x125   : > { %5954 = vmatmul.mubr.msk.bf16.gmra.mrb[24].mxu0 %vm656_vm3, %v5449_v60  ;;  %5805 = vmatprep.mubr.msk.bf16.mxu1 %vm656_vm3, %v6310_v54  ;;  %v5451_v60 = vcombine.low %v3968_v48, %v3978_v30  ;;  %v4352_v54 = vrot.slane %v6362_v5, 5  ;;  %v4350_v48 = vsel %vm6662_vm6, %v5486_v29, %v4349_v63  ;;  %v5499_v4 = vrot.slane %v5483_v17, 9  ;;  %v6313_v63 = vld [vmem:[%s6416_s15 + $0x78] sm:$0xff]  }
 0x126   : > { %5957 = vmatprep.mubr.msk.bf16.mxu0 %vm656_vm3, %v5450_v21  ;;  %v4436_v21 = vrot.slane %v7720_v56, 5  ;;  %v4357_v40 = vsel %vm6662_vm6, %v5487_v20, %v4356_v18  ;;  %v4360_v13 = vsel %vm6662_vm6, %v4358_v3, %v4359_v41  ;;  %v4440_v39 = vrot.slane %v7700_v14, 5  ;;  %v6364_v41 = vld [vmem:[%s6416_s15 + $0x70] sm:$0xf] }
 0x127   : > { %v4353_v30 = vsel %vm6662_vm6, %v4351_v2, %v4352_v54  ;;  %v4443_v59 = vrot.slane %v7771_v47, 5  ;;  %v5503_v18 = vcombine.low %v4357_v40, %v4360_v13  ;;  %v8229_v2 = vld [vmem:[#allocation5_spill] sm:$0xff]  ;;  %v2233_v17 = vshll.u32 %v6364_v41, 16 }
 0x128   : > { %v7893_v12 = vsel %vm6662_vm6, %v4435_v19, %v4436_v21  ;;  %v5502_v29 = vcombine.low %v4350_v48, %v4353_v30  ;;  %v7918_v5 = vsel %vm6662_vm6, %v5499_v4, %v4440_v39  ;;  %v4442_v54 = vrot.slane %v4440_v39, 4  ;;  %v6314_v21 = vld [vmem:[%s6416_s15 + $0x84] sm:$0xff]  }
 0x129   : > { %v5514_v56 = vcombine.low %v7887_v22, %v7893_v12  ;;  %v4366_v19 = vrot.slane %v8229_v2, 5  ;;  %v2237_v48 = vshrl.u32 %v6364_v41, 16  ;;  %v4447_v30 = vrot.slane %v7759_v33, 5  ;;  %v5210_v41 = vld [vmem:[%s6416_s15 + $0x90] sm:$0xf] }
 0x12a   : > { %v7924_v47 = vsel %vm6662_vm6, %v4442_v54, %v4443_v59  ;;  %v4450_v51 = vrot.slane %v7805_v32, 5  ;;  %v6315_v59 = vld [vmem:[%s6416_s15 + $0x90] sm:$0xff]   ;;  %v2296_v45 = vshrl.u32 %v5210_v41, 16  ;;  %v2299_v24 = vshll.u32 %v5210_v41, 16  ;;  %v6319_v41 = vld [vmem:[%s6416_s15 + $0xc0] sm:$0xff]  }
 0x12b   : > { %v5515_v0 = vcombine.low %v7918_v5, %v7924_v47  ;;  %v4449_v33 = vrot.slane %v4447_v30, 4  ;;  %v2401_v38 = vshll.u32 %v6375_v42, 16 }
 0x12c   : > { %5806 = vmatmul.mubr.msk.bf16.gmra.mrb[12].mxu1 %vm656_vm3, %v6311_v58  ;;  %v5201_v58 = vld [vmem:[%s6416_s15 + $0x6c] sm:$0xf] }
 0x12d   : > { %5958 = vmatmul.mubr.msk.bf16.gmra.mrb[28].mxu0 %vm656_vm3, %v5451_v60  ;;  %5809 = vmatprep.mubr.msk.bf16.mxu1 %vm656_vm3, %v6312_v37  ;;  %v5484_v60 = vld [vmem:[%s6416_s15 + $0xcc] sm:$0xe]  ;;  %v5488_v37 = vrot.slane %v5472_v57, 9  ;;  %v2224_v20 = vshrl.u32 %v5201_v58, 16  ;;  %v2227_v14 = vshll.u32 %v5201_v58, 16  ;;  %v2235_v58 = vrot.slane %v2233_v17, 5 }
 0x12e   : > { %5963 = vmatprep.mubr.msk.bf16.mxu0 %vm656_vm3, %v5501_v10  ;;  %v4365_v10 = vrot.slane %v4363_v15, 4  ;;  %v5500_v3 = vrot.slane %v5484_v60, 9  ;;  %v2239_v60 = vrot.slane %v2237_v48, 4  ;;  %v6317_v17 = vld [vmem:[%s6416_s15 + $0xa8] sm:$0xff]   ;;  %v2403_v26 = vrot.slane %v2401_v38, 5 }
 0x12f   : > { %v4364_v4 = vsel %vm6662_vm6, %v5488_v37, %v4363_v15  ;;  %v2226_v13 = vrot.slane %v2224_v20, 4  ;;  %v2229_v57 = vrot.slane %v2227_v14, 5  ;;  %v6316_v15 = vld [vmem:[%s6416_s15 + $0x9c] sm:$0xff]   ;;  %v6365_v37 = vld [vmem:[%s6416_s15 + $0x74] sm:$0x1] }
 0x130   : > { %v4367_v40 = vsel %vm6662_vm6, %v4365_v10, %v4366_v19  ;;  %v7941_v39 = vsel %vm6662_vm6, %v5500_v3, %v4447_v30  ;;  %v2243_v10 = vshll.u32 %v6365_v37, 16  ;;  %v6366_v19 = vld [vmem:[%s6416_s15 + $0x88] sm:$0xf]  ;;  %v6368_v37 = vld [vmem:[%s6416_s15 + $0xa0] sm:$0xf] }
 0x131   : > { %v5504_v32 = vcombine.low %v4364_v4, %v4367_v40  ;;  %v2281_v20 = vshll.u32 %v6366_v19, 16  ;;  %v2285_v14 = vshrl.u32 %v6366_v19, 16  ;;  %v5213_v40 = vld [vmem:[%s6416_s15 + $0x9c] sm:$0xf] }
 0x132   : > { %v2245_v30 = vrot.slane %v2243_v10, 5  ;;  %v2333_v10 = vshrl.u32 %v6368_v37, 16 }
 0x134   : > { %5810 = vmatmul.mubr.msk.bf16.gmra.mrb[16].mxu1 %vm656_vm3, %v6313_v63  ;;  %v7946_v63 = vsel %vm6662_vm6, %v4449_v33, %v4450_v51  ;;  %v2287_v33 = vrot.slane %v2285_v14, 4 }
 0x135   : > { %5964 = vmatmul.mubr.msk.bf16.vlgmr.msra.gmra.mrb[0].mxu0 %vm656_vm3, %v5502_v29  ;;  %5813 = vmatprep.mubr.msk.bf16.mxu1 %vm656_vm3, %v6314_v21  ;;  %v5207_v29 = vld [vmem:[%s6416_s15 + $0x84] sm:$0xf]  ;;  %v5516_v54 = vcombine.low %v7941_v39, %v7946_v63  ;;  %v2230_v21 = vor.u32 %v2229_v57, %v2226_v13  ;;  %v6318_v13 = vld [vmem:[%s6416_s15 + $0xb4] sm:$0xff]   ;;  %v7965_v57 = vrot.slane %v2281_v20, 5 }
 0x136   : > { %5967 = vmatprep.mubr.msk.bf16.mxu0 %vm656_vm3, %v5503_v18  ;;  %v2240_v18 = vor.u32 %v2239_v60, %v2235_v58  ;;  %v2272_v50 = vshrl.u32 %v5207_v29, 16  ;;  %v2275_v2 = vshll.u32 %v5207_v29, 16  ;;  %v2323_v29 = vshll.u32 %v5213_v40, 16 }
 0x137   : > { %v2231_v3 = vrot.slane %v2230_v21, 4  ;;  %v2288_v31 = vor.u32 %v2287_v33, %v7965_v57 }
 0x138   : > { %v2241_v48 = vrot.slane %v2240_v18, 4  ;;  %v2274_v51 = vrot.slane %v2272_v50, 4  ;;  %v2277_v4 = vrot.slane %v2275_v2, 5  ;;  %v2298_v50 = vrot.slane %v2296_v45, 4 }
 0x139   : > { %v2301_v2 = vrot.slane %v2299_v24, 5  ;;  %v6371_v24 = vld [vmem:[%s6416_s15 + $0xa4] sm:$0x1] }
 0x13a   : > { %v2246_v21 = vsel %vm6445_vm2, %v2241_v48, %v2245_v30  ;;  %v2278_v18 = vor.u32 %v2277_v4, %v2274_v51  ;;  %v5216_v48 = vld [vmem:[%s6416_s15 + $0xa8] sm:$0xf]  ;;  %v2289_v30 = vrot.slane %v2288_v31, 4  ;;  %v6373_v31 = vld [vmem:[%s6416_s15 + $0xb8] sm:$0xf] }
 0x13b   : > { %v2302_v4 = vor.u32 %v2301_v2, %v2298_v50 }
 0x13c   : > { %5814 = vmatmul.mubr.msk.bf16.gmra.mrb[20].mxu1 %vm656_vm3, %v6315_v59  ;;  %v6367_v59 = vld [vmem:[%s6416_s15 + $0x94] sm:$0xf]  ;;  %v2279_v7 = vrot.slane %v2278_v18, 4 }
 0x13d   : > { %5968 = vmatmul.mubr.msk.bf16.gmra.mrb[4].mxu0 %vm656_vm3, %v5504_v32  ;;  %5817 = vmatprep.mubr.msk.bf16.mxu1 %vm656_vm3, %v6316_v15  ;;  %v2305_v32 = vshll.u32 %v6367_v59, 16  ;;  %v2309_v60 = vshrl.u32 %v6367_v59, 16  ;;  %v2320_v15 = vshrl.u32 %v5213_v40, 16  ;;  %v6370_v40 = vld [vmem:[%s6416_s15 + $0x98] sm:$0x1]  ;;  %v2339_v59 = vshll.u32 %v6371_v24, 16 }
 0x13e   : > { %5971 = vmatprep.mubr.msk.bf16.mxu0 %vm656_vm3, %v5505_v55  ;;  %v2236_v55 = vsel %vm6445_vm2, %v2231_v3, %v2235_v58  ;;  %v2329_v58 = vshll.u32 %v6368_v37, 16  ;;  %v2325_v3 = vrot.slane %v2323_v29, 5  ;;  %v6372_v29 = vld [vmem:[%s6416_s15 + $0xac] sm:$0xf]  ;;  %v2284_v37 = vsel %vm6445_vm2, %v2279_v7, %v7965_v57 }
 0x13f   : > { %v7985_v19 = vrot.slane %v2305_v32, 5  ;;  %v2311_v20 = vrot.slane %v2309_v60, 4  ;;  %v2322_v14 = vrot.slane %v2320_v15, 4  ;;  %v2344_v32 = vshrl.u32 %v5216_v48, 16  ;;  %v5219_v60 = vld [vmem:[%s6416_s15 + $0xb4] sm:$0xf] }
 0x140   : > { %v7988_v11 = vrot.slane %v2329_v58, 5  ;;  %v2347_v15 = vshll.u32 %v5216_v48, 16  ;;  %v2357_v18 = vshrl.u32 %v6372_v29, 16  ;;  %v2303_v34 = vrot.slane %v2302_v4, 4  ;;  %v5222_v48 = vld [vmem:[%s6416_s15 + $0xc0] sm:$0xf] }
 0x141   : > { %v2312_v33 = vor.u32 %v2311_v20, %v7985_v19  ;;  %v2326_v45 = vor.u32 %v2325_v3, %v2322_v14  ;;  %v2368_v58 = vshrl.u32 %v5219_v60, 16  ;;  %v2341_v52 = vrot.slane %v2339_v59, 5 }
 0x142   : > { %v2346_v28 = vrot.slane %v2344_v32, 4  ;;  %v2349_v20 = vrot.slane %v2347_v15, 5  ;;  %v2359_v57 = vrot.slane %v2357_v18, 4  ;;  %v2405_v24 = vshrl.u32 %v6375_v42, 16  ;;  %v6376_v32 = vld [vmem:[%s6416_s15 + $0xbc] sm:$0x1] }
 0x143   : > { %v2313_v50 = vrot.slane %v2312_v33, 4  ;;  %v2327_v2 = vrot.slane %v2326_v45, 4  ;;  %v6374_v33 = vld [vmem:[%s6416_s15 + $0xb0] sm:$0x1] }
 0x144   : > { %5818 = vmatmul.mubr.msk.bf16.gmra.mrb[24].mxu1 %vm656_vm3, %v6317_v17  ;;  %v5233_v17 = vcombine.low %v2236_v55, %v2246_v21  ;;  %v2353_v21 = vshll.u32 %v6372_v29, 16  ;;  %v2363_v45 = vshll.u32 %v6374_v33, 16  ;;  %v2407_v43 = vrot.slane %v2405_v24, 4 }
 0x145   : > { %5972 = vmatmul.mubr.msk.bf16.gmra.mrb[8].mxu0 %vm656_vm3, %v5506_v53  ;;  %5821 = vmatprep.mubr.msk.bf16.mxu1 %vm656_vm3, %v6318_v13  ;;  %v2291_v53 = vshll.u32 %v6369_v49, 16  ;;  %v2315_v13 = vshll.u32 %v6370_v40, 16  ;;  %v2377_v49 = vshll.u32 %v6373_v31, 16  ;;  %v2332_v4 = vsel %vm6445_vm2, %v2327_v2, %v7988_v11 }
 0x146   : > { %5975 = vmatprep.mubr.msk.bf16.mxu0 %vm656_vm3, %v5507_v46  ;;  %v2335_v46 = vrot.slane %v2333_v10, 4  ;;  %v2371_v10 = vshll.u32 %v5219_v60, 16  ;;  %v2355_v14 = vrot.slane %v2353_v21, 5  ;;  %v2387_v60 = vshll.u32 %v6376_v32, 16 }
 0x147   : > { %v2293_v51 = vrot.slane %v2291_v53, 5  ;;  %v2381_v53 = vshrl.u32 %v6373_v31, 16  ;;  %v2379_v7 = vrot.slane %v2377_v49, 5  ;;  %v2365_v18 = vrot.slane %v2363_v45, 5 }
 0x148   : > { %v2336_v55 = vor.u32 %v2335_v46, %v7988_v11  ;;  %v2395_v11 = vshll.u32 %v5222_v48, 16  ;;  %v2408_v49 = vor.u32 %v2407_v43, %v2403_v26 }
 0x149   : > { %v2294_v16 = vsel %vm6445_vm2, %v2289_v30, %v2293_v51  ;;  %v2383_v46 = vrot.slane %v2381_v53, 4  ;;  %v2308_v30 = vsel %vm6445_vm2, %v2303_v34, %v7985_v19  ;;  %v2350_v19 = vor.u32 %v2349_v20, %v2346_v28  ;;  %v6377_v53 = vld [vmem:[%s6416_s15 + $0xc8] sm:$0x1] }
 0x14a   : > { %v5235_v3 = vcombine.low %v2284_v37, %v2294_v16  ;;  %v2397_v16 = vrot.slane %v2395_v11, 5  ;;  %v2409_v28 = vrot.slane %v2408_v49, 4 }
 0x14b   : > { %v2384_v59 = vor.u32 %v2383_v46, %v2379_v7  ;;  %v2351_v29 = vrot.slane %v2350_v19, 4 }
 0x14c   : > { %5822 = vmatmul.mubr.msk.bf16.gmra.mrb[28].mxu1 %vm656_vm3, %v6319_v41  ;;  %v2370_v41 = vrot.slane %v2368_v58, 4 }
 0x14d   : > { %5976 = vmatmul.mubr.msk.bf16.gmra.mrb[12].mxu0 %vm656_vm3, %v5508_v35  ;;  %5843 = vmatprep.mubr.msk.bf16.mxu1 %vm656_vm3, %v5233_v17  ;;  %v2317_v35 = vrot.slane %v2315_v13, 5  ;;  %v2373_v17 = vrot.slane %v2371_v10, 5  ;;  %v2360_v13 = vor.u32 %v2359_v57, %v2355_v14  ;;  %v2385_v34 = vrot.slane %v2384_v59, 4 }
 0x14e   : > { %5979 = vmatprep.mubr.msk.bf16.mxu0 %vm656_vm3, %v5509_v9  ;;  %v2337_v9 = vrot.slane %v2336_v55, 4  ;;  %v2356_v58 = vsel %vm6445_vm2, %v2351_v29, %v2355_v14 }
 0x14f   : > { %v2318_v51 = vsel %vm6445_vm2, %v2313_v50, %v2317_v35  ;;  %v2361_v21 = vrot.slane %v2360_v13, 4  ;;  %v2389_v35 = vrot.slane %v2387_v60, 5  ;;  %v2411_v50 = vshll.u32 %v6377_v53, 16 }
 0x150   : > { %v2342_v40 = vsel %vm6445_vm2, %v2337_v9, %v2341_v52  ;;  %v5236_v55 = vcombine.low %v2308_v30, %v2318_v51 }
 0x151   : > { %v5237_v15 = vcombine.low %v2332_v4, %v2342_v40  ;;  %v2366_v10 = vsel %vm6445_vm2, %v2361_v21, %v2365_v18  ;;  %v2390_v44 = vsel %vm6445_vm2, %v2385_v34, %v2389_v35  ;;  %v2413_v6 = vrot.slane %v2411_v50, 5 }
 0x154   : > { %5844 = vmatmul.mubr.msk.bf16.vlgmr.msra.gmra.mrb[16].mxu1 %vm656_vm3, %v7794_v36  ;;  %v2392_v36 = vshrl.u32 %v5222_v48, 16 }
 0x155   : > { %5980 = vmatmul.mubr.msk.bf16.gmra.mrb[16].mxu0 %vm656_vm3, %v5510_v8  ;;  %5847 = vmatprep.mubr.msk.bf16.mxu1 %vm656_vm3, %v5235_v3  ;;  %v2374_v8 = vor.u32 %v2373_v17, %v2370_v41 }
 0x156   : > { %5983 = vmatprep.mubr.msk.bf16.mxu0 %vm656_vm3, %v5511_v62  ;;  %v2394_v37 = vrot.slane %v2392_v36, 4 }
 0x157   : > { %v2375_v62 = vrot.slane %v2374_v8, 4 }
 0x158   : > { %v2398_v31 = vor.u32 %v2397_v16, %v2394_v37 }
 0x159   : > { %v2380_v27 = vsel %vm6445_vm2, %v2375_v62, %v2379_v7 }
 0x15a   : > { %v5239_v2 = vcombine.low %v2380_v27, %v2390_v44  ;;  %v2399_v52 = vrot.slane %v2398_v31, 4 }
 0x15c   : > { %5848 = vmatmul.mubr.msk.bf16.gmra.mrb[20].mxu1 %vm656_vm3, %v5236_v55  ;;  %v2404_v61 = vsel %vm6445_vm2, %v2399_v52, %v2403_v26 }
 0x15d   : > { %5984 = vmatmul.mubr.msk.bf16.gmra.mrb[20].mxu0 %vm656_vm3, %v5512_v25  ;;  %5851 = vmatprep.mubr.msk.bf16.mxu1 %vm656_vm3, %v5237_v15  ;;  %v5238_v25 = vcombine.low %v2356_v58, %v2366_v10 }
 0x15e   : > { %5987 = vmatprep.mubr.msk.bf16.mxu0 %vm656_vm3, %v5513_v1  ;;  %v2414_v1 = vsel %vm6445_vm2, %v2409_v28, %v2413_v6 }
 0x15f   : > { %v5240_v9 = vcombine.low %v2404_v61, %v2414_v1 }
 0x164   : > { %5852 = vmatmul.mubr.msk.bf16.gmra.mrb[24].mxu1 %vm656_vm3, %v5238_v25 }
 0x165   : > { %5988 = vmatmul.mubr.msk.bf16.gmra.mrb[24].mxu0 %vm656_vm3, %v5514_v56  ;;  %5855 = vmatprep.mubr.msk.bf16.mxu1 %vm656_vm3, %v5239_v2 }
 0x166   : > { %5991 = vmatprep.mubr.msk.bf16.mxu0 %vm656_vm3, %v5515_v0 }
 0x16c   : > { %5856 = vmatmul.mubr.msk.bf16.gmra.mrb[28].mxu1 %vm656_vm3, %v5240_v9 }
 0x16d   : > { %5992 = vmatmul.mubr.msk.bf16.gmra.mrb[28].mxu0 %vm656_vm3, %v5516_v54 }
 0x1e7   : > { %v5795_v22 = vpop.f32.mrb[0].mxu1 }
 0x1e8   : > { %v1824_v12 = vpop.f32.mrb[1].mxu1 }
 0x1e9   : > { %v5796_v56 = vpop.f32.mrb[2].mxu1 }
 0x1ea   : > { %v1827_v5 = vpop.f32.mrb[3].mxu1 }
 0x1ef   : > { %v5799_v47 = vpop.f32.mrb[4].mxu1 }
 0x1f0   : > { %v1840_v0 = vpop.f32.mrb[5].mxu1 }
 0x1f1   : > { %v5800_v20 = vpop.f32.mrb[6].mxu1 }
 0x1f2   : > { %v1843_v14 = vpop.f32.mrb[7].mxu1 }
 0x1f7   : > { %v5803_v57 = vpop.f32.mrb[8].mxu1 }
 0x1f8   : > { %v1856_v3 = vpop.f32.mrb[9].mxu1 }
 0x1f9   : > { %v8076_v23 = vpop.f32.mrb[10].mxu1 }
 0x1fa   : > { %v8078_v41 = vpop.f32.mrb[11].mxu1 }
 0x1ff   : > { %v8080_v17 = vpop.f32.mrb[12].mxu1 }
 0x200   : > { %v8082_v7 = vpop.f32.mrb[13].mxu1 }
 0x201   : > { %v8084_v39 = vpop.f32.mrb[14].mxu1 }
 0x202   : > { %v8086_v63 = vpop.f32.mrb[15].mxu1 }
 0x208   : > { %v5965_v54 = vpop.f32.mrb[0].mxu0 }
 0x209   : > { %v5997_v46 = vadd.f32 %v5965_v54, %v5795_v22  ;;  %v4590_v48 = vpop.f32.mrb[1].mxu0 }
 0x20a   : > { %v5998_v30 = vadd.f32 %v4590_v48, %v1824_v12  ;;  %v5966_v51 = vpop.f32.mrb[2].mxu0 }
 0x20b   : > { %v5999_v4 = vadd.f32 %v5966_v51, %v5796_v56  ;;  %v4593_v40 = vpop.f32.mrb[3].mxu0  ;;  %v4821_v33 = vmul.f32 %v5997_v46, %v5997_v46  ;;  %v4753_v24 = vsel %vm4749_vm7, %v5997_v46, 0.0 }
 0x20c   : > { %v4819_v19 = vmul.f32 %v5998_v30, %v5998_v30  ;;  %v6000_v13 = vadd.f32 %v4593_v40, %v1827_v5  ;;  %v4750_v45 = vsel %vm4749_vm7, %v5998_v30, 0.0 }
 0x20d   : > { %v4822_v42 = vmul.f32 %v5999_v4, %v5999_v4  ;;  %v4854_v21 = vsel %vm4749_vm7, %v4821_v33, 0.0  ;;  %v4755_v18 = vsel %vm4749_vm7, %v5999_v4, 0.0 }
 0x20e   : > { %v4751_v36 = vsel %vm4749_vm7, %v6000_v13, 0.0  ;;  %v4820_v11 = vmul.f32 %v6000_v13, %v6000_v13  ;;  %v4851_v8 = vsel %vm4749_vm7, %v4819_v19, 0.0 }
 0x20f   : > { %v4752_v38 = vadd.f32 %v4751_v36, %v4750_v45  ;;  %v4856_v26 = vsel %vm4749_vm7, %v4822_v42, 0.0 }
 0x210   : > { %v4852_v59 = vsel %vm4749_vm7, %v4820_v11, 0.0  ;;  %v5969_v32 = vpop.f32.mrb[4].mxu0 }
 0x211   : > { %v4754_v60 = vadd.f32 %v4753_v24, %v4752_v38  ;;  %v4853_v55 = vadd.f32 %v4852_v59, %v4851_v8  ;;  %v6001_v15 = vadd.f32 %v5969_v32, %v5799_v47  ;;  %v4606_v29 = vpop.f32.mrb[5].mxu0 }
 0x212   : > { %v6002_v37 = vadd.f32 %v4606_v29, %v1840_v0  ;;  %v5970_v16 = vpop.f32.mrb[6].mxu0 }
 0x213   : > { %v4855_v43 = vadd.f32 %v4854_v21, %v4853_v55  ;;  %v4756_v62 = vadd.f32 %v4755_v18, %v4754_v60  ;;  %v4609_v34 = vpop.f32.mrb[7].mxu0  ;;  %v6003_v10 = vadd.f32 %v5970_v16, %v5800_v20  ;;  %v4825_v44 = vmul.f32 %v6001_v15, %v6001_v15 }
 0x214   : > { %v4757_v35 = vsel %vm4749_vm7, %v6002_v37, 0.0  ;;  %v4823_v58 = vmul.f32 %v6002_v37, %v6002_v37  ;;  %v6004_v31 = vadd.f32 %v4609_v34, %v1843_v14  ;;  %v4761_v28 = vsel %vm4749_vm7, %v6001_v15, 0.0 }
 0x215   : > { %v4758_v49 = vadd.f32 %v4757_v35, %v4756_v62  ;;  %v4857_v53 = vadd.f32 %v4856_v26, %v4855_v43  ;;  %v4826_v61 = vmul.f32 %v6003_v10, %v6003_v10  ;;  %v4763_v56 = vsel %vm4749_vm7, %v6003_v10, 0.0 }
 0x216   : > { %v4858_v50 = vsel %vm4749_vm7, %v4823_v58, 0.0  ;;  %v4759_v27 = vsel %vm4749_vm7, %v6004_v31, 0.0  ;;  %v4824_v52 = vmul.f32 %v6004_v31, %v6004_v31  ;;  %v4862_v20 = vsel %vm4749_vm7, %v4825_v44, 0.0 }
 0x217   : > { %v4859_v25 = vadd.f32 %v4858_v50, %v4857_v53  ;;  %v4760_v2 = vadd.f32 %v4759_v27, %v4758_v49 }
 0x218   : > { %v5973_v6 = vpop.f32.mrb[8].mxu0  ;;  %v4860_v9 = vsel %vm4749_vm7, %v4824_v52, 0.0 }
 0x219   : > { %v4762_v1 = vadd.f32 %v4761_v28, %v4760_v2  ;;  %v6005_v22 = vadd.f32 %v5973_v6, %v5803_v57  ;;  %v4622_v12 = vpop.f32.mrb[9].mxu0  ;;  %v4861_v5 = vadd.f32 %v4860_v9, %v4859_v25  ;;  %v4864_v57 = vsel %vm4749_vm7, %v4826_v61, 0.0 }
 0x21a   : > { %v6006_v47 = vadd.f32 %v4622_v12, %v1856_v3  ;;  %v5974_v0 = vpop.f32.mrb[10].mxu0 }
 0x21b   : > { %v4764_v14 = vadd.f32 %v4763_v56, %v4762_v1  ;;  %v6007_v54 = vadd.f32 %v5974_v0, %v8076_v23  ;;  %v4625_v46 = vpop.f32.mrb[11].mxu0  ;;  %v4863_v48 = vadd.f32 %v4862_v20, %v4861_v5  ;;  %v4829_v45 = vmul.f32 %v6005_v22, %v6005_v22 }
 0x21c   : > { %v4765_v30 = vsel %vm4749_vm7, %v6006_v47, 0.0  ;;  %v4827_v51 = vmul.f32 %v6006_v47, %v6006_v47  ;;  %v6008_v4 = vadd.f32 %v4625_v46, %v8078_v41  ;;  %v4769_v23 = vsel %vm4749_vm7, %v6005_v22, 0.0 }
 0x21d   : > { %v4766_v40 = vadd.f32 %v4765_v30, %v4764_v14  ;;  %v4865_v19 = vadd.f32 %v4864_v57, %v4863_v48  ;;  %v4830_v24 = vmul.f32 %v6007_v54, %v6007_v54  ;;  %v4771_v32 = vsel %vm4749_vm7, %v6007_v54, 0.0 }
 0x21e   : > { %v4866_v13 = vsel %vm4749_vm7, %v4827_v51, 0.0  ;;  %v4767_v3 = vsel %vm4749_vm7, %v6008_v4, 0.0  ;;  %v4828_v33 = vmul.f32 %v6008_v4, %v6008_v4  ;;  %v4870_v29 = vsel %vm4749_vm7, %v4829_v45, 0.0 }
 0x21f   : > { %v4768_v36 = vadd.f32 %v4767_v3, %v4766_v40  ;;  %v4867_v11 = vadd.f32 %v4866_v13, %v4865_v19 }
 0x220   : > { %v4868_v42 = vsel %vm4749_vm7, %v4828_v33, 0.0  ;;  %v5977_v38 = vpop.f32.mrb[12].mxu0 }
 0x221   : > { %v4770_v8 = vadd.f32 %v4769_v23, %v4768_v36  ;;  %v6009_v41 = vadd.f32 %v5977_v38, %v8080_v17  ;;  %v4638_v59 = vpop.f32.mrb[13].mxu0  ;;  %v4869_v60 = vadd.f32 %v4868_v42, %v4867_v11  ;;  %v4872_v17 = vsel %vm4749_vm7, %v4830_v24, 0.0 }
 0x222   : > { %v6010_v55 = vadd.f32 %v4638_v59, %v8082_v7  ;;  %v5978_v15 = vpop.f32.mrb[14].mxu0 }
 0x223   : > { %v4772_v21 = vadd.f32 %v4771_v32, %v4770_v8  ;;  %v6011_v18 = vadd.f32 %v5978_v15, %v8084_v39  ;;  %v4641_v37 = vpop.f32.mrb[15].mxu0  ;;  %v4871_v16 = vadd.f32 %v4870_v29, %v4869_v60  ;;  %v4833_v31 = vmul.f32 %v6009_v41, %v6009_v41 }
 0x224   : > { %v4773_v26 = vsel %vm4749_vm7, %v6010_v55, 0.0  ;;  %v4831_v43 = vmul.f32 %v6010_v55, %v6010_v55  ;;  %v6012_v62 = vadd.f32 %v4641_v37, %v8086_v63  ;;  %v4777_v39 = vsel %vm4749_vm7, %v6009_v41, 0.0 }
 0x225   : > { %v4774_v34 = vadd.f32 %v4773_v26, %v4772_v21  ;;  %v4873_v35 = vadd.f32 %v4872_v17, %v4871_v16  ;;  %v4834_v25 = vmul.f32 %v6011_v18, %v6011_v18  ;;  %v4779_v6 = vsel %vm4749_vm7, %v6011_v18, 0.0 }
 0x226   : > { %v4874_v58 = vsel %vm4749_vm7, %v4831_v43, 0.0  ;;  %v4775_v7 = vsel %vm4749_vm7, %v6012_v62, 0.0  ;;  %v4832_v10 = vmul.f32 %v6012_v62, %v6012_v62  ;;  %v4878_v12 = vsel %vm4749_vm7, %v4833_v31, 0.0 }
 0x227   : > { %v4776_v49 = vadd.f32 %v4775_v7, %v4774_v34  ;;  %v4875_v53 = vadd.f32 %v4874_v58, %v4873_v35  ;;  %v5845_v27 = vpop.f32.mrb[16].mxu1  ;;  %v4880_v48 = vsel %vm4749_vm7, %v4834_v25, 0.0 }
 0x228   : > { %v4876_v50 = vsel %vm4749_vm7, %v4832_v10, 0.0  ;;  %v5981_v44 = vpop.f32.mrb[16].mxu0  ;;  %v2617_v52 = vpop.f32.mrb[17].mxu1 }
 0x229   : > { %v4778_v63 = vadd.f32 %v4777_v39, %v4776_v49  ;;  %v6013_v2 = vadd.f32 %v5981_v44, %v5845_v27  ;;  %v4654_v28 = vpop.f32.mrb[17].mxu0  ;;  %v4877_v61 = vadd.f32 %v4876_v50, %v4875_v53  ;;  %v5846_v9 = vpop.f32.mrb[18].mxu1 }
 0x22a   : > { %v6014_v1 = vadd.f32 %v4654_v28, %v2617_v52  ;;  %v5982_v22 = vpop.f32.mrb[18].mxu0  ;;  %v2620_v47 = vpop.f32.mrb[19].mxu1 }
 0x22b   : > { %v4780_v56 = vadd.f32 %v4779_v6, %v4778_v63  ;;  %v6015_v5 = vadd.f32 %v5982_v22, %v5846_v9  ;;  %v4657_v0 = vpop.f32.mrb[19].mxu0  ;;  %v4879_v20 = vadd.f32 %v4878_v12, %v4877_v61  ;;  %v4837_v19 = vmul.f32 %v6013_v2, %v6013_v2 }
 0x22c   : > { %v4781_v14 = vsel %vm4749_vm7, %v6014_v1, 0.0  ;;  %v4835_v54 = vmul.f32 %v6014_v1, %v6014_v1  ;;  %v6016_v46 = vadd.f32 %v4657_v0, %v2620_v47  ;;  %v4785_v3 = vsel %vm4749_vm7, %v6013_v2, 0.0 }
 0x22d   : > { %v4782_v30 = vadd.f32 %v4781_v14, %v4780_v56  ;;  %v4881_v51 = vadd.f32 %v4880_v48, %v4879_v20  ;;  %v4838_v11 = vmul.f32 %v6015_v5, %v6015_v5  ;;  %v4787_v41 = vsel %vm4749_vm7, %v6015_v5, 0.0 }
 0x22e   : > { %v4882_v4 = vsel %vm4749_vm7, %v4835_v54, 0.0  ;;  %v4783_v57 = vsel %vm4749_vm7, %v6016_v46, 0.0  ;;  %v4836_v40 = vmul.f32 %v6016_v46, %v6016_v46  ;;  %v4886_v15 = vsel %vm4749_vm7, %v4837_v19, 0.0 }
 0x22f   : > { %v4784_v13 = vadd.f32 %v4783_v57, %v4782_v30  ;;  %v4883_v33 = vadd.f32 %v4882_v4, %v4881_v51  ;;  %v5849_v36 = vpop.f32.mrb[20].mxu1  ;;  %v4888_v17 = vsel %vm4749_vm7, %v4838_v11, 0.0 }
 0x230   : > { %v4884_v45 = vsel %vm4749_vm7, %v4836_v40, 0.0  ;;  %v5985_v23 = vpop.f32.mrb[20].mxu0  ;;  %v2633_v24 = vpop.f32.mrb[21].mxu1 }
 0x231   : > { %v4786_v42 = vadd.f32 %v4785_v3, %v4784_v13  ;;  %v6017_v38 = vadd.f32 %v5985_v23, %v5849_v36  ;;  %v4670_v8 = vpop.f32.mrb[21].mxu0  ;;  %v4885_v59 = vadd.f32 %v4884_v45, %v4883_v33  ;;  %v5850_v60 = vpop.f32.mrb[22].mxu1 }
 0x232   : > { %v6018_v32 = vadd.f32 %v4670_v8, %v2633_v24  ;;  %v5986_v55 = vpop.f32.mrb[22].mxu0  ;;  %v2636_v18 = vpop.f32.mrb[23].mxu1 }
 0x233   : > { %v4788_v29 = vadd.f32 %v4787_v41, %v4786_v42  ;;  %v6019_v21 = vadd.f32 %v5986_v55, %v5850_v60  ;;  %v4673_v37 = vpop.f32.mrb[23].mxu0  ;;  %v4887_v16 = vadd.f32 %v4886_v15, %v4885_v59  ;;  %v4841_v31 = vmul.f32 %v6017_v38, %v6017_v38 }
 0x234   : > { %v4789_v26 = vsel %vm4749_vm7, %v6018_v32, 0.0  ;;  %v4839_v43 = vmul.f32 %v6018_v32, %v6018_v32  ;;  %v6020_v62 = vadd.f32 %v4673_v37, %v2636_v18  ;;  %v4793_v39 = vsel %vm4749_vm7, %v6017_v38, 0.0 }
 0x235   : > { %v4790_v34 = vadd.f32 %v4789_v26, %v4788_v29  ;;  %v4889_v35 = vadd.f32 %v4888_v17, %v4887_v16  ;;  %v4842_v25 = vmul.f32 %v6019_v21, %v6019_v21  ;;  %v4795_v6 = vsel %vm4749_vm7, %v6019_v21, 0.0 }
 0x236   : > { %v4890_v58 = vsel %vm4749_vm7, %v4839_v43, 0.0  ;;  %v4791_v7 = vsel %vm4749_vm7, %v6020_v62, 0.0  ;;  %v4840_v10 = vmul.f32 %v6020_v62, %v6020_v62  ;;  %v4894_v12 = vsel %vm4749_vm7, %v4841_v31, 0.0 }
 0x237   : > { %v4792_v49 = vadd.f32 %v4791_v7, %v4790_v34  ;;  %v4891_v53 = vadd.f32 %v4890_v58, %v4889_v35  ;;  %v5853_v27 = vpop.f32.mrb[24].mxu1  ;;  %v4896_v48 = vsel %vm4749_vm7, %v4842_v25, 0.0 }
 0x238   : > { %v4892_v50 = vsel %vm4749_vm7, %v4840_v10, 0.0  ;;  %v5989_v44 = vpop.f32.mrb[24].mxu0  ;;  %v2649_v52 = vpop.f32.mrb[25].mxu1 }
 0x239   : > { %v4794_v63 = vadd.f32 %v4793_v39, %v4792_v49  ;;  %v6021_v2 = vadd.f32 %v5989_v44, %v5853_v27  ;;  %v4686_v28 = vpop.f32.mrb[25].mxu0  ;;  %v4893_v61 = vadd.f32 %v4892_v50, %v4891_v53  ;;  %v5854_v9 = vpop.f32.mrb[26].mxu1 }
 0x23a   : > { %v6022_v1 = vadd.f32 %v4686_v28, %v2649_v52  ;;  %v5990_v22 = vpop.f32.mrb[26].mxu0  ;;  %v2652_v47 = vpop.f32.mrb[27].mxu1 }
 0x23b   : > { %v4796_v56 = vadd.f32 %v4795_v6, %v4794_v63  ;;  %v6023_v5 = vadd.f32 %v5990_v22, %v5854_v9  ;;  %v4689_v0 = vpop.f32.mrb[27].mxu0  ;;  %v4895_v20 = vadd.f32 %v4894_v12, %v4893_v61  ;;  %v4845_v19 = vmul.f32 %v6021_v2, %v6021_v2 }
 0x23c   : > { %v4797_v14 = vsel %vm4749_vm7, %v6022_v1, 0.0  ;;  %v4843_v54 = vmul.f32 %v6022_v1, %v6022_v1  ;;  %v6024_v46 = vadd.f32 %v4689_v0, %v2652_v47  ;;  %v4801_v3 = vsel %vm4749_vm7, %v6021_v2, 0.0 }
 0x23d   : > { %v4798_v30 = vadd.f32 %v4797_v14, %v4796_v56  ;;  %v4897_v51 = vadd.f32 %v4896_v48, %v4895_v20  ;;  %v4846_v11 = vmul.f32 %v6023_v5, %v6023_v5  ;;  %v4803_v41 = vsel %vm4749_vm7, %v6023_v5, 0.0 }
 0x23e   : > { %v4898_v4 = vsel %vm4749_vm7, %v4843_v54, 0.0  ;;  %v4799_v57 = vsel %vm4749_vm7, %v6024_v46, 0.0  ;;  %v4844_v40 = vmul.f32 %v6024_v46, %v6024_v46  ;;  %v4902_v15 = vsel %vm4749_vm7, %v4845_v19, 0.0 }
 0x23f   : > { %v4800_v13 = vadd.f32 %v4799_v57, %v4798_v30  ;;  %v4899_v33 = vadd.f32 %v4898_v4, %v4897_v51  ;;  %v5857_v36 = vpop.f32.mrb[28].mxu1  ;;  %v4904_v17 = vsel %vm4749_vm7, %v4846_v11, 0.0 }
 0x240   : > { %v4900_v45 = vsel %vm4749_vm7, %v4844_v40, 0.0  ;;  %v5993_v23 = vpop.f32.mrb[28].mxu0  ;;  %v2665_v24 = vpop.f32.mrb[29].mxu1 }
 0x241   : > { %v4802_v42 = vadd.f32 %v4801_v3, %v4800_v13  ;;  %v6025_v38 = vadd.f32 %v5993_v23, %v5857_v36  ;;  %v4702_v8 = vpop.f32.mrb[29].mxu0  ;;  %v4901_v59 = vadd.f32 %v4900_v45, %v4899_v33  ;;  %v5858_v60 = vpop.f32.mrb[30].mxu1 }
 0x242   : > { %v6026_v32 = vadd.f32 %v4702_v8, %v2665_v24  ;;  %v5994_v55 = vpop.f32.mrb[30].mxu0  ;;  %v2668_v18 = vpop.f32.mrb[31].mxu1 }
 0x243   : > { %v4804_v29 = vadd.f32 %v4803_v41, %v4802_v42  ;;  %v6027_v21 = vadd.f32 %v5994_v55, %v5858_v60  ;;  %v4705_v37 = vpop.f32.mrb[31].mxu0  ;;  %v4903_v16 = vadd.f32 %v4902_v15, %v4901_v59  ;;  %v4849_v31 = vmul.f32 %v6025_v38, %v6025_v38 }
 0x244   : > { %v4805_v26 = vsel %vm4749_vm7, %v6026_v32, 0.0  ;;  %v4847_v43 = vmul.f32 %v6026_v32, %v6026_v32  ;;  %v6028_v62 = vadd.f32 %v4705_v37, %v2668_v18  ;;  %v4809_v39 = vsel %vm4749_vm7, %v6025_v38, 0.0 }
 0x245   : > { %v4806_v34 = vadd.f32 %v4805_v26, %v4804_v29  ;;  %v4905_v35 = vadd.f32 %v4904_v17, %v4903_v16  ;;  %v4850_v27 = vmul.f32 %v6027_v21, %v6027_v21  ;;  %v4811_v25 = vsel %vm4749_vm7, %v6027_v21, 0.0 }
 0x246   : > { %v4906_v58 = vsel %vm4749_vm7, %v4847_v43, 0.0  ;;  %v4807_v7 = vsel %vm4749_vm7, %v6028_v62, 0.0  ;;  %v4848_v10 = vmul.f32 %v6028_v62, %v6028_v62  ;;  %v4910_v2 = vsel %vm4749_vm7, %v4849_v31, 0.0 }
 0x247   : > { %v4808_v49 = vadd.f32 %v4807_v7, %v4806_v34  ;;  %v4907_v53 = vadd.f32 %v4906_v58, %v4905_v35  ;;  %v4912_v6 = vsel %vm4749_vm7, %v4850_v27, 0.0 }
 0x248   : > { %v4908_v50 = vsel %vm4749_vm7, %v4848_v10, 0.0 }
 0x249   : > { %v4810_v44 = vadd.f32 %v4809_v39, %v4808_v49  ;;  %v4909_v63 = vadd.f32 %v4908_v50, %v4907_v53 }
 0x24b   : > { %v4812_v52 = vadd.f32 %v4811_v25, %v4810_v44  ;;  %v4911_v28 = vadd.f32 %v4910_v2, %v4909_v63 }
 0x24d   : > { %v4813_v61 = vrot.slane %v4812_v52, 4  ;;  %v4913_v1 = vadd.f32 %v4912_v6, %v4911_v28 }
 0x24f   : > { %v4814_v9 = vadd.f32 %v4813_v61, %v4812_v52  ;;  %v4914_v22 = vrot.slane %v4913_v1, 4 }
 0x251   : > { %v4815_v12 = vrot.slane %v4814_v9, 2  ;;  %v4915_v56 = vadd.f32 %v4914_v22, %v4913_v1 }
 0x253   : > { %v4816_v5 = vadd.f32 %v4815_v12, %v4814_v9  ;;  %v4916_v47 = vrot.slane %v4915_v56, 2 }
 0x255   : > { %v4817_v0 = vrot.slane %v4816_v5, 1  ;;  %v4917_v20 = vadd.f32 %v4916_v47, %v4915_v56 }
 0x257   : > { %v4918_v14 = vrot.slane %v4917_v20, 1  ;;  %v4818_v54 = vadd.f32 %v4817_v0, %v4816_v5 }
 0x259   : > { %v4919_v46 = vadd.f32 %v4918_v14, %v4917_v20 }
 0x25b   : > { %v4921_v48 = vsel %vm4920_vm8, %v4818_v54, %v4919_v46 }
 0x25c   : > { %4923 = vst.msk [vmem:[%s161_s22] sm:$0x3] %vm4922_vm9, %v4921_v48 }
 0x25d PF: > { %s12_s9 = sadd.s32 1, %s6384_s9  }
 0x25e   : > { %p9_p4 = scmp.ge.s32.totalorder %s12_s9, 4  }
 0x260   :  { %11 = sbr.rel (!%p9_p4) target bundleno = 1 (0x1), region = 63 }

// kernel: dyres_conv_forward.3
= control target key start
LH: loop header
LB: loop body
LE: loop exit
PB: predicated region body
PF: predicated region fallthrough
CT: control target
= control target key end

     0   :  { %s6664_s12 = smov 0   ;;  %s8723_s0 = inlined_call_operand.vmem [shape: bf16[2,18,18,16], index: 0, kind: input, shape index: {}]   ;;  %s8724_s1 = inlined_call_operand.vmem [shape: bf16[2,144,48], index: 1, kind: input, shape index: {}]   ;;  %s8725_s2 = inlined_call_operand.vmem [shape: f32[2,48], index: 2, kind: input, shape index: {}]   ;;  %s8726_s3 = inlined_call_operand.vmem [shape: f32[2,256,16], index: 3, kind: output, shape index: {}]  }
   0x1 LB: > { %s5239_s13 = sadd.s32 4294967295, %s6640_s12   ;;  %p5243_p0 = scmp.ge.s32.totalorder %s6640_s12, 1  ;;  %s6640_s12 = sphi %s6664_s12, %s13_s12  }
   0x2   : > { %p147_p1 = scmp.lt.s32.totalorder %s6640_s12, 3 }
   0x4   : > { %p148_p2 = pnand %p5243_p0, %p147_p1 }
   0x6   : > { %151 = sbr.rel (%p148_p2) target bundleno = 768 (0x300), region = 32 }
   0xd   : > { %p176_p3 = scmp.lt.s32.totalorder %s5239_s13, 1  ;;  %vm242_vm0 = vsmask.f32 3328  ;;  %vm243_vm1 = vsmask.f32 7440  ;;  %vm685_vm3 = vcmask 130048  }
   0xe   : > { %vm6705_vm2 = vmor %vm242_vm0, %vm243_vm1  ;;  %vm1238_vm4 = vcmask 1042432   ;;  %vm1239_vm5 = vcmask 1046532   ;;  %s6642_s26 = smov 96   ;;  %s6643_s27 = smov 112  }
   0xf   : > { %s8806_s13 = smov (!%p176_p3, %s5239_s13), 1  ;;  %vm6928_vm6 = vmor %vm1238_vm4, %vm1239_vm5 }
  0x10   : > { %s6507_s14 = smul.u32 216, %s8806_s13  ;;  %s5789_s28 = sshll.u32 %s8806_s13, 8 }
  0x11   : > { %s6508_s15 = smul.u32 72, %s8806_s13  ;;  %s8611_s4 = scalar_lea.vmem %s8726_s3, %s5789_s28 }
  0x12   : > { %s6679_s18 = scalar_lea.vmem %s8723_s0, %s6507_s14 }
  0x13   : > { %s6684_s21 = scalar_lea.vmem %s8724_s1, %s6508_s15  ;;  %v192_v0 = vld [vmem:[%s6679_s18] sm:$0xf]  ;;  %v193_v1 = vld [vmem:[%s6679_s18 + $0x4] sm:$0xf]  ;;  %v226_v2 = vld [vmem:[%s6679_s18 + $0x8] sm:$0x1] }
  0x14   : > { %v6519_v3 = vld [vmem:[%s6684_s21 + $0x20] sm:$0xff]   ;;  %v246_v4 = vshrl.u32 %v192_v0, 16  ;;  %v6520_v5 = vld [vmem:[%s6684_s21 + $0x8] sm:$0xff]   ;;  %v249_v6 = vshll.u32 %v192_v0, 16  ;;  %v255_v8 = vshll.u32 %v193_v1, 16  ;;  %v259_v9 = vshrl.u32 %v193_v1, 16 }
  0x15   : > { %6079 = vmatprep.subr.bf16.mxu0 %v6519_v3  ;;  %v265_v10 = vshll.u32 %v226_v2, 16  ;;  %v5428_v11 = vld [vmem:[%s6679_s18 + $0xc] sm:$0xf]  ;;  %5943 = vmatprep.subr.bf16.mxu1 %v6520_v5  ;;  %v6693_v13 = vld [vmem:[%s6679_s18 + $0x10] sm:$0xf]  ;;  %v6712_v29 = vld [vmem:[%s6684_s21] sm:$0xff]  }
  0x16   : > { %v248_v7 = vrot.slane %v246_v4, 4  ;;  %6080 = vmatpush3.bf16.msra.mxu0 %v6519_v3  ;;  %v251_v12 = vrot.slane %v249_v6, 5  ;;  %v6696_v14 = vld [vmem:[%s6679_s18 + $0x14] sm:$0x1]  ;;  %5944 = vmatpush3.bf16.msra.mxu1 %v6520_v5  ;;  %v257_v15 = vrot.slane %v255_v8, 5  ;;  %v261_v16 = vrot.slane %v259_v9, 4 }
  0x17   : > { %v2061_v17 = vshrl.u32 %v5428_v11, 16  ;;  %v2064_v19 = vshll.u32 %v5428_v11, 16  ;;  %v2070_v20 = vshll.u32 %v6693_v13, 16  ;;  %v2074_v21 = vshrl.u32 %v6693_v13, 16  ;;  %v6701_v22 = vld [vmem:[%s6684_s21 + $0x28] sm:$0xff]   ;;  %5977 = vmatprep.subr.bf16.mxu1 %v6712_v29 }
  0x18   : > { %v252_v18 = vor.u32 %v251_v12, %v248_v7  ;;  %v262_v24 = vor.u32 %v261_v16, %v257_v15  ;;  %v267_v25 = vrot.slane %v265_v10, 5  ;;  %v2080_v27 = vshll.u32 %v6696_v14, 16  ;;  %v194_v28 = vld [vmem:[%s6679_s18 + $0xc] sm:$0xf]  ;;  %6113 = vmatprep.subr.bf16.mxu0 %v6701_v22  ;;  %v195_v34 = vld [vmem:[%s6679_s18 + $0x10] sm:$0xf] }
  0x19   : > { %v2063_v26 = vrot.slane %v2061_v17, 4  ;;  %v2066_v31 = vrot.slane %v2064_v19, 5  ;;  %v2072_v32 = vrot.slane %v2070_v20, 5  ;;  %v2076_v33 = vrot.slane %v2074_v21, 4  ;;  %v227_v41 = vld [vmem:[%s6679_s18 + $0x14] sm:$0x1] }
  0x1a   : > { %v253_v30 = vrot.slane %v252_v18, 4  ;;  %v263_v35 = vrot.slane %v262_v24, 4  ;;  %v2082_v36 = vrot.slane %v2080_v27, 5  ;;  %v270_v37 = vshrl.u32 %v194_v28, 16  ;;  %v5431_v51 = vld [vmem:[%s6679_s18 + $0x18] sm:$0xf] }
  0x1b   : > { %v2067_v39 = vor.u32 %v2066_v31, %v2063_v26  ;;  %v2077_v40 = vor.u32 %v2076_v33, %v2072_v32  ;;  %v273_v42 = vshll.u32 %v194_v28, 16  ;;  %v279_v45 = vshll.u32 %v195_v34, 16  ;;  %v6725_v56 = vld [vmem:[%s6679_s18 + $0x1c] sm:$0xf]  ;;  %v6734_v61 = vld [vmem:[%s6679_s18 + $0x20] sm:$0x1] }
  0x1c   : > { %v258_v38 = vsel %vm6705_vm2, %v253_v30, %v257_v15  ;;  %v268_v43 = vsel %vm6705_vm2, %v263_v35, %v267_v25  ;;  %v272_v44 = vrot.slane %v270_v37, 4  ;;  %v283_v46 = vshrl.u32 %v195_v34, 16  ;;  %v196_v6 = vld [vmem:[%s6679_s18 + $0x18] sm:$0xf]  ;;  %v197_v11 = vld [vmem:[%s6679_s18 + $0x1c] sm:$0xf] }
  0x1d   : > { %v5248_v47 = vcombine.low %v258_v38, %v268_v43  ;;  %v2068_v48 = vrot.slane %v2067_v39, 4  ;;  %v2078_v49 = vrot.slane %v2077_v40, 4  ;;  %v275_v50 = vrot.slane %v273_v42, 5  ;;  %v228_v18 = vld [vmem:[%s6679_s18 + $0x20] sm:$0x1] }
  0x1e   : > { %v2807_v52 = vrot.slane %v6693_v13, 5  ;;  %v281_v53 = vrot.slane %v279_v45, 5  ;;  %v285_v54 = vrot.slane %v283_v46, 4  ;;  %v289_v55 = vshll.u32 %v227_v41, 16  ;;  %v5434_v25 = vld [vmem:[%s6679_s18 + $0x24] sm:$0xf] }
  0x1f   : > { %5945 = vmatprep.mubr.msk.bf16.mxu1 %vm685_vm3, %v5248_v47  ;;  %v2073_v57 = vsel %vm6705_vm2, %v2068_v48, %v2072_v32  ;;  %v2083_v58 = vsel %vm6705_vm2, %v2078_v49, %v2082_v36  ;;  %v2810_v59 = vrot.slane %v6696_v14, 5  ;;  %v276_v60 = vor.u32 %v275_v50, %v272_v44  ;;  %v6755_v35 = vld [vmem:[%s6679_s18 + $0x28] sm:$0xf]  ;;  %v6759_v39 = vld [vmem:[%s6679_s18 + $0x2c] sm:$0x1] }
  0x20   : > { %v5476_v62 = vcombine.low %v2073_v57, %v2083_v58  ;;  %v286_v63 = vor.u32 %v285_v54, %v281_v53  ;;  %v291_v0 = vrot.slane %v289_v55, 5  ;;  %v2085_v1 = vshrl.u32 %v5431_v51, 16  ;;  %v198_v45 = vld [vmem:[%s6679_s18 + $0x24] sm:$0xf]  ;;  %v6769_v55 = vld [vmem:[%s6684_s21 + $0x30] sm:$0xff]  }
  0x21   : > { %v277_v2 = vrot.slane %v276_v60, 4  ;;  %v2088_v3 = vshll.u32 %v5431_v51, 16  ;;  %v2094_v4 = vshll.u32 %v6725_v56, 16  ;;  %v2098_v5 = vshrl.u32 %v6725_v56, 16  ;;  %v199_v60 = vld [vmem:[%s6679_s18 + $0x28] sm:$0xf] }
  0x22   : > { %6081 = vmatprep.mubr.msk.bf16.mxu0 %vm685_vm3, %v5476_v62  ;;  %v287_v7 = vrot.slane %v286_v63, 4  ;;  %v2087_v8 = vrot.slane %v2085_v1, 4  ;;  %v2104_v9 = vshll.u32 %v6734_v61, 16  ;;  %v2814_v10 = vrot.slane %v6725_v56, 5  ;;  %v6987_v56 = vld [vmem:[%s6679_s18 + $0x88] sm:$0xf] }
  0x23   : > { %v282_v12 = vsel %vm6705_vm2, %v277_v2, %v281_v53  ;;  %v2090_v15 = vrot.slane %v2088_v3, 5  ;;  %v2096_v16 = vrot.slane %v2094_v4, 5  ;;  %v2100_v17 = vrot.slane %v2098_v5, 4  ;;  %v229_v2 = vld [vmem:[%s6679_s18 + $0x2c] sm:$0x1] }
  0x24   : > { %v292_v19 = vsel %vm6705_vm2, %v287_v7, %v291_v0  ;;  %v2106_v20 = vrot.slane %v2104_v9, 5  ;;  %v6750_v21 = vrot.slane %v2814_v10, 4  ;;  %v2817_v24 = vrot.slane %v6734_v61, 5  ;;  %v6532_v9 = vld [vmem:[%s6684_s21 + $0x10] sm:$0xff]  }
  0x25   : > { %v5249_v26 = vcombine.low %v282_v12, %v292_v19  ;;  %v2091_v27 = vor.u32 %v2090_v15, %v2087_v8  ;;  %v2101_v28 = vor.u32 %v2100_v17, %v2096_v16  ;;  %v294_v30 = vshrl.u32 %v196_v6, 16  ;;  %v5437_v8 = vld [vmem:[%s6679_s18 + $0x30] sm:$0xf] }
  0x26   : > { %v297_v31 = vshll.u32 %v196_v6, 16  ;;  %v303_v32 = vshll.u32 %v197_v11, 16  ;;  %v307_v33 = vshrl.u32 %v197_v11, 16  ;;  %v313_v34 = vshll.u32 %v228_v18, 16 }
  0x27   : > { %5946 = vmatmul.mubr.msk.bf16.vlgmr.msra.gmra.mrb[0].mxu1 %vm685_vm3, %v5249_v26  ;;  %v2092_v36 = vrot.slane %v2091_v27, 4  ;;  %v2102_v37 = vrot.slane %v2101_v28, 4  ;;  %v296_v38 = vrot.slane %v294_v30, 4  ;;  %v2109_v40 = vshrl.u32 %v5434_v25, 16 }
  0x28   : > { %v299_v41 = vrot.slane %v297_v31, 5  ;;  %v305_v42 = vrot.slane %v303_v32, 5  ;;  %v309_v43 = vrot.slane %v307_v33, 4  ;;  %v315_v44 = vrot.slane %v313_v34, 5  ;;  %5978 = vmatpush3.bf16.msra.mxu1 %v6712_v29  ;;  %v6791_v33 = vld [vmem:[%s6679_s18 + $0x38] sm:$0x1] }
  0x29   : > { %v2097_v46 = vsel %vm6705_vm2, %v2092_v36, %v2096_v16  ;;  %v2107_v47 = vsel %vm6705_vm2, %v2102_v37, %v2106_v20  ;;  %v2111_v48 = vrot.slane %v2109_v40, 4  ;;  %v2112_v49 = vshll.u32 %v5434_v25, 16  ;;  %v6785_v20 = vld [vmem:[%s6679_s18 + $0x34] sm:$0xf]  ;;  %6011 = vmatprep.subr.bf16.mxu1 %v6532_v9 }
  0x2a   : > { %v5477_v50 = vcombine.low %v2097_v46, %v2107_v47  ;;  %v300_v51 = vor.u32 %v299_v41, %v296_v38  ;;  %v310_v53 = vor.u32 %v309_v43, %v305_v42  ;;  %v2118_v54 = vshll.u32 %v6755_v35, 16  ;;  %v200_v41 = vld [vmem:[%s6679_s18 + $0x30] sm:$0xf]  ;;  %v201_v46 = vld [vmem:[%s6679_s18 + $0x34] sm:$0xf] }
  0x2b   : > { %v2114_v57 = vrot.slane %v2112_v49, 5  ;;  %v2122_v29 = vshrl.u32 %v6755_v35, 16  ;;  %v2128_v58 = vshll.u32 %v6759_v39, 16  ;;  %v318_v62 = vshrl.u32 %v198_v45, 16 }
  0x2c   : > { %6082 = vmatmul.mubr.msk.bf16.vlgmr.msra.gmra.mrb[0].mxu0 %vm685_vm3, %v5477_v50  ;;  %v301_v63 = vrot.slane %v300_v51, 4  ;;  %v311_v0 = vrot.slane %v310_v53, 4  ;;  %v2120_v1 = vrot.slane %v2118_v54, 5  ;;  %v321_v3 = vshll.u32 %v198_v45, 16 }
  0x2d   : > { %6114 = vmatpush3.bf16.msra.mxu0 %v6701_v22  ;;  %v2115_v4 = vor.u32 %v2114_v57, %v2111_v48  ;;  %v2124_v5 = vrot.slane %v2122_v29, 4  ;;  %v2130_v6 = vrot.slane %v2128_v58, 5  ;;  %v320_v7 = vrot.slane %v318_v62, 4  ;;  %v230_v57 = vld [vmem:[%s6679_s18 + $0x38] sm:$0x1] }
  0x2e   : > { %v306_v11 = vsel %vm6705_vm2, %v301_v63, %v305_v42  ;;  %v316_v12 = vsel %vm6705_vm2, %v311_v0, %v315_v44  ;;  %v323_v15 = vrot.slane %v321_v3, 5  ;;  %v327_v16 = vshll.u32 %v199_v60, 16  ;;  %6147 = vmatprep.subr.bf16.mxu0 %v6769_v55  ;;  %v5440_v0 = vld [vmem:[%s6679_s18 + $0x3c] sm:$0xf] }
  0x2f   : > { %v5250_v17 = vcombine.low %v306_v11, %v316_v12  ;;  %v2116_v22 = vrot.slane %v2115_v4, 4  ;;  %v2125_v18 = vor.u32 %v2124_v5, %v2120_v1  ;;  %v331_v19 = vshrl.u32 %v199_v60, 16  ;;  %v6808_v5 = vld [vmem:[%s6679_s18 + $0x40] sm:$0xf] }
  0x30   : > { %v324_v25 = vor.u32 %v323_v15, %v320_v7  ;;  %v329_v26 = vrot.slane %v327_v16, 5  ;;  %v337_v27 = vshll.u32 %v229_v2, 16  ;;  %v2133_v28 = vshrl.u32 %v5437_v8, 16 }
  0x31   : > { %5949 = vmatprep.mubr.msk.bf16.mxu1 %vm685_vm3, %v5250_v17  ;;  %v2121_v30 = vsel %vm6705_vm2, %v2116_v22, %v2120_v1  ;;  %v2126_v31 = vrot.slane %v2125_v18, 4  ;;  %v333_v32 = vrot.slane %v331_v19, 4  ;;  %v2136_v34 = vshll.u32 %v5437_v8, 16  ;;  %v6814_v18 = vld [vmem:[%s6679_s18 + $0x44] sm:$0x1] }
  0x32   : > { %v325_v36 = vrot.slane %v324_v25, 4  ;;  %v339_v37 = vrot.slane %v337_v27, 5  ;;  %v2135_v38 = vrot.slane %v2133_v28, 4  ;;  %v2142_v40 = vshll.u32 %v6785_v20, 16 }
  0x33   : > { %v2131_v42 = vsel %vm6705_vm2, %v2126_v31, %v2130_v6  ;;  %v334_v43 = vor.u32 %v333_v32, %v329_v26  ;;  %v2138_v44 = vrot.slane %v2136_v34, 5  ;;  %v2146_v45 = vshrl.u32 %v6785_v20, 16  ;;  %v203_v32 = vld [vmem:[%s6679_s18 + $0x40] sm:$0xf] }
  0x34   : > { %v5478_v47 = vcombine.low %v2121_v30, %v2131_v42  ;;  %v330_v48 = vsel %vm6705_vm2, %v325_v36, %v329_v26  ;;  %v2144_v49 = vrot.slane %v2142_v40, 5  ;;  %v2152_v50 = vshll.u32 %v6791_v33, 16  ;;  %v202_v26 = vld [vmem:[%s6679_s18 + $0x3c] sm:$0xf] }
  0x35   : > { %v335_v51 = vrot.slane %v334_v43, 4  ;;  %v2139_v53 = vor.u32 %v2138_v44, %v2135_v38  ;;  %v2148_v54 = vrot.slane %v2146_v45, 4  ;;  %v342_v29 = vshrl.u32 %v200_v41, 16 }
  0x36   : > { %6085 = vmatprep.mubr.msk.bf16.mxu0 %vm685_vm3, %v5478_v47  ;;  %v2154_v58 = vrot.slane %v2152_v50, 5  ;;  %v345_v60 = vshll.u32 %v200_v41, 16  ;;  %v351_v62 = vshll.u32 %v201_v46, 16  ;;  %v355_v63 = vshrl.u32 %v201_v46, 16  ;;  %v231_v47 = vld [vmem:[%s6679_s18 + $0x44] sm:$0x1] }
  0x37   : > { %v340_v1 = vsel %vm6705_vm2, %v335_v51, %v339_v37  ;;  %v2140_v2 = vrot.slane %v2139_v53, 4  ;;  %v2149_v3 = vor.u32 %v2148_v54, %v2144_v49  ;;  %v344_v4 = vrot.slane %v342_v29, 4 }
  0x38   : > { %v5251_v6 = vcombine.low %v330_v48, %v340_v1  ;;  %v347_v7 = vrot.slane %v345_v60, 5  ;;  %v353_v8 = vrot.slane %v351_v62, 5  ;;  %v357_v9 = vrot.slane %v355_v63, 4 }
  0x39   : > { %v2145_v11 = vsel %vm6705_vm2, %v2140_v2, %v2144_v49  ;;  %v2150_v12 = vrot.slane %v2149_v3, 4  ;;  %v361_v15 = vshll.u32 %v230_v57, 16  ;;  %v2157_v16 = vshrl.u32 %v5440_v0, 16  ;;  %v5443_v49 = vld [vmem:[%s6679_s18 + $0x48] sm:$0xf] }
  0x3a   : > { %5950 = vmatmul.mubr.msk.bf16.gmra.mrb[4].mxu1 %vm685_vm3, %v5251_v6  ;;  %v348_v17 = vor.u32 %v347_v7, %v344_v4  ;;  %v358_v22 = vor.u32 %v357_v9, %v353_v8  ;;  %v2160_v19 = vshll.u32 %v5440_v0, 16  ;;  %v2166_v25 = vshll.u32 %v6808_v5, 16  ;;  %v6832_v0 = vld [vmem:[%s6679_s18 + $0x4c] sm:$0xf]  ;;  %v6840_v9 = vld [vmem:[%s6679_s18 + $0x48] sm:$0xf] }
  0x3b   : > { %v2155_v27 = vsel %vm6705_vm2, %v2150_v12, %v2154_v58  ;;  %v363_v28 = vrot.slane %v361_v15, 5  ;;  %v2159_v30 = vrot.slane %v2157_v16, 4  ;;  %v2170_v31 = vshrl.u32 %v6808_v5, 16 }
  0x3c   : > { %v5479_v34 = vcombine.low %v2145_v11, %v2155_v27  ;;  %v349_v36 = vrot.slane %v348_v17, 4  ;;  %v359_v37 = vrot.slane %v358_v22, 4  ;;  %v2162_v38 = vrot.slane %v2160_v19, 5 }
  0x3d   : > { %v2168_v40 = vrot.slane %v2166_v25, 5  ;;  %v2172_v41 = vrot.slane %v2170_v31, 4  ;;  %v2176_v42 = vshll.u32 %v6814_v18, 16  ;;  %v366_v43 = vshrl.u32 %v202_v26, 16 }
  0x3e   : > { %6086 = vmatmul.mubr.msk.bf16.gmra.mrb[4].mxu0 %vm685_vm3, %v5479_v34  ;;  %v354_v44 = vsel %vm6705_vm2, %v349_v36, %v353_v8  ;;  %v364_v45 = vsel %vm6705_vm2, %v359_v37, %v363_v28  ;;  %v2163_v46 = vor.u32 %v2162_v38, %v2159_v30  ;;  %v369_v48 = vshll.u32 %v202_v26, 16  ;;  %v6837_v8 = vld [vmem:[%s6679_s18 + $0x50] sm:$0x1]  ;;  %v6848_v30 = vld [vmem:[%s6679_s18 + $0x4c] sm:$0xf] }
  0x3f   : > { %v5252_v50 = vcombine.low %v354_v44, %v364_v45  ;;  %v2173_v51 = vor.u32 %v2172_v41, %v2168_v40  ;;  %v2178_v53 = vrot.slane %v2176_v42, 5  ;;  %v368_v54 = vrot.slane %v366_v43, 4  ;;  %v232_v37 = vld [vmem:[%s6679_s18 + $0x50] sm:$0x1]  ;;  %v5446_v44 = vld [vmem:[%s6679_s18 + $0x54] sm:$0xf] }
  0x40   : > { %v2164_v57 = vrot.slane %v2163_v46, 4  ;;  %v371_v29 = vrot.slane %v369_v48, 5  ;;  %v375_v58 = vshll.u32 %v203_v32, 16  ;;  %v379_v60 = vshrl.u32 %v203_v32, 16 }
  0x41   : > { %5953 = vmatprep.mubr.msk.bf16.mxu1 %vm685_vm3, %v5252_v50  ;;  %v2174_v62 = vrot.slane %v2173_v51, 4  ;;  %v385_v63 = vshll.u32 %v231_v47, 16  ;;  %v2181_v1 = vshrl.u32 %v5443_v49, 16  ;;  %v2184_v2 = vshll.u32 %v5443_v49, 16  ;;  %v6862_v49 = vld [vmem:[%s6679_s18 + $0x58] sm:$0xf] }
  0x42   : > { %v2169_v3 = vsel %vm6705_vm2, %v2164_v57, %v2168_v40  ;;  %v372_v4 = vor.u32 %v371_v29, %v368_v54  ;;  %v377_v6 = vrot.slane %v375_v58, 5  ;;  %v381_v7 = vrot.slane %v379_v60, 4  ;;  %v6867_v60 = vld [vmem:[%s6679_s18 + $0x5c] sm:$0x1] }
  0x43   : > { %v2179_v11 = vsel %vm6705_vm2, %v2174_v62, %v2178_v53  ;;  %v387_v12 = vrot.slane %v385_v63, 5  ;;  %v2183_v15 = vrot.slane %v2181_v1, 4  ;;  %v2186_v16 = vrot.slane %v2184_v2, 5 }
  0x44   : > { %v5480_v17 = vcombine.low %v2169_v3, %v2179_v11  ;;  %v373_v22 = vrot.slane %v372_v4, 4  ;;  %v382_v19 = vor.u32 %v381_v7, %v377_v6  ;;  %v2190_v25 = vshll.u32 %v6832_v0, 16 }
  0x45   : > { %v2187_v26 = vor.u32 %v2186_v16, %v2183_v15  ;;  %v2194_v27 = vshrl.u32 %v6832_v0, 16  ;;  %v2200_v28 = vshll.u32 %v6837_v8, 16  ;;  %v390_v31 = vshrl.u32 %v6840_v9, 16 }
  0x46   : > { %6089 = vmatprep.mubr.msk.bf16.mxu0 %vm685_vm3, %v5480_v17  ;;  %v378_v32 = vsel %vm6705_vm2, %v373_v22, %v377_v6  ;;  %v383_v34 = vrot.slane %v382_v19, 4  ;;  %v2192_v36 = vrot.slane %v2190_v25, 5  ;;  %v393_v38 = vshll.u32 %v6840_v9, 16  ;;  %v6879_v19 = vld [vmem:[%s6679_s18 + $0x58] sm:$0xf] }
  0x47   : > { %v2188_v40 = vrot.slane %v2187_v26, 4  ;;  %v2196_v41 = vrot.slane %v2194_v27, 4  ;;  %v2202_v42 = vrot.slane %v2200_v28, 5  ;;  %v392_v43 = vrot.slane %v390_v31, 4 }
  0x48   : > { %v388_v45 = vsel %vm6705_vm2, %v383_v34, %v387_v12  ;;  %v395_v46 = vrot.slane %v393_v38, 5  ;;  %v399_v47 = vshll.u32 %v6848_v30, 16  ;;  %v403_v48 = vshrl.u32 %v6848_v30, 16  ;;  %v6873_v12 = vld [vmem:[%s6679_s18 + $0x54] sm:$0xf] }
  0x49   : > { %v5253_v50 = vcombine.low %v378_v32, %v388_v45  ;;  %v2193_v51 = vsel %vm6705_vm2, %v2188_v40, %v2192_v36  ;;  %v2197_v53 = vor.u32 %v2196_v41, %v2192_v36  ;;  %v409_v54 = vshll.u32 %v232_v37, 16  ;;  %v233_v34 = vld [vmem:[%s6679_s18 + $0x5c] sm:$0x1] }
  0x4a   : > { %v396_v57 = vor.u32 %v395_v46, %v392_v43  ;;  %v401_v29 = vrot.slane %v399_v47, 5  ;;  %v405_v58 = vrot.slane %v403_v48, 4  ;;  %v2205_v62 = vshrl.u32 %v5446_v44, 16  ;;  %v5449_v43 = vld [vmem:[%s6679_s18 + $0x60] sm:$0xf] }
  0x4b   : > { %5954 = vmatmul.mubr.msk.bf16.gmra.mrb[8].mxu1 %vm685_vm3, %v5253_v50  ;;  %v2198_v63 = vrot.slane %v2197_v53, 4  ;;  %v411_v1 = vrot.slane %v409_v54, 5  ;;  %v2208_v2 = vshll.u32 %v5446_v44, 16  ;;  %v2214_v3 = vshll.u32 %v6862_v49, 16  ;;  %v6893_v48 = vld [vmem:[%s6679_s18 + $0x64] sm:$0xf] }
  0x4c   : > { %v397_v4 = vrot.slane %v396_v57, 4  ;;  %v406_v6 = vor.u32 %v405_v58, %v401_v29  ;;  %v2207_v7 = vrot.slane %v2205_v62, 4  ;;  %v2218_v11 = vshrl.u32 %v6862_v49, 16  ;;  %v6899_v58 = vld [vmem:[%s6679_s18 + $0x68] sm:$0x1] }
  0x4d   : > { %v2203_v15 = vsel %vm6705_vm2, %v2198_v63, %v2202_v42  ;;  %v2210_v16 = vrot.slane %v2208_v2, 5  ;;  %v2216_v17 = vrot.slane %v2214_v3, 5  ;;  %v2224_v22 = vshll.u32 %v6867_v60, 16 }
  0x4e   : > { %v5481_v25 = vcombine.low %v2193_v51, %v2203_v15  ;;  %v402_v26 = vsel %vm6705_vm2, %v397_v4, %v401_v29  ;;  %v407_v27 = vrot.slane %v406_v6, 4  ;;  %v2220_v28 = vrot.slane %v2218_v11, 4  ;;  %v6905_v6 = vld [vmem:[%s6679_s18 + $0x60] sm:$0xf] }
  0x4f   : > { %v2211_v31 = vor.u32 %v2210_v16, %v2207_v7  ;;  %v2226_v32 = vrot.slane %v2224_v22, 5  ;;  %v414_v36 = vshrl.u32 %v6873_v12, 16  ;;  %v417_v37 = vshll.u32 %v6873_v12, 16 }
  0x50   : > { %6090 = vmatmul.mubr.msk.bf16.gmra.mrb[8].mxu0 %vm685_vm3, %v5481_v25  ;;  %v412_v38 = vsel %vm6705_vm2, %v407_v27, %v411_v1  ;;  %v2221_v40 = vor.u32 %v2220_v28, %v2216_v17  ;;  %v423_v41 = vshll.u32 %v6879_v19, 16  ;;  %v427_v42 = vshrl.u32 %v6879_v19, 16 }
  0x51   : > { %v5254_v44 = vcombine.low %v402_v26, %v412_v38  ;;  %v2212_v45 = vrot.slane %v2211_v31, 4  ;;  %v416_v46 = vrot.slane %v414_v36, 4  ;;  %v419_v47 = vrot.slane %v417_v37, 5 }
  0x52   : > { %v2222_v50 = vrot.slane %v2221_v40, 4  ;;  %v425_v51 = vrot.slane %v423_v41, 5  ;;  %v429_v53 = vrot.slane %v427_v42, 4  ;;  %v433_v54 = vshll.u32 %v233_v34, 16  ;;  %v5509_v42 = vld [vmem:[%s6679_s18 + $0xc] sm:$0xe] }
  0x53   : > { %5957 = vmatprep.mubr.msk.bf16.mxu1 %vm685_vm3, %v5254_v44  ;;  %v2217_v57 = vsel %vm6705_vm2, %v2212_v45, %v2216_v17  ;;  %v420_v29 = vor.u32 %v419_v47, %v416_v46  ;;  %v2229_v62 = vshrl.u32 %v5449_v43, 16  ;;  %v2232_v63 = vshll.u32 %v5449_v43, 16  ;;  %v6908_v17 = vld [vmem:[%s6679_s18 + $0x64] sm:$0xf]  ;;  %v6923_v47 = vld [vmem:[%s6679_s18 + $0x6c] sm:$0xf] }
  0x54   : > { %v2227_v1 = vsel %vm6705_vm2, %v2222_v50, %v2226_v32  ;;  %v430_v2 = vor.u32 %v429_v53, %v425_v51  ;;  %v435_v3 = vrot.slane %v433_v54, 5  ;;  %v2238_v4 = vshll.u32 %v6893_v48, 16  ;;  %v234_v32 = vld [vmem:[%s6679_s18 + $0x68] sm:$0x1] }
  0x55   : > { %v5482_v7 = vcombine.low %v2217_v57, %v2227_v1  ;;  %v421_v11 = vrot.slane %v420_v29, 4  ;;  %v2231_v15 = vrot.slane %v2229_v62, 4  ;;  %v2234_v16 = vrot.slane %v2232_v63, 5 }
  0x56   : > { %v431_v22 = vrot.slane %v430_v2, 4  ;;  %v2240_v25 = vrot.slane %v2238_v4, 5  ;;  %v2242_v26 = vshrl.u32 %v6893_v48, 16  ;;  %v2248_v27 = vshll.u32 %v6899_v58, 16 }
  0x57   : > { %6093 = vmatprep.mubr.msk.bf16.mxu0 %vm685_vm3, %v5482_v7  ;;  %v426_v28 = vsel %vm6705_vm2, %v421_v11, %v425_v51  ;;  %v2235_v31 = vor.u32 %v2234_v16, %v2231_v15  ;;  %v438_v34 = vshrl.u32 %v6905_v6, 16  ;;  %v441_v36 = vshll.u32 %v6905_v6, 16  ;;  %v6938_v7 = vld [vmem:[%s6679_s18 + $0x70] sm:$0xf] }
  0x58   : > { %v436_v37 = vsel %vm6705_vm2, %v431_v22, %v435_v3  ;;  %v2244_v38 = vrot.slane %v2242_v26, 4  ;;  %v2250_v40 = vrot.slane %v2248_v27, 5  ;;  %v447_v41 = vshll.u32 %v6908_v17, 16  ;;  %v5510_v27 = vld [vmem:[%s6679_s18 + $0x18] sm:$0xe] }
  0x59   : > { %v5255_v43 = vcombine.low %v426_v28, %v436_v37  ;;  %v2236_v44 = vrot.slane %v2235_v31, 4  ;;  %v440_v45 = vrot.slane %v438_v34, 4  ;;  %v443_v46 = vrot.slane %v441_v36, 5  ;;  %v6955_v34 = vld [vmem:[%s6679_s18 + $0x78] sm:$0xf] }
  0x5a   : > { %v2245_v50 = vor.u32 %v2244_v38, %v2240_v25  ;;  %v449_v51 = vrot.slane %v447_v41, 5  ;;  %v451_v53 = vshrl.u32 %v6908_v17, 16  ;;  %v457_v54 = vshll.u32 %v234_v32, 16 }
  0x5b   : > { %5958 = vmatmul.mubr.msk.bf16.gmra.mrb[12].mxu1 %vm685_vm3, %v5255_v43  ;;  %v2241_v29 = vsel %vm6705_vm2, %v2236_v44, %v2240_v25  ;;  %v444_v62 = vor.u32 %v443_v46, %v440_v45  ;;  %v5525_v63 = vrot.slane %v5509_v42, 9  ;;  %v2809_v1 = vrot.slane %v2807_v52, 4  ;;  %v235_v25 = vld [vmem:[%s6679_s18 + $0x74] sm:$0x1]  ;;  %v6968_v45 = vld [vmem:[%s6679_s18 + $0x7c] sm:$0xf] }
  0x5c   : > { %v2246_v2 = vrot.slane %v2245_v50, 4  ;;  %v453_v3 = vrot.slane %v451_v53, 4  ;;  %v459_v4 = vrot.slane %v457_v54, 5  ;;  %v462_v11 = vshrl.u32 %v6923_v47, 16  ;;  %v236_v46 = vld [vmem:[%s6679_s18 + $0x80] sm:$0x1] }
  0x5d   : > { %v445_v15 = vrot.slane %v444_v62, 4  ;;  %v2808_v16 = vsel %vm6928_vm6, %v5525_v63, %v2807_v52  ;;  %v2811_v22 = vsel %vm6928_vm6, %v2809_v1, %v2810_v59  ;;  %v465_v26 = vshll.u32 %v6923_v47, 16  ;;  %v6981_v1 = vld [vmem:[%s6679_s18 + $0x84] sm:$0xf] }
  0x5e   : > { %v2251_v28 = vsel %vm6705_vm2, %v2246_v2, %v2250_v40  ;;  %v454_v31 = vor.u32 %v453_v3, %v449_v51  ;;  %v5541_v32 = vcombine.low %v2808_v16, %v2811_v22  ;;  %v464_v13 = vrot.slane %v462_v11, 4 }
  0x5f   : > { %v5483_v52 = vcombine.low %v2241_v29, %v2251_v28  ;;  %v450_v14 = vsel %vm6705_vm2, %v445_v15, %v449_v51  ;;  %v467_v36 = vrot.slane %v465_v26, 5  ;;  %v471_v59 = vshll.u32 %v6938_v7, 16  ;;  %v5511_v29 = vld [vmem:[%s6679_s18 + $0x24] sm:$0xe] }
  0x60   : > { %v455_v37 = vrot.slane %v454_v31, 4  ;;  %v475_v38 = vshrl.u32 %v6938_v7, 16  ;;  %v481_v41 = vshll.u32 %v235_v25, 16  ;;  %v5526_v40 = vrot.slane %v5510_v27, 9  ;;  %v237_v31 = vld [vmem:[%s6679_s18 + $0x8c] sm:$0x1] }
  0x61   : > { %6094 = vmatmul.mubr.msk.bf16.gmra.mrb[12].mxu0 %vm685_vm3, %v5483_v52  ;;  %v468_v42 = vor.u32 %v467_v36, %v464_v13  ;;  %v473_v43 = vrot.slane %v471_v59, 5  ;;  %v2818_v44 = vsel %vm6928_vm6, %v6750_v21, %v2817_v24  ;;  %v486_v50 = vshrl.u32 %v6955_v34, 16  ;;  %v5512_v36 = vld [vmem:[%s6679_s18 + $0x30] sm:$0xe]  ;;  %v6999_v59 = vld [vmem:[%s6684_s21 + $0x38] sm:$0xff]  }
  0x62   : > { %v460_v51 = vsel %vm6705_vm2, %v455_v37, %v459_v4  ;;  %6115 = vmatprep.mubr.msk.bf16.mxu0 %vm685_vm3, %v5541_v32  ;;  %v477_v53 = vrot.slane %v475_v38, 4  ;;  %v483_v54 = vrot.slane %v481_v41, 5  ;;  %v2815_v61 = vsel %vm6928_vm6, %v5526_v40, %v2814_v10 }
  0x63   : > { %v5256_v21 = vcombine.low %v450_v14, %v460_v51  ;;  %v469_v24 = vrot.slane %v468_v42, 4  ;;  %v5542_v62 = vcombine.low %v2815_v61, %v2818_v44  ;;  %v488_v63 = vrot.slane %v486_v50, 4  ;;  %v7010_v44 = vld [vmem:[%s6679_s18 + $0x90] sm:$0xf] }
  0x64   : > { %v478_v2 = vor.u32 %v477_v53, %v473_v43  ;;  %v489_v3 = vshll.u32 %v6955_v34, 16  ;;  %v495_v4 = vshll.u32 %v6968_v45, 16  ;;  %v499_v11 = vshrl.u32 %v6968_v45, 16 }
  0x65   : > { %5961 = vmatprep.mubr.msk.bf16.mxu1 %vm685_vm3, %v5256_v21  ;;  %v474_v10 = vsel %vm6705_vm2, %v469_v24, %v473_v43  ;;  %v505_v15 = vshll.u32 %v236_v46, 16  ;;  %v5527_v16 = vrot.slane %v5511_v29, 9  ;;  %v2821_v22 = vrot.slane %v6755_v35, 5 }
  0x66   : > { %v479_v25 = vrot.slane %v478_v2, 4  ;;  %v491_v26 = vrot.slane %v489_v3, 5  ;;  %v497_v27 = vrot.slane %v495_v4, 5  ;;  %v501_v28 = vrot.slane %v499_v11, 4 }
  0x67   : > { %v507_v32 = vrot.slane %v505_v15, 5  ;;  %v2822_v13 = vsel %vm6928_vm6, %v5527_v16, %v2821_v22  ;;  %v2823_v52 = vrot.slane %v2821_v22, 4  ;;  %v2824_v14 = vrot.slane %v6759_v39, 5  ;;  %v5513_v16 = vld [vmem:[%s6679_s18 + $0x3c] sm:$0xe] }
  0x68   : > { %v484_v35 = vsel %vm6705_vm2, %v479_v25, %v483_v54  ;;  %v492_v37 = vor.u32 %v491_v26, %v488_v63  ;;  %v502_v38 = vor.u32 %v501_v28, %v497_v27  ;;  %v510_v41 = vshrl.u32 %v6981_v1, 16  ;;  %v7014_v54 = vld [vmem:[%s6679_s18 + $0x94] sm:$0xf] }
  0x69   : > { %v5257_v40 = vcombine.low %v474_v10, %v484_v35  ;;  %6116 = vmatmul.mubr.msk.bf16.vlgmr.msra.gmra.mrb[0].mxu0 %vm685_vm3, %v5542_v62  ;;  %v2825_v42 = vsel %vm6928_vm6, %v2823_v52, %v2824_v14  ;;  %v513_v39 = vshll.u32 %v6981_v1, 16  ;;  %v519_v43 = vshll.u32 %v6987_v56, 16  ;;  %v238_v62 = vld [vmem:[%s6679_s18 + $0x98] sm:$0x1] }
  0x6a   : > { %6148 = vmatpush3.bf16.msra.mxu0 %v6769_v55  ;;  %v493_v46 = vrot.slane %v492_v37, 4  ;;  %v503_v50 = vrot.slane %v502_v38, 4  ;;  %v5543_v51 = vcombine.low %v2822_v13, %v2825_v42  ;;  %v512_v53 = vrot.slane %v510_v41, 4  ;;  %v7035_v13 = vld [vmem:[%s6679_s18 + $0x9c] sm:$0xf] }
  0x6b   : > { %5962 = vmatmul.mubr.msk.bf16.gmra.mrb[16].mxu1 %vm685_vm3, %v5257_v40  ;;  %v515_v61 = vrot.slane %v513_v39, 5  ;;  %v521_v29 = vrot.slane %v519_v43, 5  ;;  %v523_v21 = vshrl.u32 %v6987_v56, 16  ;;  %v529_v24 = vshll.u32 %v237_v31, 16  ;;  %6181 = vmatprep.subr.bf16.mxu0 %v6999_v59  ;;  %v7043_v40 = vld [vmem:[%s6679_s18 + $0xa0] sm:$0xf] }
  0x6c   : > { %v498_v55 = vsel %vm6705_vm2, %v493_v46, %v497_v27  ;;  %v508_v63 = vsel %vm6705_vm2, %v503_v50, %v507_v32  ;;  %6119 = vmatprep.mubr.msk.bf16.mxu0 %vm685_vm3, %v5543_v51  ;;  %v5528_v2 = vrot.slane %v5512_v36, 9  ;;  %v2828_v3 = vrot.slane %v6785_v20, 5 }
  0x6d   : > { %v5258_v4 = vcombine.low %v498_v55, %v508_v63  ;;  %v516_v11 = vor.u32 %v515_v61, %v512_v53  ;;  %v525_v10 = vrot.slane %v523_v21, 4  ;;  %v531_v15 = vrot.slane %v529_v24, 5  ;;  %v5514_v63 = vld [vmem:[%s6679_s18 + $0x48] sm:$0xe] }
  0x6e   : > { %v2829_v22 = vsel %vm6928_vm6, %v5528_v2, %v2828_v3  ;;  %v2830_v25 = vrot.slane %v2828_v3, 4  ;;  %v2831_v26 = vrot.slane %v6791_v33, 5  ;;  %v534_v27 = vshrl.u32 %v7010_v44, 16 }
  0x6f   : > { %5965 = vmatprep.mubr.msk.bf16.mxu1 %vm685_vm3, %v5258_v4  ;;  %v517_v28 = vrot.slane %v516_v11, 4  ;;  %v526_v31 = vor.u32 %v525_v10, %v521_v29  ;;  %v537_v20 = vshll.u32 %v7010_v44, 16  ;;  %v543_v32 = vshll.u32 %v7014_v54, 16 }
  0x70   : > { %v2832_v52 = vsel %vm6928_vm6, %v2830_v25, %v2831_v26  ;;  %v536_v14 = vrot.slane %v534_v27, 4  ;;  %v547_v36 = vshrl.u32 %v7014_v54, 16  ;;  %v553_v33 = vshll.u32 %v238_v62, 16 }
  0x71   : > { %v522_v35 = vsel %vm6705_vm2, %v517_v28, %v521_v29  ;;  %v527_v37 = vrot.slane %v526_v31, 4  ;;  %v5544_v38 = vcombine.low %v2829_v22, %v2832_v52  ;;  %v539_v41 = vrot.slane %v537_v20, 5  ;;  %v239_v29 = vld [vmem:[%s6679_s18 + $0xa4] sm:$0x1]  ;;  %v7067_v28 = vld [vmem:[%s6679_s18 + $0xac] sm:$0xf] }
  0x72   : > { %v545_v42 = vrot.slane %v543_v32, 5  ;;  %v549_v39 = vrot.slane %v547_v36, 4  ;;  %v555_v43 = vrot.slane %v553_v33, 5  ;;  %v5529_v46 = vrot.slane %v5513_v16, 9 }
  0x73   : > { %v532_v50 = vsel %vm6705_vm2, %v527_v37, %v531_v15  ;;  %6120 = vmatmul.mubr.msk.bf16.gmra.mrb[4].mxu0 %vm685_vm3, %v5544_v38  ;;  %v540_v51 = vor.u32 %v539_v41, %v536_v14  ;;  %v2835_v53 = vrot.slane %v6808_v5, 5  ;;  %v2838_v61 = vrot.slane %v6814_v18, 5  ;;  %v7058_v5 = vld [vmem:[%s6679_s18 + $0xa8] sm:$0xf]  ;;  %v240_v14 = vld [vmem:[%s6679_s18 + $0xb0] sm:$0x1] }
  0x74   : > { %v5259_v21 = vcombine.low %v522_v35, %v532_v50  ;;  %v550_v24 = vor.u32 %v549_v39, %v545_v42  ;;  %v558_v62 = vshrl.u32 %v7035_v13, 16  ;;  %v561_v55 = vshll.u32 %v7035_v13, 16  ;;  %v5515_v38 = vld [vmem:[%s6679_s18 + $0x54] sm:$0xe] }
  0x75   : > { %v541_v2 = vrot.slane %v540_v51, 4  ;;  %v2836_v3 = vsel %vm6928_vm6, %v5529_v46, %v2835_v53  ;;  %v2837_v4 = vrot.slane %v2835_v53, 4  ;;  %v567_v11 = vshll.u32 %v7043_v40, 16  ;;  %v7083_v53 = vld [vmem:[%s6679_s18 + $0xb4] sm:$0xf] }
  0x76   : > { %5966 = vmatmul.mubr.msk.bf16.gmra.mrb[20].mxu1 %vm685_vm3, %v5259_v21  ;;  %v551_v18 = vrot.slane %v550_v24, 4  ;;  %v560_v10 = vrot.slane %v558_v62, 4  ;;  %v563_v15 = vrot.slane %v561_v55, 5  ;;  %v571_v16 = vshrl.u32 %v7043_v40, 16 }
  0x77   : > { %v546_v22 = vsel %vm6705_vm2, %v541_v2, %v545_v42  ;;  %v2839_v25 = vsel %vm6928_vm6, %v2837_v4, %v2838_v61  ;;  %v569_v26 = vrot.slane %v567_v11, 5  ;;  %v577_v27 = vshll.u32 %v239_v29, 16 }
  0x78   : > { %v556_v31 = vsel %vm6705_vm2, %v551_v18, %v555_v43  ;;  %v5545_v20 = vcombine.low %v2836_v3, %v2839_v25  ;;  %v564_v32 = vor.u32 %v563_v15, %v560_v10  ;;  %v573_v52 = vrot.slane %v571_v16, 4  ;;  %v7093_v18 = vld [vmem:[%s6679_s18 + $0xb8] sm:$0xf]  ;;  %v241_v25 = vld [vmem:[%s6679_s18 + $0xbc] sm:$0x1] }
  0x79   : > { %v5260_v36 = vcombine.low %v546_v22, %v556_v31  ;;  %v579_v33 = vrot.slane %v577_v27, 5  ;;  %v5530_v35 = vrot.slane %v5514_v63, 9  ;;  %v2842_v37 = vrot.slane %v6832_v0, 5 }
  0x7a   : > { %6123 = vmatprep.mubr.msk.bf16.mxu0 %vm685_vm3, %v5545_v20  ;;  %v565_v41 = vrot.slane %v564_v32, 4  ;;  %v574_v42 = vor.u32 %v573_v52, %v569_v26  ;;  %v2845_v39 = vrot.slane %v6837_v8, 5  ;;  %v582_v46 = vshrl.u32 %v7058_v5, 16  ;;  %v5516_v32 = vld [vmem:[%s6679_s18 + $0x60] sm:$0xe] }
  0x7b   : > { %5969 = vmatprep.mubr.msk.bf16.mxu1 %vm685_vm3, %v5260_v36  ;;  %v2843_v43 = vsel %vm6928_vm6, %v5530_v35, %v2842_v37  ;;  %v2844_v50 = vrot.slane %v2842_v37, 4  ;;  %v585_v51 = vshll.u32 %v7058_v5, 16  ;;  %v591_v0 = vshll.u32 %v7067_v28, 16 }
  0x7c   : > { %v570_v61 = vsel %vm6705_vm2, %v565_v41, %v569_v26  ;;  %v575_v29 = vrot.slane %v574_v42, 4  ;;  %v584_v8 = vrot.slane %v582_v46, 4  ;;  %v595_v21 = vshrl.u32 %v7067_v28, 16  ;;  %v5517_v46 = vld [vmem:[%s6679_s18 + $0x6c] sm:$0xe] }
  0x7d   : > { %v2846_v24 = vsel %vm6928_vm6, %v2844_v50, %v2845_v39  ;;  %v587_v62 = vrot.slane %v585_v51, 5  ;;  %v593_v55 = vrot.slane %v591_v0, 5  ;;  %v601_v63 = vshll.u32 %v240_v14, 16 }
  0x7e   : > { %v580_v2 = vsel %vm6705_vm2, %v575_v29, %v579_v33  ;;  %v5546_v3 = vcombine.low %v2843_v43, %v2846_v24  ;;  %v597_v4 = vrot.slane %v595_v21, 4  ;;  %v5531_v11 = vrot.slane %v5515_v38, 9  ;;  %v5454_v29 = vld [vmem:[%s6679_s18 + $0x74] sm:$0x1] }
  0x7f   : > { %v5261_v10 = vcombine.low %v570_v61, %v580_v2  ;;  %v588_v15 = vor.u32 %v587_v62, %v584_v8  ;;  %v603_v16 = vrot.slane %v601_v63, 5  ;;  %v2849_v22 = vrot.slane %v6862_v49, 5  ;;  %v5453_v61 = vld [vmem:[%s6679_s18 + $0x70] sm:$0xf] }
  0x80   : > { %6124 = vmatmul.mubr.msk.bf16.gmra.mrb[8].mxu0 %vm685_vm3, %v5546_v3  ;;  %v598_v26 = vor.u32 %v597_v4, %v593_v55  ;;  %v2852_v27 = vrot.slane %v6867_v60, 5  ;;  %v606_v31 = vshrl.u32 %v7083_v53, 16  ;;  %v609_v20 = vshll.u32 %v7083_v53, 16 }
  0x81   : > { %5970 = vmatmul.mubr.msk.bf16.gmra.mrb[24].mxu1 %vm685_vm3, %v5261_v10  ;;  %v589_v52 = vrot.slane %v588_v15, 4  ;;  %v2850_v14 = vsel %vm6928_vm6, %v5531_v11, %v2849_v22  ;;  %v2851_v49 = vrot.slane %v2849_v22, 4  ;;  %v615_v36 = vshll.u32 %v7093_v18, 16  ;;  %v5518_v22 = vld [vmem:[%s6679_s18 + $0x78] sm:$0xe] }
  0x82   : > { %v599_v33 = vrot.slane %v598_v26, 4  ;;  %v608_v35 = vrot.slane %v606_v31, 4  ;;  %v611_v60 = vrot.slane %v609_v20, 5  ;;  %v619_v37 = vshrl.u32 %v7093_v18, 16  ;;  %v7133_v31 = vld [vmem:[%s6679_s18 + $0x80] sm:$0x1] }
  0x83   : > { %v594_v38 = vsel %vm6705_vm2, %v589_v52, %v593_v55  ;;  %v2853_v41 = vsel %vm6928_vm6, %v2851_v49, %v2852_v27  ;;  %v617_v42 = vrot.slane %v615_v36, 5  ;;  %v625_v39 = vshll.u32 %v241_v25, 16  ;;  %v7130_v27 = vld [vmem:[%s6679_s18 + $0x7c] sm:$0xf]  ;;  %v6576_v52 = vld [vmem:[%s6679_s18] sm:$0xf] }
  0x84   : > { %v604_v43 = vsel %vm6705_vm2, %v599_v33, %v603_v16  ;;  %v5547_v50 = vcombine.low %v2850_v14, %v2853_v41  ;;  %v612_v51 = vor.u32 %v611_v60, %v608_v35  ;;  %v621_v0 = vrot.slane %v619_v37, 4  ;;  %v7139_v14 = vld [vmem:[%s6679_s18 + $0x4] sm:$0xf]  ;;  %v5459_v36 = vld [vmem:[%s6679_s18 + $0x88] sm:$0xf] }
  0x85   : > { %v5262_v8 = vcombine.low %v594_v38, %v604_v43  ;;  %v627_v21 = vrot.slane %v625_v39, 5  ;;  %v5532_v24 = vrot.slane %v5516_v32, 9  ;;  %v2856_v62 = vrot.slane %v6893_v48, 5  ;;  %v5519_v33 = vld [vmem:[%s6679_s18 + $0x84] sm:$0xe] }
  0x86   : > { %6127 = vmatprep.mubr.msk.bf16.mxu0 %vm685_vm3, %v5547_v50  ;;  %v613_v55 = vrot.slane %v612_v51, 4  ;;  %v622_v63 = vor.u32 %v621_v0, %v617_v42  ;;  %v2859_v2 = vrot.slane %v6899_v58, 5  ;;  %v5533_v3 = vrot.slane %v5517_v46, 9  ;;  %v5460_v38 = vld [vmem:[%s6679_s18 + $0x8c] sm:$0x1] }
  0x87   : > { %5973 = vmatprep.mubr.msk.bf16.mxu1 %vm685_vm3, %v5262_v8  ;;  %v2857_v4 = vsel %vm6928_vm6, %v5532_v24, %v2856_v62  ;;  %v2858_v11 = vrot.slane %v2856_v62, 4  ;;  %v2863_v10 = vrot.slane %v5453_v61, 5  ;;  %v2866_v48 = vrot.slane %v5454_v29, 5  ;;  %v5462_v50 = vld [vmem:[%s6679_s18 + $0x94] sm:$0xf] }
  0x88   : > { %v618_v15 = vsel %vm6705_vm2, %v613_v55, %v617_v42  ;;  %v623_v16 = vrot.slane %v622_v63, 4  ;;  %v5281_v49 = vcombine.low %v6576_v52, %v7139_v14  ;;  %v5534_v37 = vrot.slane %v5518_v22, 9  ;;  %v5520_v51 = vld [vmem:[%s6679_s18 + $0x90] sm:$0xe]  ;;  %v5463_v8 = vld [vmem:[%s6679_s18 + $0x98] sm:$0x1] }
  0x89   : > { %v2860_v58 = vsel %vm6928_vm6, %v2858_v11, %v2859_v2  ;;  %v2864_v25 = vsel %vm6928_vm6, %v5533_v3, %v2863_v10  ;;  %v2865_v26 = vrot.slane %v2863_v10, 4  ;;  %v2870_v42 = vrot.slane %v7130_v27, 5  ;;  %v6578_v24 = vld [vmem:[%s6679_s18 + $0xc] sm:$0xf]  ;;  %v7161_v62 = vld [vmem:[%s6679_s18 + $0x10] sm:$0xf] }
  0x8a   : > { %v628_v20 = vsel %vm6705_vm2, %v623_v16, %v627_v21  ;;  %v5548_v32 = vcombine.low %v2857_v4, %v2860_v58  ;;  %v2873_v39 = vrot.slane %v7133_v31, 5  ;;  %v5535_v46 = vrot.slane %v5519_v33, 9  ;;  %v5465_v21 = vld [vmem:[%s6679_s18 + $0xa0] sm:$0xf]  ;;  %v5466_v3 = vld [vmem:[%s6679_s18 + $0xa4] sm:$0x1] }
  0x8b   : > { %v5263_v35 = vcombine.low %v618_v15, %v628_v20  ;;  %v2867_v60 = vsel %vm6928_vm6, %v2865_v26, %v2866_v48  ;;  %v2877_v43 = vrot.slane %v5459_v36, 5  ;;  %v2871_v0 = vsel %vm6928_vm6, %v5534_v37, %v2870_v42  ;;  %v5521_v4 = vld [vmem:[%s6679_s18 + $0x9c] sm:$0xe]  ;;  %v6580_v10 = vld [vmem:[%s6679_s18 + $0x18] sm:$0xf] }
  0x8c   : > { %6128 = vmatmul.mubr.msk.bf16.gmra.mrb[12].mxu0 %vm685_vm3, %v5548_v32  ;;  %v5549_v41 = vcombine.low %v2864_v25, %v2867_v60  ;;  %v2872_v61 = vrot.slane %v2870_v42, 4  ;;  %v2880_v29 = vrot.slane %v5460_v38, 5  ;;  %v5282_v55 = vcombine.low %v6578_v24, %v7161_v62  ;;  %v7172_v48 = vld [vmem:[%s6679_s18 + $0x1c] sm:$0xf]  ;;  %v5468_v33 = vld [vmem:[%s6679_s18 + $0xac] sm:$0xf] }
  0x8d   : > { %5974 = vmatmul.mubr.msk.bf16.gmra.mrb[28].mxu1 %vm685_vm3, %v5263_v35  ;;  %v2878_v63 = vsel %vm6928_vm6, %v5535_v46, %v2877_v43  ;;  %v2879_v2 = vrot.slane %v2877_v43, 4  ;;  %v5283_v15 = vcombine.low %v6580_v10, %v7172_v48  ;;  %v5536_v16 = vrot.slane %v5520_v51, 9  ;;  %v5471_v60 = vld [vmem:[%s6679_s18 + $0xb8] sm:$0xf]  ;;  %v5522_v42 = vld [vmem:[%s6679_s18 + $0xa8] sm:$0xe] }
  0x8e   : > { %5979 = vmatprep.mubr.msk.bf16.mxu1 %vm685_vm3, %v5281_v49  ;;  %6131 = vmatprep.mubr.msk.bf16.mxu0 %vm685_vm3, %v5549_v41  ;;  %v2874_v11 = vsel %vm6928_vm6, %v2872_v61, %v2873_v39  ;;  %v2884_v22 = vrot.slane %v5462_v50, 5  ;;  %v2887_v26 = vrot.slane %v5463_v8, 5  ;;  %v2891_v20 = vrot.slane %v5465_v21, 5  ;;  %v7180_v37 = vld [vmem:[%s6684_s21 + $0x18] sm:$0xff]   ;;  %v5469_v50 = vld [vmem:[%s6679_s18 + $0xb0] sm:$0x1] }
  0x8f   : > { %v5550_v58 = vcombine.low %v2871_v0, %v2874_v11  ;;  %v2881_v25 = vsel %vm6928_vm6, %v2879_v2, %v2880_v29  ;;  %v5537_v49 = vrot.slane %v5521_v4, 9  ;;  %v2894_v36 = vrot.slane %v5466_v3, 5  ;;  %v5472_v51 = vld [vmem:[%s6679_s18 + $0xbc] sm:$0x1]  ;;  %v6582_v61 = vld [vmem:[%s6684_s21 + $0x10] sm:$0xff]  }
  0x90   : > { %v5551_v32 = vcombine.low %v2878_v63, %v2881_v25  ;;  %v2886_v52 = vrot.slane %v2884_v22, 4  ;;  %v2893_v35 = vrot.slane %v2891_v20, 4  ;;  %v2885_v38 = vsel %vm6928_vm6, %v5536_v16, %v2884_v22  ;;  %v5523_v29 = vld [vmem:[%s6679_s18 + $0xb4] sm:$0xe]  ;;  %v6583_v24 = vld [vmem:[%s6679_s18 + $0x24] sm:$0xf] }
  0x91   : > { %v2898_v39 = vrot.slane %v5468_v33, 5  ;;  %v2892_v46 = vsel %vm6928_vm6, %v5537_v49, %v2891_v20  ;;  %v2905_v0 = vrot.slane %v5471_v60, 5  ;;  %v5538_v21 = vrot.slane %v5522_v42, 9  ;;  %v6585_v11 = vld [vmem:[%s6679_s18 + $0x30] sm:$0xf] }
  0x92   : > { %v2888_v41 = vsel %vm6928_vm6, %v2886_v52, %v2887_v26  ;;  %v2895_v43 = vsel %vm6928_vm6, %v2893_v35, %v2894_v36  ;;  %v2901_v4 = vrot.slane %v5469_v50, 5  ;;  %v7207_v10 = vld [vmem:[%s6679_s18 + $0x34] sm:$0xf]  ;;  %v5539_v16 = vrot.slane %v5523_v29, 9  ;;  %v5474_v25 = vld [vmem:[%s6679_s18 + $0xc4] sm:$0xf] }
  0x93   : > { %v5552_v8 = vcombine.low %v2885_v38, %v2888_v41  ;;  %v5553_v2 = vcombine.low %v2892_v46, %v2895_v43  ;;  %v2900_v3 = vrot.slane %v2898_v39, 4  ;;  %v2907_v22 = vrot.slane %v2905_v0, 4  ;;  %v5475_v33 = vld [vmem:[%s6679_s18 + $0xc8] sm:$0x1]  ;;  %v6587_v38 = vld [vmem:[%s6679_s18 + $0x3c] sm:$0xf] }
  0x94   : > { %6132 = vmatmul.mubr.msk.bf16.gmra.mrb[16].mxu0 %vm685_vm3, %v5550_v58  ;;  %v2908_v58 = vrot.slane %v5472_v51, 5  ;;  %v2899_v26 = vsel %vm6928_vm6, %v5538_v21, %v2898_v39  ;;  %v2912_v52 = vrot.slane %v5474_v25, 5  ;;  %v2906_v49 = vsel %vm6928_vm6, %v5539_v16, %v2905_v0  ;;  %v7227_v41 = vld [vmem:[%s6679_s18 + $0x40] sm:$0xf]  ;;  %v1193_v16 = vld [vmem:[%s6679_s18 + $0x24] sm:$0xe] }
  0x95   : > { %5980 = vmatmul.mubr.msk.bf16.vlgmr.msra.gmra.mrb[0].mxu1 %vm685_vm3, %v5282_v55  ;;  %6135 = vmatprep.mubr.msk.bf16.mxu0 %vm685_vm3, %v5551_v32  ;;  %v7202_v55 = vld [vmem:[%s6679_s18 + $0x28] sm:$0xf]  ;;  %v2902_v20 = vsel %vm6928_vm6, %v2900_v3, %v2901_v4  ;;  %v5524_v32 = vld [vmem:[%s6679_s18 + $0xc0] sm:$0xe]  ;;  %v5286_v42 = vcombine.low %v6587_v38, %v7227_v41  ;;  %v2915_v43 = vrot.slane %v5475_v33, 5  ;;  %v5287_v50 = vcombine.low %v6840_v9, %v6848_v30 }
  0x96   : > { %5983 = vmatprep.mubr.msk.bf16.mxu1 %vm685_vm3, %v5283_v15  ;;  %6012 = vmatpush3.bf16.msra.mxu1 %v6582_v61  ;;  %v5284_v63 = vcombine.low %v6583_v24, %v7202_v55  ;;  %v5285_v15 = vcombine.low %v6585_v11, %v7207_v10  ;;  %v2909_v36 = vsel %vm6928_vm6, %v2907_v22, %v2908_v58  ;;  %v5540_v60 = vrot.slane %v5524_v32, 9  ;;  %v6590_v11 = vld [vmem:[%s6679_s18 + $0x14] sm:$0x1] }
  0x97   : > { %6045 = vmatprep.subr.bf16.mxu1 %v7180_v37  ;;  %v5554_v35 = vcombine.low %v2899_v26, %v2902_v20  ;;  %v5555_v39 = vcombine.low %v2906_v49, %v2909_v36  ;;  %v2914_v46 = vrot.slane %v2912_v52, 4  ;;  %v2286_v61 = vshll.u32 %v7130_v27, 16  ;;  %v1194_v26 = vld [vmem:[%s6679_s18 + $0x30] sm:$0xe] }
  0x98   : > { %v2913_v51 = vsel %vm6928_vm6, %v5540_v60, %v2912_v52  ;;  %v2290_v9 = vshrl.u32 %v7130_v27, 16  ;;  %v5288_v29 = vcombine.low %v6873_v12, %v6879_v19  ;;  %v2296_v21 = vshll.u32 %v7133_v31, 16  ;;  %v1190_v27 = vld [vmem:[%s6679_s18] sm:$0xe]  ;;  %v1191_v19 = vld [vmem:[%s6679_s18 + $0xc] sm:$0xe] }
  0x99   : > { %v2916_v0 = vsel %vm6928_vm6, %v2914_v46, %v2915_v43  ;;  %v5289_v24 = vcombine.low %v6905_v6, %v6908_v17  ;;  %v1250_v3 = vrot.slane %v7161_v62, 5  ;;  %v1243_v12 = vrot.slane %v7139_v14, 5  ;;  %v1192_v6 = vld [vmem:[%s6679_s18 + $0x18] sm:$0xe]  ;;  %v6589_v31 = vld [vmem:[%s6679_s18 + $0x8] sm:$0x1] }
  0x9a   : > { %v5556_v30 = vcombine.low %v2913_v51, %v2916_v0  ;;  %v1257_v17 = vrot.slane %v7172_v48, 5  ;;  %v1246_v4 = vrot.slane %v6589_v31, 5  ;;  %v1253_v62 = vrot.slane %v6590_v11, 5  ;;  %v6537_v48 = vld [vmem:[%s6679_s18 + $0x24] sm:$0xff]   ;;  %v6539_v32 = vld [vmem:[%s6679_s18 + $0x30] sm:$0xff]  }
  0x9b   : > { %v1264_v22 = vrot.slane %v7202_v55, 5  ;;  %v5290_v58 = vcombine.low %v6923_v47, %v6938_v7  ;;  %v5291_v25 = vcombine.low %v6955_v34, %v6968_v45  ;;  %v1271_v20 = vrot.slane %v7207_v10, 5  ;;  %v6591_v60 = vld [vmem:[%s6679_s18 + $0x20] sm:$0x1]  ;;  %v1195_v7 = vld [vmem:[%s6679_s18 + $0x3c] sm:$0xe] }
  0x9c   : > { %6136 = vmatmul.mubr.msk.bf16.gmra.mrb[20].mxu0 %vm685_vm3, %v5552_v8  ;;  %v6534_v8 = vld [vmem:[%s6679_s18 + $0x18] sm:$0xff]   ;;  %v5314_v52 = vrot.slane %v1190_v27, 9  ;;  %v5315_v49 = vrot.slane %v1191_v19, 9  ;;  %v1252_v55 = vrot.slane %v1250_v3, 4  ;;  %v5316_v36 = vrot.slane %v1192_v6, 9 }
  0x9d   : > { %5984 = vmatmul.mubr.msk.bf16.gmra.mrb[4].mxu1 %vm685_vm3, %v5284_v63  ;;  %6139 = vmatprep.mubr.msk.bf16.mxu0 %vm685_vm3, %v5553_v2  ;;  %v7248_v63 = vrot.slane %v2286_v61, 5  ;;  %v7250_v2 = vrot.slane %v2290_v9, 4  ;;  %v1245_v33 = vrot.slane %v1243_v12, 4  ;;  %v1260_v38 = vrot.slane %v6591_v60, 5  ;;  %v6593_v51 = vld [vmem:[%s6679_s18 + $0x38] sm:$0x1] }
  0x9e   : > { %5987 = vmatprep.mubr.msk.bf16.mxu1 %vm685_vm3, %v5285_v15  ;;  %v7263_v15 = vrot.slane %v2296_v21, 5  ;;  %v5317_v47 = vrot.slane %v1193_v16, 9  ;;  %v5292_v34 = vcombine.low %v6981_v1, %v6987_v56  ;;  %v5293_v45 = vcombine.low %v7010_v44, %v7014_v54  ;;  %v1196_v19 = vld [vmem:[%s6679_s18 + $0x48] sm:$0xe]  ;;  %v6594_v6 = vld [vmem:[%s6679_s18 + $0x4c] sm:$0xf] }
  0x9f   : > { %8749 = vst [vmem:[#allocation2_spill] sm:$0xff] %v7248_v63  ;;  %v2293_v14 = vor.u32 %v7250_v2, %v7248_v63  ;;  %v1266_v10 = vrot.slane %v1264_v22, 4  ;;  %v5318_v43 = vrot.slane %v1194_v26, 9  ;;  %v1274_v0 = vrot.slane %v6593_v51, 5  ;;  %v5639_v31 = vld [vmem:[%s6679_s18 + $0x18] sm:$0xf] }
  0xa0   : > { %8750 = vst [vmem:[#allocation3_spill] sm:$0xff] %v7263_v15  ;;  %v1278_v61 = vrot.slane %v7227_v41, 5  ;;  %v5294_v9 = vcombine.low %v7035_v13, %v7043_v40  ;;  %v7307_v41 = vsel %vm6928_vm6, %v1245_v33, %v1246_v4  ;;  %v7311_v21 = vsel %vm6928_vm6, %v1252_v55, %v1253_v62  ;;  %v6595_v16 = vld [vmem:[%s6679_s18 + $0x44] sm:$0x1]  ;;  %v6543_v33 = vld [vmem:[%s6679_s18 + $0x48] sm:$0xff]  }
  0xa1   : > { %v7325_v27 = vsel %vm6928_vm6, %v5317_v47, %v1264_v22  ;;  %v7336_v4 = vsel %vm6928_vm6, %v5318_v43, %v1271_v20  ;;  %v1281_v22 = vrot.slane %v6595_v16, 5  ;;  %v5296_v26 = vcombine.low %v7083_v53, %v7093_v18  ;;  %v5642_v55 = vld [vmem:[%s6679_s18 + $0x24] sm:$0xf]  ;;  %v6597_v51 = vld [vmem:[%s6679_s18 + $0x50] sm:$0x1] }
  0xa2   : > { %v1280_v62 = vrot.slane %v1278_v61, 4  ;;  %v5320_v47 = vrot.slane %v1196_v19, 9  ;;  %v3628_v43 = vshll.u32 %v5639_v31, 16  ;;  %v6598_v19 = vld [vmem:[%s6679_s18 + $0x5c] sm:$0x1] }
  0xa3   : > { %v5641_v54 = vld [vmem:[%s6679_s18 + $0x20] sm:$0x1] }
  0xa4   : > { %6140 = vmatmul.mubr.msk.bf16.gmra.mrb[24].mxu0 %vm685_vm3, %v5554_v35  ;;  %v1259_v35 = vrot.slane %v1257_v17, 4 }
  0xa5   : > { %5988 = vmatmul.mubr.msk.bf16.gmra.mrb[8].mxu1 %vm685_vm3, %v5286_v42  ;;  %6143 = vmatprep.mubr.msk.bf16.mxu0 %vm685_vm3, %v5555_v39  ;;  %v7281_v42 = vld [vmem:[%s6684_s21 + $0x40] sm:$0xff]   ;;  %v6592_v39 = vld [vmem:[%s6679_s18 + $0x2c] sm:$0x1] }
  0xa6   : > { %5991 = vmatprep.mubr.msk.bf16.mxu1 %vm685_vm3, %v5287_v50  ;;  %v1267_v46 = vrot.slane %v6592_v39, 5  ;;  %v1273_v50 = vrot.slane %v1271_v20, 4 }
  0xa8   : > { %v7340_v11 = vsel %vm6928_vm6, %v1273_v50, %v1274_v0  ;;  %v7370_v50 = vsel %vm6928_vm6, %v1280_v62, %v1281_v22  ;;  %v1288_v0 = vrot.slane %v6597_v51, 5  ;;  %v3652_v62 = vshll.u32 %v5642_v55, 16 }
  0xac   : > { %6144 = vmatmul.mubr.msk.bf16.gmra.mrb[28].mxu0 %vm685_vm3, %v5556_v30  ;;  %v5295_v30 = vcombine.low %v7058_v5, %v7067_v28 }
  0xad   : > { %5992 = vmatmul.mubr.msk.bf16.gmra.mrb[12].mxu1 %vm685_vm3, %v5288_v29  ;;  %6149 = vmatprep.mubr.msk.bf16.mxu0 %vm685_vm3, %v6534_v8  ;;  %v7297_v29 = vsel %vm6928_vm6, %v5314_v52, %v1243_v12  ;;  %v7301_v8 = vsel %vm6928_vm6, %v5315_v49, %v1250_v3  ;;  %v5319_v3 = vrot.slane %v1195_v7, 9  ;;  %v7329_v12 = vsel %vm6928_vm6, %v1266_v10, %v1267_v46  ;;  %v6596_v52 = vld [vmem:[%s6679_s18 + $0x58] sm:$0xf]  ;;  %v1198_v7 = vld [vmem:[%s6679_s18 + $0x60] sm:$0xe] }
  0xae   : > { %5995 = vmatprep.mubr.msk.bf16.mxu1 %vm685_vm3, %v5289_v24  ;;  %v7315_v24 = vsel %vm6928_vm6, %v5316_v36, %v1257_v17  ;;  %v1285_v17 = vrot.slane %v6594_v6, 5  ;;  %v5330_v20 = vcombine.low %v7297_v29, %v7307_v41  ;;  %v1292_v49 = vrot.slane %v6596_v52, 5  ;;  %v5643_v36 = vld [vmem:[%s6679_s18 + $0x28] sm:$0xf]  ;;  %v6599_v10 = vld [vmem:[%s6679_s18 + $0x64] sm:$0xf] }
  0xaf   : > { %v3625_v46 = vshrl.u32 %v5639_v31, 16  ;;  %v1295_v52 = vrot.slane %v6598_v19, 5  ;;  %v1299_v60 = vrot.slane %v6599_v10, 5  ;;  %v3649_v31 = vshrl.u32 %v5642_v55, 16  ;;  %v6600_v10 = vld [vmem:[%s6679_s18 + $0x68] sm:$0x1] }
  0xb0   : > { %v1287_v39 = vrot.slane %v1285_v17, 4  ;;  %v3658_v22 = vshll.u32 %v5643_v36, 16  ;;  %v7388_v1 = vsel %vm6928_vm6, %v5320_v47, %v1285_v17  ;;  %v5322_v56 = vrot.slane %v1198_v7, 9  ;;  %v5646_v19 = vld [vmem:[%s6679_s18 + $0x34] sm:$0xf] }
  0xb1   : > { %v1301_v7 = vrot.slane %v1299_v60, 4  ;;  %v3651_v51 = vrot.slane %v3649_v31, 4 }
  0xb2   : > { %v7395_v44 = vsel %vm6928_vm6, %v1287_v39, %v1288_v0  ;;  %v5645_v39 = vld [vmem:[%s6679_s18 + $0x30] sm:$0xf]  ;;  %v3654_v0 = vrot.slane %v3652_v62, 5  ;;  %v1199_v62 = vld [vmem:[%s6679_s18 + $0x6c] sm:$0xe] }
  0xb4   : > { %6150 = vmatmul.mubr.msk.bf16.vlgmr.msra.gmra.mrb[0].mxu0 %vm685_vm3, %v6537_v48  ;;  %v5640_v48 = vld [vmem:[%s6679_s18 + $0x1c] sm:$0xf] }
  0xb5   : > { %5996 = vmatmul.mubr.msk.bf16.gmra.mrb[16].mxu1 %vm685_vm3, %v5290_v58  ;;  %6182 = vmatpush3.bf16.msra.mxu0 %v6999_v59  ;;  %v7321_v59 = vsel %vm6928_vm6, %v1259_v35, %v1260_v38  ;;  %v1197_v58 = vld [vmem:[%s6679_s18 + $0x54] sm:$0xe]  ;;  %v7363_v38 = vsel %vm6928_vm6, %v5319_v3, %v1278_v61  ;;  %v3634_v6 = vshll.u32 %v5640_v48, 16  ;;  %v3638_v16 = vshrl.u32 %v5640_v48, 16  ;;  %v1200_v35 = vld [vmem:[%s6679_s18 + $0x78] sm:$0xe] }
  0xb6   : > { %5999 = vmatprep.mubr.msk.bf16.mxu1 %vm685_vm3, %v5291_v25  ;;  %6153 = vmatprep.mubr.msk.bf16.mxu0 %vm685_vm3, %v6539_v32  ;;  %v6541_v25 = vld [vmem:[%s6679_s18 + $0x3c] sm:$0xff]   ;;  %v5321_v61 = vrot.slane %v1197_v58, 9  ;;  %v1294_v3 = vrot.slane %v1292_v49, 4  ;;  %v3662_v48 = vshrl.u32 %v5643_v36, 16  ;;  %v6545_v58 = vld [vmem:[%s6679_s18 + $0x54] sm:$0xff]   ;;  %v3676_v32 = vshll.u32 %v5645_v39, 16 }
  0xb7   : > { %6215 = vmatprep.subr.bf16.mxu0 %v7281_v42  ;;  %v3640_v36 = vrot.slane %v3638_v16, 4 }
  0xb8   : > { %v7402_v17 = vsel %vm6928_vm6, %v5321_v61, %v1292_v49  ;;  %v7406_v47 = vsel %vm6928_vm6, %v1294_v3, %v1295_v52  ;;  %v3664_v16 = vrot.slane %v3662_v48, 4  ;;  %v7418_v61 = vsel %vm6928_vm6, %v5322_v56, %v1299_v60 }
  0xb9   : > { %v3644_v52 = vshll.u32 %v5641_v54, 16  ;;  %v3673_v49 = vshrl.u32 %v5645_v39, 16  ;;  %v3682_v60 = vshll.u32 %v5646_v19, 16  ;;  %v3686_v56 = vshrl.u32 %v5646_v19, 16  ;;  %v6602_v54 = vld [vmem:[%s6679_s18 + $0x7c] sm:$0xf] }
  0xba   : > { %v6550_v19 = vld [vmem:[%s6679_s18 + $0x78] sm:$0xff]   ;;  %v3678_v5 = vrot.slane %v3676_v32, 5 }
  0xbb   : > { %v3646_v40 = vrot.slane %v3644_v52, 5  ;;  %v7450_v28 = vrot.slane %v3682_v60, 5 }
  0xbc   : > { %6154 = vmatmul.mubr.msk.bf16.gmra.mrb[4].mxu0 %vm685_vm3, %v6541_v25  ;;  %v3630_v25 = vrot.slane %v3628_v43, 5  ;;  %v5644_v43 = vld [vmem:[%s6679_s18 + $0x2c] sm:$0x1] }
  0xbd   : > { %6000 = vmatmul.mubr.msk.bf16.gmra.mrb[20].mxu1 %vm685_vm3, %v5292_v34  ;;  %6157 = vmatprep.mubr.msk.bf16.mxu0 %vm685_vm3, %v6543_v33  ;;  %v3627_v34 = vrot.slane %v3625_v46, 4  ;;  %v6547_v33 = vld [vmem:[%s6679_s18 + $0x60] sm:$0xff]   ;;  %v1302_v46 = vrot.slane %v6600_v10, 5  ;;  %v3668_v48 = vshll.u32 %v5644_v43, 16  ;;  %v7588_v10 = vld [vmem:[%s6679_s18 + $0x5c] sm:$0x1] }
  0xbe   : > { %6003 = vmatprep.mubr.msk.bf16.mxu1 %vm685_vm3, %v5293_v45  ;;  %v7398_v45 = vrot.slane %v3634_v6, 5  ;;  %v7411_v6 = vrot.slane %v3658_v22, 5  ;;  %v6601_v22 = vld [vmem:[%s6679_s18 + $0x70] sm:$0xf]  ;;  %8762 = vst [vmem:[#allocation13_spill] sm:$0xff] %v7588_v10 }
  0xbf   : > { %v3631_v3 = vor.u32 %v3630_v25, %v3627_v34  ;;  %v1306_v55 = vrot.slane %v6601_v22, 5  ;;  %v7434_v34 = vsel %vm6928_vm6, %v1301_v7, %v1302_v46  ;;  %v3670_v39 = vrot.slane %v3668_v48, 5 }
  0xc0   : > { %v3641_v31 = vor.u32 %v3640_v36, %v7398_v45  ;;  %v3665_v25 = vor.u32 %v3664_v16, %v7411_v6  ;;  %v1313_v36 = vrot.slane %v6602_v54, 5  ;;  %v6549_v16 = vld [vmem:[%s6679_s18 + $0x6c] sm:$0xff]   ;;  %v3675_v22 = vrot.slane %v3673_v49, 4 }
  0xc1   : > { %v7442_v13 = vrot.slane %v3631_v3, 4  ;;  %v1308_v43 = vrot.slane %v1306_v55, 4 }
  0xc2   : > { %v3642_v46 = vrot.slane %v3641_v31, 4  ;;  %v3666_v52 = vrot.slane %v3665_v25, 4  ;;  %v6604_v31 = vld [vmem:[%s6679_s18 + $0x80] sm:$0x1]  ;;  %v1201_v25 = vld [vmem:[%s6679_s18 + $0x84] sm:$0xe] }
  0xc3   : > { %v1316_v54 = vrot.slane %v6604_v31, 5  ;;  %v3637_v32 = vsel %vm6705_vm2, %v7442_v13, %v7398_v45  ;;  %v6605_v31 = vld [vmem:[%s6679_s18 + $0x88] sm:$0xf]  ;;  %v7478_v13 = vld [vmem:[%s6679_s18 + $0x40] sm:$0xf] }
  0xc4   : > { %6158 = vmatmul.mubr.msk.bf16.gmra.mrb[8].mxu0 %vm685_vm3, %v6545_v58  ;;  %v3655_v58 = vor.u32 %v3654_v0, %v3651_v51  ;;  %v5324_v51 = vrot.slane %v1200_v35, 9  ;;  %v7446_v0 = vld [vmem:[%s6679_s18 + $0x38] sm:$0x1]  ;;  %v3647_v60 = vsel %vm6705_vm2, %v3642_v46, %v3646_v40  ;;  %v1320_v45 = vrot.slane %v6605_v31, 5  ;;  %8752 = vst [vmem:[#allocation5_spill] sm:$0xff] %v7478_v13 }
  0xc5   : > { %6004 = vmatmul.mubr.msk.bf16.gmra.mrb[24].mxu1 %vm685_vm3, %v5294_v9  ;;  %6161 = vmatprep.mubr.msk.bf16.mxu0 %vm685_vm3, %v6547_v33  ;;  %v5323_v9 = vrot.slane %v1199_v62, 9  ;;  %v6603_v33 = vld [vmem:[%s6679_s18 + $0x74] sm:$0x1]  ;;  %8751 = vst [vmem:[#allocation4_spill] sm:$0xff] %v7446_v0  ;;  %v1315_v62 = vrot.slane %v1313_v36, 4  ;;  %v3692_v48 = vshll.u32 %v7446_v0, 16 }
  0xc6   : > { %6007 = vmatprep.mubr.msk.bf16.mxu1 %vm685_vm3, %v5295_v30  ;;  %v1309_v7 = vrot.slane %v6603_v33, 5  ;;  %v3688_v30 = vrot.slane %v3686_v56, 4  ;;  %v3656_v3 = vrot.slane %v3655_v58, 4  ;;  %v5648_v33 = vld [vmem:[%s6679_s18 + $0x3c] sm:$0xf]  ;;  %v7473_v58 = vsel %vm6928_vm6, %v5324_v51, %v1313_v36 }
  0xc7   : > { %v7462_v49 = vsel %vm6928_vm6, %v5323_v9, %v1306_v55  ;;  %v3679_v55 = vor.u32 %v3678_v5, %v3675_v22  ;;  %v3697_v40 = vshrl.u32 %v5648_v33, 16  ;;  %v3700_v46 = vshll.u32 %v5648_v33, 16 }
  0xc8   : > { %v7469_v56 = vsel %vm6928_vm6, %v1308_v43, %v1309_v7  ;;  %v3689_v9 = vor.u32 %v3688_v30, %v7450_v28  ;;  %v5651_v7 = vld [vmem:[%s6679_s18 + $0x48] sm:$0xf]  ;;  %v7486_v36 = vrot.slane %v2293_v14, 4  ;;  %v3661_v43 = vsel %vm6705_vm2, %v3656_v3, %v7411_v6 }
  0xc9   : > { %v3671_v51 = vsel %vm6705_vm2, %v3666_v52, %v3670_v39  ;;  %v7500_v2 = vsel %vm6928_vm6, %v1315_v62, %v1316_v54  ;;  %v3694_v53 = vrot.slane %v3692_v48, 5  ;;  %v5325_v14 = vrot.slane %v1201_v25, 9  ;;  %v6551_v3 = vld [vmem:[%s6679_s18 + $0x84] sm:$0xff]   ;;  %v6552_v62 = vld [vmem:[%s6679_s18 + $0x90] sm:$0xff]  }
  0xca   : > { %8753 = vst [vmem:[#allocation6_spill] sm:$0xff] %v7486_v36  ;;  %v3710_v6 = vshrl.u32 %v7478_v13, 16  ;;  %v1322_v39 = vrot.slane %v1320_v45, 4  ;;  %v3721_v5 = vshrl.u32 %v5651_v7, 16  ;;  %v3724_v30 = vshll.u32 %v5651_v7, 16 }
  0xcb   : > { %v3680_v29 = vrot.slane %v3679_v55, 4  ;;  %v3690_v41 = vrot.slane %v3689_v9, 4  ;;  %v3702_v52 = vrot.slane %v3700_v46, 5  ;;  %v7514_v54 = vcombine.low %v3637_v32, %v3647_v60  ;;  %v7519_v48 = vld [vmem:[%s6679_s18 + $0x44] sm:$0x1] }
  0xcc   : > { %6162 = vmatmul.mubr.msk.bf16.gmra.mrb[12].mxu0 %vm685_vm3, %v6549_v16  ;;  %v7509_v16 = vld [vmem:[%s6679_s18 + $0x4c] sm:$0xf]  ;;  %8755 = vst [vmem:[#allocation8_spill] sm:$0xff] %v7519_v48  ;;  %v7523_v7 = vcombine.low %v3661_v43, %v3671_v51  ;;  %v5654_v32 = vld [vmem:[%s6679_s18 + $0x54] sm:$0xf]  ;;  %v7532_v60 = vsel %vm6928_vm6, %v5325_v14, %v1320_v45  ;;  %v3726_v33 = vrot.slane %v3724_v30, 5 }
  0xcd   : > { %6008 = vmatmul.mubr.msk.bf16.gmra.mrb[28].mxu1 %vm685_vm3, %v5296_v26  ;;  %6165 = vmatprep.mubr.msk.bf16.mxu0 %vm685_vm3, %v6550_v19  ;;  %v3706_v26 = vshll.u32 %v7478_v13, 16  ;;  %8754 = vst [vmem:[#allocation7_spill] sm:$0xff] %v7509_v16  ;;  %v6606_v19 = vld [vmem:[%s6679_s18 + $0x8c] sm:$0x1]  ;;  %v3730_v25 = vshll.u32 %v7509_v16, 16  ;;  %v3734_v31 = vshrl.u32 %v7509_v16, 16  ;;  %v3685_v51 = vsel %vm6705_vm2, %v3680_v29, %v7450_v28 }
  0xce   : > { %6013 = vmatprep.mubr.msk.bf16.mxu1 %vm685_vm3, %v5330_v20  ;;  %v1323_v22 = vrot.slane %v6606_v19, 5  ;;  %v3699_v20 = vrot.slane %v3697_v40, 4  ;;  %v3712_v40 = vrot.slane %v3710_v6, 4  ;;  %v3723_v19 = vrot.slane %v3721_v5, 4  ;;  %v7539_v43 = vld [vmem:[%s6679_s18 + $0x58] sm:$0xf] }
  0xcf   : > { %v7527_v9 = vrot.slane %v3706_v26, 5  ;;  %8756 = vst [vmem:[#allocation9_spill] sm:$0xff] %v7539_v43  ;;  %v3695_v45 = vsel %vm6705_vm2, %v3690_v41, %v3694_v53  ;;  %v3716_v26 = vshll.u32 %v7519_v48, 16  ;;  %v1202_v6 = vld [vmem:[%s6679_s18 + $0x90] sm:$0xe]  ;;  %v3736_v5 = vrot.slane %v3734_v31, 4 }
  0xd0   : > { %v7536_v46 = vsel %vm6928_vm6, %v1322_v39, %v1323_v22  ;;  %v3703_v14 = vor.u32 %v3702_v52, %v3699_v20  ;;  %v8757_v39 = vcombine.low %v7301_v8, %v7311_v21  ;;  %v7554_v22 = vrot.slane %v3730_v25, 5  ;;  %v5657_v53 = vld [vmem:[%s6679_s18 + $0x60] sm:$0xf]  ;;  %v7566_v29 = vld [vmem:[%s6679_s18 + $0x50] sm:$0x1] }
  0xd1   : > { %v3745_v28 = vshrl.u32 %v5654_v32, 16  ;;  %v3748_v30 = vshll.u32 %v5654_v32, 16  ;;  %v3713_v21 = vor.u32 %v3712_v40, %v7527_v9  ;;  %8759 = vst [vmem:[#allocation10_spill] sm:$0xff] %v7566_v29  ;;  %v3754_v41 = vshll.u32 %v7539_v43, 16  ;;  %v7574_v25 = vld [vmem:[%s6684_s21 + $0x20] sm:$0xff]  }
  0xd2   : > { %v3758_v20 = vshrl.u32 %v7539_v43, 16  ;;  %v7570_v52 = vcombine.low %v3685_v51, %v3695_v45  ;;  %8760 = vst [vmem:[#allocation11_spill] sm:$0xff] %v7574_v25  ;;  %v6553_v31 = vld [vmem:[%s6679_s18 + $0x9c] sm:$0xff]   ;;  %v7578_v40 = vrot.slane %v3703_v14, 4  ;;  %v3718_v32 = vrot.slane %v3716_v26, 5  ;;  %v6554_v51 = vld [vmem:[%s6679_s18 + $0xa8] sm:$0xff]  }
  0xd3   : > { %v3737_v45 = vor.u32 %v3736_v5, %v7554_v22  ;;  %v3714_v8 = vrot.slane %v3713_v21, 4  ;;  %v6609_v55 = vld [vmem:[%s6679_s18 + $0x98] sm:$0x1]  ;;  %v7590_v14 = vrot.slane %v3754_v41, 5  ;;  %v6610_v13 = vld [vmem:[%s6679_s18 + $0xa0] sm:$0xf] }
  0xd4   : > { %6166 = vmatmul.mubr.msk.bf16.gmra.mrb[16].mxu0 %vm685_vm3, %v6551_v3  ;;  %v8758_v3 = vcombine.low %v7315_v24, %v7321_v59  ;;  %v6607_v24 = vld [vmem:[%s6679_s18 + $0x94] sm:$0xf]  ;;  %v1330_v35 = vrot.slane %v6609_v55, 5  ;;  %v3760_v26 = vrot.slane %v3758_v20, 4  ;;  %v1334_v0 = vrot.slane %v6610_v13, 5 }
  0xd5   : > { %6014 = vmatmul.mubr.msk.bf16.vlgmr.msra.gmra.mrb[0].mxu1 %vm685_vm3, %v8757_v39  ;;  %6169 = vmatprep.mubr.msk.bf16.mxu0 %vm685_vm3, %v6552_v62  ;;  %v5326_v62 = vrot.slane %v1202_v6, 9  ;;  %v1327_v59 = vrot.slane %v6607_v24, 5  ;;  %v3769_v39 = vshrl.u32 %v5657_v53, 16  ;;  %v3740_v6 = vshll.u32 %v7566_v29, 16  ;;  %v6613_v36 = vld [vmem:[%s6679_s18 + $0xb0] sm:$0x1] }
  0xd6   : > { %6017 = vmatprep.mubr.msk.bf16.mxu1 %vm685_vm3, %v8758_v3  ;;  %6046 = vmatpush3.bf16.msra.mxu1 %v7180_v37  ;;  %v3727_v37 = vor.u32 %v3726_v33, %v3723_v19  ;;  %v3772_v3 = vshll.u32 %v5657_v53, 16  ;;  %v3747_v24 = vrot.slane %v3745_v28, 4  ;;  %v3750_v33 = vrot.slane %v3748_v30, 5  ;;  %v7584_v19 = vld [vmem:[%s6679_s18 + $0x64] sm:$0xf] }
  0xd7   : > { %6249 = vmatprep.subr.bf16.mxu1 %v7574_v25  ;;  %8761 = vst [vmem:[#allocation12_spill] sm:$0xff] %v7584_v19  ;;  %v7594_v53 = vsel %vm6928_vm6, %v5326_v62, %v1327_v59  ;;  %v1329_v5 = vrot.slane %v1327_v59, 4  ;;  %v1203_v28 = vld [vmem:[%s6679_s18 + $0x9c] sm:$0xe]  ;;  %v3771_v30 = vrot.slane %v3769_v39, 4  ;;  %v3778_v21 = vshll.u32 %v7584_v19, 16 }
  0xd8   : > { %v3728_v48 = vrot.slane %v3727_v37, 4  ;;  %v3774_v55 = vrot.slane %v3772_v3, 5  ;;  %v3782_v41 = vshrl.u32 %v7584_v19, 16  ;;  %v8763_v20 = vcombine.low %v7325_v27, %v7329_v12  ;;  %v1204_v3 = vld [vmem:[%s6679_s18 + $0xa8] sm:$0xe] }
  0xd9   : > { %v3738_v13 = vrot.slane %v3737_v45, 4  ;;  %v3742_v62 = vrot.slane %v3740_v6, 5  ;;  %v3751_v59 = vor.u32 %v3750_v33, %v3747_v24  ;;  %v3764_v37 = vshll.u32 %v7588_v10, 16  ;;  %v6612_v24 = vld [vmem:[%s6679_s18 + $0xa4] sm:$0x1] }
  0xda   : > { %v3709_v27 = vsel %vm6705_vm2, %v7578_v40, %v7527_v9  ;;  %v3719_v12 = vsel %vm6705_vm2, %v3714_v8, %v3718_v32  ;;  %v3761_v39 = vor.u32 %v3760_v26, %v7590_v14  ;;  %v1336_v6 = vrot.slane %v1334_v0, 4  ;;  %v7626_v9 = vld [vmem:[%s6679_s18 + $0x68] sm:$0x1]  ;;  %v6555_v40 = vld [vmem:[%s6679_s18 + $0xb4] sm:$0xff]   ;;  %v5672_v10 = vld [vmem:[%s6679_s18 + $0x9c] sm:$0xf] }
  0xdb   : > { %v1337_v33 = vrot.slane %v6612_v24, 5  ;;  %8765 = vst [vmem:[#allocation14_spill] sm:$0xff] %v7626_v9  ;;  %v3733_v8 = vsel %vm6705_vm2, %v3728_v48, %v7554_v22  ;;  %v3775_v32 = vor.u32 %v3774_v55, %v3771_v30  ;;  %v7632_v26 = vrot.slane %v3778_v21, 5  ;;  %v7766_v29 = vld [vmem:[%s6679_s18 + $0x98] sm:$0x1] }
  0xdc   : > { %6170 = vmatmul.mubr.msk.bf16.gmra.mrb[20].mxu0 %vm685_vm3, %v6553_v31  ;;  %v8764_v31 = vcombine.low %v7336_v4, %v7340_v11  ;;  %v7622_v4 = vsel %vm6928_vm6, %v1329_v5, %v1330_v35  ;;  %v5327_v11 = vrot.slane %v1203_v28, 9  ;;  %v3743_v35 = vsel %vm6705_vm2, %v3738_v13, %v3742_v62 }
  0xdd   : > { %6018 = vmatmul.mubr.msk.bf16.gmra.mrb[4].mxu1 %vm685_vm3, %v8763_v20  ;;  %6173 = vmatprep.mubr.msk.bf16.mxu0 %vm685_vm3, %v6554_v51  ;;  %v6611_v51 = vld [vmem:[%s6679_s18 + $0xac] sm:$0xf]  ;;  %8766 = vst [vmem:[#allocation15_spill] sm:$0xff] %v7632_v26  ;;  %v3784_v20 = vrot.slane %v3782_v41, 4  ;;  %v7638_v5 = vrot.slane %v3751_v59, 4  ;;  %v7640_v28 = vrot.slane %v3764_v37, 5  ;;  %v7646_v30 = vcombine.low %v3709_v27, %v3719_v12 }
  0xde   : > { %6021 = vmatprep.mubr.msk.bf16.mxu1 %vm685_vm3, %v8764_v31  ;;  %v1341_v45 = vrot.slane %v6611_v51, 5  ;;  %v1205_v31 = vld [vmem:[%s6679_s18 + $0xb4] sm:$0xe]  ;;  %v6556_v51 = vld [vmem:[%s6679_s18 + $0xc0] sm:$0xff]   ;;  %v5328_v24 = vrot.slane %v1204_v3, 9  ;;  %v7642_v25 = vrot.slane %v3761_v39, 4  ;;  %v7654_v13 = vsel %vm6928_vm6, %v5327_v11, %v1334_v0 }
  0xdf   : > { %v1344_v48 = vrot.slane %v6613_v36, 5  ;;  %v3788_v22 = vshll.u32 %v7626_v9, 16  ;;  %v5329_v21 = vrot.slane %v1205_v31, 9  ;;  %v1348_v41 = vrot.slane %v7093_v18, 5  ;;  %v5660_v37 = vld [vmem:[%s6679_s18 + $0x6c] sm:$0xf] }
  0xe0   : > { %v1343_v63 = vrot.slane %v1341_v45, 4  ;;  %v7658_v36 = vsel %vm6928_vm6, %v1336_v6, %v1337_v33  ;;  %v7660_v62 = vrot.slane %v3775_v32, 4  ;;  %v3785_v59 = vor.u32 %v3784_v20, %v7632_v26  ;;  %v7680_v39 = vld [vmem:[%s6679_s18 + $0x70] sm:$0xf]  ;;  %v7701_v33 = vld [vmem:[%s6679_s18 + $0xbc] sm:$0x1] }
  0xe1   : > { %v8768_v18 = vcombine.low %v7363_v38, %v7370_v50  ;;  %v7669_v0 = vcombine.low %v3733_v8, %v3743_v35  ;;  %v7677_v12 = vsel %vm6928_vm6, %v5328_v24, %v1341_v45  ;;  %8769 = vst [vmem:[#allocation17_spill] sm:$0xff] %v7680_v39  ;;  %v5663_v38 = vld [vmem:[%s6679_s18 + $0x78] sm:$0xf]  ;;  %v7684_v50 = vld [vmem:[%s6679_s18 + $0x7c] sm:$0xf]  ;;  %v8771_v3 = vcombine.low %v7388_v1, %v7395_v44 }
  0xe2   : > { %8767 = vst [vmem:[#allocation16_spill] sm:$0xff] %v7660_v62  ;;  %8770 = vst [vmem:[#allocation18_spill] sm:$0xff] %v7684_v50  ;;  %v7696_v45 = vsel %vm6928_vm6, %v1343_v63, %v1344_v48  ;;  %v7698_v6 = vrot.slane %v3788_v22, 5  ;;  %v5666_v8 = vld [vmem:[%s6679_s18 + $0x84] sm:$0xf]  ;;  %v7710_v44 = vsel %vm6928_vm6, %v5329_v21, %v1348_v41  ;;  %v7712_v32 = vrot.slane %v1348_v41, 4 }
  0xe3   : > { %v7706_v1 = vld [vmem:[%s6679_s18 + $0x88] sm:$0xf]  ;;  %8773 = vst [vmem:[#allocation20_spill] sm:$0xff] %v7710_v44  ;;  %v3793_v20 = vshrl.u32 %v5660_v37, 16  ;;  %v3796_v31 = vshll.u32 %v5660_v37, 16  ;;  %v7720_v24 = vrot.slane %v3785_v59, 4 }
  0xe4   : > { %6174 = vmatmul.mubr.msk.bf16.gmra.mrb[24].mxu0 %vm685_vm3, %v6555_v40  ;;  %8772 = vst [vmem:[#allocation19_spill] sm:$0xff] %v7706_v1  ;;  %v5669_v63 = vld [vmem:[%s6679_s18 + $0x90] sm:$0xf]  ;;  %v3802_v48 = vshll.u32 %v7680_v39, 16  ;;  %v3806_v22 = vshrl.u32 %v7680_v39, 16  ;;  %v3817_v41 = vshrl.u32 %v5663_v38, 16 }
  0xe5   : > { %6022 = vmatmul.mubr.msk.bf16.gmra.mrb[8].mxu1 %vm685_vm3, %v8768_v18  ;;  %6177 = vmatprep.mubr.msk.bf16.mxu0 %vm685_vm3, %v6556_v51  ;;  %v6557_v51 = vld [vmem:[%s6679_s18 + $0xcc] sm:$0xff]   ;;  %v7725_v21 = vld [vmem:[%s6679_s18 + $0x94] sm:$0xf]  ;;  %v3820_v18 = vshll.u32 %v5663_v38, 16  ;;  %v3826_v37 = vshll.u32 %v7684_v50, 16  ;;  %v3841_v27 = vshrl.u32 %v5666_v8, 16 }
  0xe6   : > { %6025 = vmatprep.mubr.msk.bf16.mxu1 %vm685_vm3, %v8771_v3  ;;  %8774 = vst [vmem:[#allocation21_spill] sm:$0xff] %v7725_v21  ;;  %v3830_v3 = vshrl.u32 %v7684_v50, 16  ;;  %v3844_v11 = vshll.u32 %v5666_v8, 16  ;;  %v3850_v35 = vshll.u32 %v7706_v1, 16  ;;  %v3854_v59 = vshrl.u32 %v7706_v1, 16 }
  0xe7   : > { %v3795_v55 = vrot.slane %v3793_v20, 4  ;;  %v3865_v40 = vshrl.u32 %v5669_v63, 16  ;;  %v3868_v15 = vshll.u32 %v5669_v63, 16  ;;  %v3874_v39 = vshll.u32 %v7725_v21, 16  ;;  %v7734_v38 = vld [vmem:[%s6679_s18 + $0x74] sm:$0x1] }
  0xe8   : > { %v3798_v9 = vrot.slane %v3796_v31, 5  ;;  %v7736_v19 = vrot.slane %v3802_v48, 5  ;;  %v3808_v50 = vrot.slane %v3806_v22, 4  ;;  %v3878_v8 = vshrl.u32 %v7725_v21, 16  ;;  %v7749_v48 = vld [vmem:[%s6679_s18 + $0xa0] sm:$0xf] }
  0xe9   : > { %v8775_v20 = vcombine.low %v7402_v17, %v7406_v47  ;;  %v3819_v63 = vrot.slane %v3817_v41, 4  ;;  %v7746_v1 = vrot.slane %v3826_v37, 5  ;;  %v3832_v31 = vrot.slane %v3830_v3, 4  ;;  %v7756_v21 = vld [vmem:[%s6679_s18 + $0x80] sm:$0x1] }
  0xea   : > { %v8776_v22 = vcombine.low %v7418_v61, %v7434_v34  ;;  %v3843_v17 = vrot.slane %v3841_v27, 4  ;;  %v3846_v47 = vrot.slane %v3844_v11, 5  ;;  %v7761_v41 = vld [vmem:[%s6679_s18 + $0x8c] sm:$0x1]  ;;  %v3870_v37 = vrot.slane %v3868_v15, 5 }
  0xeb   : > { %v7763_v43 = vrot.slane %v3874_v39, 5  ;;  %v3889_v3 = vshrl.u32 %v5672_v10, 16  ;;  %v3880_v16 = vrot.slane %v3878_v8, 4  ;;  %v3892_v61 = vshll.u32 %v5672_v10, 16 }
  0xec   : > { %6178 = vmatmul.mubr.msk.bf16.gmra.mrb[28].mxu0 %vm685_vm3, %v6557_v51  ;;  %v3822_v51 = vrot.slane %v3820_v18, 5  ;;  %v3867_v18 = vrot.slane %v3865_v40, 4  ;;  %v3898_v34 = vshll.u32 %v7749_v48, 16  ;;  %v3902_v27 = vshrl.u32 %v7749_v48, 16 }
  0xed   : > { %6026 = vmatmul.mubr.msk.bf16.gmra.mrb[12].mxu1 %vm685_vm3, %v8775_v20  ;;  %6183 = vmatprep.mubr.msk.bf16.mxu0 %vm685_vm3, %v7514_v54  ;;  %v7758_v20 = vrot.slane %v3850_v35, 5  ;;  %v3856_v54 = vrot.slane %v3854_v59, 4  ;;  %v3799_v11 = vor.u32 %v3798_v9, %v3795_v55  ;;  %v3809_v35 = vor.u32 %v3808_v50, %v7736_v19  ;;  %v7781_v55 = vld [vmem:[%s6679_s18 + $0xa4] sm:$0x1] }
  0xee   : > { %6029 = vmatprep.mubr.msk.bf16.mxu1 %vm685_vm3, %v8776_v22  ;;  %v3812_v59 = vshll.u32 %v7734_v38, 16  ;;  %v3836_v40 = vshll.u32 %v7756_v21, 16  ;;  %v3823_v15 = vor.u32 %v3822_v51, %v3819_v63  ;;  %v3833_v39 = vor.u32 %v3832_v31, %v7746_v1 }
  0xef   : > { %v3847_v22 = vor.u32 %v3846_v47, %v3843_v17  ;;  %v3860_v44 = vshll.u32 %v7761_v41, 16  ;;  %v3857_v10 = vor.u32 %v3856_v54, %v7758_v20  ;;  %v3871_v8 = vor.u32 %v3870_v37, %v3867_v18  ;;  %v5675_v37 = vld [vmem:[%s6679_s18 + $0xa8] sm:$0xf] }
  0xf0   : > { %v3884_v26 = vshll.u32 %v7766_v29, 16  ;;  %v3891_v62 = vrot.slane %v3889_v3, 4  ;;  %v3881_v9 = vor.u32 %v3880_v16, %v7763_v43  ;;  %v3894_v50 = vrot.slane %v3892_v61, 5 }
  0xf1   : > { %v7783_v63 = vrot.slane %v3898_v34, 5  ;;  %v3904_v51 = vrot.slane %v3902_v27, 4  ;;  %v8777_v31 = vcombine.low %v7462_v49, %v7469_v56  ;;  %v8778_v17 = vrot.slane %v7701_v33, 5 }
  0xf2   : > { %v3810_v47 = vrot.slane %v3809_v35, 4  ;;  %v3814_v54 = vrot.slane %v3812_v59, 5  ;;  %v8779_v18 = vcombine.low %v7473_v58, %v7500_v2  ;;  %v3834_v49 = vrot.slane %v3833_v39, 4  ;;  %v7807_v35 = vld [vmem:[%s6679_s18 + $0xac] sm:$0xf] }
  0xf3   : > { %v7795_v16 = vsel %vm6928_vm6, %v7712_v32, %v8778_v17  ;;  %v3838_v56 = vrot.slane %v3836_v40, 5  ;;  %v3848_v33 = vrot.slane %v3847_v22, 4  ;;  %v3858_v3 = vrot.slane %v3857_v10, 4 }
  0xf4   : > { %6184 = vmatmul.mubr.msk.bf16.vlgmr.msra.gmra.mrb[0].mxu0 %vm685_vm3, %v7523_v7  ;;  %v3800_v7 = vrot.slane %v3799_v11, 4  ;;  %v3862_v32 = vrot.slane %v3860_v44, 5  ;;  %v3872_v61 = vrot.slane %v3871_v8, 4  ;;  %v3908_v34 = vshll.u32 %v7781_v55, 16 }
  0xf5   : > { %6030 = vmatmul.mubr.msk.bf16.gmra.mrb[16].mxu1 %vm685_vm3, %v8777_v31  ;;  %6216 = vmatpush3.bf16.msra.mxu0 %v7281_v42  ;;  %v3824_v42 = vrot.slane %v3823_v15, 4  ;;  %v3882_v27 = vrot.slane %v3881_v9, 4  ;;  %v3886_v11 = vrot.slane %v3884_v26, 5  ;;  %v3895_v58 = vor.u32 %v3894_v50, %v3891_v62 }
  0xf6   : > { %6033 = vmatprep.mubr.msk.bf16.mxu1 %vm685_vm3, %v8779_v18  ;;  %6187 = vmatprep.mubr.msk.bf16.mxu0 %vm685_vm3, %v7570_v52  ;;  %v3905_v2 = vor.u32 %v3904_v51, %v7783_v63  ;;  %v3791_v52 = vsel %vm6705_vm2, %v7720_v24, %v7698_v6  ;;  %v3805_v44 = vsel %vm6705_vm2, %v3800_v7, %v7736_v19  ;;  %v3913_v59 = vshrl.u32 %v5675_v37, 16  ;;  %v7827_v24 = vld [vmem:[%s6679_s18 + $0xb0] sm:$0x1] }
  0xf7   : > { %v3916_v40 = vshll.u32 %v5675_v37, 16  ;;  %v3815_v15 = vsel %vm6705_vm2, %v3810_v47, %v3814_v54  ;;  %v3829_v26 = vsel %vm6705_vm2, %v3824_v42, %v7746_v1  ;;  %v3839_v62 = vsel %vm6705_vm2, %v3834_v49, %v3838_v56  ;;  %v8787_v47 = vld [vmem:[#allocation20_spill] sm:$0xff]  ;;  %v7891_v37 = vld [vmem:[%s6679_s18 + $0xb8] sm:$0xf] }
  0xf8   : > { %v3853_v6 = vsel %vm6705_vm2, %v3848_v33, %v7758_v20  ;;  %v3863_v19 = vsel %vm6705_vm2, %v3858_v3, %v3862_v32  ;;  %v3877_v39 = vsel %vm6705_vm2, %v3872_v61, %v7763_v43  ;;  %v3910_v22 = vrot.slane %v3908_v34, 5 }
  0xf9   : > { %v3922_v10 = vshll.u32 %v7807_v35, 16  ;;  %v3887_v1 = vsel %vm6705_vm2, %v3882_v27, %v3886_v11  ;;  %v3896_v20 = vrot.slane %v3895_v58, 4  ;;  %v3906_v8 = vrot.slane %v3905_v2, 4  ;;  %v5726_v27 = vld [vmem:[%s6679_s18 + $0x60] sm:$0xe]  ;;  %v8788_v58 = vld [vmem:[#allocation7_spill] sm:$0xff] }
  0xfa   : > { %v3926_v9 = vshrl.u32 %v7807_v35, 16  ;;  %v8780_v50 = vcombine.low %v7532_v60, %v7536_v46  ;;  %v5343_v43 = vcombine.low %v7654_v13, %v7658_v36  ;;  %v3918_v51 = vrot.slane %v3916_v40, 5 }
  0xfb   : > { %v3932_v31 = vshll.u32 %v7827_v24, 16  ;;  %v8781_v17 = vcombine.low %v7594_v53, %v7622_v4  ;;  %v8782_v60 = vsel %vm6705_vm2, %v7642_v25, %v7640_v28  ;;  %v8783_v46 = vsel %vm6705_vm2, %v7638_v5, %v7590_v14  ;;  %v8784_v53 = vld [vmem:[#allocation16_spill] sm:$0xff]  ;;  %v8785_v4 = vld [vmem:[#allocation15_spill] sm:$0xff] }
  0xfc   : > { %6188 = vmatmul.mubr.msk.bf16.gmra.mrb[4].mxu0 %vm685_vm3, %v7646_v30  ;;  %v3915_v30 = vrot.slane %v3913_v59, 4  ;;  %v5692_v13 = vcombine.low %v8783_v46, %v8782_v60  ;;  %v5344_v36 = vcombine.low %v7677_v12, %v7696_v45  ;;  %v5345_v54 = vcombine.low %v8787_v47, %v7795_v16  ;;  %v5678_v25 = vld [vmem:[%s6679_s18 + $0xb4] sm:$0xf]  ;;  %v5724_v28 = vld [vmem:[%s6679_s18 + $0x48] sm:$0xe] }
  0xfd   : > { %6034 = vmatmul.mubr.msk.bf16.gmra.mrb[20].mxu1 %vm685_vm3, %v8780_v50  ;;  %6191 = vmatprep.mubr.msk.bf16.mxu0 %vm685_vm3, %v7669_v0  ;;  %v8786_v0 = vsel %vm6705_vm2, %v8784_v53, %v8785_v4  ;;  %v7874_v18 = vcombine.low %v3805_v44, %v3815_v15  ;;  %v7876_v14 = vcombine.low %v3829_v26, %v3839_v62  ;;  %v5725_v12 = vld [vmem:[%s6679_s18 + $0x54] sm:$0xe]  ;;  %v7888_v56 = vrot.slane %v3922_v10, 5  ;;  %v8790_v15 = vld [vmem:[#allocation9_spill] sm:$0xff]  ;;  %v8796_v47 = vld [vmem:[#allocation3_spill] sm:$0xff] }
  0xfe   : > { %6037 = vmatprep.mubr.msk.bf16.mxu1 %vm685_vm3, %v8781_v17  ;;  %v5693_v7 = vcombine.low %v8786_v0, %v3791_v52  ;;  %v7878_v5 = vcombine.low %v3853_v6, %v3863_v19  ;;  %v7880_v42 = vcombine.low %v3877_v39, %v3887_v1  ;;  %v3901_v45 = vsel %vm6705_vm2, %v3896_v20, %v7783_v63  ;;  %v8789_v52 = vld [vmem:[#allocation10_spill] sm:$0xff]  ;;  %v8791_v62 = vld [vmem:[#allocation13_spill] sm:$0xff]  ;;  %v5727_v19 = vld [vmem:[%s6679_s18 + $0x6c] sm:$0xe] }
  0xff   : > { %v3911_v49 = vsel %vm6705_vm2, %v3906_v8, %v3910_v22  ;;  %v3928_v33 = vrot.slane %v3926_v9, 4  ;;  %v3919_v3 = vor.u32 %v3918_v51, %v3915_v30  ;;  %v7893_v32 = vrot.slane %v3932_v31, 5  ;;  %v8792_v9 = vld [vmem:[#allocation12_spill] sm:$0xff]  ;;  %v8793_v30 = vld [vmem:[#allocation14_spill] sm:$0xff]  ;;  %v8794_v17 = vld [vmem:[#allocation17_spill] sm:$0xff] }
 0x100   : > { %v3937_v61 = vshrl.u32 %v5678_v25, 16  ;;  %v5740_v34 = vrot.slane %v5724_v28, 9  ;;  %v3940_v11 = vshll.u32 %v5678_v25, 16  ;;  %v4399_v2 = vrot.slane %v8788_v58, 5  ;;  %v5728_v58 = vld [vmem:[%s6679_s18 + $0x78] sm:$0xe] }
 0x101   : > { %v4402_v63 = vrot.slane %v8789_v52, 5  ;;  %v5741_v44 = vrot.slane %v5725_v12, 9  ;;  %v7898_v59 = vcombine.low %v3901_v45, %v3911_v49  ;;  %v3946_v40 = vshll.u32 %v7891_v37, 16  ;;  %v6560_v45 = vld [vmem:[%s6679_s18 + $0xc] sm:$0xff]  }
 0x102   : > { %v4406_v26 = vrot.slane %v8790_v15, 5  ;;  %v4409_v6 = vrot.slane %v8791_v62, 5  ;;  %v3929_v39 = vor.u32 %v3928_v33, %v7888_v56  ;;  %v7908_v22 = vsel %vm6928_vm6, %v5740_v34, %v4399_v2  ;;  %v5729_v62 = vld [vmem:[%s6679_s18 + $0x84] sm:$0xe] }
 0x103   : > { %v4401_v10 = vrot.slane %v4399_v2, 4  ;;  %v5742_v1 = vrot.slane %v5726_v27, 9  ;;  %v4413_v50 = vrot.slane %v8792_v9, 5  ;;  %v4416_v51 = vrot.slane %v8793_v30, 5 }
 0x104   : > { %6192 = vmatmul.mubr.msk.bf16.gmra.mrb[8].mxu0 %vm685_vm3, %v5692_v13  ;;  %v7914_v20 = vsel %vm6928_vm6, %v5741_v44, %v4406_v26  ;;  %v4408_v8 = vrot.slane %v4406_v26, 4  ;;  %v4420_v60 = vrot.slane %v8794_v17, 5  ;;  %v4423_v46 = vrot.slane %v7734_v38, 5  ;;  %v7926_v13 = vld [vmem:[%s6679_s18 + $0xbc] sm:$0x1] }
 0x105   : > { %6038 = vmatmul.mubr.msk.bf16.gmra.mrb[24].mxu1 %vm685_vm3, %v5343_v43  ;;  %6195 = vmatprep.mubr.msk.bf16.mxu0 %vm685_vm3, %v5693_v7  ;;  %v7921_v31 = vsel %vm6928_vm6, %v4401_v10, %v4402_v63  ;;  %v5743_v43 = vrot.slane %v5727_v19, 9  ;;  %v4415_v0 = vrot.slane %v4413_v50, 4  ;;  %v3950_v7 = vshrl.u32 %v7891_v37, 16  ;;  %v5681_v38 = vld [vmem:[%s6679_s18 + $0xc0] sm:$0xf] }
 0x106   : > { %6041 = vmatprep.mubr.msk.bf16.mxu1 %vm685_vm3, %v5344_v36  ;;  %v5756_v53 = vcombine.low %v7908_v22, %v7921_v31  ;;  %v7932_v4 = vsel %vm6928_vm6, %v4408_v8, %v4409_v6  ;;  %v7936_v36 = vsel %vm6928_vm6, %v5742_v1, %v4413_v50  ;;  %v4422_v12 = vrot.slane %v4420_v60, 4  ;;  %v7962_v63 = vld [vmem:[%s6679_s18 + $0xc4] sm:$0xf] }
 0x107   : > { %v5757_v25 = vcombine.low %v7914_v20, %v7932_v4  ;;  %v7944_v28 = vsel %vm6928_vm6, %v5743_v43, %v4420_v60  ;;  %v7947_v49 = vrot.slane %v3919_v3, 4  ;;  %v7949_v33 = vrot.slane %v3937_v61, 4  ;;  %v5455_v61 = vld [vmem:[%s6679_s18 + $0x78] sm:$0xf]  ;;  %v8795_v10 = vld [vmem:[#allocation18_spill] sm:$0xff] }
 0x108   : > { %v7951_v34 = vrot.slane %v3940_v11, 5  ;;  %v7955_v27 = vsel %vm6928_vm6, %v4415_v0, %v4416_v51  ;;  %v7958_v2 = vrot.slane %v3946_v40, 5  ;;  %v3956_v52 = vshll.u32 %v7926_v13, 16  ;;  %v5684_v0 = vld [vmem:[%s6679_s18 + $0xcc] sm:$0xf] }
 0x109   : > { %v5758_v44 = vcombine.low %v7936_v36, %v7955_v27  ;;  %v7968_v3 = vsel %vm6928_vm6, %v4422_v12, %v4423_v46  ;;  %v7971_v11 = vrot.slane %v3929_v39, 4  ;;  %v3961_v15 = vshrl.u32 %v5681_v38, 16  ;;  %v6625_v4 = vld [vmem:[%s6679_s18 + $0x8c] sm:$0x1] }
 0x10a   : > { %v3964_v26 = vshll.u32 %v5681_v38, 16  ;;  %v5759_v40 = vcombine.low %v7944_v28, %v7968_v3  ;;  %v7978_v6 = vrot.slane %v3950_v7, 4  ;;  %v5744_v19 = vrot.slane %v5728_v58, 9  ;;  %v8798_v38 = vld [vmem:[#allocation19_spill] sm:$0xff]  ;;  %v6561_v58 = vld [vmem:[%s6679_s18 + $0x18] sm:$0xff]  }
 0x10b   : > { %v4427_v1 = vrot.slane %v8795_v10, 5  ;;  %v4430_v8 = vrot.slane %v7756_v21, 5  ;;  %v3970_v39 = vshll.u32 %v7962_v63, 16  ;;  %v2277_v9 = vshrl.u32 %v5455_v61, 16  ;;  %v6628_v3 = vld [vmem:[%s6679_s18 + $0xac] sm:$0xf] }
 0x10c   : > { %6196 = vmatmul.mubr.msk.bf16.gmra.mrb[12].mxu0 %vm685_vm3, %v7874_v18  ;;  %v3974_v18 = vshrl.u32 %v7962_v63, 16  ;;  %v2280_v50 = vshll.u32 %v5455_v61, 16  ;;  %v3963_v51 = vrot.slane %v3961_v15, 4  ;;  %v3966_v43 = vrot.slane %v3964_v26, 5  ;;  %v5730_v26 = vld [vmem:[%s6679_s18 + $0x90] sm:$0xe] }
 0x10d   : > { %6042 = vmatmul.mubr.msk.bf16.gmra.mrb[28].mxu1 %vm685_vm3, %v5345_v54  ;;  %6199 = vmatprep.mubr.msk.bf16.mxu0 %vm685_vm3, %v7876_v14  ;;  %v7993_v21 = vsel %vm6928_vm6, %v5744_v19, %v4427_v1  ;;  %v4429_v16 = vrot.slane %v4427_v1, 4  ;;  %v8797_v54 = vld [vmem:[#allocation6_spill] sm:$0xff]  ;;  %v5745_v14 = vrot.slane %v5729_v62, 9  ;;  %v2279_v17 = vrot.slane %v2277_v9, 4  ;;  %v8024_v1 = vld [vmem:[%s6679_s18 + $0xd0] sm:$0xf] }
 0x10e   : > { %6047 = vmatprep.mubr.msk.bf16.mxu1 %vm685_vm3, %v6560_v45  ;;  %v2299_v30 = vsel %vm6705_vm2, %v8797_v54, %v8796_v47  ;;  %v2282_v60 = vrot.slane %v2280_v50, 5  ;;  %v3925_v46 = vsel %vm6705_vm2, %v7947_v49, %v7888_v56  ;;  %v4434_v12 = vrot.slane %v8798_v38, 5  ;;  %v6562_v62 = vld [vmem:[%s6679_s18 + $0x24] sm:$0xff]  }
 0x10f   : > { %v8006_v7 = vsel %vm6928_vm6, %v4429_v16, %v4430_v8  ;;  %v4437_v45 = vrot.slane %v7761_v41, 5  ;;  %v3935_v61 = vsel %vm6705_vm2, %v7971_v11, %v7893_v32  ;;  %v3943_v15 = vor.u32 %v7951_v34, %v7949_v33  ;;  %v8033_v33 = vld [vmem:[%s6679_s18 + $0xc8] sm:$0x1]  ;;  %v8799_v16 = vld [vmem:[#allocation21_spill] sm:$0xff] }
 0x110   : > { %v5760_v56 = vcombine.low %v7993_v21, %v8006_v7  ;;  %v2283_v49 = vor.u32 %v2282_v60, %v2279_v17  ;;  %v8021_v19 = vrot.slane %v3970_v39, 5  ;;  %v3976_v10 = vrot.slane %v3974_v18, 4  ;;  %v8801_v60 = vld [vmem:[#allocation11_spill] sm:$0xff]  ;;  %v6629_v7 = vld [vmem:[%s6679_s18 + $0xb8] sm:$0xf] }
 0x111   : > { %v8028_v41 = vsel %vm6928_vm6, %v5745_v14, %v4434_v12  ;;  %v4436_v8 = vrot.slane %v4434_v12, 4  ;;  %v3953_v32 = vor.u32 %v7978_v6, %v7958_v2  ;;  %v3967_v34 = vor.u32 %v3966_v43, %v3963_v51  ;;  %v8800_v14 = vld [vmem:[#allocation2_spill] sm:$0xff] }
 0x112   : > { %v3985_v11 = vshrl.u32 %v5684_v0, 16  ;;  %v2284_v9 = vrot.slane %v2283_v49, 4  ;;  %v3988_v39 = vshll.u32 %v5684_v0, 16  ;;  %v5746_v50 = vrot.slane %v5730_v26, 9 }
 0x113   : > { %v8039_v18 = vsel %vm6928_vm6, %v4436_v8, %v4437_v45  ;;  %v4441_v47 = vrot.slane %v8799_v16, 5  ;;  %v3994_v6 = vshll.u32 %v8024_v1, 16  ;;  %v3998_v54 = vshrl.u32 %v8024_v1, 16  ;;  %v6563_v8 = vld [vmem:[%s6679_s18 + $0x30] sm:$0xff]  }
 0x114   : > { %6200 = vmatmul.mubr.msk.bf16.gmra.mrb[16].mxu0 %vm685_vm3, %v7878_v5  ;;  %v2289_v5 = vsel %vm6705_vm2, %v2284_v9, %v8800_v14  ;;  %v5761_v51 = vcombine.low %v8028_v41, %v8039_v18  ;;  %v3958_v43 = vrot.slane %v3956_v52, 5  ;;  %v3980_v17 = vshll.u32 %v8033_v33, 16  ;;  %v8068_v9 = vld [vmem:[%s6679_s18 + $0xd4] sm:$0x1] }
 0x115   : > { %6048 = vmatmul.mubr.msk.bf16.vlgmr.msra.gmra.mrb[0].mxu1 %vm685_vm3, %v6561_v58  ;;  %6203 = vmatprep.mubr.msk.bf16.mxu0 %vm685_vm3, %v7880_v42  ;;  %v3977_v42 = vor.u32 %v3976_v10, %v8021_v19  ;;  %v8058_v0 = vcombine.low %v2289_v5, %v2299_v30  ;;  %v3944_v38 = vrot.slane %v3943_v15, 4  ;;  %v8062_v12 = vsel %vm6928_vm6, %v5746_v50, %v4441_v47  ;;  %v5731_v10 = vld [vmem:[%s6679_s18 + $0x9c] sm:$0xe]  ;;  %v5720_v5 = vld [vmem:[%s6679_s18 + $0x18] sm:$0xe] }
 0x116   : > { %6051 = vmatprep.mubr.msk.bf16.mxu1 %vm685_vm3, %v6562_v62  ;;  %6250 = vmatpush3.bf16.msra.mxu1 %v8801_v60  ;;  %v4443_v45 = vrot.slane %v4441_v47, 4  ;;  %v4444_v58 = vrot.slane %v7766_v29, 5  ;;  %v5699_v49 = vcombine.low %v3925_v46, %v3935_v61  ;;  %v3954_v26 = vrot.slane %v3953_v32, 4  ;;  %v6564_v50 = vld [vmem:[%s6679_s18 + $0x3c] sm:$0xff]   ;;  %v5732_v60 = vld [vmem:[%s6679_s18 + $0xa8] sm:$0xe] }
 0x117   : > { %v3968_v52 = vrot.slane %v3967_v34, 4  ;;  %v3987_v62 = vrot.slane %v3985_v11, 4  ;;  %v3990_v16 = vrot.slane %v3988_v39, 5  ;;  %v8070_v30 = vrot.slane %v3994_v6, 5 }
 0x118   : > { %v4000_v14 = vrot.slane %v3998_v54, 4  ;;  %v8074_v15 = vsel %vm6928_vm6, %v4443_v45, %v4444_v58  ;;  %v3978_v47 = vrot.slane %v3977_v42, 4  ;;  %v3982_v29 = vrot.slane %v3980_v17, 5 }
 0x119   : > { %v5762_v46 = vcombine.low %v8062_v12, %v8074_v15  ;;  %v3949_v61 = vsel %vm6705_vm2, %v3944_v38, %v7958_v2  ;;  %v5747_v32 = vrot.slane %v5731_v10, 9  ;;  %v3959_v34 = vsel %vm6705_vm2, %v3954_v26, %v3958_v43 }
 0x11a   : > { %v4004_v11 = vshll.u32 %v8068_v9, 16  ;;  %v4448_v39 = vrot.slane %v7749_v48, 5  ;;  %v4451_v6 = vrot.slane %v7781_v55, 5  ;;  %v3973_v2 = vsel %vm6705_vm2, %v3968_v52, %v8021_v19  ;;  %v6615_v55 = vld [vmem:[%s6679_s18 + $0x1c] sm:$0xf] }
 0x11b   : > { %v4001_v54 = vor.u32 %v4000_v14, %v8070_v30  ;;  %v3983_v48 = vsel %vm6705_vm2, %v3978_v47, %v3982_v29  ;;  %v4371_v43 = vrot.slane %v6615_v55, 5  ;;  %v5700_v19 = vcombine.low %v3949_v61, %v3959_v34  ;;  %v6616_v14 = vld [vmem:[%s6679_s18 + $0x20] sm:$0x1] }
 0x11c   : > { %6204 = vmatmul.mubr.msk.bf16.gmra.mrb[20].mxu0 %vm685_vm3, %v7898_v59  ;;  %v3991_v59 = vor.u32 %v3990_v16, %v3987_v62  ;;  %v8102_v42 = vsel %vm6928_vm6, %v5747_v32, %v4448_v39  ;;  %v4450_v17 = vrot.slane %v4448_v39, 4  ;;  %v4006_v38 = vrot.slane %v4004_v11, 5  ;;  %v6617_v32 = vld [vmem:[%s6679_s18 + $0x28] sm:$0xf] }
 0x11d   : > { %6052 = vmatmul.mubr.msk.bf16.gmra.mrb[4].mxu1 %vm685_vm3, %v6563_v8  ;;  %6207 = vmatprep.mubr.msk.bf16.mxu0 %vm685_vm3, %v5699_v49  ;;  %v5736_v45 = vrot.slane %v5720_v5, 9  ;;  %v6565_v49 = vld [vmem:[%s6679_s18 + $0x48] sm:$0xff]   ;;  %v5701_v26 = vcombine.low %v3973_v2, %v3983_v48  ;;  %v4002_v62 = vrot.slane %v4001_v54, 4  ;;  %v6566_v8 = vld [vmem:[%s6679_s18 + $0x54] sm:$0xff]   ;;  %v4373_v16 = vrot.slane %v4371_v43, 4 }
 0x11e   : > { %6055 = vmatprep.mubr.msk.bf16.mxu1 %vm685_vm3, %v6564_v50  ;;  %v8107_v58 = vsel %vm6928_vm6, %v4450_v17, %v4451_v6  ;;  %v3992_v52 = vrot.slane %v3991_v59, 4  ;;  %v4374_v50 = vrot.slane %v6616_v14, 5  ;;  %v5748_v47 = vrot.slane %v5732_v60, 9  ;;  %v5733_v6 = vld [vmem:[%s6679_s18 + $0xb4] sm:$0xe]  ;;  %v6568_v14 = vld [vmem:[%s6679_s18 + $0x6c] sm:$0xff]  }
 0x11f   : > { %v5763_v10 = vcombine.low %v8102_v42, %v8107_v58  ;;  %v4455_v29 = vrot.slane %v7807_v35, 5  ;;  %v4458_v61 = vrot.slane %v7827_v24, 5  ;;  %v4378_v34 = vrot.slane %v6617_v32, 5  ;;  %v5721_v2 = vld [vmem:[%s6679_s18 + $0x24] sm:$0xe] }
 0x120   : > { %v3997_v35 = vsel %vm6705_vm2, %v3992_v52, %v8070_v30  ;;  %v4007_v24 = vsel %vm6705_vm2, %v4002_v62, %v4006_v38  ;;  %v4372_v59 = vsel %vm6928_vm6, %v5736_v45, %v4371_v43  ;;  %v4375_v54 = vsel %vm6928_vm6, %v4373_v16, %v4374_v50  ;;  %v5722_v5 = vld [vmem:[%s6679_s18 + $0x30] sm:$0xe]  ;;  %v6618_v48 = vld [vmem:[%s6679_s18 + $0x34] sm:$0xf]  ;;  %v6619_v52 = vld [vmem:[%s6679_s18 + $0x2c] sm:$0x1] }
 0x121   : > { %v8120_v11 = vsel %vm6928_vm6, %v5748_v47, %v4455_v29  ;;  %v4457_v39 = vrot.slane %v4455_v29, 4  ;;  %v4385_v55 = vrot.slane %v6618_v48, 5  ;;  %v5749_v60 = vrot.slane %v5733_v6, 9  ;;  %v8802_v47 = vld [vmem:[#allocation4_spill] sm:$0xff]  ;;  %v8803_v6 = vld [vmem:[#allocation5_spill] sm:$0xff] }
 0x122   : > { %v5737_v38 = vrot.slane %v5721_v2, 9  ;;  %v4380_v43 = vrot.slane %v4378_v34, 4  ;;  %v4462_v45 = vrot.slane %v7891_v37, 5  ;;  %v4381_v62 = vrot.slane %v6619_v52, 5  ;;  %v5723_v37 = vld [vmem:[%s6679_s18 + $0x3c] sm:$0xe] }
 0x123   : > { %v8140_v30 = vsel %vm6928_vm6, %v4457_v39, %v4458_v61  ;;  %v4465_v16 = vrot.slane %v7926_v13, 5  ;;  %v4387_v50 = vrot.slane %v4385_v55, 4  ;;  %v4388_v29 = vrot.slane %v8802_v47, 5  ;;  %v5734_v39 = vld [vmem:[%s6679_s18 + $0xc0] sm:$0xe] }
 0x124   : > { %6208 = vmatmul.mubr.msk.bf16.gmra.mrb[24].mxu0 %vm685_vm3, %v5700_v19  ;;  %v5764_v17 = vcombine.low %v8120_v11, %v8140_v30  ;;  %v5702_v19 = vcombine.low %v3997_v35, %v4007_v24  ;;  %v8152_v61 = vsel %vm6928_vm6, %v5749_v60, %v4462_v45  ;;  %v4464_v32 = vrot.slane %v4462_v45, 4  ;;  %v6633_v42 = vld [vmem:[%s6679_s18 + $0xc8] sm:$0x1] }
 0x125   : > { %6056 = vmatmul.mubr.msk.bf16.gmra.mrb[8].mxu1 %vm685_vm3, %v6565_v49  ;;  %6211 = vmatprep.mubr.msk.bf16.mxu0 %vm685_vm3, %v5701_v26  ;;  %v6567_v49 = vld [vmem:[%s6679_s18 + $0x60] sm:$0xff]   ;;  %v5752_v26 = vcombine.low %v4372_v59, %v4375_v54  ;;  %v4392_v35 = vrot.slane %v8803_v6, 5  ;;  %v4379_v13 = vsel %vm6928_vm6, %v5737_v38, %v4378_v34  ;;  %v4382_v2 = vsel %vm6928_vm6, %v4380_v43, %v4381_v62  ;;  %v5735_v62 = vld [vmem:[%s6679_s18 + $0xcc] sm:$0xe]  ;;  %v6620_v6 = vld [vmem:[%s6679_s18 + $0x70] sm:$0xf] }
 0x126   : > { %6059 = vmatprep.mubr.msk.bf16.mxu1 %vm685_vm3, %v6566_v8  ;;  %v5738_v8 = vrot.slane %v5722_v5, 9  ;;  %v8160_v24 = vsel %vm6928_vm6, %v4464_v32, %v4465_v16  ;;  %v4389_v5 = vsel %vm6928_vm6, %v4387_v50, %v4388_v29  ;;  %v5750_v48 = vrot.slane %v5734_v39, 9  ;;  %v5452_v16 = vld [vmem:[%s6679_s18 + $0x6c] sm:$0xf] }
 0x127   : > { %v5765_v59 = vcombine.low %v8152_v61, %v8160_v24  ;;  %v4469_v34 = vrot.slane %v7962_v63, 5  ;;  %v5739_v60 = vrot.slane %v5723_v37, 9  ;;  %v4472_v43 = vrot.slane %v8033_v33, 5 }
 0x128   : > { %v4386_v54 = vsel %vm6928_vm6, %v5738_v8, %v4385_v55  ;;  %v5753_v45 = vcombine.low %v4379_v13, %v4382_v2  ;;  %v6569_v55 = vld [vmem:[%s6679_s18 + $0x78] sm:$0xff]   ;;  %v5751_v50 = vrot.slane %v5735_v62, 9  ;;  %v2253_v32 = vshrl.u32 %v5452_v16, 16 }
 0x129   : > { %v4471_v52 = vrot.slane %v4469_v34, 4  ;;  %v5754_v8 = vcombine.low %v4386_v54, %v4389_v5  ;;  %v4393_v47 = vsel %vm6928_vm6, %v5739_v60, %v4392_v35  ;;  %v4476_v39 = vrot.slane %v8024_v1, 5  ;;  %v6571_v60 = vld [vmem:[%s6679_s18 + $0x90] sm:$0xff]  }
 0x12a   : > { %v2256_v37 = vshll.u32 %v5452_v16, 16  ;;  %v2262_v13 = vshll.u32 %v6620_v6, 16  ;;  %v2266_v2 = vshrl.u32 %v6620_v6, 16  ;;  %v5464_v6 = vld [vmem:[%s6679_s18 + $0x9c] sm:$0xf]  ;;  %v2440_v58 = vshll.u32 %v6633_v42, 16 }
 0x12b   : > { %v8188_v63 = vsel %vm6928_vm6, %v4471_v52, %v4472_v43  ;;  %v8205_v54 = vsel %vm6928_vm6, %v5751_v50, %v4476_v39  ;;  %v4478_v1 = vrot.slane %v4476_v39, 4  ;;  %v6621_v52 = vld [vmem:[%s6679_s18 + $0x74] sm:$0x1] }
 0x12c   : > { %6212 = vmatmul.mubr.msk.bf16.gmra.mrb[28].mxu0 %vm685_vm3, %v5702_v19  ;;  %v8804_v19 = vld [vmem:[#allocation8_spill] sm:$0xff]  ;;  %v2268_v43 = vrot.slane %v2266_v2, 4  ;;  %v2272_v62 = vshll.u32 %v6621_v52, 16 }
 0x12d   : > { %6060 = vmatmul.mubr.msk.bf16.gmra.mrb[12].mxu1 %vm685_vm3, %v6567_v49  ;;  %6217 = vmatprep.mubr.msk.bf16.mxu0 %vm685_vm3, %v5752_v26  ;;  %v4395_v38 = vrot.slane %v8804_v19, 5  ;;  %v4394_v49 = vrot.slane %v4392_v35, 4  ;;  %v8180_v26 = vsel %vm6928_vm6, %v5750_v48, %v4469_v34  ;;  %v4479_v35 = vrot.slane %v8068_v9, 5 }
 0x12e   : > { %6063 = vmatprep.mubr.msk.bf16.mxu1 %vm685_vm3, %v6568_v14  ;;  %v6570_v14 = vld [vmem:[%s6679_s18 + $0x84] sm:$0xff]   ;;  %v5766_v33 = vcombine.low %v8180_v26, %v8188_v63  ;;  %v2255_v48 = vrot.slane %v2253_v32, 4  ;;  %v2258_v19 = vrot.slane %v2256_v37, 5  ;;  %v2274_v39 = vrot.slane %v2272_v62, 5 }
 0x12f   : > { %v4396_v29 = vsel %vm6928_vm6, %v4394_v49, %v4395_v38  ;;  %v8209_v34 = vsel %vm6928_vm6, %v4478_v1, %v4479_v35  ;;  %v2264_v38 = vrot.slane %v2262_v13, 5  ;;  %v5458_v49 = vld [vmem:[%s6679_s18 + $0x84] sm:$0xf]  ;;  %v6573_v32 = vld [vmem:[%s6679_s18 + $0xa8] sm:$0xff]   ;;  %v6574_v13 = vld [vmem:[%s6679_s18 + $0xb4] sm:$0xff]  }
 0x130   : > { %v5755_v5 = vcombine.low %v4393_v47, %v4396_v29  ;;  %v5767_v9 = vcombine.low %v8205_v54, %v8209_v34  ;;  %v2259_v57 = vor.u32 %v2258_v19, %v2255_v48  ;;  %v2304_v16 = vshll.u32 %v5458_v49, 16  ;;  %v5461_v29 = vld [vmem:[%s6679_s18 + $0x90] sm:$0xf]  ;;  %v6623_v48 = vld [vmem:[%s6679_s18 + $0x94] sm:$0xf] }
 0x131   : > { %v2325_v1 = vshrl.u32 %v5461_v29, 16  ;;  %v2338_v19 = vshrl.u32 %v6623_v48, 16 }
 0x132   : > { %v2260_v37 = vrot.slane %v2259_v57, 4 }
 0x134   : > { %6218 = vmatmul.mubr.msk.bf16.vlgmr.msra.gmra.mrb[0].mxu0 %vm685_vm3, %v5753_v45  ;;  %v6572_v45 = vld [vmem:[%s6679_s18 + $0x9c] sm:$0xff]   ;;  %v2265_v57 = vsel %vm6705_vm2, %v2260_v37, %v2264_v38 }
 0x135   : > { %6064 = vmatmul.mubr.msk.bf16.gmra.mrb[16].mxu1 %vm685_vm3, %v6569_v55  ;;  %6221 = vmatprep.mubr.msk.bf16.mxu0 %vm685_vm3, %v5754_v8  ;;  %v2269_v55 = vor.u32 %v2268_v43, %v2264_v38  ;;  %v2301_v8 = vshrl.u32 %v5458_v49, 16  ;;  %v2349_v43 = vshrl.u32 %v5464_v6, 16  ;;  %v6624_v49 = vld [vmem:[%s6679_s18 + $0xa0] sm:$0xf] }
 0x136   : > { %6067 = vmatprep.mubr.msk.bf16.mxu1 %vm685_vm3, %v6570_v14  ;;  %v6622_v14 = vld [vmem:[%s6679_s18 + $0x88] sm:$0xf]  ;;  %v2358_v52 = vshll.u32 %v6624_v49, 16  ;;  %v2362_v62 = vshrl.u32 %v6624_v49, 16 }
 0x137   : > { %v2310_v50 = vshll.u32 %v6622_v14, 16  ;;  %v2314_v47 = vshrl.u32 %v6622_v14, 16  ;;  %v2270_v22 = vrot.slane %v2269_v55, 4  ;;  %v2303_v31 = vrot.slane %v2301_v8, 4 }
 0x138   : > { %v2351_v14 = vrot.slane %v2349_v43, 4  ;;  %v8251_v38 = vrot.slane %v2358_v52, 5 }
 0x139   : > { %v8229_v2 = vrot.slane %v2310_v50, 5  ;;  %v2316_v35 = vrot.slane %v2314_v47, 4  ;;  %v2275_v20 = vsel %vm6705_vm2, %v2270_v22, %v2274_v39  ;;  %v2364_v47 = vrot.slane %v2362_v62, 4 }
 0x13b   : > { %v2317_v8 = vor.u32 %v2316_v35, %v8229_v2 }
 0x13c   : > { %6222 = vmatmul.mubr.msk.bf16.gmra.mrb[4].mxu0 %vm685_vm3, %v5755_v5  ;;  %v2328_v5 = vshll.u32 %v5461_v29, 16  ;;  %v6575_v29 = vld [vmem:[%s6679_s18 + $0xc0] sm:$0xff]  }
 0x13d   : > { %6068 = vmatmul.mubr.msk.bf16.gmra.mrb[20].mxu1 %vm685_vm3, %v6571_v60  ;;  %6225 = vmatprep.mubr.msk.bf16.mxu0 %vm685_vm3, %v5756_v53  ;;  %v2306_v53 = vrot.slane %v2304_v16, 5  ;;  %v2334_v60 = vshll.u32 %v6623_v48, 16  ;;  %v2327_v16 = vrot.slane %v2325_v1, 4  ;;  %v2318_v22 = vrot.slane %v2317_v8, 4  ;;  %v6627_v48 = vld [vmem:[%s6679_s18 + $0xa4] sm:$0x1] }
 0x13e   : > { %6071 = vmatprep.mubr.msk.bf16.mxu1 %vm685_vm3, %v6572_v45  ;;  %v2352_v45 = vshll.u32 %v5464_v6, 16  ;;  %v2330_v36 = vrot.slane %v2328_v5, 5  ;;  %v2365_v5 = vor.u32 %v2364_v47, %v8251_v38 }
 0x13f   : > { %v2307_v55 = vor.u32 %v2306_v53, %v2303_v31  ;;  %v8249_v27 = vrot.slane %v2334_v60, 5  ;;  %v6626_v53 = vld [vmem:[%s6679_s18 + $0x98] sm:$0x1]  ;;  %v2368_v60 = vshll.u32 %v6627_v48, 16 }
 0x140   : > { %v2354_v50 = vrot.slane %v2352_v45, 5  ;;  %v2331_v31 = vor.u32 %v2330_v36, %v2327_v16  ;;  %v2344_v6 = vshll.u32 %v6626_v53, 16  ;;  %v2386_v45 = vshrl.u32 %v6628_v3, 16 }
 0x141   : > { %v2308_v37 = vrot.slane %v2307_v55, 4  ;;  %v2366_v8 = vrot.slane %v2365_v5, 4  ;;  %v2370_v16 = vrot.slane %v2368_v60, 5  ;;  %v6632_v60 = vld [vmem:[%s6679_s18 + $0xbc] sm:$0x1] }
 0x142   : > { %v2355_v1 = vor.u32 %v2354_v50, %v2351_v14  ;;  %v2332_v62 = vrot.slane %v2331_v31, 4  ;;  %v2388_v50 = vrot.slane %v2386_v45, 4  ;;  %v2416_v12 = vshll.u32 %v6632_v60, 16 }
 0x143   : > { %v2313_v49 = vsel %vm6705_vm2, %v2308_v37, %v8229_v2  ;;  %v5473_v37 = vld [vmem:[%s6679_s18 + $0xc0] sm:$0xf]  ;;  %v2371_v41 = vsel %vm6705_vm2, %v2366_v8, %v2370_v16 }
 0x144   : > { %6226 = vmatmul.mubr.msk.bf16.gmra.mrb[8].mxu0 %vm685_vm3, %v5757_v25  ;;  %v2320_v25 = vshll.u32 %v6625_v4, 16  ;;  %v2410_v4 = vshrl.u32 %v6629_v7, 16  ;;  %v2356_v55 = vrot.slane %v2355_v1, 4 }
 0x145   : > { %6072 = vmatmul.mubr.msk.bf16.gmra.mrb[24].mxu1 %vm685_vm3, %v6573_v32  ;;  %6229 = vmatprep.mubr.msk.bf16.mxu0 %vm685_vm3, %v5758_v44  ;;  %v2340_v44 = vrot.slane %v2338_v19, 4  ;;  %v5484_v32 = vcombine.low %v2265_v57, %v2275_v20  ;;  %v5470_v19 = vld [vmem:[%s6679_s18 + $0xb4] sm:$0xf]  ;;  %v2346_v57 = vrot.slane %v2344_v6, 5 }
 0x146   : > { %6075 = vmatprep.mubr.msk.bf16.mxu1 %vm685_vm3, %v6574_v13  ;;  %v2322_v39 = vrot.slane %v2320_v25, 5  ;;  %v5467_v13 = vld [vmem:[%s6679_s18 + $0xa8] sm:$0xf]  ;;  %v2397_v20 = vshrl.u32 %v5470_v19, 16  ;;  %v2400_v21 = vshll.u32 %v5470_v19, 16  ;;  %v2361_v53 = vsel %vm6705_vm2, %v2356_v55, %v8251_v38 }
 0x147   : > { %v2341_v35 = vor.u32 %v2340_v44, %v8249_v27  ;;  %v2373_v43 = vshrl.u32 %v5467_v13, 16  ;;  %v2376_v28 = vshll.u32 %v5467_v13, 16  ;;  %v2421_v13 = vshrl.u32 %v5473_v37, 16 }
 0x148   : > { %v2323_v52 = vsel %vm6705_vm2, %v2318_v22, %v2322_v39  ;;  %v2399_v47 = vrot.slane %v2397_v20, 4  ;;  %v2412_v39 = vrot.slane %v2410_v4, 4  ;;  %v2337_v22 = vsel %vm6705_vm2, %v2332_v62, %v8249_v27  ;;  %v6630_v27 = vld [vmem:[%s6679_s18 + $0xb0] sm:$0x1] }
 0x149   : > { %v2342_v25 = vrot.slane %v2341_v35, 4  ;;  %v2375_v36 = vrot.slane %v2373_v43, 4  ;;  %v2378_v44 = vrot.slane %v2376_v28, 5  ;;  %v5486_v2 = vcombine.low %v2313_v49, %v2323_v52  ;;  %v6631_v35 = vld [vmem:[%s6679_s18 + $0xc4] sm:$0xf] }
 0x14a   : > { %v2392_v6 = vshll.u32 %v6630_v27, 16  ;;  %v2424_v38 = vshll.u32 %v5473_v37, 16  ;;  %v2430_v1 = vshll.u32 %v6631_v35, 16  ;;  %v2434_v5 = vshrl.u32 %v6631_v35, 16 }
 0x14b   : > { %v2347_v31 = vsel %vm6705_vm2, %v2342_v25, %v2346_v57  ;;  %v2379_v18 = vor.u32 %v2378_v44, %v2375_v36  ;;  %v2418_v57 = vrot.slane %v2416_v12, 5  ;;  %v2442_v55 = vrot.slane %v2440_v58, 5 }
 0x14c   : > { %6230 = vmatmul.mubr.msk.bf16.gmra.mrb[12].mxu0 %vm685_vm3, %v5759_v40  ;;  %v2382_v40 = vshll.u32 %v6628_v3, 16  ;;  %v5487_v15 = vcombine.low %v2337_v22, %v2347_v31  ;;  %v2394_v28 = vrot.slane %v2392_v6, 5  ;;  %v2423_v3 = vrot.slane %v2421_v13, 4 }
 0x14d   : > { %6076 = vmatmul.mubr.msk.bf16.gmra.mrb[28].mxu1 %vm685_vm3, %v6575_v29  ;;  %6233 = vmatprep.mubr.msk.bf16.mxu0 %vm685_vm3, %v5760_v56  ;;  %v2406_v56 = vshll.u32 %v6629_v7, 16  ;;  %v2402_v29 = vrot.slane %v2400_v21, 5  ;;  %v2380_v19 = vrot.slane %v2379_v18, 4  ;;  %v2432_v45 = vrot.slane %v2430_v1, 5 }
 0x14e   : > { %6097 = vmatprep.mubr.msk.bf16.mxu1 %vm685_vm3, %v5484_v32  ;;  %v2384_v14 = vrot.slane %v2382_v40, 5  ;;  %v2426_v40 = vrot.slane %v2424_v38, 5  ;;  %v2436_v49 = vrot.slane %v2434_v5, 4 }
 0x14f   : > { %v2408_v32 = vrot.slane %v2406_v56, 5 }
 0x150   : > { %v2385_v20 = vsel %vm6705_vm2, %v2380_v19, %v2384_v14  ;;  %v2427_v7 = vor.u32 %v2426_v40, %v2423_v3  ;;  %v2437_v56 = vor.u32 %v2436_v49, %v2432_v45 }
 0x151   : > { %v2413_v48 = vor.u32 %v2412_v39, %v2408_v32 }
 0x152   : > { %v2428_v4 = vrot.slane %v2427_v7, 4  ;;  %v2438_v25 = vrot.slane %v2437_v56, 4 }
 0x153   : > { %v2414_v62 = vrot.slane %v2413_v48, 4 }
 0x154   : > { %6234 = vmatmul.mubr.msk.bf16.gmra.mrb[16].mxu0 %vm685_vm3, %v5761_v51  ;;  %v2389_v51 = vor.u32 %v2388_v50, %v2384_v14  ;;  %v2433_v8 = vsel %vm6705_vm2, %v2428_v4, %v2432_v45  ;;  %v2443_v16 = vsel %vm6705_vm2, %v2438_v25, %v2442_v55 }
 0x155   : > { %6098 = vmatmul.mubr.msk.bf16.vlgmr.msra.gmra.mrb[16].mxu1 %vm685_vm3, %v8058_v0  ;;  %6237 = vmatprep.mubr.msk.bf16.mxu0 %vm685_vm3, %v5762_v46  ;;  %v2403_v0 = vor.u32 %v2402_v29, %v2399_v47  ;;  %v5488_v46 = vcombine.low %v2361_v53, %v2371_v41  ;;  %v2419_v11 = vsel %vm6705_vm2, %v2414_v62, %v2418_v57  ;;  %v8348_v41 = vld [vmem:[%s8725_s2 + $0x1] ss:$0 sm:$0xff] }
 0x156   : > { %6101 = vmatprep.mubr.msk.bf16.mxu1 %vm685_vm3, %v5486_v2  ;;  %v2390_v43 = vrot.slane %v2389_v51, 4  ;;  %v5491_v36 = vcombine.low %v2433_v8, %v2443_v16 }
 0x157   : > { %v2404_v52 = vrot.slane %v2403_v0, 4 }
 0x158   : > { %v2395_v21 = vsel %vm6705_vm2, %v2390_v43, %v2394_v28 }
 0x159   : > { %v5489_v30 = vcombine.low %v2385_v20, %v2395_v21 }
 0x15c   : > { %6238 = vmatmul.mubr.msk.bf16.gmra.mrb[20].mxu0 %vm685_vm3, %v5763_v10  ;;  %v2409_v10 = vsel %vm6705_vm2, %v2404_v52, %v2408_v32 }
 0x15d   : > { %6102 = vmatmul.mubr.msk.bf16.gmra.mrb[20].mxu1 %vm685_vm3, %v5487_v15  ;;  %6241 = vmatprep.mubr.msk.bf16.mxu0 %vm685_vm3, %v5764_v17  ;;  %v5490_v17 = vcombine.low %v2409_v10, %v2419_v11 }
 0x15e   : > { %6105 = vmatprep.mubr.msk.bf16.mxu1 %vm685_vm3, %v5488_v46 }
 0x164   : > { %6242 = vmatmul.mubr.msk.bf16.gmra.mrb[24].mxu0 %vm685_vm3, %v5765_v59 }
 0x165   : > { %6106 = vmatmul.mubr.msk.bf16.gmra.mrb[24].mxu1 %vm685_vm3, %v5489_v30  ;;  %6245 = vmatprep.mubr.msk.bf16.mxu0 %vm685_vm3, %v5766_v33 }
 0x166   : > { %6109 = vmatprep.mubr.msk.bf16.mxu1 %vm685_vm3, %v5490_v17 }
 0x16c   : > { %6246 = vmatmul.mubr.msk.bf16.gmra.mrb[28].mxu0 %vm685_vm3, %v5767_v9  ;;  %v8343_v9 = vld [vmem:[%s8725_s2] ss:$0 sm:$0xff] }
 0x16d   : > { %6110 = vmatmul.mubr.msk.bf16.gmra.mrb[28].mxu1 %vm685_vm3, %v5491_v36 }
 0x1e8   : > { %v6049_v61 = vpop.f32.mrb[0].mxu1 }
 0x1e9   : > { %v1853_v24 = vpop.f32.mrb[1].mxu1 }
 0x1ea   : > { %v6050_v59 = vpop.f32.mrb[2].mxu1 }
 0x1eb   : > { %v1856_v26 = vpop.f32.mrb[3].mxu1 }
 0x1f0   : > { %v6053_v63 = vpop.f32.mrb[4].mxu1 }
 0x1f1   : > { %v1869_v33 = vpop.f32.mrb[5].mxu1 }
 0x1f2   : > { %v6054_v44 = vpop.f32.mrb[6].mxu1 }
 0x1f3   : > { %v1872_v14 = vpop.f32.mrb[7].mxu1 }
 0x1f8   : > { %v6057_v50 = vpop.f32.mrb[8].mxu1 }
 0x1f9   : > { %v1885_v2 = vpop.f32.mrb[9].mxu1 }
 0x1fa   : > { %v6058_v23 = vpop.f32.mrb[10].mxu1 }
 0x1fb   : > { %v1888_v47 = vpop.f32.mrb[11].mxu1 }
 0x200   : > { %v6061_v29 = vpop.f32.mrb[12].mxu1 }
 0x201   : > { %v1901_v32 = vpop.f32.mrb[13].mxu1 }
 0x202   : > { %v6062_v39 = vpop.f32.mrb[14].mxu1 }
 0x203   : > { %v1904_v54 = vpop.f32.mrb[15].mxu1 }
 0x207   : > { %v6219_v34 = vpop.f32.mrb[0].mxu0 }
 0x208   : > { %v6251_v37 = vadd.f32 %v6219_v34, %v6049_v61  ;;  %v4619_v22 = vpop.f32.mrb[1].mxu0 }
 0x209   : > { %v6252_v31 = vadd.f32 %v4619_v22, %v1853_v24  ;;  %v6220_v53 = vpop.f32.mrb[2].mxu0 }
 0x20a   : > { %v4785_v18 = vmul.f32 %v6251_v37, %v8343_v9  ;;  %v6253_v51 = vadd.f32 %v6220_v53, %v6050_v59  ;;  %v4622_v27 = vpop.f32.mrb[3].mxu0 }
 0x20b   : > { %v6254_v6 = vadd.f32 %v4622_v27, %v1856_v26  ;;  %v4783_v13 = vmul.f32 %v6252_v31, %v8343_v9 }
 0x20c   : > { %v4786_v38 = vmul.f32 %v6253_v51, %v8343_v9  ;;  %v8354_v35 = vadd.f32 %v8348_v41, %v4785_v18 }
 0x20d   : > { %v8361_v48 = vadd.f32 %v8348_v41, %v4783_v13  ;;  %v4784_v28 = vmul.f32 %v6254_v6, %v8343_v9 }
 0x20e   : > { %5016 = vrot.lane.b32.xlu0 %v8354_v35, %s6642_s26  ;;  %4888 = vrot.lane.b32.xlu1 %v8354_v35, %s6643_s27  ;;  %v8364_v60 = vadd.f32 %v8348_v41, %v4786_v38 }
 0x20f   : > { %v6223_v1 = vpop.f32.mrb[4].mxu0  ;;  %v8378_v62 = vadd.f32 %v8348_v41, %v4784_v28 }
 0x210   : > { %v6255_v5 = vadd.f32 %v6223_v1, %v6053_v63  ;;  %v4635_v0 = vpop.f32.mrb[5].mxu0 }
 0x211   : > { %v6256_v12 = vadd.f32 %v4635_v0, %v1869_v33  ;;  %v6224_v15 = vpop.f32.mrb[6].mxu0 }
 0x212   : > { %v6257_v46 = vadd.f32 %v6224_v15, %v6054_v44  ;;  %v4638_v19 = vpop.f32.mrb[7].mxu0  ;;  %4884 = vrot.lane.b32.xlu0 %v8361_v48, %s6643_s27  ;;  %4890 = vrot.lane.b32.xlu1 %v8364_v60, %s6643_s27  ;;  %v4789_v40 = vmul.f32 %v6255_v5, %v8343_v9 }
 0x213   : > { %v6258_v43 = vadd.f32 %v4638_v19, %v1872_v14  ;;  %v4787_v11 = vmul.f32 %v6256_v12, %v8343_v9 }
 0x214   : > { %v4790_v45 = vmul.f32 %v6257_v46, %v8343_v9  ;;  %v8385_v42 = vadd.f32 %v8348_v41, %v4789_v40 }
 0x215   : > { %v4788_v30 = vmul.f32 %v6258_v43, %v8343_v9  ;;  %v8409_v61 = vadd.f32 %v8348_v41, %v4787_v11 }
 0x216   : > { %5012 = vrot.lane.b32.xlu0 %v8361_v48, %s6642_s26  ;;  %5018 = vrot.lane.b32.xlu1 %v8364_v60, %s6642_s26  ;;  %v8388_v58 = vadd.f32 %v8348_v41, %v4790_v45 }
 0x217   : > { %v6227_v3 = vpop.f32.mrb[8].mxu0  ;;  %v8412_v24 = vadd.f32 %v8348_v41, %v4788_v30 }
 0x218   : > { %v6259_v49 = vadd.f32 %v6227_v3, %v6057_v50  ;;  %v4651_v52 = vpop.f32.mrb[9].mxu0 }
 0x219   : > { %v6260_v57 = vadd.f32 %v4651_v52, %v1885_v2  ;;  %v6228_v20 = vpop.f32.mrb[10].mxu0 }
 0x21a   : > { %v6261_v21 = vadd.f32 %v6228_v20, %v6058_v23  ;;  %v4654_v7 = vpop.f32.mrb[11].mxu0  ;;  %5014 = vrot.lane.b32.xlu1 %v8378_v62, %s6642_s26  ;;  %4886 = vrot.lane.b32.xlu0 %v8378_v62, %s6643_s27  ;;  %v4793_v26 = vmul.f32 %v6259_v49, %v8343_v9 }
 0x21b   : > { %v6262_v56 = vadd.f32 %v4654_v7, %v1888_v47  ;;  %v4791_v38 = vmul.f32 %v6260_v57, %v8343_v9 }
 0x21c   : > { %v4794_v63 = vmul.f32 %v6261_v21, %v8343_v9  ;;  %v8427_v22 = vadd.f32 %v8348_v41, %v4793_v26 }
 0x21d   : > { %v4792_v1 = vmul.f32 %v6262_v56, %v8343_v9  ;;  %v8459_v20 = vadd.f32 %v8348_v41, %v4791_v38 }
 0x21e   : > { %4896 = vrot.lane.b32.xlu0 %v8385_v42, %s6643_s27  ;;  %4898 = vrot.lane.b32.xlu1 %v8388_v58, %s6643_s27  ;;  %v8430_v31 = vadd.f32 %v8348_v41, %v4794_v63 }
 0x21f   : > { %v6231_v10 = vpop.f32.mrb[12].mxu0  ;;  %v8462_v21 = vadd.f32 %v8348_v41, %v4792_v1 }
 0x220   : > { %v8396_v17 = vadd.f32 %v6231_v10, %v6061_v29  ;;  %v4667_v4 = vpop.f32.mrb[13].mxu0 }
 0x221   : > { %v8398_v25 = vadd.f32 %v4667_v4, %v1901_v32  ;;  %v6232_v55 = vpop.f32.mrb[14].mxu0 }
 0x222   : > { %v8400_v8 = vadd.f32 %v6232_v55, %v6062_v39  ;;  %v4670_v16 = vpop.f32.mrb[15].mxu0  ;;  %5024 = vrot.lane.b32.xlu0 %v8385_v42, %s6642_s26  ;;  %5026 = vrot.lane.b32.xlu1 %v8388_v58, %s6642_s26  ;;  %v4797_v55 = vmul.f32 %v8396_v17, %v8343_v9 }
 0x223   : > { %v8406_v36 = vadd.f32 %v4670_v16, %v1904_v54  ;;  %v4795_v1 = vmul.f32 %v8398_v25, %v8343_v9 }
 0x224   : > { %v4798_v16 = vmul.f32 %v8400_v8, %v8343_v9 }
 0x226   : > { %4892 = vrot.lane.b32.xlu0 %v8409_v61, %s6643_s27  ;;  %4894 = vrot.lane.b32.xlu1 %v8412_v24, %s6643_s27 }
 0x227   : > { %v6235_v59 = vpop.f32.mrb[16].mxu0 }
 0x228   : > { %v6099_v33 = vpop.f32.mrb[16].mxu1  ;;  %v4683_v44 = vpop.f32.mrb[17].mxu0 }
 0x229   : > { %v6267_v14 = vadd.f32 %v6235_v59, %v6099_v33  ;;  %v2646_v50 = vpop.f32.mrb[17].mxu1  ;;  %v6236_v2 = vpop.f32.mrb[18].mxu0 }
 0x22a   : > { %v6268_v23 = vadd.f32 %v4683_v44, %v2646_v50  ;;  %v6100_v47 = vpop.f32.mrb[18].mxu1  ;;  %v4686_v29 = vpop.f32.mrb[19].mxu0  ;;  %5020 = vrot.lane.b32.xlu0 %v8409_v61, %s6642_s26  ;;  %5022 = vrot.lane.b32.xlu1 %v8412_v24, %s6642_s26 }
 0x22b   : > { %v4801_v32 = vmul.f32 %v6267_v14, %v8343_v9  ;;  %v6269_v39 = vadd.f32 %v6236_v2, %v6100_v47  ;;  %v2649_v54 = vpop.f32.mrb[19].mxu1 }
 0x22c   : > { %v4799_v34 = vmul.f32 %v6268_v23, %v8343_v9  ;;  %v6270_v37 = vadd.f32 %v4686_v29, %v2649_v54  ;;  %v8496_v54 = vadd.f32 %v8348_v41, %v4798_v16 }
 0x22d   : > { %v4802_v53 = vmul.f32 %v6269_v39, %v8343_v9  ;;  %v8434_v18 = vadd.f32 %v8348_v41, %v4801_v32  ;;  %v8493_v39 = vadd.f32 %v8348_v41, %v4797_v55 }
 0x22e   : > { %v4800_v51 = vmul.f32 %v6270_v37, %v8343_v9  ;;  %4904 = vrot.lane.b32.xlu0 %v8427_v22, %s6643_s27  ;;  %4906 = vrot.lane.b32.xlu1 %v8430_v31, %s6643_s27  ;;  %v8442_v27 = vadd.f32 %v8348_v41, %v4799_v34 }
 0x22f   : > { %v6239_v6 = vpop.f32.mrb[20].mxu0  ;;  %v8445_v13 = vadd.f32 %v8348_v41, %v4802_v53 }
 0x230   : > { %v6103_v5 = vpop.f32.mrb[20].mxu1  ;;  %v4699_v0 = vpop.f32.mrb[21].mxu0  ;;  %v8450_v12 = vadd.f32 %v8348_v41, %v4800_v51 }
 0x231   : > { %v6271_v15 = vadd.f32 %v6239_v6, %v6103_v5  ;;  %v2662_v46 = vpop.f32.mrb[21].mxu1  ;;  %v6240_v19 = vpop.f32.mrb[22].mxu0  ;;  %v4796_v5 = vmul.f32 %v8406_v36, %v8343_v9 }
 0x232   : > { %v6272_v43 = vadd.f32 %v4699_v0, %v2662_v46  ;;  %v6104_v28 = vpop.f32.mrb[22].mxu1  ;;  %v4702_v3 = vpop.f32.mrb[23].mxu0  ;;  %5032 = vrot.lane.b32.xlu0 %v8427_v22, %s6642_s26  ;;  %5034 = vrot.lane.b32.xlu1 %v8430_v31, %s6642_s26 }
 0x233   : > { %v4805_v40 = vmul.f32 %v6271_v15, %v8343_v9  ;;  %v6273_v45 = vadd.f32 %v6240_v19, %v6104_v28  ;;  %v2665_v49 = vpop.f32.mrb[23].mxu1 }
 0x234   : > { %v4803_v52 = vmul.f32 %v6272_v43, %v8343_v9  ;;  %v6274_v57 = vadd.f32 %v4702_v3, %v2665_v49 }
 0x235   : > { %v4806_v7 = vmul.f32 %v6273_v45, %v8343_v9  ;;  %v8466_v56 = vadd.f32 %v8348_v41, %v4805_v40 }
 0x236   : > { %v4804_v10 = vmul.f32 %v6274_v57, %v8343_v9  ;;  %4900 = vrot.lane.b32.xlu0 %v8459_v20, %s6643_s27  ;;  %4902 = vrot.lane.b32.xlu1 %v8462_v21, %s6643_s27  ;;  %v8474_v11 = vadd.f32 %v8348_v41, %v4803_v52 }
 0x237   : > { %v6243_v30 = vpop.f32.mrb[24].mxu0  ;;  %v8477_v4 = vadd.f32 %v8348_v41, %v4806_v7  ;;  %v8527_v7 = vadd.f32 %v8348_v41, %v4795_v1 }
 0x238   : > { %v6107_v59 = vpop.f32.mrb[24].mxu1  ;;  %v4715_v26 = vpop.f32.mrb[25].mxu0  ;;  %v8484_v63 = vadd.f32 %v8348_v41, %v4804_v10  ;;  %v8530_v10 = vadd.f32 %v8348_v41, %v4796_v5 }
 0x239   : > { %v6275_v33 = vadd.f32 %v6243_v30, %v6107_v59  ;;  %v2678_v44 = vpop.f32.mrb[25].mxu1  ;;  %v6244_v14 = vpop.f32.mrb[26].mxu0 }
 0x23a   : > { %v6276_v50 = vadd.f32 %v4715_v26, %v2678_v44  ;;  %v6108_v2 = vpop.f32.mrb[26].mxu1  ;;  %v4718_v23 = vpop.f32.mrb[27].mxu0  ;;  %5028 = vrot.lane.b32.xlu0 %v8459_v20, %s6642_s26  ;;  %5030 = vrot.lane.b32.xlu1 %v8462_v21, %s6642_s26 }
 0x23b   : > { %v4809_v17 = vmul.f32 %v6275_v33, %v8343_v9  ;;  %v6277_v8 = vadd.f32 %v6244_v14, %v6108_v2  ;;  %v2681_v47 = vpop.f32.mrb[27].mxu1 }
 0x23c   : > { %v4807_v29 = vmul.f32 %v6276_v50, %v8343_v9  ;;  %v6278_v32 = vadd.f32 %v4718_v23, %v2681_v47 }
 0x23d   : > { %v4810_v34 = vmul.f32 %v6277_v8, %v8343_v9  ;;  %v8500_v37 = vadd.f32 %v8348_v41, %v4809_v17 }
 0x23e   : > { %v4808_v53 = vmul.f32 %v6278_v32, %v8343_v9  ;;  %4912 = vrot.lane.b32.xlu0 %v8493_v39, %s6643_s27  ;;  %4914 = vrot.lane.b32.xlu1 %v8496_v54, %s6643_s27  ;;  %v8508_v51 = vadd.f32 %v8348_v41, %v4807_v29 }
 0x23f   : > { %v6247_v6 = vpop.f32.mrb[28].mxu0  ;;  %v8511_v38 = vadd.f32 %v8348_v41, %v4810_v34 }
 0x240   : > { %v6111_v0 = vpop.f32.mrb[28].mxu1  ;;  %v4731_v15 = vpop.f32.mrb[29].mxu0  ;;  %v8518_v46 = vadd.f32 %v8348_v41, %v4808_v53 }
 0x241   : > { %v6279_v19 = vadd.f32 %v6247_v6, %v6111_v0  ;;  %v2694_v43 = vpop.f32.mrb[29].mxu1  ;;  %v6248_v28 = vpop.f32.mrb[30].mxu0 }
 0x242   : > { %v6280_v3 = vadd.f32 %v4731_v15, %v2694_v43  ;;  %v6112_v40 = vpop.f32.mrb[30].mxu1  ;;  %v4734_v45 = vpop.f32.mrb[31].mxu0  ;;  %5040 = vrot.lane.b32.xlu0 %v8493_v39, %s6642_s26  ;;  %5042 = vrot.lane.b32.xlu1 %v8496_v54, %s6642_s26 }
 0x243   : > { %v4813_v25 = vmul.f32 %v6279_v19, %v8343_v9  ;;  %v6281_v36 = vadd.f32 %v6248_v28, %v6112_v40  ;;  %v2697_v49 = vpop.f32.mrb[31].mxu1 }
 0x244   : > { %v4811_v52 = vmul.f32 %v6280_v3, %v8343_v9  ;;  %v6282_v57 = vadd.f32 %v4734_v45, %v2697_v49 }
 0x245   : > { %v4814_v30 = vmul.f32 %v6281_v36, %v8343_v9  ;;  %v8534_v55 = vadd.f32 %v8348_v41, %v4813_v25 }
 0x246   : > { %v4812_v16 = vmul.f32 %v6282_v57, %v8343_v9  ;;  %4908 = vrot.lane.b32.xlu0 %v8527_v7, %s6643_s27  ;;  %4910 = vrot.lane.b32.xlu1 %v8530_v10, %s6643_s27  ;;  %v8542_v59 = vadd.f32 %v8348_v41, %v4811_v52 }
 0x247   : > { %v8545_v26 = vadd.f32 %v8348_v41, %v4814_v30 }
 0x248   : > { %v8548_v33 = vadd.f32 %v8348_v41, %v4812_v16 }
 0x24a   : > { %5036 = vrot.lane.b32.xlu0 %v8527_v7, %s6642_s26  ;;  %5038 = vrot.lane.b32.xlu1 %v8530_v10, %s6642_s26 }
 0x24e   : > { %4920 = vrot.lane.b32.xlu0 %v8434_v18, %s6643_s27  ;;  %4922 = vrot.lane.b32.xlu1 %v8445_v13, %s6643_s27 }
 0x252   : > { %5048 = vrot.lane.b32.xlu0 %v8434_v18, %s6642_s26  ;;  %5050 = vrot.lane.b32.xlu1 %v8445_v13, %s6642_s26 }
 0x256   : > { %4916 = vrot.lane.b32.xlu0 %v8442_v27, %s6643_s27  ;;  %4918 = vrot.lane.b32.xlu1 %v8450_v12, %s6643_s27 }
 0x25a   : > { %5044 = vrot.lane.b32.xlu0 %v8442_v27, %s6642_s26  ;;  %5046 = vrot.lane.b32.xlu1 %v8450_v12, %s6642_s26 }
 0x25e   : > { %4928 = vrot.lane.b32.xlu0 %v8466_v56, %s6643_s27  ;;  %4930 = vrot.lane.b32.xlu1 %v8477_v4, %s6643_s27 }
 0x262   : > { %5056 = vrot.lane.b32.xlu0 %v8466_v56, %s6642_s26  ;;  %5058 = vrot.lane.b32.xlu1 %v8477_v4, %s6642_s26 }
 0x266   : > { %4924 = vrot.lane.b32.xlu0 %v8474_v11, %s6643_s27  ;;  %4926 = vrot.lane.b32.xlu1 %v8484_v63, %s6643_s27 }
 0x26a   : > { %5052 = vrot.lane.b32.xlu0 %v8474_v11, %s6642_s26  ;;  %5054 = vrot.lane.b32.xlu1 %v8484_v63, %s6642_s26 }
 0x26e   : > { %4936 = vrot.lane.b32.xlu0 %v8500_v37, %s6643_s27  ;;  %4938 = vrot.lane.b32.xlu1 %v8511_v38, %s6643_s27 }
 0x272   : > { %5064 = vrot.lane.b32.xlu0 %v8500_v37, %s6642_s26  ;;  %5066 = vrot.lane.b32.xlu1 %v8511_v38, %s6642_s26 }
 0x276   : > { %4932 = vrot.lane.b32.xlu0 %v8508_v51, %s6643_s27  ;;  %4934 = vrot.lane.b32.xlu1 %v8518_v46, %s6643_s27 }
 0x27a   : > { %5060 = vrot.lane.b32.xlu0 %v8508_v51, %s6642_s26  ;;  %5062 = vrot.lane.b32.xlu1 %v8518_v46, %s6642_s26 }
 0x27e   : > { %4944 = vrot.lane.b32.xlu0 %v8534_v55, %s6643_s27  ;;  %4946 = vrot.lane.b32.xlu1 %v8545_v26, %s6643_s27 }
 0x280   : > { %v5017_v9 = vpop.permute.xlu0 %5016  ;;  %v4889_v41 = vpop.permute.xlu1 %4888 }
 0x281   : > { %v4982_v44 = vadd.f32 %v4889_v41, %v8354_v35 }
 0x282   : > { %4940 = vrot.lane.b32.xlu0 %v8542_v59, %s6643_s27  ;;  %4942 = vrot.lane.b32.xlu1 %v8548_v33, %s6643_s27 }
 0x283   : > { %v5110_v14 = vadd.f32 %v5017_v9, %v4982_v44 }
 0x284   : > { %v4885_v50 = vpop.permute.xlu0 %4884  ;;  %v4891_v2 = vpop.permute.xlu1 %4890 }
 0x285   : > { %5142 = vst.msk [vmem:[%s8611_s4 + $0x10] sm:$0xff] %vm685_vm3, %v5110_v14  ;;  %v4980_v35 = vadd.f32 %v4885_v50, %v8361_v48  ;;  %v4983_v23 = vadd.f32 %v4891_v2, %v8364_v60 }
 0x286   : > { %5068 = vrot.lane.b32.xlu0 %v8542_v59, %s6642_s26  ;;  %5070 = vrot.lane.b32.xlu1 %v8548_v33, %s6642_s26 }
 0x288   : > { %v5013_v17 = vpop.permute.xlu0 %5012  ;;  %v5019_v8 = vpop.permute.xlu1 %5018 }
 0x289   : > { %v5108_v47 = vadd.f32 %v5013_v17, %v4980_v35  ;;  %v5111_v29 = vadd.f32 %v5019_v8, %v4983_v23 }
 0x28a   : > { %5072 = vrot.lane.b32.xlu0 %v8534_v55, %s6642_s26  ;;  %5074 = vrot.lane.b32.xlu1 %v8545_v26, %s6642_s26 }
 0x28b   : > { %5140 = vst.msk [vmem:[%s8611_s4] sm:$0xff] %vm685_vm3, %v5108_v47  ;;  %5143 = vst.msk [vmem:[%s8611_s4 + $0x18] sm:$0xff] %vm685_vm3, %v5111_v29 }
 0x28c   : > { %v5015_v48 = vpop.permute.xlu1 %5014  ;;  %v4887_v32 = vpop.permute.xlu0 %4886 }
 0x28d   : > { %v4981_v60 = vadd.f32 %v4887_v32, %v8378_v62 }
 0x28f   : > { %v5109_v34 = vadd.f32 %v5015_v48, %v4981_v60 }
 0x290   : > { %v4897_v53 = vpop.permute.xlu0 %4896  ;;  %v4899_v6 = vpop.permute.xlu1 %4898 }
 0x291   : > { %5141 = vst.msk [vmem:[%s8611_s4 + $0x8] sm:$0xff] %vm685_vm3, %v5109_v34  ;;  %v4986_v1 = vadd.f32 %v4897_v53, %v8385_v42  ;;  %v4987_v5 = vadd.f32 %v4899_v6, %v8388_v58 }
 0x294   : > { %v5025_v0 = vpop.permute.xlu0 %5024  ;;  %v5027_v15 = vpop.permute.xlu1 %5026 }
 0x295   : > { %v5114_v19 = vadd.f32 %v5025_v0, %v4986_v1  ;;  %v5115_v43 = vadd.f32 %v5027_v15, %v4987_v5 }
 0x297   : > { %5146 = vst.msk [vmem:[%s8611_s4 + $0x30] sm:$0xff] %vm685_vm3, %v5114_v19  ;;  %5147 = vst.msk [vmem:[%s8611_s4 + $0x38] sm:$0xff] %vm685_vm3, %v5115_v43 }
 0x298   : > { %v4893_v62 = vpop.permute.xlu0 %4892  ;;  %v4895_v28 = vpop.permute.xlu1 %4894 }
 0x299   : > { %v4984_v3 = vadd.f32 %v4893_v62, %v8409_v61  ;;  %v4985_v40 = vadd.f32 %v4895_v28, %v8412_v24 }
 0x29c   : > { %v5021_v42 = vpop.permute.xlu0 %5020  ;;  %v5023_v45 = vpop.permute.xlu1 %5022 }
 0x29d   : > { %v5112_v58 = vadd.f32 %v5021_v42, %v4984_v3  ;;  %v5113_v25 = vadd.f32 %v5023_v45, %v4985_v40 }
 0x29f   : > { %5144 = vst.msk [vmem:[%s8611_s4 + $0x20] sm:$0xff] %vm685_vm3, %v5112_v58  ;;  %5145 = vst.msk [vmem:[%s8611_s4 + $0x28] sm:$0xff] %vm685_vm3, %v5113_v25 }
 0x2a0   : > { %v4905_v36 = vpop.permute.xlu0 %4904  ;;  %v4907_v49 = vpop.permute.xlu1 %4906 }
 0x2a1   : > { %v4990_v52 = vadd.f32 %v4905_v36, %v8427_v22  ;;  %v4991_v57 = vadd.f32 %v4907_v49, %v8430_v31 }
 0x2a4   : > { %v5033_v61 = vpop.permute.xlu0 %5032  ;;  %v5035_v30 = vpop.permute.xlu1 %5034 }
 0x2a5   : > { %v5118_v24 = vadd.f32 %v5033_v61, %v4990_v52  ;;  %v5119_v16 = vadd.f32 %v5035_v30, %v4991_v57 }
 0x2a7   : > { %5150 = vst.msk [vmem:[%s8611_s4 + $0x50] sm:$0xff] %vm685_vm3, %v5118_v24  ;;  %5151 = vst.msk [vmem:[%s8611_s4 + $0x58] sm:$0xff] %vm685_vm3, %v5119_v16 }
 0x2a8   : > { %v4901_v9 = vpop.permute.xlu0 %4900  ;;  %v4903_v41 = vpop.permute.xlu1 %4902 }
 0x2a9   : > { %v4988_v44 = vadd.f32 %v4901_v9, %v8459_v20  ;;  %v4989_v14 = vadd.f32 %v4903_v41, %v8462_v21 }
 0x2ac   : > { %v5029_v22 = vpop.permute.xlu0 %5028  ;;  %v5031_v50 = vpop.permute.xlu1 %5030 }
 0x2ad   : > { %v5116_v31 = vadd.f32 %v5029_v22, %v4988_v44  ;;  %v5117_v2 = vadd.f32 %v5031_v50, %v4989_v14 }
 0x2af   : > { %5148 = vst.msk [vmem:[%s8611_s4 + $0x40] sm:$0xff] %vm685_vm3, %v5116_v31  ;;  %5149 = vst.msk [vmem:[%s8611_s4 + $0x48] sm:$0xff] %vm685_vm3, %v5117_v2 }
 0x2b0   : > { %v4913_v35 = vpop.permute.xlu0 %4912  ;;  %v4915_v23 = vpop.permute.xlu1 %4914 }
 0x2b1   : > { %v4994_v17 = vadd.f32 %v4913_v35, %v8493_v39  ;;  %v4995_v8 = vadd.f32 %v4915_v23, %v8496_v54 }
 0x2b4   : > { %v5041_v20 = vpop.permute.xlu0 %5040  ;;  %v5043_v47 = vpop.permute.xlu1 %5042 }
 0x2b5   : > { %v5122_v21 = vadd.f32 %v5041_v20, %v4994_v17  ;;  %v5123_v29 = vadd.f32 %v5043_v47, %v4995_v8 }
 0x2b7   : > { %5154 = vst.msk [vmem:[%s8611_s4 + $0x70] sm:$0xff] %vm685_vm3, %v5122_v21  ;;  %5155 = vst.msk [vmem:[%s8611_s4 + $0x78] sm:$0xff] %vm685_vm3, %v5123_v29 }
 0x2b8   : > { %v4909_v48 = vpop.permute.xlu0 %4908  ;;  %v4911_v32 = vpop.permute.xlu1 %4910 }
 0x2b9   : > { %v4992_v60 = vadd.f32 %v4909_v48, %v8527_v7  ;;  %v4993_v34 = vadd.f32 %v4911_v32, %v8530_v10 }
 0x2bc   : > { %v5037_v39 = vpop.permute.xlu0 %5036  ;;  %v5039_v53 = vpop.permute.xlu1 %5038 }
 0x2bd   : > { %v5120_v54 = vadd.f32 %v5037_v39, %v4992_v60  ;;  %v5121_v6 = vadd.f32 %v5039_v53, %v4993_v34 }
 0x2bf   : > { %5152 = vst.msk [vmem:[%s8611_s4 + $0x60] sm:$0xff] %vm685_vm3, %v5120_v54  ;;  %5153 = vst.msk [vmem:[%s8611_s4 + $0x68] sm:$0xff] %vm685_vm3, %v5121_v6 }
 0x2c0   : > { %v4921_v1 = vpop.permute.xlu0 %4920  ;;  %v4923_v5 = vpop.permute.xlu1 %4922 }
 0x2c1   : > { %v4998_v0 = vadd.f32 %v4921_v1, %v8434_v18  ;;  %v4999_v15 = vadd.f32 %v4923_v5, %v8445_v13 }
 0x2c4   : > { %v5049_v7 = vpop.permute.xlu0 %5048  ;;  %v5051_v19 = vpop.permute.xlu1 %5050 }
 0x2c5   : > { %v5126_v10 = vadd.f32 %v5049_v7, %v4998_v0  ;;  %v5127_v43 = vadd.f32 %v5051_v19, %v4999_v15 }
 0x2c7   : > { %5158 = vst.msk [vmem:[%s8611_s4 + $0x90] sm:$0xff] %vm685_vm3, %v5126_v10  ;;  %5159 = vst.msk [vmem:[%s8611_s4 + $0x98] sm:$0xff] %vm685_vm3, %v5127_v43 }
 0x2c8   : > { %v4917_v62 = vpop.permute.xlu0 %4916  ;;  %v4919_v28 = vpop.permute.xlu1 %4918 }
 0x2c9   : > { %v4996_v3 = vadd.f32 %v4917_v62, %v8442_v27  ;;  %v4997_v40 = vadd.f32 %v4919_v28, %v8450_v12 }
 0x2cc   : > { %v5045_v18 = vpop.permute.xlu0 %5044  ;;  %v5047_v42 = vpop.permute.xlu1 %5046 }
 0x2cd   : > { %v5124_v13 = vadd.f32 %v5045_v18, %v4996_v3  ;;  %v5125_v45 = vadd.f32 %v5047_v42, %v4997_v40 }
 0x2cf   : > { %5156 = vst.msk [vmem:[%s8611_s4 + $0x80] sm:$0xff] %vm685_vm3, %v5124_v13  ;;  %5157 = vst.msk [vmem:[%s8611_s4 + $0x88] sm:$0xff] %vm685_vm3, %v5125_v45 }
 0x2d0   : > { %v4929_v58 = vpop.permute.xlu0 %4928  ;;  %v4931_v25 = vpop.permute.xlu1 %4930 }
 0x2d1   : > { %v5002_v36 = vadd.f32 %v4929_v58, %v8466_v56  ;;  %v5003_v49 = vadd.f32 %v4931_v25, %v8477_v4 }
 0x2d4   : > { %v5057_v27 = vpop.permute.xlu0 %5056  ;;  %v5059_v52 = vpop.permute.xlu1 %5058 }
 0x2d5   : > { %v5130_v12 = vadd.f32 %v5057_v27, %v5002_v36  ;;  %v5131_v57 = vadd.f32 %v5059_v52, %v5003_v49 }
 0x2d7   : > { %5162 = vst.msk [vmem:[%s8611_s4 + $0xb0] sm:$0xff] %vm685_vm3, %v5130_v12  ;;  %5163 = vst.msk [vmem:[%s8611_s4 + $0xb8] sm:$0xff] %vm685_vm3, %v5131_v57 }
 0x2d8   : > { %v4925_v61 = vpop.permute.xlu0 %4924  ;;  %v4927_v30 = vpop.permute.xlu1 %4926 }
 0x2d9   : > { %v5000_v24 = vadd.f32 %v4925_v61, %v8474_v11  ;;  %v5001_v16 = vadd.f32 %v4927_v30, %v8484_v63 }
 0x2dc   : > { %v5053_v56 = vpop.permute.xlu0 %5052  ;;  %v5055_v9 = vpop.permute.xlu1 %5054 }
 0x2dd   : > { %v5128_v4 = vadd.f32 %v5053_v56, %v5000_v24  ;;  %v5129_v41 = vadd.f32 %v5055_v9, %v5001_v16 }
 0x2df   : > { %5160 = vst.msk [vmem:[%s8611_s4 + $0xa0] sm:$0xff] %vm685_vm3, %v5128_v4  ;;  %5161 = vst.msk [vmem:[%s8611_s4 + $0xa8] sm:$0xff] %vm685_vm3, %v5129_v41 }
 0x2e0   : > { %v4937_v44 = vpop.permute.xlu0 %4936  ;;  %v4939_v14 = vpop.permute.xlu1 %4938 }
 0x2e1   : > { %v5006_v22 = vadd.f32 %v4937_v44, %v8500_v37  ;;  %v5007_v50 = vadd.f32 %v4939_v14, %v8511_v38 }
 0x2e4   : > { %v5065_v11 = vpop.permute.xlu0 %5064  ;;  %v5067_v31 = vpop.permute.xlu1 %5066 }
 0x2e5   : > { %v5134_v63 = vadd.f32 %v5065_v11, %v5006_v22  ;;  %v5135_v2 = vadd.f32 %v5067_v31, %v5007_v50 }
 0x2e7   : > { %5166 = vst.msk [vmem:[%s8611_s4 + $0xd0] sm:$0xff] %vm685_vm3, %v5134_v63  ;;  %5167 = vst.msk [vmem:[%s8611_s4 + $0xd8] sm:$0xff] %vm685_vm3, %v5135_v2 }
 0x2e8   : > { %v4933_v35 = vpop.permute.xlu0 %4932  ;;  %v4935_v23 = vpop.permute.xlu1 %4934 }
 0x2e9   : > { %v5004_v17 = vadd.f32 %v4933_v35, %v8508_v51  ;;  %v5005_v8 = vadd.f32 %v4935_v23, %v8518_v46 }
 0x2ec   : > { %v5061_v20 = vpop.permute.xlu0 %5060  ;;  %v5063_v37 = vpop.permute.xlu1 %5062 }
 0x2ed   : > { %v5132_v47 = vadd.f32 %v5061_v20, %v5004_v17  ;;  %v5133_v38 = vadd.f32 %v5063_v37, %v5005_v8 }
 0x2ef   : > { %5164 = vst.msk [vmem:[%s8611_s4 + $0xc0] sm:$0xff] %vm685_vm3, %v5132_v47  ;;  %5165 = vst.msk [vmem:[%s8611_s4 + $0xc8] sm:$0xff] %vm685_vm3, %v5133_v38 }
 0x2f0   : > { %v4945_v21 = vpop.permute.xlu0 %4944  ;;  %v4947_v29 = vpop.permute.xlu1 %4946 }
 0x2f1   : > { %v5010_v54 = vadd.f32 %v4945_v21, %v8534_v55  ;;  %v5011_v6 = vadd.f32 %v4947_v29, %v8545_v26 }
 0x2f4   : > { %v4941_v48 = vpop.permute.xlu0 %4940  ;;  %v4943_v32 = vpop.permute.xlu1 %4942 }
 0x2f5   : > { %v5008_v51 = vadd.f32 %v4941_v48, %v8542_v59  ;;  %v5009_v46 = vadd.f32 %v4943_v32, %v8548_v33 }
 0x2f8   : > { %v5069_v60 = vpop.permute.xlu0 %5068  ;;  %v5071_v34 = vpop.permute.xlu1 %5070 }
 0x2f9   : > { %v5136_v39 = vadd.f32 %v5069_v60, %v5008_v51  ;;  %v5137_v53 = vadd.f32 %v5071_v34, %v5009_v46 }
 0x2fb   : > { %5168 = vst.msk [vmem:[%s8611_s4 + $0xe0] sm:$0xff] %vm685_vm3, %v5136_v39  ;;  %5169 = vst.msk [vmem:[%s8611_s4 + $0xe8] sm:$0xff] %vm685_vm3, %v5137_v53 }
 0x2fc   : > { %v5073_v1 = vpop.permute.xlu0 %5072  ;;  %v5075_v5 = vpop.permute.xlu1 %5074 }
 0x2fd   : > { %v5138_v0 = vadd.f32 %v5073_v1, %v5010_v54  ;;  %v5139_v15 = vadd.f32 %v5075_v5, %v5011_v6 }
 0x2ff   : > { %5170 = vst.msk [vmem:[%s8611_s4 + $0xf0] sm:$0xff] %vm685_vm3, %v5138_v0  ;;  %5171 = vst.msk [vmem:[%s8611_s4 + $0xf8] sm:$0xff] %vm685_vm3, %v5139_v15 }
 0x300 PF: > { %s13_s12 = sadd.s32 1, %s6640_s12  }
 0x301   : > { %p10_p4 = scmp.ge.s32.totalorder %s13_s12, 4  }
 0x303   :  { %12 = sbr.rel (!%p10_p4) target bundleno = 1 (0x1), region = 67 }

</bundles_post_ra>
